<compile_context>
chip_gen: v6e
topology: v6e:2x2x1
jax: 0.10.0
libtpu: 0.0.40
codegen_flags: <defaults>
</compile_context>

<pallas_src>
import numpy as np
import jax
import jax.numpy as jnp
from jax import lax
from jax.experimental import pallas as pl
from jax.experimental.pallas import tpu as pltpu


def ghmm_kernel(obs_ref, w1_ref, w2_ref, c_ref, pmat_ref, ptmat_ref, p0_ref,
                out_ref, b_scr):
    """One tile of Bt sequences per grid step, batch-on-lanes layout.

    obs_ref:   (T, D, Bt)   observations, batch on the 128-lane axis
    w1_ref:    (D, K, 1)    -0.5 * inv_var  (pre-transposed for (1,K,1) broadcasts)
    w2_ref:    (D, K, 1)    means * inv_var
    c_ref:     (1, K, 1)    per-state log-normalizer constant
    pmat_ref:  (K, K, 1)    P[i, j]     (forward:  sum over i = major-axis VPU adds)
    ptmat_ref: (K, K, 1)    P.T[j, i]   (backward: sum over j = major-axis VPU adds)
    p0_ref:    (K, 1)       initial state distribution
    out_ref:   (T, K, Bt)   forward alphas first, overwritten with posteriors (lane-dense)
    b_scr:     (T, K, Bt)   VMEM scratch: observation probabilities
    """
    T, D, Bt = obs_ref.shape
    K = out_ref.shape[1]
    unroll = True if T <= 64 else 8

    # ---- Gaussian observation model (batch on lanes, K on sublanes) ----------------
    # logp[t,k,b] = c[k] + sum_d w1[k,d]*obs[t,d,b]^2 + w2[k,d]*obs[t,d,b]
    obs = obs_ref[...]                                   # (T, D, Bt)
    w1 = w1_ref[...]                                     # (D, K, 1)
    w2 = w2_ref[...]                                     # (D, K, 1)
    logp = jnp.zeros((T, K, Bt), jnp.float32) + c_ref[...]
    for d in range(D):                                   # static; D small at demo scale
        od = obs[:, d:d + 1, :]                          # (T, 1, Bt)
        logp = logp + w1[d][None] * (od * od) + w2[d][None] * od
    # per-(t,b) max subtraction: posterior-invariant, prevents f32 underflow
    logp = logp - jnp.max(logp, axis=1, keepdims=True)
    b_scr[...] = jnp.exp(logp)

    pmat = pmat_ref[...]                                 # (K, K, 1), hoisted out of loops
    ptmat = ptmat_ref[...]                               # (K, K, 1)

    # ---- forward pass: scaled alphas written directly into out_ref -----------------
    a0 = p0_ref[...] * b_scr[0]                          # (K,1)*(K,Bt) -> (K,Bt)
    a0 = a0 * pl.reciprocal(jnp.sum(a0, axis=0, keepdims=True), approx=True)
    out_ref[0] = a0

    def fwd_body(t, alpha):
        # alpha_new[j,b] = b[t,j,b] * sum_i P[i,j]*alpha[i,b]
        # sum over the MAJOR axis => plain VPU adds; no MXU, no lane reduce.
        am = jnp.sum(pmat * alpha[:, None, :], axis=0)   # (K, Bt)
        am = am * b_scr[t]
        # any positive per-(t,b) rescale cancels in the final gammas -> approx (EUP) OK
        am = am * pl.reciprocal(jnp.sum(am, axis=0, keepdims=True), approx=True)
        out_ref[t] = am
        return am

    _ = lax.fori_loop(1, T, fwd_body, a0, unroll=unroll)

    # ---- backward pass: overwrite alphas with posteriors ---------------------------
    def bwd_body(s, beta):
        t = T - 1 - s
        g = out_ref[t] * beta
        g = g / jnp.sum(g, axis=0, keepdims=True)        # exact divide for the output
        out_ref[t] = g
        u = b_scr[t] * beta
        bp = jnp.sum(ptmat * u[:, None, :], axis=0)      # (K, Bt)
        bp = bp * pl.reciprocal(jnp.sum(bp, axis=0, keepdims=True), approx=True)
        return bp

    _ = lax.fori_loop(0, T, bwd_body, jnp.ones((K, Bt), jnp.float32), unroll=unroll)


# -------------------- wrapper --------------------

def _round_up(x, m):
    return ((x + m - 1) // m) * m


def _precompute_gaussian(means, log_scales):
    """Batch-invariant Gaussian terms, pre-transposed for batch-on-lanes broadcasts."""
    K, D = means.shape
    log_var = 2.0 * log_scales                                     # (K, D)
    inv_var = jnp.exp(-log_var)                                    # (K, D)
    w1 = jnp.transpose(-0.5 * inv_var)[:, :, None]                 # (D, K, 1)
    w2 = jnp.transpose(means * inv_var)[:, :, None]                # (D, K, 1)
    c = (-0.5 * (D * jnp.log(2.0 * jnp.pi) + jnp.sum(log_var, axis=-1))
         - 0.5 * jnp.sum(means * means * inv_var, axis=-1))        # (K,)
    return (w1.astype(jnp.float32), w2.astype(jnp.float32),
            c.reshape(1, K, 1).astype(jnp.float32))


def gaussian_hmm_forward(obs, means, log_scales, P, p0, *, block_b=128):
    B, T, D = obs.shape
    K = means.shape[0]
    w1, w2, c = _precompute_gaussian(means, log_scales)
    pmat = P[:, :, None].astype(jnp.float32)                       # forward coefficients
    ptmat = jnp.transpose(P)[:, :, None].astype(jnp.float32)       # backward coefficients
    p0c = p0.reshape(K, 1).astype(jnp.float32)

    LANE = 128
    Bt = max(LANE, (int(block_b) // LANE) * LANE)                  # lane-dense batch tile
    Bt = min(Bt, _round_up(B, LANE))
    if _round_up(B, LANE) >= 2 * LANE:
        # v7x megacore: keep at least 2 batch tiles when the batch allows it.
        Bt = min(Bt, _round_up(_round_up(B, LANE) // 2, LANE))
    B_pad = _round_up(B, Bt)
    if B_pad != B:
        obs = jnp.pad(obs, ((0, B_pad - B), (0, 0), (0, 0)))       # padded lanes: wasted but correct
    obs_t = jnp.transpose(obs, (1, 2, 0))                          # (T, D, B_pad), batch on lanes

    # VMEM budget: double-buffered obs + out blocks + full-T scratch (+ headroom).
    block_bytes = 4 * (2 * T * D * Bt + 3 * T * K * Bt)
    vmem_limit = int(min(max(2 * block_bytes + (4 << 20), 16 << 20), 64 << 20))

    out_t = pl.pallas_call(
        ghmm_kernel,
        out_shape=jax.ShapeDtypeStruct((T, K, B_pad), jnp.float32),
        grid_spec=pltpu.PrefetchScalarGridSpec(
            num_scalar_prefetch=0,
            grid=(B_pad // Bt,),
            in_specs=[
                pl.BlockSpec((T, D, Bt), lambda i: (0, 0, i)),     # observations
                pl.BlockSpec((D, K, 1), lambda i: (0, 0, 0)),      # w1
                pl.BlockSpec((D, K, 1), lambda i: (0, 0, 0)),      # w2
                pl.BlockSpec((1, K, 1), lambda i: (0, 0, 0)),      # c
                pl.BlockSpec((K, K, 1), lambda i: (0, 0, 0)),      # P     (forward)
                pl.BlockSpec((K, K, 1), lambda i: (0, 0, 0)),      # P.T   (backward)
                pl.BlockSpec((K, 1), lambda i: (0, 0)),            # p0
            ],
            out_specs=pl.BlockSpec((T, K, Bt), lambda i: (0, 0, i)),
            scratch_shapes=[pltpu.VMEM((T, K, Bt), jnp.float32)],  # observation probs
        ),
        compiler_params=pltpu.CompilerParams(
            dimension_semantics=("parallel",),                     # independent batch tiles
            vmem_limit_bytes=vmem_limit,
        ),
    )(obs_t, w1, w2, c, pmat, ptmat, p0c)

    out = jnp.transpose(out_t, (2, 0, 1))                          # (B_pad, T, K)
    return out[:B]


# -------------------- parameter construction (deterministic) --------------------

def create_left_to_right_matrix(num_states, self_loop_prob=0.7):
    P = np.zeros((num_states, num_states), dtype=np.float32)
    for i in range(num_states):
        if i < num_states - 1:
            P[i, i] = self_loop_prob
            P[i, i + 1] = 1.0 - self_loop_prob
        else:
            P[i, i] = 1.0
    return P


def build_params(num_states, feature_dim, key):
    P_init = create_left_to_right_matrix(num_states, 0.7)
    log_transition_logits = np.log(P_init + 1e-8)
    transition_matrix = jax.nn.softmax(jnp.asarray(log_transition_logits), axis=1)
    log_initial_logits = np.log(np.ones(num_states, np.float32) / num_states + 1e-8)
    p0 = jax.nn.softmax(jnp.asarray(log_initial_logits), axis=0).reshape(1, num_states)
    means = jax.random.normal(key, (num_states, feature_dim), dtype=jnp.float32)
    log_scales = jnp.zeros((num_states, feature_dim), dtype=jnp.float32)
    return means, log_scales, transition_matrix.astype(jnp.float32), p0.astype(jnp.float32)


# -------------------- pure-JAX reference (for correctness check) ----------------

def reference_forward(obs, means, log_scales, P, p0):
    B, T, D = obs.shape
    K = means.shape[0]
    diff = obs[:, :, None, :] - means[None, None, :, :]            # (B,T,K,D)
    log_var = 2.0 * log_scales                                     # (K,D)
    var = jnp.exp(log_var)
    mahal = jnp.sum(diff ** 2 / var[None, None, :, :], axis=-1)    # (B,T,K)
    log_norm = -0.5 * (D * np.log(2 * np.pi) + jnp.sum(log_var, axis=-1))
    b = jnp.exp(log_norm[None, None, :] - 0.5 * mahal)             # (B,T,K)

    p0v = p0.reshape(K)

    def per_batch(bk):
        def fwd(alpha, bt):
            a = bt * (alpha @ P)
            a = a / jnp.sum(a)
            return a, a
        a0 = p0v * bk[0]
        a0 = a0 / jnp.sum(a0)
        _, alphas = lax.scan(fwd, a0, bk[1:])
        alphas = jnp.concatenate([a0[None], alphas], axis=0)       # (T,K)

        def bwd(beta, xs):
            at, bt = xs
            gamma = at * beta
            gamma = gamma / jnp.sum(gamma)
            beta_prev = (bt * beta) @ P.T
            beta_prev = beta_prev / jnp.sum(beta_prev)
            return beta_prev, gamma

        _, gammas = lax.scan(bwd, jnp.ones(K), (alphas, bk), reverse=True)
        return gammas

    return jax.vmap(per_batch)(b)


if __name__ == "__main__":
    B, T, K, D = 16, 16, 8, 16

    key = jax.random.PRNGKey(0)
    k_obs, k_means = jax.random.split(key)
    obs = 0.5 * jax.random.normal(k_obs, (B, T, D), dtype=jnp.float32)
    means, log_scales, P, p0 = build_params(K, D, k_means)

    out = jax.block_until_ready(gaussian_hmm_forward(obs, means, log_scales, P, p0))
    ref = jax.block_until_ready(reference_forward(obs, means, log_scales, P, p0))

    assert out.shape == (B, T, K)
    # posteriors must be a valid distribution per timestep
    assert np.allclose(np.asarray(out).sum(-1), 1.0, atol=1e-4)
    assert np.allclose(np.asarray(out), np.asarray(ref), atol=2e-3)

    print("KERNEL_OK")
</pallas_src>

<mosaic_0001>
module attributes {stable_mosaic.version = 11 : i64} {
  func.func @ghmm_kernel(%arg0: i32, %arg1: memref<16x16x128xf32, #tpu.memory_space<vmem>>, %arg2: memref<16x8x1xf32, #tpu.memory_space<vmem>>, %arg3: memref<16x8x1xf32, #tpu.memory_space<vmem>>, %arg4: memref<1x8x1xf32, #tpu.memory_space<vmem>>, %arg5: memref<8x8x1xf32, #tpu.memory_space<vmem>>, %arg6: memref<8x8x1xf32, #tpu.memory_space<vmem>>, %arg7: memref<8x1xf32, #tpu.memory_space<vmem>>, %arg8: memref<16x8x128xf32, #tpu.memory_space<vmem>>, %arg9: memref<16x8x128xf32, #tpu.memory_space<vmem>>) attributes {dimension_semantics = [#tpu.dimension_semantics<parallel>], iteration_bounds = array<i64: 1>, scalar_prefetch = 0 : i64, scratch_operands = 1 : i64, tpu.core_type = #tpu.core_type<tc>, window_params = [{transform_indices = @transform_0, window_bounds = array<i64: 16, 16, 128>}, {pipeline_mode = #tpu.pipeline_mode<synchronous>, transform_indices = @transform_1, window_bounds = array<i64: 16, 8, 1>}, {pipeline_mode = #tpu.pipeline_mode<synchronous>, transform_indices = @transform_2, window_bounds = array<i64: 16, 8, 1>}, {pipeline_mode = #tpu.pipeline_mode<synchronous>, transform_indices = @transform_3, window_bounds = array<i64: 1, 8, 1>}, {pipeline_mode = #tpu.pipeline_mode<synchronous>, transform_indices = @transform_4, window_bounds = array<i64: 8, 8, 1>}, {pipeline_mode = #tpu.pipeline_mode<synchronous>, transform_indices = @transform_5, window_bounds = array<i64: 8, 8, 1>}, {pipeline_mode = #tpu.pipeline_mode<synchronous>, transform_indices = @transform_6, window_bounds = array<i64: 8, 1>}, {transform_indices = @transform_7, window_bounds = array<i64: 16, 8, 128>}]} {
    %c0 = arith.constant 0 : index
    %c0_0 = arith.constant 0 : index
    %c0_1 = arith.constant 0 : index
    %0 = vector.load %arg1[%c0, %c0_0, %c0_1] : memref<16x16x128xf32, #tpu.memory_space<vmem>>, vector<16x16x128xf32>
    %c0_2 = arith.constant 0 : index
    %c0_3 = arith.constant 0 : index
    %c0_4 = arith.constant 0 : index
    %1 = vector.load %arg2[%c0_2, %c0_3, %c0_4] : memref<16x8x1xf32, #tpu.memory_space<vmem>>, vector<16x8x1xf32>
    %c0_5 = arith.constant 0 : index
    %c0_6 = arith.constant 0 : index
    %c0_7 = arith.constant 0 : index
    %2 = vector.load %arg3[%c0_5, %c0_6, %c0_7] : memref<16x8x1xf32, #tpu.memory_space<vmem>>, vector<16x8x1xf32>
    %cst = arith.constant 0.000000e+00 : f32
    %3 = vector.broadcast %cst : f32 to vector<16x8x128xf32>
    %c0_8 = arith.constant 0 : index
    %c0_9 = arith.constant 0 : index
    %c0_10 = arith.constant 0 : index
    %4 = vector.load %arg4[%c0_8, %c0_9, %c0_10] : memref<1x8x1xf32, #tpu.memory_space<vmem>>, vector<1x8x1xf32>
    %5 = vector.broadcast %4 : vector<1x8x1xf32> to vector<16x8x128xf32>
    %6 = arith.addf %3, %5 : vector<16x8x128xf32>
    %7 = vector.extract_strided_slice %0 {offsets = [0, 0, 0], sizes = [16, 1, 128], strides = [1, 1, 1]} : vector<16x16x128xf32> to vector<16x1x128xf32>
    %8 = vector.extract_strided_slice %1 {offsets = [0, 0, 0], sizes = [1, 8, 1], strides = [1, 1, 1]} : vector<16x8x1xf32> to vector<1x8x1xf32>
    %9 = vector.shape_cast %8 : vector<1x8x1xf32> to vector<8x1xf32>
    %10 = vector.shape_cast %9 : vector<8x1xf32> to vector<1x8x1xf32>
    %11 = arith.mulf %7, %7 : vector<16x1x128xf32>
    %12 = vector.broadcast %10 : vector<1x8x1xf32> to vector<16x8x128xf32>
    %13 = vector.broadcast %11 : vector<16x1x128xf32> to vector<16x8x128xf32>
    %14 = arith.mulf %12, %13 : vector<16x8x128xf32>
    %15 = arith.addf %6, %14 : vector<16x8x128xf32>
    %16 = vector.extract_strided_slice %2 {offsets = [0, 0, 0], sizes = [1, 8, 1], strides = [1, 1, 1]} : vector<16x8x1xf32> to vector<1x8x1xf32>
    %17 = vector.shape_cast %16 : vector<1x8x1xf32> to vector<8x1xf32>
    %18 = vector.shape_cast %17 : vector<8x1xf32> to vector<1x8x1xf32>
    %19 = vector.broadcast %18 : vector<1x8x1xf32> to vector<16x8x128xf32>
    %20 = vector.broadcast %7 : vector<16x1x128xf32> to vector<16x8x128xf32>
    %21 = arith.mulf %19, %20 : vector<16x8x128xf32>
    %22 = arith.addf %15, %21 : vector<16x8x128xf32>
    %23 = vector.extract_strided_slice %0 {offsets = [0, 1, 0], sizes = [16, 1, 128], strides = [1, 1, 1]} : vector<16x16x128xf32> to vector<16x1x128xf32>
    %24 = vector.extract_strided_slice %1 {offsets = [1, 0, 0], sizes = [1, 8, 1], strides = [1, 1, 1]} : vector<16x8x1xf32> to vector<1x8x1xf32>
    %25 = vector.shape_cast %24 : vector<1x8x1xf32> to vector<8x1xf32>
    %26 = vector.shape_cast %25 : vector<8x1xf32> to vector<1x8x1xf32>
    %27 = arith.mulf %23, %23 : vector<16x1x128xf32>
    %28 = vector.broadcast %26 : vector<1x8x1xf32> to vector<16x8x128xf32>
    %29 = vector.broadcast %27 : vector<16x1x128xf32> to vector<16x8x128xf32>
    %30 = arith.mulf %28, %29 : vector<16x8x128xf32>
    %31 = arith.addf %22, %30 : vector<16x8x128xf32>
    %32 = vector.extract_strided_slice %2 {offsets = [1, 0, 0], sizes = [1, 8, 1], strides = [1, 1, 1]} : vector<16x8x1xf32> to vector<1x8x1xf32>
    %33 = vector.shape_cast %32 : vector<1x8x1xf32> to vector<8x1xf32>
    %34 = vector.shape_cast %33 : vector<8x1xf32> to vector<1x8x1xf32>
    %35 = vector.broadcast %34 : vector<1x8x1xf32> to vector<16x8x128xf32>
    %36 = vector.broadcast %23 : vector<16x1x128xf32> to vector<16x8x128xf32>
    %37 = arith.mulf %35, %36 : vector<16x8x128xf32>
    %38 = arith.addf %31, %37 : vector<16x8x128xf32>
    %39 = vector.extract_strided_slice %0 {offsets = [0, 2, 0], sizes = [16, 1, 128], strides = [1, 1, 1]} : vector<16x16x128xf32> to vector<16x1x128xf32>
    %40 = vector.extract_strided_slice %1 {offsets = [2, 0, 0], sizes = [1, 8, 1], strides = [1, 1, 1]} : vector<16x8x1xf32> to vector<1x8x1xf32>
    %41 = vector.shape_cast %40 : vector<1x8x1xf32> to vector<8x1xf32>
    %42 = vector.shape_cast %41 : vector<8x1xf32> to vector<1x8x1xf32>
    %43 = arith.mulf %39, %39 : vector<16x1x128xf32>
    %44 = vector.broadcast %42 : vector<1x8x1xf32> to vector<16x8x128xf32>
    %45 = vector.broadcast %43 : vector<16x1x128xf32> to vector<16x8x128xf32>
    %46 = arith.mulf %44, %45 : vector<16x8x128xf32>
    %47 = arith.addf %38, %46 : vector<16x8x128xf32>
    %48 = vector.extract_strided_slice %2 {offsets = [2, 0, 0], sizes = [1, 8, 1], strides = [1, 1, 1]} : vector<16x8x1xf32> to vector<1x8x1xf32>
    %49 = vector.shape_cast %48 : vector<1x8x1xf32> to vector<8x1xf32>
    %50 = vector.shape_cast %49 : vector<8x1xf32> to vector<1x8x1xf32>
    %51 = vector.broadcast %50 : vector<1x8x1xf32> to vector<16x8x128xf32>
    %52 = vector.broadcast %39 : vector<16x1x128xf32> to vector<16x8x128xf32>
    %53 = arith.mulf %51, %52 : vector<16x8x128xf32>
    %54 = arith.addf %47, %53 : vector<16x8x128xf32>
    %55 = vector.extract_strided_slice %0 {offsets = [0, 3, 0], sizes = [16, 1, 128], strides = [1, 1, 1]} : vector<16x16x128xf32> to vector<16x1x128xf32>
    %56 = vector.extract_strided_slice %1 {offsets = [3, 0, 0], sizes = [1, 8, 1], strides = [1, 1, 1]} : vector<16x8x1xf32> to vector<1x8x1xf32>
    %57 = vector.shape_cast %56 : vector<1x8x1xf32> to vector<8x1xf32>
    %58 = vector.shape_cast %57 : vector<8x1xf32> to vector<1x8x1xf32>
    %59 = arith.mulf %55, %55 : vector<16x1x128xf32>
    %60 = vector.broadcast %58 : vector<1x8x1xf32> to vector<16x8x128xf32>
    %61 = vector.broadcast %59 : vector<16x1x128xf32> to vector<16x8x128xf32>
    %62 = arith.mulf %60, %61 : vector<16x8x128xf32>
    %63 = arith.addf %54, %62 : vector<16x8x128xf32>
    %64 = vector.extract_strided_slice %2 {offsets = [3, 0, 0], sizes = [1, 8, 1], strides = [1, 1, 1]} : vector<16x8x1xf32> to vector<1x8x1xf32>
    %65 = vector.shape_cast %64 : vector<1x8x1xf32> to vector<8x1xf32>
    %66 = vector.shape_cast %65 : vector<8x1xf32> to vector<1x8x1xf32>
    %67 = vector.broadcast %66 : vector<1x8x1xf32> to vector<16x8x128xf32>
    %68 = vector.broadcast %55 : vector<16x1x128xf32> to vector<16x8x128xf32>
    %69 = arith.mulf %67, %68 : vector<16x8x128xf32>
    %70 = arith.addf %63, %69 : vector<16x8x128xf32>
    %71 = vector.extract_strided_slice %0 {offsets = [0, 4, 0], sizes = [16, 1, 128], strides = [1, 1, 1]} : vector<16x16x128xf32> to vector<16x1x128xf32>
    %72 = vector.extract_strided_slice %1 {offsets = [4, 0, 0], sizes = [1, 8, 1], strides = [1, 1, 1]} : vector<16x8x1xf32> to vector<1x8x1xf32>
    %73 = vector.shape_cast %72 : vector<1x8x1xf32> to vector<8x1xf32>
    %74 = vector.shape_cast %73 : vector<8x1xf32> to vector<1x8x1xf32>
    %75 = arith.mulf %71, %71 : vector<16x1x128xf32>
    %76 = vector.broadcast %74 : vector<1x8x1xf32> to vector<16x8x128xf32>
    %77 = vector.broadcast %75 : vector<16x1x128xf32> to vector<16x8x128xf32>
    %78 = arith.mulf %76, %77 : vector<16x8x128xf32>
    %79 = arith.addf %70, %78 : vector<16x8x128xf32>
    %80 = vector.extract_strided_slice %2 {offsets = [4, 0, 0], sizes = [1, 8, 1], strides = [1, 1, 1]} : vector<16x8x1xf32> to vector<1x8x1xf32>
    %81 = vector.shape_cast %80 : vector<1x8x1xf32> to vector<8x1xf32>
    %82 = vector.shape_cast %81 : vector<8x1xf32> to vector<1x8x1xf32>
    %83 = vector.broadcast %82 : vector<1x8x1xf32> to vector<16x8x128xf32>
    %84 = vector.broadcast %71 : vector<16x1x128xf32> to vector<16x8x128xf32>
    %85 = arith.mulf %83, %84 : vector<16x8x128xf32>
    %86 = arith.addf %79, %85 : vector<16x8x128xf32>
    %87 = vector.extract_strided_slice %0 {offsets = [0, 5, 0], sizes = [16, 1, 128], strides = [1, 1, 1]} : vector<16x16x128xf32> to vector<16x1x128xf32>
    %88 = vector.extract_strided_slice %1 {offsets = [5, 0, 0], sizes = [1, 8, 1], strides = [1, 1, 1]} : vector<16x8x1xf32> to vector<1x8x1xf32>
    %89 = vector.shape_cast %88 : vector<1x8x1xf32> to vector<8x1xf32>
    %90 = vector.shape_cast %89 : vector<8x1xf32> to vector<1x8x1xf32>
    %91 = arith.mulf %87, %87 : vector<16x1x128xf32>
    %92 = vector.broadcast %90 : vector<1x8x1xf32> to vector<16x8x128xf32>
    %93 = vector.broadcast %91 : vector<16x1x128xf32> to vector<16x8x128xf32>
    %94 = arith.mulf %92, %93 : vector<16x8x128xf32>
    %95 = arith.addf %86, %94 : vector<16x8x128xf32>
    %96 = vector.extract_strided_slice %2 {offsets = [5, 0, 0], sizes = [1, 8, 1], strides = [1, 1, 1]} : vector<16x8x1xf32> to vector<1x8x1xf32>
    %97 = vector.shape_cast %96 : vector<1x8x1xf32> to vector<8x1xf32>
    %98 = vector.shape_cast %97 : vector<8x1xf32> to vector<1x8x1xf32>
    %99 = vector.broadcast %98 : vector<1x8x1xf32> to vector<16x8x128xf32>
    %100 = vector.broadcast %87 : vector<16x1x128xf32> to vector<16x8x128xf32>
    %101 = arith.mulf %99, %100 : vector<16x8x128xf32>
    %102 = arith.addf %95, %101 : vector<16x8x128xf32>
    %103 = vector.extract_strided_slice %0 {offsets = [0, 6, 0], sizes = [16, 1, 128], strides = [1, 1, 1]} : vector<16x16x128xf32> to vector<16x1x128xf32>
    %104 = vector.extract_strided_slice %1 {offsets = [6, 0, 0], sizes = [1, 8, 1], strides = [1, 1, 1]} : vector<16x8x1xf32> to vector<1x8x1xf32>
    %105 = vector.shape_cast %104 : vector<1x8x1xf32> to vector<8x1xf32>
    %106 = vector.shape_cast %105 : vector<8x1xf32> to vector<1x8x1xf32>
    %107 = arith.mulf %103, %103 : vector<16x1x128xf32>
    %108 = vector.broadcast %106 : vector<1x8x1xf32> to vector<16x8x128xf32>
    %109 = vector.broadcast %107 : vector<16x1x128xf32> to vector<16x8x128xf32>
    %110 = arith.mulf %108, %109 : vector<16x8x128xf32>
    %111 = arith.addf %102, %110 : vector<16x8x128xf32>
    %112 = vector.extract_strided_slice %2 {offsets = [6, 0, 0], sizes = [1, 8, 1], strides = [1, 1, 1]} : vector<16x8x1xf32> to vector<1x8x1xf32>
    %113 = vector.shape_cast %112 : vector<1x8x1xf32> to vector<8x1xf32>
    %114 = vector.shape_cast %113 : vector<8x1xf32> to vector<1x8x1xf32>
    %115 = vector.broadcast %114 : vector<1x8x1xf32> to vector<16x8x128xf32>
    %116 = vector.broadcast %103 : vector<16x1x128xf32> to vector<16x8x128xf32>
    %117 = arith.mulf %115, %116 : vector<16x8x128xf32>
    %118 = arith.addf %111, %117 : vector<16x8x128xf32>
    %119 = vector.extract_strided_slice %0 {offsets = [0, 7, 0], sizes = [16, 1, 128], strides = [1, 1, 1]} : vector<16x16x128xf32> to vector<16x1x128xf32>
    %120 = vector.extract_strided_slice %1 {offsets = [7, 0, 0], sizes = [1, 8, 1], strides = [1, 1, 1]} : vector<16x8x1xf32> to vector<1x8x1xf32>
    %121 = vector.shape_cast %120 : vector<1x8x1xf32> to vector<8x1xf32>
    %122 = vector.shape_cast %121 : vector<8x1xf32> to vector<1x8x1xf32>
    %123 = arith.mulf %119, %119 : vector<16x1x128xf32>
    %124 = vector.broadcast %122 : vector<1x8x1xf32> to vector<16x8x128xf32>
    %125 = vector.broadcast %123 : vector<16x1x128xf32> to vector<16x8x128xf32>
    %126 = arith.mulf %124, %125 : vector<16x8x128xf32>
    %127 = arith.addf %118, %126 : vector<16x8x128xf32>
    %128 = vector.extract_strided_slice %2 {offsets = [7, 0, 0], sizes = [1, 8, 1], strides = [1, 1, 1]} : vector<16x8x1xf32> to vector<1x8x1xf32>
    %129 = vector.shape_cast %128 : vector<1x8x1xf32> to vector<8x1xf32>
    %130 = vector.shape_cast %129 : vector<8x1xf32> to vector<1x8x1xf32>
    %131 = vector.broadcast %130 : vector<1x8x1xf32> to vector<16x8x128xf32>
    %132 = vector.broadcast %119 : vector<16x1x128xf32> to vector<16x8x128xf32>
    %133 = arith.mulf %131, %132 : vector<16x8x128xf32>
    %134 = arith.addf %127, %133 : vector<16x8x128xf32>
    %135 = vector.extract_strided_slice %0 {offsets = [0, 8, 0], sizes = [16, 1, 128], strides = [1, 1, 1]} : vector<16x16x128xf32> to vector<16x1x128xf32>
    %136 = vector.extract_strided_slice %1 {offsets = [8, 0, 0], sizes = [1, 8, 1], strides = [1, 1, 1]} : vector<16x8x1xf32> to vector<1x8x1xf32>
    %137 = vector.shape_cast %136 : vector<1x8x1xf32> to vector<8x1xf32>
    %138 = vector.shape_cast %137 : vector<8x1xf32> to vector<1x8x1xf32>
    %139 = arith.mulf %135, %135 : vector<16x1x128xf32>
    %140 = vector.broadcast %138 : vector<1x8x1xf32> to vector<16x8x128xf32>
    %141 = vector.broadcast %139 : vector<16x1x128xf32> to vector<16x8x128xf32>
    %142 = arith.mulf %140, %141 : vector<16x8x128xf32>
    %143 = arith.addf %134, %142 : vector<16x8x128xf32>
    %144 = vector.extract_strided_slice %2 {offsets = [8, 0, 0], sizes = [1, 8, 1], strides = [1, 1, 1]} : vector<16x8x1xf32> to vector<1x8x1xf32>
    %145 = vector.shape_cast %144 : vector<1x8x1xf32> to vector<8x1xf32>
    %146 = vector.shape_cast %145 : vector<8x1xf32> to vector<1x8x1xf32>
    %147 = vector.broadcast %146 : vector<1x8x1xf32> to vector<16x8x128xf32>
    %148 = vector.broadcast %135 : vector<16x1x128xf32> to vector<16x8x128xf32>
    %149 = arith.mulf %147, %148 : vector<16x8x128xf32>
    %150 = arith.addf %143, %149 : vector<16x8x128xf32>
    %151 = vector.extract_strided_slice %0 {offsets = [0, 9, 0], sizes = [16, 1, 128], strides = [1, 1, 1]} : vector<16x16x128xf32> to vector<16x1x128xf32>
    %152 = vector.extract_strided_slice %1 {offsets = [9, 0, 0], sizes = [1, 8, 1], strides = [1, 1, 1]} : vector<16x8x1xf32> to vector<1x8x1xf32>
    %153 = vector.shape_cast %152 : vector<1x8x1xf32> to vector<8x1xf32>
    %154 = vector.shape_cast %153 : vector<8x1xf32> to vector<1x8x1xf32>
    %155 = arith.mulf %151, %151 : vector<16x1x128xf32>
    %156 = vector.broadcast %154 : vector<1x8x1xf32> to vector<16x8x128xf32>
    %157 = vector.broadcast %155 : vector<16x1x128xf32> to vector<16x8x128xf32>
    %158 = arith.mulf %156, %157 : vector<16x8x128xf32>
    %159 = arith.addf %150, %158 : vector<16x8x128xf32>
    %160 = vector.extract_strided_slice %2 {offsets = [9, 0, 0], sizes = [1, 8, 1], strides = [1, 1, 1]} : vector<16x8x1xf32> to vector<1x8x1xf32>
    %161 = vector.shape_cast %160 : vector<1x8x1xf32> to vector<8x1xf32>
    %162 = vector.shape_cast %161 : vector<8x1xf32> to vector<1x8x1xf32>
    %163 = vector.broadcast %162 : vector<1x8x1xf32> to vector<16x8x128xf32>
    %164 = vector.broadcast %151 : vector<16x1x128xf32> to vector<16x8x128xf32>
    %165 = arith.mulf %163, %164 : vector<16x8x128xf32>
    %166 = arith.addf %159, %165 : vector<16x8x128xf32>
    %167 = vector.extract_strided_slice %0 {offsets = [0, 10, 0], sizes = [16, 1, 128], strides = [1, 1, 1]} : vector<16x16x128xf32> to vector<16x1x128xf32>
    %168 = vector.extract_strided_slice %1 {offsets = [10, 0, 0], sizes = [1, 8, 1], strides = [1, 1, 1]} : vector<16x8x1xf32> to vector<1x8x1xf32>
    %169 = vector.shape_cast %168 : vector<1x8x1xf32> to vector<8x1xf32>
    %170 = vector.shape_cast %169 : vector<8x1xf32> to vector<1x8x1xf32>
    %171 = arith.mulf %167, %167 : vector<16x1x128xf32>
    %172 = vector.broadcast %170 : vector<1x8x1xf32> to vector<16x8x128xf32>
    %173 = vector.broadcast %171 : vector<16x1x128xf32> to vector<16x8x128xf32>
    %174 = arith.mulf %172, %173 : vector<16x8x128xf32>
    %175 = arith.addf %166, %174 : vector<16x8x128xf32>
    %176 = vector.extract_strided_slice %2 {offsets = [10, 0, 0], sizes = [1, 8, 1], strides = [1, 1, 1]} : vector<16x8x1xf32> to vector<1x8x1xf32>
    %177 = vector.shape_cast %176 : vector<1x8x1xf32> to vector<8x1xf32>
    %178 = vector.shape_cast %177 : vector<8x1xf32> to vector<1x8x1xf32>
    %179 = vector.broadcast %178 : vector<1x8x1xf32> to vector<16x8x128xf32>
    %180 = vector.broadcast %167 : vector<16x1x128xf32> to vector<16x8x128xf32>
    %181 = arith.mulf %179, %180 : vector<16x8x128xf32>
    %182 = arith.addf %175, %181 : vector<16x8x128xf32>
    %183 = vector.extract_strided_slice %0 {offsets = [0, 11, 0], sizes = [16, 1, 128], strides = [1, 1, 1]} : vector<16x16x128xf32> to vector<16x1x128xf32>
    %184 = vector.extract_strided_slice %1 {offsets = [11, 0, 0], sizes = [1, 8, 1], strides = [1, 1, 1]} : vector<16x8x1xf32> to vector<1x8x1xf32>
    %185 = vector.shape_cast %184 : vector<1x8x1xf32> to vector<8x1xf32>
    %186 = vector.shape_cast %185 : vector<8x1xf32> to vector<1x8x1xf32>
    %187 = arith.mulf %183, %183 : vector<16x1x128xf32>
    %188 = vector.broadcast %186 : vector<1x8x1xf32> to vector<16x8x128xf32>
    %189 = vector.broadcast %187 : vector<16x1x128xf32> to vector<16x8x128xf32>
    %190 = arith.mulf %188, %189 : vector<16x8x128xf32>
    %191 = arith.addf %182, %190 : vector<16x8x128xf32>
    %192 = vector.extract_strided_slice %2 {offsets = [11, 0, 0], sizes = [1, 8, 1], strides = [1, 1, 1]} : vector<16x8x1xf32> to vector<1x8x1xf32>
    %193 = vector.shape_cast %192 : vector<1x8x1xf32> to vector<8x1xf32>
    %194 = vector.shape_cast %193 : vector<8x1xf32> to vector<1x8x1xf32>
    %195 = vector.broadcast %194 : vector<1x8x1xf32> to vector<16x8x128xf32>
    %196 = vector.broadcast %183 : vector<16x1x128xf32> to vector<16x8x128xf32>
    %197 = arith.mulf %195, %196 : vector<16x8x128xf32>
    %198 = arith.addf %191, %197 : vector<16x8x128xf32>
    %199 = vector.extract_strided_slice %0 {offsets = [0, 12, 0], sizes = [16, 1, 128], strides = [1, 1, 1]} : vector<16x16x128xf32> to vector<16x1x128xf32>
    %200 = vector.extract_strided_slice %1 {offsets = [12, 0, 0], sizes = [1, 8, 1], strides = [1, 1, 1]} : vector<16x8x1xf32> to vector<1x8x1xf32>
    %201 = vector.shape_cast %200 : vector<1x8x1xf32> to vector<8x1xf32>
    %202 = vector.shape_cast %201 : vector<8x1xf32> to vector<1x8x1xf32>
    %203 = arith.mulf %199, %199 : vector<16x1x128xf32>
    %204 = vector.broadcast %202 : vector<1x8x1xf32> to vector<16x8x128xf32>
    %205 = vector.broadcast %203 : vector<16x1x128xf32> to vector<16x8x128xf32>
    %206 = arith.mulf %204, %205 : vector<16x8x128xf32>
    %207 = arith.addf %198, %206 : vector<16x8x128xf32>
    %208 = vector.extract_strided_slice %2 {offsets = [12, 0, 0], sizes = [1, 8, 1], strides = [1, 1, 1]} : vector<16x8x1xf32> to vector<1x8x1xf32>
    %209 = vector.shape_cast %208 : vector<1x8x1xf32> to vector<8x1xf32>
    %210 = vector.shape_cast %209 : vector<8x1xf32> to vector<1x8x1xf32>
    %211 = vector.broadcast %210 : vector<1x8x1xf32> to vector<16x8x128xf32>
    %212 = vector.broadcast %199 : vector<16x1x128xf32> to vector<16x8x128xf32>
    %213 = arith.mulf %211, %212 : vector<16x8x128xf32>
    %214 = arith.addf %207, %213 : vector<16x8x128xf32>
    %215 = vector.extract_strided_slice %0 {offsets = [0, 13, 0], sizes = [16, 1, 128], strides = [1, 1, 1]} : vector<16x16x128xf32> to vector<16x1x128xf32>
    %216 = vector.extract_strided_slice %1 {offsets = [13, 0, 0], sizes = [1, 8, 1], strides = [1, 1, 1]} : vector<16x8x1xf32> to vector<1x8x1xf32>
    %217 = vector.shape_cast %216 : vector<1x8x1xf32> to vector<8x1xf32>
    %218 = vector.shape_cast %217 : vector<8x1xf32> to vector<1x8x1xf32>
    %219 = arith.mulf %215, %215 : vector<16x1x128xf32>
    %220 = vector.broadcast %218 : vector<1x8x1xf32> to vector<16x8x128xf32>
    %221 = vector.broadcast %219 : vector<16x1x128xf32> to vector<16x8x128xf32>
    %222 = arith.mulf %220, %221 : vector<16x8x128xf32>
    %223 = arith.addf %214, %222 : vector<16x8x128xf32>
    %224 = vector.extract_strided_slice %2 {offsets = [13, 0, 0], sizes = [1, 8, 1], strides = [1, 1, 1]} : vector<16x8x1xf32> to vector<1x8x1xf32>
    %225 = vector.shape_cast %224 : vector<1x8x1xf32> to vector<8x1xf32>
    %226 = vector.shape_cast %225 : vector<8x1xf32> to vector<1x8x1xf32>
    %227 = vector.broadcast %226 : vector<1x8x1xf32> to vector<16x8x128xf32>
    %228 = vector.broadcast %215 : vector<16x1x128xf32> to vector<16x8x128xf32>
    %229 = arith.mulf %227, %228 : vector<16x8x128xf32>
    %230 = arith.addf %223, %229 : vector<16x8x128xf32>
    %231 = vector.extract_strided_slice %0 {offsets = [0, 14, 0], sizes = [16, 1, 128], strides = [1, 1, 1]} : vector<16x16x128xf32> to vector<16x1x128xf32>
    %232 = vector.extract_strided_slice %1 {offsets = [14, 0, 0], sizes = [1, 8, 1], strides = [1, 1, 1]} : vector<16x8x1xf32> to vector<1x8x1xf32>
    %233 = vector.shape_cast %232 : vector<1x8x1xf32> to vector<8x1xf32>
    %234 = vector.shape_cast %233 : vector<8x1xf32> to vector<1x8x1xf32>
    %235 = arith.mulf %231, %231 : vector<16x1x128xf32>
    %236 = vector.broadcast %234 : vector<1x8x1xf32> to vector<16x8x128xf32>
    %237 = vector.broadcast %235 : vector<16x1x128xf32> to vector<16x8x128xf32>
    %238 = arith.mulf %236, %237 : vector<16x8x128xf32>
    %239 = arith.addf %230, %238 : vector<16x8x128xf32>
    %240 = vector.extract_strided_slice %2 {offsets = [14, 0, 0], sizes = [1, 8, 1], strides = [1, 1, 1]} : vector<16x8x1xf32> to vector<1x8x1xf32>
    %241 = vector.shape_cast %240 : vector<1x8x1xf32> to vector<8x1xf32>
    %242 = vector.shape_cast %241 : vector<8x1xf32> to vector<1x8x1xf32>
    %243 = vector.broadcast %242 : vector<1x8x1xf32> to vector<16x8x128xf32>
    %244 = vector.broadcast %231 : vector<16x1x128xf32> to vector<16x8x128xf32>
    %245 = arith.mulf %243, %244 : vector<16x8x128xf32>
    %246 = arith.addf %239, %245 : vector<16x8x128xf32>
    %247 = vector.extract_strided_slice %0 {offsets = [0, 15, 0], sizes = [16, 1, 128], strides = [1, 1, 1]} : vector<16x16x128xf32> to vector<16x1x128xf32>
    %248 = vector.extract_strided_slice %1 {offsets = [15, 0, 0], sizes = [1, 8, 1], strides = [1, 1, 1]} : vector<16x8x1xf32> to vector<1x8x1xf32>
    %249 = vector.shape_cast %248 : vector<1x8x1xf32> to vector<8x1xf32>
    %250 = vector.shape_cast %249 : vector<8x1xf32> to vector<1x8x1xf32>
    %251 = arith.mulf %247, %247 : vector<16x1x128xf32>
    %252 = vector.broadcast %250 : vector<1x8x1xf32> to vector<16x8x128xf32>
    %253 = vector.broadcast %251 : vector<16x1x128xf32> to vector<16x8x128xf32>
    %254 = arith.mulf %252, %253 : vector<16x8x128xf32>
    %255 = arith.addf %246, %254 : vector<16x8x128xf32>
    %256 = vector.extract_strided_slice %2 {offsets = [15, 0, 0], sizes = [1, 8, 1], strides = [1, 1, 1]} : vector<16x8x1xf32> to vector<1x8x1xf32>
    %257 = vector.shape_cast %256 : vector<1x8x1xf32> to vector<8x1xf32>
    %258 = vector.shape_cast %257 : vector<8x1xf32> to vector<1x8x1xf32>
    %259 = vector.broadcast %258 : vector<1x8x1xf32> to vector<16x8x128xf32>
    %260 = vector.broadcast %247 : vector<16x1x128xf32> to vector<16x8x128xf32>
    %261 = arith.mulf %259, %260 : vector<16x8x128xf32>
    %262 = arith.addf %255, %261 : vector<16x8x128xf32>
    %cst_11 = arith.constant dense<0xFF800000> : vector<16x128xf32>
    %263 = vector.multi_reduction <maximumf>, %262, %cst_11 [1] : vector<16x8x128xf32> to vector<16x128xf32>
    %264 = vector.shape_cast %263 : vector<16x128xf32> to vector<16x1x128xf32>
    %265 = vector.broadcast %264 : vector<16x1x128xf32> to vector<16x8x128xf32>
    %266 = arith.subf %262, %265 : vector<16x8x128xf32>
    %267 = math.exp %266 : vector<16x8x128xf32>
    %c0_12 = arith.constant 0 : index
    %c0_13 = arith.constant 0 : index
    %c0_14 = arith.constant 0 : index
    %268 = vector.load %arg9[%c0_12, %c0_13, %c0_14] : memref<16x8x128xf32, #tpu.memory_space<vmem>>, vector<16x8x128xf32>
    tpu.vector_store %arg9[%c0_12, %c0_13, %c0_14], %267 {strides = array<i32>} : memref<16x8x128xf32, #tpu.memory_space<vmem>>, vector<16x8x128xf32>,
    %c0_15 = arith.constant 0 : index
    %c0_16 = arith.constant 0 : index
    %c0_17 = arith.constant 0 : index
    %269 = vector.load %arg5[%c0_15, %c0_16, %c0_17] : memref<8x8x1xf32, #tpu.memory_space<vmem>>, vector<8x8x1xf32>
    %c0_18 = arith.constant 0 : index
    %c0_19 = arith.constant 0 : index
    %c0_20 = arith.constant 0 : index
    %270 = vector.load %arg6[%c0_18, %c0_19, %c0_20] : memref<8x8x1xf32, #tpu.memory_space<vmem>>, vector<8x8x1xf32>
    %c0_21 = arith.constant 0 : index
    %c0_22 = arith.constant 0 : index
    %271 = vector.load %arg7[%c0_21, %c0_22] : memref<8x1xf32, #tpu.memory_space<vmem>>, vector<8x1xf32>
    %c0_23 = arith.constant 0 : index
    %c0_24 = arith.constant 0 : index
    %c0_25 = arith.constant 0 : index
    %272 = vector.load %arg9[%c0_23, %c0_24, %c0_25] : memref<16x8x128xf32, #tpu.memory_space<vmem>>, vector<1x8x128xf32>
    %273 = vector.shape_cast %272 : vector<1x8x128xf32> to vector<8x128xf32>
    %274 = vector.broadcast %271 : vector<8x1xf32> to vector<8x128xf32>
    %275 = arith.mulf %274, %273 : vector<8x128xf32>
    %cst_26 = arith.constant dense<0.000000e+00> : vector<128xf32>
    %276 = vector.multi_reduction <add>, %275, %cst_26 [0] : vector<8x128xf32> to vector<128xf32>
    %277 = vector.shape_cast %276 : vector<128xf32> to vector<1x128xf32>
    %278 = tpu.reciprocal %277 {approx = true} : vector<1x128xf32> -> vector<1x128xf32>
    %279 = vector.broadcast %278 : vector<1x128xf32> to vector<8x128xf32>
    %280 = arith.mulf %275, %279 : vector<8x128xf32>
    %c0_27 = arith.constant 0 : index
    %c0_28 = arith.constant 0 : index
    %c0_29 = arith.constant 0 : index
    %281 = vector.load %arg8[%c0_27, %c0_28, %c0_29] : memref<16x8x128xf32, #tpu.memory_space<vmem>>, vector<1x8x128xf32>
    %282 = vector.shape_cast %281 : vector<1x8x128xf32> to vector<8x128xf32>
    %283 = vector.shape_cast %280 : vector<8x128xf32> to vector<1x8x128xf32>
    tpu.vector_store %arg8[%c0_27, %c0_28, %c0_29], %283 {strides = array<i32>} : memref<16x8x128xf32, #tpu.memory_space<vmem>>, vector<1x8x128xf32>,
    %c1_i32 = arith.constant 1 : i32
    %284 = vector.shape_cast %280 : vector<8x128xf32> to vector<8x1x128xf32>
    %285 = vector.broadcast %269 : vector<8x8x1xf32> to vector<8x8x128xf32>
    %286 = vector.broadcast %284 : vector<8x1x128xf32> to vector<8x8x128xf32>
    %287 = arith.mulf %285, %286 : vector<8x8x128xf32>
    %cst_30 = arith.constant dense<0.000000e+00> : vector<8x128xf32>
    %288 = vector.multi_reduction <add>, %287, %cst_30 [0] : vector<8x8x128xf32> to vector<8x128xf32>
    %289 = arith.index_cast %c1_i32 : i32 to index
    %c0_31 = arith.constant 0 : index
    %c0_32 = arith.constant 0 : index
    %290 = vector.load %arg9[%289, %c0_31, %c0_32] : memref<16x8x128xf32, #tpu.memory_space<vmem>>, vector<1x8x128xf32>
    %291 = vector.shape_cast %290 : vector<1x8x128xf32> to vector<8x128xf32>
    %292 = arith.mulf %288, %291 : vector<8x128xf32>
    %cst_33 = arith.constant dense<0.000000e+00> : vector<128xf32>
    %293 = vector.multi_reduction <add>, %292, %cst_33 [0] : vector<8x128xf32> to vector<128xf32>
    %294 = vector.shape_cast %293 : vector<128xf32> to vector<1x128xf32>
    %295 = tpu.reciprocal %294 {approx = true} : vector<1x128xf32> -> vector<1x128xf32>
    %296 = vector.broadcast %295 : vector<1x128xf32> to vector<8x128xf32>
    %297 = arith.mulf %292, %296 : vector<8x128xf32>
    %298 = arith.index_cast %c1_i32 : i32 to index
    %c0_34 = arith.constant 0 : index
    %c0_35 = arith.constant 0 : index
    %299 = vector.load %arg8[%298, %c0_34, %c0_35] : memref<16x8x128xf32, #tpu.memory_space<vmem>>, vector<1x8x128xf32>
    %300 = vector.shape_cast %299 : vector<1x8x128xf32> to vector<8x128xf32>
    %301 = vector.shape_cast %297 : vector<8x128xf32> to vector<1x8x128xf32>
    tpu.vector_store %arg8[%298, %c0_34, %c0_35], %301 {strides = array<i32>} : memref<16x8x128xf32, #tpu.memory_space<vmem>>, vector<1x8x128xf32>,
    %c2_i32 = arith.constant 2 : i32
    %302 = vector.shape_cast %297 : vector<8x128xf32> to vector<8x1x128xf32>
    %303 = vector.broadcast %269 : vector<8x8x1xf32> to vector<8x8x128xf32>
    %304 = vector.broadcast %302 : vector<8x1x128xf32> to vector<8x8x128xf32>
    %305 = arith.mulf %303, %304 : vector<8x8x128xf32>
    %cst_36 = arith.constant dense<0.000000e+00> : vector<8x128xf32>
    %306 = vector.multi_reduction <add>, %305, %cst_36 [0] : vector<8x8x128xf32> to vector<8x128xf32>
    %307 = arith.index_cast %c2_i32 : i32 to index
    %c0_37 = arith.constant 0 : index
    %c0_38 = arith.constant 0 : index
    %308 = vector.load %arg9[%307, %c0_37, %c0_38] : memref<16x8x128xf32, #tpu.memory_space<vmem>>, vector<1x8x128xf32>
    %309 = vector.shape_cast %308 : vector<1x8x128xf32> to vector<8x128xf32>
    %310 = arith.mulf %306, %309 : vector<8x128xf32>
    %cst_39 = arith.constant dense<0.000000e+00> : vector<128xf32>
    %311 = vector.multi_reduction <add>, %310, %cst_39 [0] : vector<8x128xf32> to vector<128xf32>
    %312 = vector.shape_cast %311 : vector<128xf32> to vector<1x128xf32>
    %313 = tpu.reciprocal %312 {approx = true} : vector<1x128xf32> -> vector<1x128xf32>
    %314 = vector.broadcast %313 : vector<1x128xf32> to vector<8x128xf32>
    %315 = arith.mulf %310, %314 : vector<8x128xf32>
    %316 = arith.index_cast %c2_i32 : i32 to index
    %c0_40 = arith.constant 0 : index
    %c0_41 = arith.constant 0 : index
    %317 = vector.load %arg8[%316, %c0_40, %c0_41] : memref<16x8x128xf32, #tpu.memory_space<vmem>>, vector<1x8x128xf32>
    %318 = vector.shape_cast %317 : vector<1x8x128xf32> to vector<8x128xf32>
    %319 = vector.shape_cast %315 : vector<8x128xf32> to vector<1x8x128xf32>
    tpu.vector_store %arg8[%316, %c0_40, %c0_41], %319 {strides = array<i32>} : memref<16x8x128xf32, #tpu.memory_space<vmem>>, vector<1x8x128xf32>,
    %c3_i32 = arith.constant 3 : i32
    %320 = vector.shape_cast %315 : vector<8x128xf32> to vector<8x1x128xf32>
    %321 = vector.broadcast %269 : vector<8x8x1xf32> to vector<8x8x128xf32>
    %322 = vector.broadcast %320 : vector<8x1x128xf32> to vector<8x8x128xf32>
    %323 = arith.mulf %321, %322 : vector<8x8x128xf32>
    %cst_42 = arith.constant dense<0.000000e+00> : vector<8x128xf32>
    %324 = vector.multi_reduction <add>, %323, %cst_42 [0] : vector<8x8x128xf32> to vector<8x128xf32>
    %325 = arith.index_cast %c3_i32 : i32 to index
    %c0_43 = arith.constant 0 : index
    %c0_44 = arith.constant 0 : index
    %326 = vector.load %arg9[%325, %c0_43, %c0_44] : memref<16x8x128xf32, #tpu.memory_space<vmem>>, vector<1x8x128xf32>
    %327 = vector.shape_cast %326 : vector<1x8x128xf32> to vector<8x128xf32>
    %328 = arith.mulf %324, %327 : vector<8x128xf32>
    %cst_45 = arith.constant dense<0.000000e+00> : vector<128xf32>
    %329 = vector.multi_reduction <add>, %328, %cst_45 [0] : vector<8x128xf32> to vector<128xf32>
    %330 = vector.shape_cast %329 : vector<128xf32> to vector<1x128xf32>
    %331 = tpu.reciprocal %330 {approx = true} : vector<1x128xf32> -> vector<1x128xf32>
    %332 = vector.broadcast %331 : vector<1x128xf32> to vector<8x128xf32>
    %333 = arith.mulf %328, %332 : vector<8x128xf32>
    %334 = arith.index_cast %c3_i32 : i32 to index
    %c0_46 = arith.constant 0 : index
    %c0_47 = arith.constant 0 : index
    %335 = vector.load %arg8[%334, %c0_46, %c0_47] : memref<16x8x128xf32, #tpu.memory_space<vmem>>, vector<1x8x128xf32>
    %336 = vector.shape_cast %335 : vector<1x8x128xf32> to vector<8x128xf32>
    %337 = vector.shape_cast %333 : vector<8x128xf32> to vector<1x8x128xf32>
    tpu.vector_store %arg8[%334, %c0_46, %c0_47], %337 {strides = array<i32>} : memref<16x8x128xf32, #tpu.memory_space<vmem>>, vector<1x8x128xf32>,
    %c4_i32 = arith.constant 4 : i32
    %338 = vector.shape_cast %333 : vector<8x128xf32> to vector<8x1x128xf32>
    %339 = vector.broadcast %269 : vector<8x8x1xf32> to vector<8x8x128xf32>
    %340 = vector.broadcast %338 : vector<8x1x128xf32> to vector<8x8x128xf32>
    %341 = arith.mulf %339, %340 : vector<8x8x128xf32>
    %cst_48 = arith.constant dense<0.000000e+00> : vector<8x128xf32>
    %342 = vector.multi_reduction <add>, %341, %cst_48 [0] : vector<8x8x128xf32> to vector<8x128xf32>
    %343 = arith.index_cast %c4_i32 : i32 to index
    %c0_49 = arith.constant 0 : index
    %c0_50 = arith.constant 0 : index
    %344 = vector.load %arg9[%343, %c0_49, %c0_50] : memref<16x8x128xf32, #tpu.memory_space<vmem>>, vector<1x8x128xf32>
    %345 = vector.shape_cast %344 : vector<1x8x128xf32> to vector<8x128xf32>
    %346 = arith.mulf %342, %345 : vector<8x128xf32>
    %cst_51 = arith.constant dense<0.000000e+00> : vector<128xf32>
    %347 = vector.multi_reduction <add>, %346, %cst_51 [0] : vector<8x128xf32> to vector<128xf32>
    %348 = vector.shape_cast %347 : vector<128xf32> to vector<1x128xf32>
    %349 = tpu.reciprocal %348 {approx = true} : vector<1x128xf32> -> vector<1x128xf32>
    %350 = vector.broadcast %349 : vector<1x128xf32> to vector<8x128xf32>
    %351 = arith.mulf %346, %350 : vector<8x128xf32>
    %352 = arith.index_cast %c4_i32 : i32 to index
    %c0_52 = arith.constant 0 : index
    %c0_53 = arith.constant 0 : index
    %353 = vector.load %arg8[%352, %c0_52, %c0_53] : memref<16x8x128xf32, #tpu.memory_space<vmem>>, vector<1x8x128xf32>
    %354 = vector.shape_cast %353 : vector<1x8x128xf32> to vector<8x128xf32>
    %355 = vector.shape_cast %351 : vector<8x128xf32> to vector<1x8x128xf32>
    tpu.vector_store %arg8[%352, %c0_52, %c0_53], %355 {strides = array<i32>} : memref<16x8x128xf32, #tpu.memory_space<vmem>>, vector<1x8x128xf32>,
    %c5_i32 = arith.constant 5 : i32
    %356 = vector.shape_cast %351 : vector<8x128xf32> to vector<8x1x128xf32>
    %357 = vector.broadcast %269 : vector<8x8x1xf32> to vector<8x8x128xf32>
    %358 = vector.broadcast %356 : vector<8x1x128xf32> to vector<8x8x128xf32>
    %359 = arith.mulf %357, %358 : vector<8x8x128xf32>
    %cst_54 = arith.constant dense<0.000000e+00> : vector<8x128xf32>
    %360 = vector.multi_reduction <add>, %359, %cst_54 [0] : vector<8x8x128xf32> to vector<8x128xf32>
    %361 = arith.index_cast %c5_i32 : i32 to index
    %c0_55 = arith.constant 0 : index
    %c0_56 = arith.constant 0 : index
    %362 = vector.load %arg9[%361, %c0_55, %c0_56] : memref<16x8x128xf32, #tpu.memory_space<vmem>>, vector<1x8x128xf32>
    %363 = vector.shape_cast %362 : vector<1x8x128xf32> to vector<8x128xf32>
    %364 = arith.mulf %360, %363 : vector<8x128xf32>
    %cst_57 = arith.constant dense<0.000000e+00> : vector<128xf32>
    %365 = vector.multi_reduction <add>, %364, %cst_57 [0] : vector<8x128xf32> to vector<128xf32>
    %366 = vector.shape_cast %365 : vector<128xf32> to vector<1x128xf32>
    %367 = tpu.reciprocal %366 {approx = true} : vector<1x128xf32> -> vector<1x128xf32>
    %368 = vector.broadcast %367 : vector<1x128xf32> to vector<8x128xf32>
    %369 = arith.mulf %364, %368 : vector<8x128xf32>
    %370 = arith.index_cast %c5_i32 : i32 to index
    %c0_58 = arith.constant 0 : index
    %c0_59 = arith.constant 0 : index
    %371 = vector.load %arg8[%370, %c0_58, %c0_59] : memref<16x8x128xf32, #tpu.memory_space<vmem>>, vector<1x8x128xf32>
    %372 = vector.shape_cast %371 : vector<1x8x128xf32> to vector<8x128xf32>
    %373 = vector.shape_cast %369 : vector<8x128xf32> to vector<1x8x128xf32>
    tpu.vector_store %arg8[%370, %c0_58, %c0_59], %373 {strides = array<i32>} : memref<16x8x128xf32, #tpu.memory_space<vmem>>, vector<1x8x128xf32>,
    %c6_i32 = arith.constant 6 : i32
    %374 = vector.shape_cast %369 : vector<8x128xf32> to vector<8x1x128xf32>
    %375 = vector.broadcast %269 : vector<8x8x1xf32> to vector<8x8x128xf32>
    %376 = vector.broadcast %374 : vector<8x1x128xf32> to vector<8x8x128xf32>
    %377 = arith.mulf %375, %376 : vector<8x8x128xf32>
    %cst_60 = arith.constant dense<0.000000e+00> : vector<8x128xf32>
    %378 = vector.multi_reduction <add>, %377, %cst_60 [0] : vector<8x8x128xf32> to vector<8x128xf32>
    %379 = arith.index_cast %c6_i32 : i32 to index
    %c0_61 = arith.constant 0 : index
    %c0_62 = arith.constant 0 : index
    %380 = vector.load %arg9[%379, %c0_61, %c0_62] : memref<16x8x128xf32, #tpu.memory_space<vmem>>, vector<1x8x128xf32>
    %381 = vector.shape_cast %380 : vector<1x8x128xf32> to vector<8x128xf32>
    %382 = arith.mulf %378, %381 : vector<8x128xf32>
    %cst_63 = arith.constant dense<0.000000e+00> : vector<128xf32>
    %383 = vector.multi_reduction <add>, %382, %cst_63 [0] : vector<8x128xf32> to vector<128xf32>
    %384 = vector.shape_cast %383 : vector<128xf32> to vector<1x128xf32>
    %385 = tpu.reciprocal %384 {approx = true} : vector<1x128xf32> -> vector<1x128xf32>
    %386 = vector.broadcast %385 : vector<1x128xf32> to vector<8x128xf32>
    %387 = arith.mulf %382, %386 : vector<8x128xf32>
    %388 = arith.index_cast %c6_i32 : i32 to index
    %c0_64 = arith.constant 0 : index
    %c0_65 = arith.constant 0 : index
    %389 = vector.load %arg8[%388, %c0_64, %c0_65] : memref<16x8x128xf32, #tpu.memory_space<vmem>>, vector<1x8x128xf32>
    %390 = vector.shape_cast %389 : vector<1x8x128xf32> to vector<8x128xf32>
    %391 = vector.shape_cast %387 : vector<8x128xf32> to vector<1x8x128xf32>
    tpu.vector_store %arg8[%388, %c0_64, %c0_65], %391 {strides = array<i32>} : memref<16x8x128xf32, #tpu.memory_space<vmem>>, vector<1x8x128xf32>,
    %c7_i32 = arith.constant 7 : i32
    %392 = vector.shape_cast %387 : vector<8x128xf32> to vector<8x1x128xf32>
    %393 = vector.broadcast %269 : vector<8x8x1xf32> to vector<8x8x128xf32>
    %394 = vector.broadcast %392 : vector<8x1x128xf32> to vector<8x8x128xf32>
    %395 = arith.mulf %393, %394 : vector<8x8x128xf32>
    %cst_66 = arith.constant dense<0.000000e+00> : vector<8x128xf32>
    %396 = vector.multi_reduction <add>, %395, %cst_66 [0] : vector<8x8x128xf32> to vector<8x128xf32>
    %397 = arith.index_cast %c7_i32 : i32 to index
    %c0_67 = arith.constant 0 : index
    %c0_68 = arith.constant 0 : index
    %398 = vector.load %arg9[%397, %c0_67, %c0_68] : memref<16x8x128xf32, #tpu.memory_space<vmem>>, vector<1x8x128xf32>
    %399 = vector.shape_cast %398 : vector<1x8x128xf32> to vector<8x128xf32>
    %400 = arith.mulf %396, %399 : vector<8x128xf32>
    %cst_69 = arith.constant dense<0.000000e+00> : vector<128xf32>
    %401 = vector.multi_reduction <add>, %400, %cst_69 [0] : vector<8x128xf32> to vector<128xf32>
    %402 = vector.shape_cast %401 : vector<128xf32> to vector<1x128xf32>
    %403 = tpu.reciprocal %402 {approx = true} : vector<1x128xf32> -> vector<1x128xf32>
    %404 = vector.broadcast %403 : vector<1x128xf32> to vector<8x128xf32>
    %405 = arith.mulf %400, %404 : vector<8x128xf32>
    %406 = arith.index_cast %c7_i32 : i32 to index
    %c0_70 = arith.constant 0 : index
    %c0_71 = arith.constant 0 : index
    %407 = vector.load %arg8[%406, %c0_70, %c0_71] : memref<16x8x128xf32, #tpu.memory_space<vmem>>, vector<1x8x128xf32>
    %408 = vector.shape_cast %407 : vector<1x8x128xf32> to vector<8x128xf32>
    %409 = vector.shape_cast %405 : vector<8x128xf32> to vector<1x8x128xf32>
    tpu.vector_store %arg8[%406, %c0_70, %c0_71], %409 {strides = array<i32>} : memref<16x8x128xf32, #tpu.memory_space<vmem>>, vector<1x8x128xf32>,
    %c8_i32 = arith.constant 8 : i32
    %410 = vector.shape_cast %405 : vector<8x128xf32> to vector<8x1x128xf32>
    %411 = vector.broadcast %269 : vector<8x8x1xf32> to vector<8x8x128xf32>
    %412 = vector.broadcast %410 : vector<8x1x128xf32> to vector<8x8x128xf32>
    %413 = arith.mulf %411, %412 : vector<8x8x128xf32>
    %cst_72 = arith.constant dense<0.000000e+00> : vector<8x128xf32>
    %414 = vector.multi_reduction <add>, %413, %cst_72 [0] : vector<8x8x128xf32> to vector<8x128xf32>
    %415 = arith.index_cast %c8_i32 : i32 to index
    %c0_73 = arith.constant 0 : index
    %c0_74 = arith.constant 0 : index
    %416 = vector.load %arg9[%415, %c0_73, %c0_74] : memref<16x8x128xf32, #tpu.memory_space<vmem>>, vector<1x8x128xf32>
    %417 = vector.shape_cast %416 : vector<1x8x128xf32> to vector<8x128xf32>
    %418 = arith.mulf %414, %417 : vector<8x128xf32>
    %cst_75 = arith.constant dense<0.000000e+00> : vector<128xf32>
    %419 = vector.multi_reduction <add>, %418, %cst_75 [0] : vector<8x128xf32> to vector<128xf32>
    %420 = vector.shape_cast %419 : vector<128xf32> to vector<1x128xf32>
    %421 = tpu.reciprocal %420 {approx = true} : vector<1x128xf32> -> vector<1x128xf32>
    %422 = vector.broadcast %421 : vector<1x128xf32> to vector<8x128xf32>
    %423 = arith.mulf %418, %422 : vector<8x128xf32>
    %424 = arith.index_cast %c8_i32 : i32 to index
    %c0_76 = arith.constant 0 : index
    %c0_77 = arith.constant 0 : index
    %425 = vector.load %arg8[%424, %c0_76, %c0_77] : memref<16x8x128xf32, #tpu.memory_space<vmem>>, vector<1x8x128xf32>
    %426 = vector.shape_cast %425 : vector<1x8x128xf32> to vector<8x128xf32>
    %427 = vector.shape_cast %423 : vector<8x128xf32> to vector<1x8x128xf32>
    tpu.vector_store %arg8[%424, %c0_76, %c0_77], %427 {strides = array<i32>} : memref<16x8x128xf32, #tpu.memory_space<vmem>>, vector<1x8x128xf32>,
    %c9_i32 = arith.constant 9 : i32
    %428 = vector.shape_cast %423 : vector<8x128xf32> to vector<8x1x128xf32>
    %429 = vector.broadcast %269 : vector<8x8x1xf32> to vector<8x8x128xf32>
    %430 = vector.broadcast %428 : vector<8x1x128xf32> to vector<8x8x128xf32>
    %431 = arith.mulf %429, %430 : vector<8x8x128xf32>
    %cst_78 = arith.constant dense<0.000000e+00> : vector<8x128xf32>
    %432 = vector.multi_reduction <add>, %431, %cst_78 [0] : vector<8x8x128xf32> to vector<8x128xf32>
    %433 = arith.index_cast %c9_i32 : i32 to index
    %c0_79 = arith.constant 0 : index
    %c0_80 = arith.constant 0 : index
    %434 = vector.load %arg9[%433, %c0_79, %c0_80] : memref<16x8x128xf32, #tpu.memory_space<vmem>>, vector<1x8x128xf32>
    %435 = vector.shape_cast %434 : vector<1x8x128xf32> to vector<8x128xf32>
    %436 = arith.mulf %432, %435 : vector<8x128xf32>
    %cst_81 = arith.constant dense<0.000000e+00> : vector<128xf32>
    %437 = vector.multi_reduction <add>, %436, %cst_81 [0] : vector<8x128xf32> to vector<128xf32>
    %438 = vector.shape_cast %437 : vector<128xf32> to vector<1x128xf32>
    %439 = tpu.reciprocal %438 {approx = true} : vector<1x128xf32> -> vector<1x128xf32>
    %440 = vector.broadcast %439 : vector<1x128xf32> to vector<8x128xf32>
    %441 = arith.mulf %436, %440 : vector<8x128xf32>
    %442 = arith.index_cast %c9_i32 : i32 to index
    %c0_82 = arith.constant 0 : index
    %c0_83 = arith.constant 0 : index
    %443 = vector.load %arg8[%442, %c0_82, %c0_83] : memref<16x8x128xf32, #tpu.memory_space<vmem>>, vector<1x8x128xf32>
    %444 = vector.shape_cast %443 : vector<1x8x128xf32> to vector<8x128xf32>
    %445 = vector.shape_cast %441 : vector<8x128xf32> to vector<1x8x128xf32>
    tpu.vector_store %arg8[%442, %c0_82, %c0_83], %445 {strides = array<i32>} : memref<16x8x128xf32, #tpu.memory_space<vmem>>, vector<1x8x128xf32>,
    %c10_i32 = arith.constant 10 : i32
    %446 = vector.shape_cast %441 : vector<8x128xf32> to vector<8x1x128xf32>
    %447 = vector.broadcast %269 : vector<8x8x1xf32> to vector<8x8x128xf32>
    %448 = vector.broadcast %446 : vector<8x1x128xf32> to vector<8x8x128xf32>
    %449 = arith.mulf %447, %448 : vector<8x8x128xf32>
    %cst_84 = arith.constant dense<0.000000e+00> : vector<8x128xf32>
    %450 = vector.multi_reduction <add>, %449, %cst_84 [0] : vector<8x8x128xf32> to vector<8x128xf32>
    %451 = arith.index_cast %c10_i32 : i32 to index
    %c0_85 = arith.constant 0 : index
    %c0_86 = arith.constant 0 : index
    %452 = vector.load %arg9[%451, %c0_85, %c0_86] : memref<16x8x128xf32, #tpu.memory_space<vmem>>, vector<1x8x128xf32>
    %453 = vector.shape_cast %452 : vector<1x8x128xf32> to vector<8x128xf32>
    %454 = arith.mulf %450, %453 : vector<8x128xf32>
    %cst_87 = arith.constant dense<0.000000e+00> : vector<128xf32>
    %455 = vector.multi_reduction <add>, %454, %cst_87 [0] : vector<8x128xf32> to vector<128xf32>
    %456 = vector.shape_cast %455 : vector<128xf32> to vector<1x128xf32>
    %457 = tpu.reciprocal %456 {approx = true} : vector<1x128xf32> -> vector<1x128xf32>
    %458 = vector.broadcast %457 : vector<1x128xf32> to vector<8x128xf32>
    %459 = arith.mulf %454, %458 : vector<8x128xf32>
    %460 = arith.index_cast %c10_i32 : i32 to index
    %c0_88 = arith.constant 0 : index
    %c0_89 = arith.constant 0 : index
    %461 = vector.load %arg8[%460, %c0_88, %c0_89] : memref<16x8x128xf32, #tpu.memory_space<vmem>>, vector<1x8x128xf32>
    %462 = vector.shape_cast %461 : vector<1x8x128xf32> to vector<8x128xf32>
    %463 = vector.shape_cast %459 : vector<8x128xf32> to vector<1x8x128xf32>
    tpu.vector_store %arg8[%460, %c0_88, %c0_89], %463 {strides = array<i32>} : memref<16x8x128xf32, #tpu.memory_space<vmem>>, vector<1x8x128xf32>,
    %c11_i32 = arith.constant 11 : i32
    %464 = vector.shape_cast %459 : vector<8x128xf32> to vector<8x1x128xf32>
    %465 = vector.broadcast %269 : vector<8x8x1xf32> to vector<8x8x128xf32>
    %466 = vector.broadcast %464 : vector<8x1x128xf32> to vector<8x8x128xf32>
    %467 = arith.mulf %465, %466 : vector<8x8x128xf32>
    %cst_90 = arith.constant dense<0.000000e+00> : vector<8x128xf32>
    %468 = vector.multi_reduction <add>, %467, %cst_90 [0] : vector<8x8x128xf32> to vector<8x128xf32>
    %469 = arith.index_cast %c11_i32 : i32 to index
    %c0_91 = arith.constant 0 : index
    %c0_92 = arith.constant 0 : index
    %470 = vector.load %arg9[%469, %c0_91, %c0_92] : memref<16x8x128xf32, #tpu.memory_space<vmem>>, vector<1x8x128xf32>
    %471 = vector.shape_cast %470 : vector<1x8x128xf32> to vector<8x128xf32>
    %472 = arith.mulf %468, %471 : vector<8x128xf32>
    %cst_93 = arith.constant dense<0.000000e+00> : vector<128xf32>
    %473 = vector.multi_reduction <add>, %472, %cst_93 [0] : vector<8x128xf32> to vector<128xf32>
    %474 = vector.shape_cast %473 : vector<128xf32> to vector<1x128xf32>
    %475 = tpu.reciprocal %474 {approx = true} : vector<1x128xf32> -> vector<1x128xf32>
    %476 = vector.broadcast %475 : vector<1x128xf32> to vector<8x128xf32>
    %477 = arith.mulf %472, %476 : vector<8x128xf32>
    %478 = arith.index_cast %c11_i32 : i32 to index
    %c0_94 = arith.constant 0 : index
    %c0_95 = arith.constant 0 : index
    %479 = vector.load %arg8[%478, %c0_94, %c0_95] : memref<16x8x128xf32, #tpu.memory_space<vmem>>, vector<1x8x128xf32>
    %480 = vector.shape_cast %479 : vector<1x8x128xf32> to vector<8x128xf32>
    %481 = vector.shape_cast %477 : vector<8x128xf32> to vector<1x8x128xf32>
    tpu.vector_store %arg8[%478, %c0_94, %c0_95], %481 {strides = array<i32>} : memref<16x8x128xf32, #tpu.memory_space<vmem>>, vector<1x8x128xf32>,
    %c12_i32 = arith.constant 12 : i32
    %482 = vector.shape_cast %477 : vector<8x128xf32> to vector<8x1x128xf32>
    %483 = vector.broadcast %269 : vector<8x8x1xf32> to vector<8x8x128xf32>
    %484 = vector.broadcast %482 : vector<8x1x128xf32> to vector<8x8x128xf32>
    %485 = arith.mulf %483, %484 : vector<8x8x128xf32>
    %cst_96 = arith.constant dense<0.000000e+00> : vector<8x128xf32>
    %486 = vector.multi_reduction <add>, %485, %cst_96 [0] : vector<8x8x128xf32> to vector<8x128xf32>
    %487 = arith.index_cast %c12_i32 : i32 to index
    %c0_97 = arith.constant 0 : index
    %c0_98 = arith.constant 0 : index
    %488 = vector.load %arg9[%487, %c0_97, %c0_98] : memref<16x8x128xf32, #tpu.memory_space<vmem>>, vector<1x8x128xf32>
    %489 = vector.shape_cast %488 : vector<1x8x128xf32> to vector<8x128xf32>
    %490 = arith.mulf %486, %489 : vector<8x128xf32>
    %cst_99 = arith.constant dense<0.000000e+00> : vector<128xf32>
    %491 = vector.multi_reduction <add>, %490, %cst_99 [0] : vector<8x128xf32> to vector<128xf32>
    %492 = vector.shape_cast %491 : vector<128xf32> to vector<1x128xf32>
    %493 = tpu.reciprocal %492 {approx = true} : vector<1x128xf32> -> vector<1x128xf32>
    %494 = vector.broadcast %493 : vector<1x128xf32> to vector<8x128xf32>
    %495 = arith.mulf %490, %494 : vector<8x128xf32>
    %496 = arith.index_cast %c12_i32 : i32 to index
    %c0_100 = arith.constant 0 : index
    %c0_101 = arith.constant 0 : index
    %497 = vector.load %arg8[%496, %c0_100, %c0_101] : memref<16x8x128xf32, #tpu.memory_space<vmem>>, vector<1x8x128xf32>
    %498 = vector.shape_cast %497 : vector<1x8x128xf32> to vector<8x128xf32>
    %499 = vector.shape_cast %495 : vector<8x128xf32> to vector<1x8x128xf32>
    tpu.vector_store %arg8[%496, %c0_100, %c0_101], %499 {strides = array<i32>} : memref<16x8x128xf32, #tpu.memory_space<vmem>>, vector<1x8x128xf32>,
    %c13_i32 = arith.constant 13 : i32
    %500 = vector.shape_cast %495 : vector<8x128xf32> to vector<8x1x128xf32>
    %501 = vector.broadcast %269 : vector<8x8x1xf32> to vector<8x8x128xf32>
    %502 = vector.broadcast %500 : vector<8x1x128xf32> to vector<8x8x128xf32>
    %503 = arith.mulf %501, %502 : vector<8x8x128xf32>
    %cst_102 = arith.constant dense<0.000000e+00> : vector<8x128xf32>
    %504 = vector.multi_reduction <add>, %503, %cst_102 [0] : vector<8x8x128xf32> to vector<8x128xf32>
    %505 = arith.index_cast %c13_i32 : i32 to index
    %c0_103 = arith.constant 0 : index
    %c0_104 = arith.constant 0 : index
    %506 = vector.load %arg9[%505, %c0_103, %c0_104] : memref<16x8x128xf32, #tpu.memory_space<vmem>>, vector<1x8x128xf32>
    %507 = vector.shape_cast %506 : vector<1x8x128xf32> to vector<8x128xf32>
    %508 = arith.mulf %504, %507 : vector<8x128xf32>
    %cst_105 = arith.constant dense<0.000000e+00> : vector<128xf32>
    %509 = vector.multi_reduction <add>, %508, %cst_105 [0] : vector<8x128xf32> to vector<128xf32>
    %510 = vector.shape_cast %509 : vector<128xf32> to vector<1x128xf32>
    %511 = tpu.reciprocal %510 {approx = true} : vector<1x128xf32> -> vector<1x128xf32>
    %512 = vector.broadcast %511 : vector<1x128xf32> to vector<8x128xf32>
    %513 = arith.mulf %508, %512 : vector<8x128xf32>
    %514 = arith.index_cast %c13_i32 : i32 to index
    %c0_106 = arith.constant 0 : index
    %c0_107 = arith.constant 0 : index
    %515 = vector.load %arg8[%514, %c0_106, %c0_107] : memref<16x8x128xf32, #tpu.memory_space<vmem>>, vector<1x8x128xf32>
    %516 = vector.shape_cast %515 : vector<1x8x128xf32> to vector<8x128xf32>
    %517 = vector.shape_cast %513 : vector<8x128xf32> to vector<1x8x128xf32>
    tpu.vector_store %arg8[%514, %c0_106, %c0_107], %517 {strides = array<i32>} : memref<16x8x128xf32, #tpu.memory_space<vmem>>, vector<1x8x128xf32>,
    %c14_i32 = arith.constant 14 : i32
    %518 = vector.shape_cast %513 : vector<8x128xf32> to vector<8x1x128xf32>
    %519 = vector.broadcast %269 : vector<8x8x1xf32> to vector<8x8x128xf32>
    %520 = vector.broadcast %518 : vector<8x1x128xf32> to vector<8x8x128xf32>
    %521 = arith.mulf %519, %520 : vector<8x8x128xf32>
    %cst_108 = arith.constant dense<0.000000e+00> : vector<8x128xf32>
    %522 = vector.multi_reduction <add>, %521, %cst_108 [0] : vector<8x8x128xf32> to vector<8x128xf32>
    %523 = arith.index_cast %c14_i32 : i32 to index
    %c0_109 = arith.constant 0 : index
    %c0_110 = arith.constant 0 : index
    %524 = vector.load %arg9[%523, %c0_109, %c0_110] : memref<16x8x128xf32, #tpu.memory_space<vmem>>, vector<1x8x128xf32>
    %525 = vector.shape_cast %524 : vector<1x8x128xf32> to vector<8x128xf32>
    %526 = arith.mulf %522, %525 : vector<8x128xf32>
    %cst_111 = arith.constant dense<0.000000e+00> : vector<128xf32>
    %527 = vector.multi_reduction <add>, %526, %cst_111 [0] : vector<8x128xf32> to vector<128xf32>
    %528 = vector.shape_cast %527 : vector<128xf32> to vector<1x128xf32>
    %529 = tpu.reciprocal %528 {approx = true} : vector<1x128xf32> -> vector<1x128xf32>
    %530 = vector.broadcast %529 : vector<1x128xf32> to vector<8x128xf32>
    %531 = arith.mulf %526, %530 : vector<8x128xf32>
    %532 = arith.index_cast %c14_i32 : i32 to index
    %c0_112 = arith.constant 0 : index
    %c0_113 = arith.constant 0 : index
    %533 = vector.load %arg8[%532, %c0_112, %c0_113] : memref<16x8x128xf32, #tpu.memory_space<vmem>>, vector<1x8x128xf32>
    %534 = vector.shape_cast %533 : vector<1x8x128xf32> to vector<8x128xf32>
    %535 = vector.shape_cast %531 : vector<8x128xf32> to vector<1x8x128xf32>
    tpu.vector_store %arg8[%532, %c0_112, %c0_113], %535 {strides = array<i32>} : memref<16x8x128xf32, #tpu.memory_space<vmem>>, vector<1x8x128xf32>,
    %c15_i32 = arith.constant 15 : i32
    %536 = vector.shape_cast %531 : vector<8x128xf32> to vector<8x1x128xf32>
    %537 = vector.broadcast %269 : vector<8x8x1xf32> to vector<8x8x128xf32>
    %538 = vector.broadcast %536 : vector<8x1x128xf32> to vector<8x8x128xf32>
    %539 = arith.mulf %537, %538 : vector<8x8x128xf32>
    %cst_114 = arith.constant dense<0.000000e+00> : vector<8x128xf32>
    %540 = vector.multi_reduction <add>, %539, %cst_114 [0] : vector<8x8x128xf32> to vector<8x128xf32>
    %541 = arith.index_cast %c15_i32 : i32 to index
    %c0_115 = arith.constant 0 : index
    %c0_116 = arith.constant 0 : index
    %542 = vector.load %arg9[%541, %c0_115, %c0_116] : memref<16x8x128xf32, #tpu.memory_space<vmem>>, vector<1x8x128xf32>
    %543 = vector.shape_cast %542 : vector<1x8x128xf32> to vector<8x128xf32>
    %544 = arith.mulf %540, %543 : vector<8x128xf32>
    %cst_117 = arith.constant dense<0.000000e+00> : vector<128xf32>
    %545 = vector.multi_reduction <add>, %544, %cst_117 [0] : vector<8x128xf32> to vector<128xf32>
    %546 = vector.shape_cast %545 : vector<128xf32> to vector<1x128xf32>
    %547 = tpu.reciprocal %546 {approx = true} : vector<1x128xf32> -> vector<1x128xf32>
    %548 = vector.broadcast %547 : vector<1x128xf32> to vector<8x128xf32>
    %549 = arith.mulf %544, %548 : vector<8x128xf32>
    %550 = arith.index_cast %c15_i32 : i32 to index
    %c0_118 = arith.constant 0 : index
    %c0_119 = arith.constant 0 : index
    %551 = vector.load %arg8[%550, %c0_118, %c0_119] : memref<16x8x128xf32, #tpu.memory_space<vmem>>, vector<1x8x128xf32>
    %552 = vector.shape_cast %551 : vector<1x8x128xf32> to vector<8x128xf32>
    %553 = vector.shape_cast %549 : vector<8x128xf32> to vector<1x8x128xf32>
    tpu.vector_store %arg8[%550, %c0_118, %c0_119], %553 {strides = array<i32>} : memref<16x8x128xf32, #tpu.memory_space<vmem>>, vector<1x8x128xf32>,
    %c15_i32_120 = arith.constant 15 : i32
    %cst_121 = arith.constant 1.000000e+00 : f32
    %554 = vector.broadcast %cst_121 : f32 to vector<8x128xf32>
    %c0_i32 = arith.constant 0 : i32
    %c15_i32_122 = arith.constant 15 : i32
    %555 = arith.subi %c15_i32_122, %c0_i32 : i32
    %556 = arith.index_cast %555 : i32 to index
    %c0_123 = arith.constant 0 : index
    %c0_124 = arith.constant 0 : index
    %557 = vector.load %arg8[%556, %c0_123, %c0_124] : memref<16x8x128xf32, #tpu.memory_space<vmem>>, vector<1x8x128xf32>
    %558 = vector.shape_cast %557 : vector<1x8x128xf32> to vector<8x128xf32>
    %559 = arith.mulf %558, %554 : vector<8x128xf32>
    %cst_125 = arith.constant dense<0.000000e+00> : vector<128xf32>
    %560 = vector.multi_reduction <add>, %559, %cst_125 [0] : vector<8x128xf32> to vector<128xf32>
    %561 = vector.shape_cast %560 : vector<128xf32> to vector<1x128xf32>
    %562 = vector.broadcast %561 : vector<1x128xf32> to vector<8x128xf32>
    %563 = arith.divf %559, %562 : vector<8x128xf32>
    %564 = arith.index_cast %555 : i32 to index
    %c0_126 = arith.constant 0 : index
    %c0_127 = arith.constant 0 : index
    %565 = vector.load %arg8[%564, %c0_126, %c0_127] : memref<16x8x128xf32, #tpu.memory_space<vmem>>, vector<1x8x128xf32>
    %566 = vector.shape_cast %565 : vector<1x8x128xf32> to vector<8x128xf32>
    %567 = vector.shape_cast %563 : vector<8x128xf32> to vector<1x8x128xf32>
    tpu.vector_store %arg8[%564, %c0_126, %c0_127], %567 {strides = array<i32>} : memref<16x8x128xf32, #tpu.memory_space<vmem>>, vector<1x8x128xf32>,
    %568 = arith.index_cast %555 : i32 to index
    %c0_128 = arith.constant 0 : index
    %c0_129 = arith.constant 0 : index
    %569 = vector.load %arg9[%568, %c0_128, %c0_129] : memref<16x8x128xf32, #tpu.memory_space<vmem>>, vector<1x8x128xf32>
    %570 = vector.shape_cast %569 : vector<1x8x128xf32> to vector<8x128xf32>
    %571 = arith.mulf %570, %554 : vector<8x128xf32>
    %572 = vector.shape_cast %571 : vector<8x128xf32> to vector<8x1x128xf32>
    %573 = vector.broadcast %270 : vector<8x8x1xf32> to vector<8x8x128xf32>
    %574 = vector.broadcast %572 : vector<8x1x128xf32> to vector<8x8x128xf32>
    %575 = arith.mulf %573, %574 : vector<8x8x128xf32>
    %cst_130 = arith.constant dense<0.000000e+00> : vector<8x128xf32>
    %576 = vector.multi_reduction <add>, %575, %cst_130 [0] : vector<8x8x128xf32> to vector<8x128xf32>
    %cst_131 = arith.constant dense<0.000000e+00> : vector<128xf32>
    %577 = vector.multi_reduction <add>, %576, %cst_131 [0] : vector<8x128xf32> to vector<128xf32>
    %578 = vector.shape_cast %577 : vector<128xf32> to vector<1x128xf32>
    %579 = tpu.reciprocal %578 {approx = true} : vector<1x128xf32> -> vector<1x128xf32>
    %580 = vector.broadcast %579 : vector<1x128xf32> to vector<8x128xf32>
    %581 = arith.mulf %576, %580 : vector<8x128xf32>
    %c1_i32_132 = arith.constant 1 : i32
    %c15_i32_133 = arith.constant 15 : i32
    %582 = arith.subi %c15_i32_133, %c1_i32_132 : i32
    %583 = arith.index_cast %582 : i32 to index
    %c0_134 = arith.constant 0 : index
    %c0_135 = arith.constant 0 : index
    %584 = vector.load %arg8[%583, %c0_134, %c0_135] : memref<16x8x128xf32, #tpu.memory_space<vmem>>, vector<1x8x128xf32>
    %585 = vector.shape_cast %584 : vector<1x8x128xf32> to vector<8x128xf32>
    %586 = arith.mulf %585, %581 : vector<8x128xf32>
    %cst_136 = arith.constant dense<0.000000e+00> : vector<128xf32>
    %587 = vector.multi_reduction <add>, %586, %cst_136 [0] : vector<8x128xf32> to vector<128xf32>
    %588 = vector.shape_cast %587 : vector<128xf32> to vector<1x128xf32>
    %589 = vector.broadcast %588 : vector<1x128xf32> to vector<8x128xf32>
    %590 = arith.divf %586, %589 : vector<8x128xf32>
    %591 = arith.index_cast %582 : i32 to index
    %c0_137 = arith.constant 0 : index
    %c0_138 = arith.constant 0 : index
    %592 = vector.load %arg8[%591, %c0_137, %c0_138] : memref<16x8x128xf32, #tpu.memory_space<vmem>>, vector<1x8x128xf32>
    %593 = vector.shape_cast %592 : vector<1x8x128xf32> to vector<8x128xf32>
    %594 = vector.shape_cast %590 : vector<8x128xf32> to vector<1x8x128xf32>
    tpu.vector_store %arg8[%591, %c0_137, %c0_138], %594 {strides = array<i32>} : memref<16x8x128xf32, #tpu.memory_space<vmem>>, vector<1x8x128xf32>,
    %595 = arith.index_cast %582 : i32 to index
    %c0_139 = arith.constant 0 : index
    %c0_140 = arith.constant 0 : index
    %596 = vector.load %arg9[%595, %c0_139, %c0_140] : memref<16x8x128xf32, #tpu.memory_space<vmem>>, vector<1x8x128xf32>
    %597 = vector.shape_cast %596 : vector<1x8x128xf32> to vector<8x128xf32>
    %598 = arith.mulf %597, %581 : vector<8x128xf32>
    %599 = vector.shape_cast %598 : vector<8x128xf32> to vector<8x1x128xf32>
    %600 = vector.broadcast %270 : vector<8x8x1xf32> to vector<8x8x128xf32>
    %601 = vector.broadcast %599 : vector<8x1x128xf32> to vector<8x8x128xf32>
    %602 = arith.mulf %600, %601 : vector<8x8x128xf32>
    %cst_141 = arith.constant dense<0.000000e+00> : vector<8x128xf32>
    %603 = vector.multi_reduction <add>, %602, %cst_141 [0] : vector<8x8x128xf32> to vector<8x128xf32>
    %cst_142 = arith.constant dense<0.000000e+00> : vector<128xf32>
    %604 = vector.multi_reduction <add>, %603, %cst_142 [0] : vector<8x128xf32> to vector<128xf32>
    %605 = vector.shape_cast %604 : vector<128xf32> to vector<1x128xf32>
    %606 = tpu.reciprocal %605 {approx = true} : vector<1x128xf32> -> vector<1x128xf32>
    %607 = vector.broadcast %606 : vector<1x128xf32> to vector<8x128xf32>
    %608 = arith.mulf %603, %607 : vector<8x128xf32>
    %c2_i32_143 = arith.constant 2 : i32
    %c15_i32_144 = arith.constant 15 : i32
    %609 = arith.subi %c15_i32_144, %c2_i32_143 : i32
    %610 = arith.index_cast %609 : i32 to index
    %c0_145 = arith.constant 0 : index
    %c0_146 = arith.constant 0 : index
    %611 = vector.load %arg8[%610, %c0_145, %c0_146] : memref<16x8x128xf32, #tpu.memory_space<vmem>>, vector<1x8x128xf32>
    %612 = vector.shape_cast %611 : vector<1x8x128xf32> to vector<8x128xf32>
    %613 = arith.mulf %612, %608 : vector<8x128xf32>
    %cst_147 = arith.constant dense<0.000000e+00> : vector<128xf32>
    %614 = vector.multi_reduction <add>, %613, %cst_147 [0] : vector<8x128xf32> to vector<128xf32>
    %615 = vector.shape_cast %614 : vector<128xf32> to vector<1x128xf32>
    %616 = vector.broadcast %615 : vector<1x128xf32> to vector<8x128xf32>
    %617 = arith.divf %613, %616 : vector<8x128xf32>
    %618 = arith.index_cast %609 : i32 to index
    %c0_148 = arith.constant 0 : index
    %c0_149 = arith.constant 0 : index
    %619 = vector.load %arg8[%618, %c0_148, %c0_149] : memref<16x8x128xf32, #tpu.memory_space<vmem>>, vector<1x8x128xf32>
    %620 = vector.shape_cast %619 : vector<1x8x128xf32> to vector<8x128xf32>
    %621 = vector.shape_cast %617 : vector<8x128xf32> to vector<1x8x128xf32>
    tpu.vector_store %arg8[%618, %c0_148, %c0_149], %621 {strides = array<i32>} : memref<16x8x128xf32, #tpu.memory_space<vmem>>, vector<1x8x128xf32>,
    %622 = arith.index_cast %609 : i32 to index
    %c0_150 = arith.constant 0 : index
    %c0_151 = arith.constant 0 : index
    %623 = vector.load %arg9[%622, %c0_150, %c0_151] : memref<16x8x128xf32, #tpu.memory_space<vmem>>, vector<1x8x128xf32>
    %624 = vector.shape_cast %623 : vector<1x8x128xf32> to vector<8x128xf32>
    %625 = arith.mulf %624, %608 : vector<8x128xf32>
    %626 = vector.shape_cast %625 : vector<8x128xf32> to vector<8x1x128xf32>
    %627 = vector.broadcast %270 : vector<8x8x1xf32> to vector<8x8x128xf32>
    %628 = vector.broadcast %626 : vector<8x1x128xf32> to vector<8x8x128xf32>
    %629 = arith.mulf %627, %628 : vector<8x8x128xf32>
    %cst_152 = arith.constant dense<0.000000e+00> : vector<8x128xf32>
    %630 = vector.multi_reduction <add>, %629, %cst_152 [0] : vector<8x8x128xf32> to vector<8x128xf32>
    %cst_153 = arith.constant dense<0.000000e+00> : vector<128xf32>
    %631 = vector.multi_reduction <add>, %630, %cst_153 [0] : vector<8x128xf32> to vector<128xf32>
    %632 = vector.shape_cast %631 : vector<128xf32> to vector<1x128xf32>
    %633 = tpu.reciprocal %632 {approx = true} : vector<1x128xf32> -> vector<1x128xf32>
    %634 = vector.broadcast %633 : vector<1x128xf32> to vector<8x128xf32>
    %635 = arith.mulf %630, %634 : vector<8x128xf32>
    %c3_i32_154 = arith.constant 3 : i32
    %c15_i32_155 = arith.constant 15 : i32
    %636 = arith.subi %c15_i32_155, %c3_i32_154 : i32
    %637 = arith.index_cast %636 : i32 to index
    %c0_156 = arith.constant 0 : index
    %c0_157 = arith.constant 0 : index
    %638 = vector.load %arg8[%637, %c0_156, %c0_157] : memref<16x8x128xf32, #tpu.memory_space<vmem>>, vector<1x8x128xf32>
    %639 = vector.shape_cast %638 : vector<1x8x128xf32> to vector<8x128xf32>
    %640 = arith.mulf %639, %635 : vector<8x128xf32>
    %cst_158 = arith.constant dense<0.000000e+00> : vector<128xf32>
    %641 = vector.multi_reduction <add>, %640, %cst_158 [0] : vector<8x128xf32> to vector<128xf32>
    %642 = vector.shape_cast %641 : vector<128xf32> to vector<1x128xf32>
    %643 = vector.broadcast %642 : vector<1x128xf32> to vector<8x128xf32>
    %644 = arith.divf %640, %643 : vector<8x128xf32>
    %645 = arith.index_cast %636 : i32 to index
    %c0_159 = arith.constant 0 : index
    %c0_160 = arith.constant 0 : index
    %646 = vector.load %arg8[%645, %c0_159, %c0_160] : memref<16x8x128xf32, #tpu.memory_space<vmem>>, vector<1x8x128xf32>
    %647 = vector.shape_cast %646 : vector<1x8x128xf32> to vector<8x128xf32>
    %648 = vector.shape_cast %644 : vector<8x128xf32> to vector<1x8x128xf32>
    tpu.vector_store %arg8[%645, %c0_159, %c0_160], %648 {strides = array<i32>} : memref<16x8x128xf32, #tpu.memory_space<vmem>>, vector<1x8x128xf32>,
    %649 = arith.index_cast %636 : i32 to index
    %c0_161 = arith.constant 0 : index
    %c0_162 = arith.constant 0 : index
    %650 = vector.load %arg9[%649, %c0_161, %c0_162] : memref<16x8x128xf32, #tpu.memory_space<vmem>>, vector<1x8x128xf32>
    %651 = vector.shape_cast %650 : vector<1x8x128xf32> to vector<8x128xf32>
    %652 = arith.mulf %651, %635 : vector<8x128xf32>
    %653 = vector.shape_cast %652 : vector<8x128xf32> to vector<8x1x128xf32>
    %654 = vector.broadcast %270 : vector<8x8x1xf32> to vector<8x8x128xf32>
    %655 = vector.broadcast %653 : vector<8x1x128xf32> to vector<8x8x128xf32>
    %656 = arith.mulf %654, %655 : vector<8x8x128xf32>
    %cst_163 = arith.constant dense<0.000000e+00> : vector<8x128xf32>
    %657 = vector.multi_reduction <add>, %656, %cst_163 [0] : vector<8x8x128xf32> to vector<8x128xf32>
    %cst_164 = arith.constant dense<0.000000e+00> : vector<128xf32>
    %658 = vector.multi_reduction <add>, %657, %cst_164 [0] : vector<8x128xf32> to vector<128xf32>
    %659 = vector.shape_cast %658 : vector<128xf32> to vector<1x128xf32>
    %660 = tpu.reciprocal %659 {approx = true} : vector<1x128xf32> -> vector<1x128xf32>
    %661 = vector.broadcast %660 : vector<1x128xf32> to vector<8x128xf32>
    %662 = arith.mulf %657, %661 : vector<8x128xf32>
    %c4_i32_165 = arith.constant 4 : i32
    %c15_i32_166 = arith.constant 15 : i32
    %663 = arith.subi %c15_i32_166, %c4_i32_165 : i32
    %664 = arith.index_cast %663 : i32 to index
    %c0_167 = arith.constant 0 : index
    %c0_168 = arith.constant 0 : index
    %665 = vector.load %arg8[%664, %c0_167, %c0_168] : memref<16x8x128xf32, #tpu.memory_space<vmem>>, vector<1x8x128xf32>
    %666 = vector.shape_cast %665 : vector<1x8x128xf32> to vector<8x128xf32>
    %667 = arith.mulf %666, %662 : vector<8x128xf32>
    %cst_169 = arith.constant dense<0.000000e+00> : vector<128xf32>
    %668 = vector.multi_reduction <add>, %667, %cst_169 [0] : vector<8x128xf32> to vector<128xf32>
    %669 = vector.shape_cast %668 : vector<128xf32> to vector<1x128xf32>
    %670 = vector.broadcast %669 : vector<1x128xf32> to vector<8x128xf32>
    %671 = arith.divf %667, %670 : vector<8x128xf32>
    %672 = arith.index_cast %663 : i32 to index
    %c0_170 = arith.constant 0 : index
    %c0_171 = arith.constant 0 : index
    %673 = vector.load %arg8[%672, %c0_170, %c0_171] : memref<16x8x128xf32, #tpu.memory_space<vmem>>, vector<1x8x128xf32>
    %674 = vector.shape_cast %673 : vector<1x8x128xf32> to vector<8x128xf32>
    %675 = vector.shape_cast %671 : vector<8x128xf32> to vector<1x8x128xf32>
    tpu.vector_store %arg8[%672, %c0_170, %c0_171], %675 {strides = array<i32>} : memref<16x8x128xf32, #tpu.memory_space<vmem>>, vector<1x8x128xf32>,
    %676 = arith.index_cast %663 : i32 to index
    %c0_172 = arith.constant 0 : index
    %c0_173 = arith.constant 0 : index
    %677 = vector.load %arg9[%676, %c0_172, %c0_173] : memref<16x8x128xf32, #tpu.memory_space<vmem>>, vector<1x8x128xf32>
    %678 = vector.shape_cast %677 : vector<1x8x128xf32> to vector<8x128xf32>
    %679 = arith.mulf %678, %662 : vector<8x128xf32>
    %680 = vector.shape_cast %679 : vector<8x128xf32> to vector<8x1x128xf32>
    %681 = vector.broadcast %270 : vector<8x8x1xf32> to vector<8x8x128xf32>
    %682 = vector.broadcast %680 : vector<8x1x128xf32> to vector<8x8x128xf32>
    %683 = arith.mulf %681, %682 : vector<8x8x128xf32>
    %cst_174 = arith.constant dense<0.000000e+00> : vector<8x128xf32>
    %684 = vector.multi_reduction <add>, %683, %cst_174 [0] : vector<8x8x128xf32> to vector<8x128xf32>
    %cst_175 = arith.constant dense<0.000000e+00> : vector<128xf32>
    %685 = vector.multi_reduction <add>, %684, %cst_175 [0] : vector<8x128xf32> to vector<128xf32>
    %686 = vector.shape_cast %685 : vector<128xf32> to vector<1x128xf32>
    %687 = tpu.reciprocal %686 {approx = true} : vector<1x128xf32> -> vector<1x128xf32>
    %688 = vector.broadcast %687 : vector<1x128xf32> to vector<8x128xf32>
    %689 = arith.mulf %684, %688 : vector<8x128xf32>
    %c5_i32_176 = arith.constant 5 : i32
    %c15_i32_177 = arith.constant 15 : i32
    %690 = arith.subi %c15_i32_177, %c5_i32_176 : i32
    %691 = arith.index_cast %690 : i32 to index
    %c0_178 = arith.constant 0 : index
    %c0_179 = arith.constant 0 : index
    %692 = vector.load %arg8[%691, %c0_178, %c0_179] : memref<16x8x128xf32, #tpu.memory_space<vmem>>, vector<1x8x128xf32>
    %693 = vector.shape_cast %692 : vector<1x8x128xf32> to vector<8x128xf32>
    %694 = arith.mulf %693, %689 : vector<8x128xf32>
    %cst_180 = arith.constant dense<0.000000e+00> : vector<128xf32>
    %695 = vector.multi_reduction <add>, %694, %cst_180 [0] : vector<8x128xf32> to vector<128xf32>
    %696 = vector.shape_cast %695 : vector<128xf32> to vector<1x128xf32>
    %697 = vector.broadcast %696 : vector<1x128xf32> to vector<8x128xf32>
    %698 = arith.divf %694, %697 : vector<8x128xf32>
    %699 = arith.index_cast %690 : i32 to index
    %c0_181 = arith.constant 0 : index
    %c0_182 = arith.constant 0 : index
    %700 = vector.load %arg8[%699, %c0_181, %c0_182] : memref<16x8x128xf32, #tpu.memory_space<vmem>>, vector<1x8x128xf32>
    %701 = vector.shape_cast %700 : vector<1x8x128xf32> to vector<8x128xf32>
    %702 = vector.shape_cast %698 : vector<8x128xf32> to vector<1x8x128xf32>
    tpu.vector_store %arg8[%699, %c0_181, %c0_182], %702 {strides = array<i32>} : memref<16x8x128xf32, #tpu.memory_space<vmem>>, vector<1x8x128xf32>,
    %703 = arith.index_cast %690 : i32 to index
    %c0_183 = arith.constant 0 : index
    %c0_184 = arith.constant 0 : index
    %704 = vector.load %arg9[%703, %c0_183, %c0_184] : memref<16x8x128xf32, #tpu.memory_space<vmem>>, vector<1x8x128xf32>
    %705 = vector.shape_cast %704 : vector<1x8x128xf32> to vector<8x128xf32>
    %706 = arith.mulf %705, %689 : vector<8x128xf32>
    %707 = vector.shape_cast %706 : vector<8x128xf32> to vector<8x1x128xf32>
    %708 = vector.broadcast %270 : vector<8x8x1xf32> to vector<8x8x128xf32>
    %709 = vector.broadcast %707 : vector<8x1x128xf32> to vector<8x8x128xf32>
    %710 = arith.mulf %708, %709 : vector<8x8x128xf32>
    %cst_185 = arith.constant dense<0.000000e+00> : vector<8x128xf32>
    %711 = vector.multi_reduction <add>, %710, %cst_185 [0] : vector<8x8x128xf32> to vector<8x128xf32>
    %cst_186 = arith.constant dense<0.000000e+00> : vector<128xf32>
    %712 = vector.multi_reduction <add>, %711, %cst_186 [0] : vector<8x128xf32> to vector<128xf32>
    %713 = vector.shape_cast %712 : vector<128xf32> to vector<1x128xf32>
    %714 = tpu.reciprocal %713 {approx = true} : vector<1x128xf32> -> vector<1x128xf32>
    %715 = vector.broadcast %714 : vector<1x128xf32> to vector<8x128xf32>
    %716 = arith.mulf %711, %715 : vector<8x128xf32>
    %c6_i32_187 = arith.constant 6 : i32
    %c15_i32_188 = arith.constant 15 : i32
    %717 = arith.subi %c15_i32_188, %c6_i32_187 : i32
    %718 = arith.index_cast %717 : i32 to index
    %c0_189 = arith.constant 0 : index
    %c0_190 = arith.constant 0 : index
    %719 = vector.load %arg8[%718, %c0_189, %c0_190] : memref<16x8x128xf32, #tpu.memory_space<vmem>>, vector<1x8x128xf32>
    %720 = vector.shape_cast %719 : vector<1x8x128xf32> to vector<8x128xf32>
    %721 = arith.mulf %720, %716 : vector<8x128xf32>
    %cst_191 = arith.constant dense<0.000000e+00> : vector<128xf32>
    %722 = vector.multi_reduction <add>, %721, %cst_191 [0] : vector<8x128xf32> to vector<128xf32>
    %723 = vector.shape_cast %722 : vector<128xf32> to vector<1x128xf32>
    %724 = vector.broadcast %723 : vector<1x128xf32> to vector<8x128xf32>
    %725 = arith.divf %721, %724 : vector<8x128xf32>
    %726 = arith.index_cast %717 : i32 to index
    %c0_192 = arith.constant 0 : index
    %c0_193 = arith.constant 0 : index
    %727 = vector.load %arg8[%726, %c0_192, %c0_193] : memref<16x8x128xf32, #tpu.memory_space<vmem>>, vector<1x8x128xf32>
    %728 = vector.shape_cast %727 : vector<1x8x128xf32> to vector<8x128xf32>
    %729 = vector.shape_cast %725 : vector<8x128xf32> to vector<1x8x128xf32>
    tpu.vector_store %arg8[%726, %c0_192, %c0_193], %729 {strides = array<i32>} : memref<16x8x128xf32, #tpu.memory_space<vmem>>, vector<1x8x128xf32>,
    %730 = arith.index_cast %717 : i32 to index
    %c0_194 = arith.constant 0 : index
    %c0_195 = arith.constant 0 : index
    %731 = vector.load %arg9[%730, %c0_194, %c0_195] : memref<16x8x128xf32, #tpu.memory_space<vmem>>, vector<1x8x128xf32>
    %732 = vector.shape_cast %731 : vector<1x8x128xf32> to vector<8x128xf32>
    %733 = arith.mulf %732, %716 : vector<8x128xf32>
    %734 = vector.shape_cast %733 : vector<8x128xf32> to vector<8x1x128xf32>
    %735 = vector.broadcast %270 : vector<8x8x1xf32> to vector<8x8x128xf32>
    %736 = vector.broadcast %734 : vector<8x1x128xf32> to vector<8x8x128xf32>
    %737 = arith.mulf %735, %736 : vector<8x8x128xf32>
    %cst_196 = arith.constant dense<0.000000e+00> : vector<8x128xf32>
    %738 = vector.multi_reduction <add>, %737, %cst_196 [0] : vector<8x8x128xf32> to vector<8x128xf32>
    %cst_197 = arith.constant dense<0.000000e+00> : vector<128xf32>
    %739 = vector.multi_reduction <add>, %738, %cst_197 [0] : vector<8x128xf32> to vector<128xf32>
    %740 = vector.shape_cast %739 : vector<128xf32> to vector<1x128xf32>
    %741 = tpu.reciprocal %740 {approx = true} : vector<1x128xf32> -> vector<1x128xf32>
    %742 = vector.broadcast %741 : vector<1x128xf32> to vector<8x128xf32>
    %743 = arith.mulf %738, %742 : vector<8x128xf32>
    %c7_i32_198 = arith.constant 7 : i32
    %c15_i32_199 = arith.constant 15 : i32
    %744 = arith.subi %c15_i32_199, %c7_i32_198 : i32
    %745 = arith.index_cast %744 : i32 to index
    %c0_200 = arith.constant 0 : index
    %c0_201 = arith.constant 0 : index
    %746 = vector.load %arg8[%745, %c0_200, %c0_201] : memref<16x8x128xf32, #tpu.memory_space<vmem>>, vector<1x8x128xf32>
    %747 = vector.shape_cast %746 : vector<1x8x128xf32> to vector<8x128xf32>
    %748 = arith.mulf %747, %743 : vector<8x128xf32>
    %cst_202 = arith.constant dense<0.000000e+00> : vector<128xf32>
    %749 = vector.multi_reduction <add>, %748, %cst_202 [0] : vector<8x128xf32> to vector<128xf32>
    %750 = vector.shape_cast %749 : vector<128xf32> to vector<1x128xf32>
    %751 = vector.broadcast %750 : vector<1x128xf32> to vector<8x128xf32>
    %752 = arith.divf %748, %751 : vector<8x128xf32>
    %753 = arith.index_cast %744 : i32 to index
    %c0_203 = arith.constant 0 : index
    %c0_204 = arith.constant 0 : index
    %754 = vector.load %arg8[%753, %c0_203, %c0_204] : memref<16x8x128xf32, #tpu.memory_space<vmem>>, vector<1x8x128xf32>
    %755 = vector.shape_cast %754 : vector<1x8x128xf32> to vector<8x128xf32>
    %756 = vector.shape_cast %752 : vector<8x128xf32> to vector<1x8x128xf32>
    tpu.vector_store %arg8[%753, %c0_203, %c0_204], %756 {strides = array<i32>} : memref<16x8x128xf32, #tpu.memory_space<vmem>>, vector<1x8x128xf32>,
    %757 = arith.index_cast %744 : i32 to index
    %c0_205 = arith.constant 0 : index
    %c0_206 = arith.constant 0 : index
    %758 = vector.load %arg9[%757, %c0_205, %c0_206] : memref<16x8x128xf32, #tpu.memory_space<vmem>>, vector<1x8x128xf32>
    %759 = vector.shape_cast %758 : vector<1x8x128xf32> to vector<8x128xf32>
    %760 = arith.mulf %759, %743 : vector<8x128xf32>
    %761 = vector.shape_cast %760 : vector<8x128xf32> to vector<8x1x128xf32>
    %762 = vector.broadcast %270 : vector<8x8x1xf32> to vector<8x8x128xf32>
    %763 = vector.broadcast %761 : vector<8x1x128xf32> to vector<8x8x128xf32>
    %764 = arith.mulf %762, %763 : vector<8x8x128xf32>
    %cst_207 = arith.constant dense<0.000000e+00> : vector<8x128xf32>
    %765 = vector.multi_reduction <add>, %764, %cst_207 [0] : vector<8x8x128xf32> to vector<8x128xf32>
    %cst_208 = arith.constant dense<0.000000e+00> : vector<128xf32>
    %766 = vector.multi_reduction <add>, %765, %cst_208 [0] : vector<8x128xf32> to vector<128xf32>
    %767 = vector.shape_cast %766 : vector<128xf32> to vector<1x128xf32>
    %768 = tpu.reciprocal %767 {approx = true} : vector<1x128xf32> -> vector<1x128xf32>
    %769 = vector.broadcast %768 : vector<1x128xf32> to vector<8x128xf32>
    %770 = arith.mulf %765, %769 : vector<8x128xf32>
    %c8_i32_209 = arith.constant 8 : i32
    %c15_i32_210 = arith.constant 15 : i32
    %771 = arith.subi %c15_i32_210, %c8_i32_209 : i32
    %772 = arith.index_cast %771 : i32 to index
    %c0_211 = arith.constant 0 : index
    %c0_212 = arith.constant 0 : index
    %773 = vector.load %arg8[%772, %c0_211, %c0_212] : memref<16x8x128xf32, #tpu.memory_space<vmem>>, vector<1x8x128xf32>
    %774 = vector.shape_cast %773 : vector<1x8x128xf32> to vector<8x128xf32>
    %775 = arith.mulf %774, %770 : vector<8x128xf32>
    %cst_213 = arith.constant dense<0.000000e+00> : vector<128xf32>
    %776 = vector.multi_reduction <add>, %775, %cst_213 [0] : vector<8x128xf32> to vector<128xf32>
    %777 = vector.shape_cast %776 : vector<128xf32> to vector<1x128xf32>
    %778 = vector.broadcast %777 : vector<1x128xf32> to vector<8x128xf32>
    %779 = arith.divf %775, %778 : vector<8x128xf32>
    %780 = arith.index_cast %771 : i32 to index
    %c0_214 = arith.constant 0 : index
    %c0_215 = arith.constant 0 : index
    %781 = vector.load %arg8[%780, %c0_214, %c0_215] : memref<16x8x128xf32, #tpu.memory_space<vmem>>, vector<1x8x128xf32>
    %782 = vector.shape_cast %781 : vector<1x8x128xf32> to vector<8x128xf32>
    %783 = vector.shape_cast %779 : vector<8x128xf32> to vector<1x8x128xf32>
    tpu.vector_store %arg8[%780, %c0_214, %c0_215], %783 {strides = array<i32>} : memref<16x8x128xf32, #tpu.memory_space<vmem>>, vector<1x8x128xf32>,
    %784 = arith.index_cast %771 : i32 to index
    %c0_216 = arith.constant 0 : index
    %c0_217 = arith.constant 0 : index
    %785 = vector.load %arg9[%784, %c0_216, %c0_217] : memref<16x8x128xf32, #tpu.memory_space<vmem>>, vector<1x8x128xf32>
    %786 = vector.shape_cast %785 : vector<1x8x128xf32> to vector<8x128xf32>
    %787 = arith.mulf %786, %770 : vector<8x128xf32>
    %788 = vector.shape_cast %787 : vector<8x128xf32> to vector<8x1x128xf32>
    %789 = vector.broadcast %270 : vector<8x8x1xf32> to vector<8x8x128xf32>
    %790 = vector.broadcast %788 : vector<8x1x128xf32> to vector<8x8x128xf32>
    %791 = arith.mulf %789, %790 : vector<8x8x128xf32>
    %cst_218 = arith.constant dense<0.000000e+00> : vector<8x128xf32>
    %792 = vector.multi_reduction <add>, %791, %cst_218 [0] : vector<8x8x128xf32> to vector<8x128xf32>
    %cst_219 = arith.constant dense<0.000000e+00> : vector<128xf32>
    %793 = vector.multi_reduction <add>, %792, %cst_219 [0] : vector<8x128xf32> to vector<128xf32>
    %794 = vector.shape_cast %793 : vector<128xf32> to vector<1x128xf32>
    %795 = tpu.reciprocal %794 {approx = true} : vector<1x128xf32> -> vector<1x128xf32>
    %796 = vector.broadcast %795 : vector<1x128xf32> to vector<8x128xf32>
    %797 = arith.mulf %792, %796 : vector<8x128xf32>
    %c9_i32_220 = arith.constant 9 : i32
    %c15_i32_221 = arith.constant 15 : i32
    %798 = arith.subi %c15_i32_221, %c9_i32_220 : i32
    %799 = arith.index_cast %798 : i32 to index
    %c0_222 = arith.constant 0 : index
    %c0_223 = arith.constant 0 : index
    %800 = vector.load %arg8[%799, %c0_222, %c0_223] : memref<16x8x128xf32, #tpu.memory_space<vmem>>, vector<1x8x128xf32>
    %801 = vector.shape_cast %800 : vector<1x8x128xf32> to vector<8x128xf32>
    %802 = arith.mulf %801, %797 : vector<8x128xf32>
    %cst_224 = arith.constant dense<0.000000e+00> : vector<128xf32>
    %803 = vector.multi_reduction <add>, %802, %cst_224 [0] : vector<8x128xf32> to vector<128xf32>
    %804 = vector.shape_cast %803 : vector<128xf32> to vector<1x128xf32>
    %805 = vector.broadcast %804 : vector<1x128xf32> to vector<8x128xf32>
    %806 = arith.divf %802, %805 : vector<8x128xf32>
    %807 = arith.index_cast %798 : i32 to index
    %c0_225 = arith.constant 0 : index
    %c0_226 = arith.constant 0 : index
    %808 = vector.load %arg8[%807, %c0_225, %c0_226] : memref<16x8x128xf32, #tpu.memory_space<vmem>>, vector<1x8x128xf32>
    %809 = vector.shape_cast %808 : vector<1x8x128xf32> to vector<8x128xf32>
    %810 = vector.shape_cast %806 : vector<8x128xf32> to vector<1x8x128xf32>
    tpu.vector_store %arg8[%807, %c0_225, %c0_226], %810 {strides = array<i32>} : memref<16x8x128xf32, #tpu.memory_space<vmem>>, vector<1x8x128xf32>,
    %811 = arith.index_cast %798 : i32 to index
    %c0_227 = arith.constant 0 : index
    %c0_228 = arith.constant 0 : index
    %812 = vector.load %arg9[%811, %c0_227, %c0_228] : memref<16x8x128xf32, #tpu.memory_space<vmem>>, vector<1x8x128xf32>
    %813 = vector.shape_cast %812 : vector<1x8x128xf32> to vector<8x128xf32>
    %814 = arith.mulf %813, %797 : vector<8x128xf32>
    %815 = vector.shape_cast %814 : vector<8x128xf32> to vector<8x1x128xf32>
    %816 = vector.broadcast %270 : vector<8x8x1xf32> to vector<8x8x128xf32>
    %817 = vector.broadcast %815 : vector<8x1x128xf32> to vector<8x8x128xf32>
    %818 = arith.mulf %816, %817 : vector<8x8x128xf32>
    %cst_229 = arith.constant dense<0.000000e+00> : vector<8x128xf32>
    %819 = vector.multi_reduction <add>, %818, %cst_229 [0] : vector<8x8x128xf32> to vector<8x128xf32>
    %cst_230 = arith.constant dense<0.000000e+00> : vector<128xf32>
    %820 = vector.multi_reduction <add>, %819, %cst_230 [0] : vector<8x128xf32> to vector<128xf32>
    %821 = vector.shape_cast %820 : vector<128xf32> to vector<1x128xf32>
    %822 = tpu.reciprocal %821 {approx = true} : vector<1x128xf32> -> vector<1x128xf32>
    %823 = vector.broadcast %822 : vector<1x128xf32> to vector<8x128xf32>
    %824 = arith.mulf %819, %823 : vector<8x128xf32>
    %c10_i32_231 = arith.constant 10 : i32
    %c15_i32_232 = arith.constant 15 : i32
    %825 = arith.subi %c15_i32_232, %c10_i32_231 : i32
    %826 = arith.index_cast %825 : i32 to index
    %c0_233 = arith.constant 0 : index
    %c0_234 = arith.constant 0 : index
    %827 = vector.load %arg8[%826, %c0_233, %c0_234] : memref<16x8x128xf32, #tpu.memory_space<vmem>>, vector<1x8x128xf32>
    %828 = vector.shape_cast %827 : vector<1x8x128xf32> to vector<8x128xf32>
    %829 = arith.mulf %828, %824 : vector<8x128xf32>
    %cst_235 = arith.constant dense<0.000000e+00> : vector<128xf32>
    %830 = vector.multi_reduction <add>, %829, %cst_235 [0] : vector<8x128xf32> to vector<128xf32>
    %831 = vector.shape_cast %830 : vector<128xf32> to vector<1x128xf32>
    %832 = vector.broadcast %831 : vector<1x128xf32> to vector<8x128xf32>
    %833 = arith.divf %829, %832 : vector<8x128xf32>
    %834 = arith.index_cast %825 : i32 to index
    %c0_236 = arith.constant 0 : index
    %c0_237 = arith.constant 0 : index
    %835 = vector.load %arg8[%834, %c0_236, %c0_237] : memref<16x8x128xf32, #tpu.memory_space<vmem>>, vector<1x8x128xf32>
    %836 = vector.shape_cast %835 : vector<1x8x128xf32> to vector<8x128xf32>
    %837 = vector.shape_cast %833 : vector<8x128xf32> to vector<1x8x128xf32>
    tpu.vector_store %arg8[%834, %c0_236, %c0_237], %837 {strides = array<i32>} : memref<16x8x128xf32, #tpu.memory_space<vmem>>, vector<1x8x128xf32>,
    %838 = arith.index_cast %825 : i32 to index
    %c0_238 = arith.constant 0 : index
    %c0_239 = arith.constant 0 : index
    %839 = vector.load %arg9[%838, %c0_238, %c0_239] : memref<16x8x128xf32, #tpu.memory_space<vmem>>, vector<1x8x128xf32>
    %840 = vector.shape_cast %839 : vector<1x8x128xf32> to vector<8x128xf32>
    %841 = arith.mulf %840, %824 : vector<8x128xf32>
    %842 = vector.shape_cast %841 : vector<8x128xf32> to vector<8x1x128xf32>
    %843 = vector.broadcast %270 : vector<8x8x1xf32> to vector<8x8x128xf32>
    %844 = vector.broadcast %842 : vector<8x1x128xf32> to vector<8x8x128xf32>
    %845 = arith.mulf %843, %844 : vector<8x8x128xf32>
    %cst_240 = arith.constant dense<0.000000e+00> : vector<8x128xf32>
    %846 = vector.multi_reduction <add>, %845, %cst_240 [0] : vector<8x8x128xf32> to vector<8x128xf32>
    %cst_241 = arith.constant dense<0.000000e+00> : vector<128xf32>
    %847 = vector.multi_reduction <add>, %846, %cst_241 [0] : vector<8x128xf32> to vector<128xf32>
    %848 = vector.shape_cast %847 : vector<128xf32> to vector<1x128xf32>
    %849 = tpu.reciprocal %848 {approx = true} : vector<1x128xf32> -> vector<1x128xf32>
    %850 = vector.broadcast %849 : vector<1x128xf32> to vector<8x128xf32>
    %851 = arith.mulf %846, %850 : vector<8x128xf32>
    %c11_i32_242 = arith.constant 11 : i32
    %c15_i32_243 = arith.constant 15 : i32
    %852 = arith.subi %c15_i32_243, %c11_i32_242 : i32
    %853 = arith.index_cast %852 : i32 to index
    %c0_244 = arith.constant 0 : index
    %c0_245 = arith.constant 0 : index
    %854 = vector.load %arg8[%853, %c0_244, %c0_245] : memref<16x8x128xf32, #tpu.memory_space<vmem>>, vector<1x8x128xf32>
    %855 = vector.shape_cast %854 : vector<1x8x128xf32> to vector<8x128xf32>
    %856 = arith.mulf %855, %851 : vector<8x128xf32>
    %cst_246 = arith.constant dense<0.000000e+00> : vector<128xf32>
    %857 = vector.multi_reduction <add>, %856, %cst_246 [0] : vector<8x128xf32> to vector<128xf32>
    %858 = vector.shape_cast %857 : vector<128xf32> to vector<1x128xf32>
    %859 = vector.broadcast %858 : vector<1x128xf32> to vector<8x128xf32>
    %860 = arith.divf %856, %859 : vector<8x128xf32>
    %861 = arith.index_cast %852 : i32 to index
    %c0_247 = arith.constant 0 : index
    %c0_248 = arith.constant 0 : index
    %862 = vector.load %arg8[%861, %c0_247, %c0_248] : memref<16x8x128xf32, #tpu.memory_space<vmem>>, vector<1x8x128xf32>
    %863 = vector.shape_cast %862 : vector<1x8x128xf32> to vector<8x128xf32>
    %864 = vector.shape_cast %860 : vector<8x128xf32> to vector<1x8x128xf32>
    tpu.vector_store %arg8[%861, %c0_247, %c0_248], %864 {strides = array<i32>} : memref<16x8x128xf32, #tpu.memory_space<vmem>>, vector<1x8x128xf32>,
    %865 = arith.index_cast %852 : i32 to index
    %c0_249 = arith.constant 0 : index
    %c0_250 = arith.constant 0 : index
    %866 = vector.load %arg9[%865, %c0_249, %c0_250] : memref<16x8x128xf32, #tpu.memory_space<vmem>>, vector<1x8x128xf32>
    %867 = vector.shape_cast %866 : vector<1x8x128xf32> to vector<8x128xf32>
    %868 = arith.mulf %867, %851 : vector<8x128xf32>
    %869 = vector.shape_cast %868 : vector<8x128xf32> to vector<8x1x128xf32>
    %870 = vector.broadcast %270 : vector<8x8x1xf32> to vector<8x8x128xf32>
    %871 = vector.broadcast %869 : vector<8x1x128xf32> to vector<8x8x128xf32>
    %872 = arith.mulf %870, %871 : vector<8x8x128xf32>
    %cst_251 = arith.constant dense<0.000000e+00> : vector<8x128xf32>
    %873 = vector.multi_reduction <add>, %872, %cst_251 [0] : vector<8x8x128xf32> to vector<8x128xf32>
    %cst_252 = arith.constant dense<0.000000e+00> : vector<128xf32>
    %874 = vector.multi_reduction <add>, %873, %cst_252 [0] : vector<8x128xf32> to vector<128xf32>
    %875 = vector.shape_cast %874 : vector<128xf32> to vector<1x128xf32>
    %876 = tpu.reciprocal %875 {approx = true} : vector<1x128xf32> -> vector<1x128xf32>
    %877 = vector.broadcast %876 : vector<1x128xf32> to vector<8x128xf32>
    %878 = arith.mulf %873, %877 : vector<8x128xf32>
    %c12_i32_253 = arith.constant 12 : i32
    %c15_i32_254 = arith.constant 15 : i32
    %879 = arith.subi %c15_i32_254, %c12_i32_253 : i32
    %880 = arith.index_cast %879 : i32 to index
    %c0_255 = arith.constant 0 : index
    %c0_256 = arith.constant 0 : index
    %881 = vector.load %arg8[%880, %c0_255, %c0_256] : memref<16x8x128xf32, #tpu.memory_space<vmem>>, vector<1x8x128xf32>
    %882 = vector.shape_cast %881 : vector<1x8x128xf32> to vector<8x128xf32>
    %883 = arith.mulf %882, %878 : vector<8x128xf32>
    %cst_257 = arith.constant dense<0.000000e+00> : vector<128xf32>
    %884 = vector.multi_reduction <add>, %883, %cst_257 [0] : vector<8x128xf32> to vector<128xf32>
    %885 = vector.shape_cast %884 : vector<128xf32> to vector<1x128xf32>
    %886 = vector.broadcast %885 : vector<1x128xf32> to vector<8x128xf32>
    %887 = arith.divf %883, %886 : vector<8x128xf32>
    %888 = arith.index_cast %879 : i32 to index
    %c0_258 = arith.constant 0 : index
    %c0_259 = arith.constant 0 : index
    %889 = vector.load %arg8[%888, %c0_258, %c0_259] : memref<16x8x128xf32, #tpu.memory_space<vmem>>, vector<1x8x128xf32>
    %890 = vector.shape_cast %889 : vector<1x8x128xf32> to vector<8x128xf32>
    %891 = vector.shape_cast %887 : vector<8x128xf32> to vector<1x8x128xf32>
    tpu.vector_store %arg8[%888, %c0_258, %c0_259], %891 {strides = array<i32>} : memref<16x8x128xf32, #tpu.memory_space<vmem>>, vector<1x8x128xf32>,
    %892 = arith.index_cast %879 : i32 to index
    %c0_260 = arith.constant 0 : index
    %c0_261 = arith.constant 0 : index
    %893 = vector.load %arg9[%892, %c0_260, %c0_261] : memref<16x8x128xf32, #tpu.memory_space<vmem>>, vector<1x8x128xf32>
    %894 = vector.shape_cast %893 : vector<1x8x128xf32> to vector<8x128xf32>
    %895 = arith.mulf %894, %878 : vector<8x128xf32>
    %896 = vector.shape_cast %895 : vector<8x128xf32> to vector<8x1x128xf32>
    %897 = vector.broadcast %270 : vector<8x8x1xf32> to vector<8x8x128xf32>
    %898 = vector.broadcast %896 : vector<8x1x128xf32> to vector<8x8x128xf32>
    %899 = arith.mulf %897, %898 : vector<8x8x128xf32>
    %cst_262 = arith.constant dense<0.000000e+00> : vector<8x128xf32>
    %900 = vector.multi_reduction <add>, %899, %cst_262 [0] : vector<8x8x128xf32> to vector<8x128xf32>
    %cst_263 = arith.constant dense<0.000000e+00> : vector<128xf32>
    %901 = vector.multi_reduction <add>, %900, %cst_263 [0] : vector<8x128xf32> to vector<128xf32>
    %902 = vector.shape_cast %901 : vector<128xf32> to vector<1x128xf32>
    %903 = tpu.reciprocal %902 {approx = true} : vector<1x128xf32> -> vector<1x128xf32>
    %904 = vector.broadcast %903 : vector<1x128xf32> to vector<8x128xf32>
    %905 = arith.mulf %900, %904 : vector<8x128xf32>
    %c13_i32_264 = arith.constant 13 : i32
    %c15_i32_265 = arith.constant 15 : i32
    %906 = arith.subi %c15_i32_265, %c13_i32_264 : i32
    %907 = arith.index_cast %906 : i32 to index
    %c0_266 = arith.constant 0 : index
    %c0_267 = arith.constant 0 : index
    %908 = vector.load %arg8[%907, %c0_266, %c0_267] : memref<16x8x128xf32, #tpu.memory_space<vmem>>, vector<1x8x128xf32>
    %909 = vector.shape_cast %908 : vector<1x8x128xf32> to vector<8x128xf32>
    %910 = arith.mulf %909, %905 : vector<8x128xf32>
    %cst_268 = arith.constant dense<0.000000e+00> : vector<128xf32>
    %911 = vector.multi_reduction <add>, %910, %cst_268 [0] : vector<8x128xf32> to vector<128xf32>
    %912 = vector.shape_cast %911 : vector<128xf32> to vector<1x128xf32>
    %913 = vector.broadcast %912 : vector<1x128xf32> to vector<8x128xf32>
    %914 = arith.divf %910, %913 : vector<8x128xf32>
    %915 = arith.index_cast %906 : i32 to index
    %c0_269 = arith.constant 0 : index
    %c0_270 = arith.constant 0 : index
    %916 = vector.load %arg8[%915, %c0_269, %c0_270] : memref<16x8x128xf32, #tpu.memory_space<vmem>>, vector<1x8x128xf32>
    %917 = vector.shape_cast %916 : vector<1x8x128xf32> to vector<8x128xf32>
    %918 = vector.shape_cast %914 : vector<8x128xf32> to vector<1x8x128xf32>
    tpu.vector_store %arg8[%915, %c0_269, %c0_270], %918 {strides = array<i32>} : memref<16x8x128xf32, #tpu.memory_space<vmem>>, vector<1x8x128xf32>,
    %919 = arith.index_cast %906 : i32 to index
    %c0_271 = arith.constant 0 : index
    %c0_272 = arith.constant 0 : index
    %920 = vector.load %arg9[%919, %c0_271, %c0_272] : memref<16x8x128xf32, #tpu.memory_space<vmem>>, vector<1x8x128xf32>
    %921 = vector.shape_cast %920 : vector<1x8x128xf32> to vector<8x128xf32>
    %922 = arith.mulf %921, %905 : vector<8x128xf32>
    %923 = vector.shape_cast %922 : vector<8x128xf32> to vector<8x1x128xf32>
    %924 = vector.broadcast %270 : vector<8x8x1xf32> to vector<8x8x128xf32>
    %925 = vector.broadcast %923 : vector<8x1x128xf32> to vector<8x8x128xf32>
    %926 = arith.mulf %924, %925 : vector<8x8x128xf32>
    %cst_273 = arith.constant dense<0.000000e+00> : vector<8x128xf32>
    %927 = vector.multi_reduction <add>, %926, %cst_273 [0] : vector<8x8x128xf32> to vector<8x128xf32>
    %cst_274 = arith.constant dense<0.000000e+00> : vector<128xf32>
    %928 = vector.multi_reduction <add>, %927, %cst_274 [0] : vector<8x128xf32> to vector<128xf32>
    %929 = vector.shape_cast %928 : vector<128xf32> to vector<1x128xf32>
    %930 = tpu.reciprocal %929 {approx = true} : vector<1x128xf32> -> vector<1x128xf32>
    %931 = vector.broadcast %930 : vector<1x128xf32> to vector<8x128xf32>
    %932 = arith.mulf %927, %931 : vector<8x128xf32>
    %c14_i32_275 = arith.constant 14 : i32
    %c15_i32_276 = arith.constant 15 : i32
    %933 = arith.subi %c15_i32_276, %c14_i32_275 : i32
    %934 = arith.index_cast %933 : i32 to index
    %c0_277 = arith.constant 0 : index
    %c0_278 = arith.constant 0 : index
    %935 = vector.load %arg8[%934, %c0_277, %c0_278] : memref<16x8x128xf32, #tpu.memory_space<vmem>>, vector<1x8x128xf32>
    %936 = vector.shape_cast %935 : vector<1x8x128xf32> to vector<8x128xf32>
    %937 = arith.mulf %936, %932 : vector<8x128xf32>
    %cst_279 = arith.constant dense<0.000000e+00> : vector<128xf32>
    %938 = vector.multi_reduction <add>, %937, %cst_279 [0] : vector<8x128xf32> to vector<128xf32>
    %939 = vector.shape_cast %938 : vector<128xf32> to vector<1x128xf32>
    %940 = vector.broadcast %939 : vector<1x128xf32> to vector<8x128xf32>
    %941 = arith.divf %937, %940 : vector<8x128xf32>
    %942 = arith.index_cast %933 : i32 to index
    %c0_280 = arith.constant 0 : index
    %c0_281 = arith.constant 0 : index
    %943 = vector.load %arg8[%942, %c0_280, %c0_281] : memref<16x8x128xf32, #tpu.memory_space<vmem>>, vector<1x8x128xf32>
    %944 = vector.shape_cast %943 : vector<1x8x128xf32> to vector<8x128xf32>
    %945 = vector.shape_cast %941 : vector<8x128xf32> to vector<1x8x128xf32>
    tpu.vector_store %arg8[%942, %c0_280, %c0_281], %945 {strides = array<i32>} : memref<16x8x128xf32, #tpu.memory_space<vmem>>, vector<1x8x128xf32>,
    %946 = arith.index_cast %933 : i32 to index
    %c0_282 = arith.constant 0 : index
    %c0_283 = arith.constant 0 : index
    %947 = vector.load %arg9[%946, %c0_282, %c0_283] : memref<16x8x128xf32, #tpu.memory_space<vmem>>, vector<1x8x128xf32>
    %948 = vector.shape_cast %947 : vector<1x8x128xf32> to vector<8x128xf32>
    %949 = arith.mulf %948, %932 : vector<8x128xf32>
    %950 = vector.shape_cast %949 : vector<8x128xf32> to vector<8x1x128xf32>
    %951 = vector.broadcast %270 : vector<8x8x1xf32> to vector<8x8x128xf32>
    %952 = vector.broadcast %950 : vector<8x1x128xf32> to vector<8x8x128xf32>
    %953 = arith.mulf %951, %952 : vector<8x8x128xf32>
    %cst_284 = arith.constant dense<0.000000e+00> : vector<8x128xf32>
    %954 = vector.multi_reduction <add>, %953, %cst_284 [0] : vector<8x8x128xf32> to vector<8x128xf32>
    %cst_285 = arith.constant dense<0.000000e+00> : vector<128xf32>
    %955 = vector.multi_reduction <add>, %954, %cst_285 [0] : vector<8x128xf32> to vector<128xf32>
    %956 = vector.shape_cast %955 : vector<128xf32> to vector<1x128xf32>
    %957 = tpu.reciprocal %956 {approx = true} : vector<1x128xf32> -> vector<1x128xf32>
    %958 = vector.broadcast %957 : vector<1x128xf32> to vector<8x128xf32>
    %959 = arith.mulf %954, %958 : vector<8x128xf32>
    %c15_i32_286 = arith.constant 15 : i32
    %c15_i32_287 = arith.constant 15 : i32
    %960 = arith.subi %c15_i32_287, %c15_i32_286 : i32
    %961 = arith.index_cast %960 : i32 to index
    %c0_288 = arith.constant 0 : index
    %c0_289 = arith.constant 0 : index
    %962 = vector.load %arg8[%961, %c0_288, %c0_289] : memref<16x8x128xf32, #tpu.memory_space<vmem>>, vector<1x8x128xf32>
    %963 = vector.shape_cast %962 : vector<1x8x128xf32> to vector<8x128xf32>
    %964 = arith.mulf %963, %959 : vector<8x128xf32>
    %cst_290 = arith.constant dense<0.000000e+00> : vector<128xf32>
    %965 = vector.multi_reduction <add>, %964, %cst_290 [0] : vector<8x128xf32> to vector<128xf32>
    %966 = vector.shape_cast %965 : vector<128xf32> to vector<1x128xf32>
    %967 = vector.broadcast %966 : vector<1x128xf32> to vector<8x128xf32>
    %968 = arith.divf %964, %967 : vector<8x128xf32>
    %969 = arith.index_cast %960 : i32 to index
    %c0_291 = arith.constant 0 : index
    %c0_292 = arith.constant 0 : index
    %970 = vector.load %arg8[%969, %c0_291, %c0_292] : memref<16x8x128xf32, #tpu.memory_space<vmem>>, vector<1x8x128xf32>
    %971 = vector.shape_cast %970 : vector<1x8x128xf32> to vector<8x128xf32>
    %972 = vector.shape_cast %968 : vector<8x128xf32> to vector<1x8x128xf32>
    tpu.vector_store %arg8[%969, %c0_291, %c0_292], %972 {strides = array<i32>} : memref<16x8x128xf32, #tpu.memory_space<vmem>>, vector<1x8x128xf32>,
    %973 = arith.index_cast %960 : i32 to index
    %c0_293 = arith.constant 0 : index
    %c0_294 = arith.constant 0 : index
    %974 = vector.load %arg9[%973, %c0_293, %c0_294] : memref<16x8x128xf32, #tpu.memory_space<vmem>>, vector<1x8x128xf32>
    %975 = vector.shape_cast %974 : vector<1x8x128xf32> to vector<8x128xf32>
    %976 = arith.mulf %975, %959 : vector<8x128xf32>
    %977 = vector.shape_cast %976 : vector<8x128xf32> to vector<8x1x128xf32>
    %978 = vector.broadcast %270 : vector<8x8x1xf32> to vector<8x8x128xf32>
    %979 = vector.broadcast %977 : vector<8x1x128xf32> to vector<8x8x128xf32>
    %980 = arith.mulf %978, %979 : vector<8x8x128xf32>
    %cst_295 = arith.constant dense<0.000000e+00> : vector<8x128xf32>
    %981 = vector.multi_reduction <add>, %980, %cst_295 [0] : vector<8x8x128xf32> to vector<8x128xf32>
    %cst_296 = arith.constant dense<0.000000e+00> : vector<128xf32>
    %982 = vector.multi_reduction <add>, %981, %cst_296 [0] : vector<8x128xf32> to vector<128xf32>
    %983 = vector.shape_cast %982 : vector<128xf32> to vector<1x128xf32>
    %984 = tpu.reciprocal %983 {approx = true} : vector<1x128xf32> -> vector<1x128xf32>
    %985 = vector.broadcast %984 : vector<1x128xf32> to vector<8x128xf32>
    %986 = arith.mulf %981, %985 : vector<8x128xf32>
    %c16_i32 = arith.constant 16 : i32
    return
  }
  func.func @transform_0(%arg0: i32) -> (i32, i32, i32) {
    %c0_i32 = arith.constant 0 : i32
    %c0_i32_0 = arith.constant 0 : i32
    %c0_i32_1 = arith.constant 0 : i32
    return %c0_i32, %c0_i32_0, %arg0 : i32, i32, i32
  }
  func.func @transform_1(%arg0: i32) -> (i32, i32, i32) {
    %c0_i32 = arith.constant 0 : i32
    %c0_i32_0 = arith.constant 0 : i32
    %c0_i32_1 = arith.constant 0 : i32
    %c0_i32_2 = arith.constant 0 : i32
    return %c0_i32, %c0_i32_0, %c0_i32_1 : i32, i32, i32
  }
  func.func @transform_2(%arg0: i32) -> (i32, i32, i32) {
    %c0_i32 = arith.constant 0 : i32
    %c0_i32_0 = arith.constant 0 : i32
    %c0_i32_1 = arith.constant 0 : i32
    %c0_i32_2 = arith.constant 0 : i32
    return %c0_i32, %c0_i32_0, %c0_i32_1 : i32, i32, i32
  }
  func.func @transform_3(%arg0: i32) -> (i32, i32, i32) {
    %c0_i32 = arith.constant 0 : i32
    %c0_i32_0 = arith.constant 0 : i32
    %c0_i32_1 = arith.constant 0 : i32
    %c0_i32_2 = arith.constant 0 : i32
    return %c0_i32, %c0_i32_0, %c0_i32_1 : i32, i32, i32
  }
  func.func @transform_4(%arg0: i32) -> (i32, i32, i32) {
    %c0_i32 = arith.constant 0 : i32
    %c0_i32_0 = arith.constant 0 : i32
    %c0_i32_1 = arith.constant 0 : i32
    %c0_i32_2 = arith.constant 0 : i32
    return %c0_i32, %c0_i32_0, %c0_i32_1 : i32, i32, i32
  }
  func.func @transform_5(%arg0: i32) -> (i32, i32, i32) {
    %c0_i32 = arith.constant 0 : i32
    %c0_i32_0 = arith.constant 0 : i32
    %c0_i32_1 = arith.constant 0 : i32
    %c0_i32_2 = arith.constant 0 : i32
    return %c0_i32, %c0_i32_0, %c0_i32_1 : i32, i32, i32
  }
  func.func @transform_6(%arg0: i32) -> (i32, i32) {
    %c0_i32 = arith.constant 0 : i32
    %c0_i32_0 = arith.constant 0 : i32
    %c0_i32_1 = arith.constant 0 : i32
    return %c0_i32, %c0_i32_0 : i32, i32
  }
  func.func @transform_7(%arg0: i32) -> (i32, i32, i32) {
    %c0_i32 = arith.constant 0 : i32
    %c0_i32_0 = arith.constant 0 : i32
    %c0_i32_1 = arith.constant 0 : i32
    return %c0_i32, %c0_i32_0, %arg0 : i32, i32, i32
  }
}

</mosaic_0001>

<bundles_post_ra>
// kernel: tpu_custom_call.1
= control target key start
LH: loop header
LB: loop body
LE: loop exit
PB: predicated region body
PF: predicated region fallthrough
CT: control target
= control target key end

     0   :  { %v7497_v2 = vmov 0   ;;  %s11351_s0 = inlined_call_operand.vmem [shape: f32[16,16,128], index: 0, kind: input, shape index: {}]   ;;  %s11352_s1 = inlined_call_operand.vmem [shape: f32[16,8,1], index: 1, kind: input, shape index: {}]   ;;  %s11353_s2 = inlined_call_operand.vmem [shape: f32[16,8,1], index: 2, kind: input, shape index: {}]   ;;  %s11354_s3 = inlined_call_operand.vmem [shape: f32[1,8,1], index: 3, kind: input, shape index: {}]   ;;  %s11355_s4 = inlined_call_operand.vmem [shape: f32[8,8,1], index: 4, kind: input, shape index: {}]   ;;  %s11356_s5 = inlined_call_operand.vmem [shape: f32[8,8,1], index: 5, kind: input, shape index: {}]   ;;  %s11357_s6 = inlined_call_operand.vmem [shape: f32[8,1], index: 6, kind: input, shape index: {}]   ;;  %s11358_s7 = inlined_call_operand.hbm [shape: f32[16,8,128], index: 7, kind: output, shape index: {}]  }
   0x1   :  { %v75_v0 = vld [vmem:[%s11353_s2] sm:$0xff]  ;;  %7326 = vset.pattern.permute.xlu1 %v7497_v2  ;;  %7325 = vset.pattern.permute.xlu0 %v7497_v2  ;;  %v60_v3 = vld [vmem:[%s11352_s1 + $0x8] sm:$0xff]  ;;  %v61_v5 = vld [vmem:[%s11352_s1 + $0x10] sm:$0xff] }
   0x2   :  { %v59_v1 = vld [vmem:[%s11352_s1] sm:$0xff]  ;;  %217 = vperm.xlu1 %7326, %v75_v0   ;;  %v76_v6 = vld [vmem:[%s11353_s2 + $0x8] sm:$0xff]  ;;  %v62_v7 = vld [vmem:[%s11352_s1 + $0x18] sm:$0xff] }
   0x3   :  { %116 = vperm.xlu0 %7325, %v59_v1   ;;  %v91_v4 = vld [vmem:[%s11354_s3] sm:$0xff]  ;;  %v77_v8 = vld [vmem:[%s11353_s2 + $0x10] sm:$0xff]  ;;  %v78_v10 = vld [vmem:[%s11353_s2 + $0x18] sm:$0xff] }
   0x4   :  { %v63_v9 = vld [vmem:[%s11352_s1 + $0x20] sm:$0xff]  ;;  %v64_v11 = vld [vmem:[%s11352_s1 + $0x28] sm:$0xff] }
   0x5   :  { %v79_v12 = vld [vmem:[%s11353_s2 + $0x20] sm:$0xff] }
   0x6   :  { %318 = vperm.xlu1 %7326, %v60_v3  }
   0x7   :  { %94 = vperm.xlu0 %7325, %v91_v4  }
   0xa   :  { %520 = vperm.xlu1 %7326, %v61_v5  }
   0xb   :  { %419 = vperm.xlu0 %7325, %v76_v6  }
   0xe   :  { %722 = vperm.xlu1 %7326, %v62_v7  }
   0xf   :  { %621 = vperm.xlu0 %7325, %v77_v8  }
  0x12   :  { %924 = vperm.xlu1 %7326, %v63_v9  }
  0x13   :  { %823 = vperm.xlu0 %7325, %v78_v10  }
  0x16   :  { %1126 = vperm.xlu1 %7326, %v64_v11  }
  0x17   :  { %1025 = vperm.xlu0 %7325, %v79_v12  }
  0x18   :  { %12 = vsyncpa [#allocation4], 0  ;;  %v65_v13 = vld [vmem:[%s11352_s1 + $0x30] sm:$0xff]  ;;  %v80_v14 = vld [vmem:[%s11353_s2 + $0x28] sm:$0xff]  ;;  %v119_v49 = vlaneseq }
  0x19   :  { %v66_v15 = vld [vmem:[%s11352_s1 + $0x38] sm:$0xff]  ;;  %v81_v16 = vld [vmem:[%s11353_s2 + $0x30] sm:$0xff]  ;;  %v67_v17 = vld [vmem:[%s11352_s1 + $0x40] sm:$0xff] }
  0x1a   :  { %1328 = vperm.xlu1 %7326, %v65_v13   ;;  %v82_v18 = vld [vmem:[%s11353_s2 + $0x38] sm:$0xff]  ;;  %v68_v19 = vld [vmem:[%s11352_s1 + $0x48] sm:$0xff]  ;;  %v83_v20 = vld [vmem:[%s11353_s2 + $0x40] sm:$0xff]  ;;  %v7692_v52 = vshrl.u32 %v119_v49, 7 }
  0x1b   :  { %1227 = vperm.xlu0 %7325, %v80_v14   ;;  %v69_v21 = vld [vmem:[%s11352_s1 + $0x50] sm:$0xff]  ;;  %v84_v22 = vld [vmem:[%s11353_s2 + $0x48] sm:$0xff]  ;;  %v70_v23 = vld [vmem:[%s11352_s1 + $0x58] sm:$0xff] }
  0x1c   :  { %v85_v24 = vld [vmem:[%s11353_s2 + $0x50] sm:$0xff]  ;;  %v71_v25 = vld [vmem:[%s11352_s1 + $0x60] sm:$0xff]  ;;  %v86_v26 = vld [vmem:[%s11353_s2 + $0x58] sm:$0xff]  ;;  %11597 = vst [vmem:[#allocation6_spill] sm:$0xff] %v7692_v52  ;;  %v7695_v53 = vsub.s32 0, %v7692_v52  ;;  %v7725_v60 = vsub.s32 1, %v7692_v52 }
  0x1d   :  { %v72_v27 = vld [vmem:[%s11352_s1 + $0x68] sm:$0xff]  ;;  %v87_v28 = vld [vmem:[%s11353_s2 + $0x60] sm:$0xff]  ;;  %v73_v29 = vld [vmem:[%s11352_s1 + $0x70] sm:$0xff]  ;;  %v7728_v61 = vsub.s32 2, %v7692_v52 }
  0x1e   :  { %1530 = vperm.xlu1 %7326, %v66_v15   ;;  %v88_v30 = vld [vmem:[%s11353_s2 + $0x68] sm:$0xff]  ;;  %v74_v31 = vld [vmem:[%s11352_s1 + $0x78] sm:$0xff]  ;;  %v89_v32 = vld [vmem:[%s11353_s2 + $0x70] sm:$0xff]  ;;  %11598 = vst [vmem:[#allocation7_spill] sm:$0xff] %v7695_v53 }
  0x1f   :  { %1429 = vperm.xlu0 %7325, %v81_v16   ;;  %v3538_v33 = vld [vmem:[%s11357_s6] sm:$0xff]  ;;  %v90_v34 = vld [vmem:[%s11353_s2 + $0x78] sm:$0xff]  ;;  %v3523_v35 = vld [vmem:[%s11355_s4 + $0x8] sm:$0xff]  ;;  %11600 = vst [vmem:[#allocation9_spill] sm:$0xff] %v7725_v60 }
  0x20   :  { %v3522_v36 = vld [vmem:[%s11355_s4] sm:$0xff]  ;;  %v3525_v37 = vld [vmem:[%s11355_s4 + $0x18] sm:$0xff]  ;;  %v3524_v38 = vld [vmem:[%s11355_s4 + $0x10] sm:$0xff]  ;;  %11601 = vst [vmem:[#allocation10_spill] sm:$0xff] %v7728_v61 }
  0x21   :  { %v3527_v39 = vld [vmem:[%s11355_s4 + $0x28] sm:$0xff]  ;;  %v3526_v40 = vld [vmem:[%s11355_s4 + $0x20] sm:$0xff]  ;;  %v3532_v43 = vld [vmem:[%s11356_s5 + $0x10] sm:$0xff] }
  0x22   :  { %1748 = vperm.xlu1 %7326, %v67_v17   ;;  %v3531_v41 = vld [vmem:[%s11356_s5 + $0x8] sm:$0xff]  ;;  %v3530_v42 = vld [vmem:[%s11356_s5] sm:$0xff]  ;;  %v3528_v44 = vld [vmem:[%s11355_s4 + $0x30] sm:$0xff] }
  0x23   :  { %1631 = vperm.xlu0 %7325, %v82_v18   ;;  %v3533_v45 = vld [vmem:[%s11356_s5 + $0x18] sm:$0xff]  ;;  %v3535_v47 = vld [vmem:[%s11356_s5 + $0x28] sm:$0xff]  ;;  %v3534_v48 = vld [vmem:[%s11356_s5 + $0x20] sm:$0xff] }
  0x24   :  { %v3529_v46 = vld [vmem:[%s11355_s4 + $0x38] sm:$0xff]  ;;  %v3536_v51 = vld [vmem:[%s11356_s5 + $0x30] sm:$0xff]  ;;  %v7700_v54 = vld [vmem:[%s11351_s0 + $0x20] sm:$0xff] }
  0x25   :  { %v3537_v50 = vld [vmem:[%s11356_s5 + $0x38] sm:$0xff]  ;;  %11599 = vst [vmem:[#allocation8_spill] sm:$0xff] %v7700_v54  ;;  %v7705_v55 = vld [vmem:[%s11351_s0 + $0x30] sm:$0xff]  ;;  %v7710_v56 = vld [vmem:[%s11351_s0 + $0x40] sm:$0xff]  ;;  %v231_v59 = vrot.slane %v7700_v54, %v7695_v53  ;;  %v7776_v11 = vmul.f32 %v7700_v54, %v7700_v54 }
  0x26   :  { %1950 = vperm.xlu1 %7326, %v68_v19   ;;  %v7715_v57 = vld [vmem:[%s11351_s0 + $0x50] sm:$0xff]  ;;  %v7720_v58 = vld [vmem:[%s11351_s0 + $0x60] sm:$0xff]  ;;  %v235_v1 = vrot.slane %v7705_v55, %v7695_v53  ;;  %v239_v2 = vrot.slane %v7710_v56, %v7695_v53  ;;  %v7794_v16 = vmul.f32 %v7705_v55, %v7705_v55  ;;  %v7798_v17 = vmul.f32 %v7710_v56, %v7710_v56 }
  0x27   :  { %1849 = vperm.xlu0 %7325, %v83_v20   ;;  %v7733_v62 = vld [vmem:[%s11351_s0 + $0x70] sm:$0xff]  ;;  %v7738_v63 = vld [vmem:[%s11351_s0 + $0x80] sm:$0xff]  ;;  %v243_v3 = vrot.slane %v7715_v57, %v7695_v53  ;;  %v247_v4 = vrot.slane %v7720_v58, %v7695_v53  ;;  %11606 = vst [vmem:[#allocation15_spill] sm:$0xff] %v7776_v11  ;;  %v7802_v18 = vmul.f32 %v7715_v57, %v7715_v57 }
  0x28   :  { %v7743_v0 = vld [vmem:[%s11351_s0 + $0x90] sm:$0xff]  ;;  %v7756_v5 = vld [vmem:[%s11351_s0 + $0xa0] sm:$0xff]  ;;  %v251_v8 = vrot.slane %v7733_v62, %v7695_v53  ;;  %v255_v9 = vrot.slane %v7738_v63, %v7695_v53  ;;  %11609 = vst [vmem:[#allocation18_spill] sm:$0xff] %v7794_v16  ;;  %11610 = vst [vmem:[#allocation19_spill] sm:$0xff] %v7798_v17  ;;  %v7806_v19 = vmul.f32 %v7720_v58, %v7720_v58 }
  0x29   :  { %11602 = vst [vmem:[#allocation11_spill] sm:$0xff] %v7743_v0  ;;  %11603 = vst [vmem:[#allocation12_spill] sm:$0xff] %v7756_v5  ;;  %v7761_v6 = vld [vmem:[%s11351_s0 + $0xb0] sm:$0xff]  ;;  %v7766_v7 = vld [vmem:[%s11351_s0 + $0xc0] sm:$0xff]  ;;  %v259_v10 = vrot.slane %v7743_v0, %v7695_v53  ;;  %v263_v14 = vrot.slane %v7756_v5, %v7695_v53  ;;  %v7810_v20 = vmul.f32 %v7733_v62, %v7733_v62 }
  0x2a   :  { %2152 = vperm.xlu1 %7326, %v69_v21   ;;  %11604 = vst [vmem:[#allocation13_spill] sm:$0xff] %v7761_v6  ;;  %11605 = vst [vmem:[#allocation14_spill] sm:$0xff] %v7766_v7  ;;  %v7781_v12 = vld [vmem:[%s11351_s0 + $0xd0] sm:$0xff]  ;;  %v7786_v13 = vld [vmem:[%s11351_s0 + $0xe0] sm:$0xff]  ;;  %v267_v15 = vrot.slane %v7761_v6, %v7695_v53  ;;  %v7814_v21 = vmul.f32 %v7738_v63, %v7738_v63 }
  0x2b   :  { %2051 = vperm.xlu0 %7325, %v84_v22   ;;  %11607 = vst [vmem:[#allocation16_spill] sm:$0xff] %v7781_v12  ;;  %11608 = vst [vmem:[#allocation17_spill] sm:$0xff] %v7786_v13  ;;  %v7818_v22 = vmul.f32 %v7743_v0, %v7743_v0 }
  0x2c   :  { %11611 = vst [vmem:[#allocation20_spill] sm:$0xff] %v7802_v18  ;;  %11612 = vst [vmem:[#allocation21_spill] sm:$0xff] %v7806_v19 }
  0x2d   :  { %11613 = vst [vmem:[#allocation22_spill] sm:$0xff] %v7810_v20  ;;  %11614 = vst [vmem:[#allocation23_spill] sm:$0xff] %v7814_v21 }
  0x2e   :  { %2354 = vperm.xlu1 %7326, %v70_v23   ;;  %11615 = vst [vmem:[#allocation24_spill] sm:$0xff] %v7818_v22  ;;  %v7822_v23 = vmul.f32 %v7756_v5, %v7756_v5 }
  0x2f   :  { %2253 = vperm.xlu0 %7325, %v85_v24   ;;  %v7826_v24 = vmul.f32 %v7761_v6, %v7761_v6 }
  0x30   :  { %11616 = vst [vmem:[#allocation25_spill] sm:$0xff] %v7822_v23 }
  0x31   :  { %11617 = vst [vmem:[#allocation26_spill] sm:$0xff] %v7826_v24 }
  0x32   :  { %2556 = vperm.xlu1 %7326, %v71_v25   ;;  %v7830_v25 = vmul.f32 %v7766_v7, %v7766_v7 }
  0x33   :  { %2455 = vperm.xlu0 %7325, %v86_v26  }
  0x34   :  { %11618 = vst [vmem:[#allocation27_spill] sm:$0xff] %v7830_v25 }
  0x36   :  { %2758 = vperm.xlu1 %7326, %v72_v27  }
  0x37   :  { %2657 = vperm.xlu0 %7325, %v87_v28   ;;  %v7838_v28 = vmul.f32 %v7781_v12, %v7781_v12 }
  0x39   :  { %11619 = vst [vmem:[#allocation28_spill] sm:$0xff] %v7838_v28 }
  0x3a   :  { %2960 = vperm.xlu1 %7326, %v73_v29   ;;  %v7842_v29 = vmul.f32 %v7786_v13, %v7786_v13 }
  0x3b   :  { %2859 = vperm.xlu0 %7325, %v88_v30  }
  0x3c   :  { %11620 = vst [vmem:[#allocation29_spill] sm:$0xff] %v7842_v29 }
  0x3e   :  { %3162 = vperm.xlu1 %7326, %v74_v31   ;;  %v130_v31 = vrot.slane %v7776_v11, %v7695_v53 }
  0x3f   :  { %3061 = vperm.xlu0 %7325, %v89_v32   ;;  %v134_v32 = vrot.slane %v7794_v16, %v7695_v53 }
  0x42   :  { %3542 = vperm.xlu1 %7326, %v3538_v33   ;;  %v138_v33 = vrot.slane %v7798_v17, %v7695_v53 }
  0x43   :  { %3263 = vperm.xlu0 %7325, %v90_v34   ;;  %v142_v34 = vrot.slane %v7802_v18, %v7695_v53 }
  0x46   :  { %3612 = vperm.xlu1 %7326, %v3523_v35   ;;  %v146_v35 = vrot.slane %v7806_v19, %v7695_v53 }
  0x47   :  { %3607 = vperm.xlu0 %7325, %v3522_v36   ;;  %v150_v36 = vrot.slane %v7810_v20, %v7695_v53 }
  0x4a   :  { %3622 = vperm.xlu1 %7326, %v3525_v37   ;;  %v154_v37 = vrot.slane %v7814_v21, %v7695_v53 }
  0x4b   :  { %3617 = vperm.xlu0 %7325, %v3524_v38   ;;  %v158_v38 = vrot.slane %v7818_v22, %v7695_v53 }
  0x4e   :  { %3632 = vperm.xlu1 %7326, %v3527_v39   ;;  %v162_v39 = vrot.slane %v7822_v23, %v7695_v53 }
  0x4f   :  { %3627 = vperm.xlu0 %7325, %v3526_v40   ;;  %v166_v40 = vrot.slane %v7826_v24, %v7695_v53 }
  0x52   :  { %5433 = vperm.xlu1 %7326, %v3531_v41   ;;  %v170_v41 = vrot.slane %v7830_v25, %v7695_v53 }
  0x53   :  { %5428 = vperm.xlu0 %7325, %v3530_v42   ;;  %v174_v42 = vrot.slane %v7838_v28, %v7695_v53 }
  0x56   :  { %5438 = vperm.xlu1 %7326, %v3532_v43   ;;  %v178_v43 = vrot.slane %v7842_v29, %v7695_v53 }
  0x57   :  { %3637 = vperm.xlu0 %7325, %v3528_v44  }
  0x5a   :  { %5443 = vperm.xlu1 %7326, %v3533_v45  }
  0x5b   :  { %3642 = vperm.xlu0 %7325, %v3529_v46  }
  0x5e   :  { %5453 = vperm.xlu1 %7326, %v3535_v47  }
  0x5f   :  { %5448 = vperm.xlu0 %7325, %v3534_v48   ;;  %v7980_v48 = vsub.s32 4, %v7692_v52 }
  0x61   :  { %11622 = vst [vmem:[#allocation31_spill] sm:$0xff] %v7980_v48 }
  0x62   :  { %5463 = vperm.xlu1 %7326, %v3537_v50   ;;  %v7899_v50 = vsub.s32 3, %v7692_v52 }
  0x63   :  { %5458 = vperm.xlu0 %7325, %v3536_v51  }
  0x64   :  { %11621 = vst [vmem:[#allocation30_spill] sm:$0xff] %v7899_v50 }
  0x7d   :  { %v8024_v26 = vpop.permute.xlu1 %217 }
  0x7e   :  { %v8006_v27 = vpop.permute.xlu0 %116  ;;  %11624 = vst [vmem:[#allocation33_spill] sm:$0xff] %v8024_v26  ;;  %v286_v47 = vmul.f32 %v231_v59, %v8024_v26  ;;  %v287_v45 = vmul.f32 %v235_v1, %v8024_v26  ;;  %v288_v46 = vmul.f32 %v239_v2, %v8024_v26  ;;  %v289_v59 = vmul.f32 %v243_v3, %v8024_v26 }
  0x7f   :  { %11623 = vst [vmem:[#allocation32_spill] sm:$0xff] %v8006_v27  ;;  %v290_v44 = vmul.f32 %v247_v4, %v8024_v26  ;;  %v291_v1 = vmul.f32 %v251_v8, %v8024_v26  ;;  %v292_v2 = vmul.f32 %v255_v9, %v8024_v26  ;;  %v293_v3 = vmul.f32 %v259_v10, %v8024_v26 }
  0x80   :  { %v294_v4 = vmul.f32 %v263_v14, %v8024_v26  ;;  %v295_v8 = vmul.f32 %v267_v15, %v8024_v26  ;;  %v185_v9 = vmul.f32 %v130_v31, %v8006_v27  ;;  %v186_v10 = vmul.f32 %v134_v32, %v8006_v27 }
  0x81   :  { %v187_v14 = vmul.f32 %v138_v33, %v8006_v27  ;;  %v188_v15 = vmul.f32 %v142_v34, %v8006_v27  ;;  %v189_v31 = vmul.f32 %v146_v35, %v8006_v27  ;;  %v190_v32 = vmul.f32 %v150_v36, %v8006_v27  ;;  %v8159_v54 = vpop.permute.xlu1 %318 }
  0x82   :  { %v8092_v30 = vpop.permute.xlu0 %94  ;;  %v191_v33 = vmul.f32 %v154_v37, %v8006_v27  ;;  %v192_v34 = vmul.f32 %v158_v38, %v8006_v27  ;;  %v193_v35 = vmul.f32 %v162_v39, %v8006_v27  ;;  %v194_v36 = vmul.f32 %v166_v40, %v8006_v27  ;;  %11629 = vst [vmem:[#allocation35_spill] sm:$0xff] %v8159_v54 }
  0x83   :  { %11625 = vst [vmem:[#allocation34_spill] sm:$0xff] %v8092_v30  ;;  %v195_v37 = vmul.f32 %v170_v41, %v8006_v27  ;;  %v196_v38 = vmul.f32 %v174_v42, %v8006_v27  ;;  %v197_v39 = vmul.f32 %v178_v43, %v8006_v27  ;;  %v201_v49 = vadd.f32 %v185_v9, %v8092_v30 }
  0x84   :  { %v202_v51 = vadd.f32 %v186_v10, %v8092_v30  ;;  %v203_v40 = vadd.f32 %v187_v14, %v8092_v30  ;;  %v204_v48 = vadd.f32 %v188_v15, %v8092_v30  ;;  %v205_v41 = vadd.f32 %v189_v31, %v8092_v30 }
  0x85   :  { %v206_v61 = vadd.f32 %v190_v32, %v8092_v30  ;;  %v207_v52 = vadd.f32 %v191_v33, %v8092_v30  ;;  %v208_v42 = vadd.f32 %v192_v34, %v8092_v30  ;;  %v209_v6 = vadd.f32 %v193_v35, %v8092_v30 }
  0x86   :  { %v210_v43 = vadd.f32 %v194_v36, %v8092_v30  ;;  %v11626_v9 = vrot.slane %v7766_v7, %v7695_v53  ;;  %v211_v14 = vadd.f32 %v195_v37, %v8092_v30  ;;  %v212_v15 = vadd.f32 %v196_v38, %v8092_v30 }
  0x87   :  { %v213_v31 = vadd.f32 %v197_v39, %v8092_v30  ;;  %v11627_v32 = vrot.slane %v7781_v12, %v7695_v53  ;;  %v11628_v34 = vrot.slane %v7786_v13, %v7695_v53  ;;  %v302_v36 = vadd.f32 %v286_v47, %v201_v49 }
  0x88   :  { %v296_v10 = vmul.f32 %v11626_v9, %v8024_v26  ;;  %v303_v27 = vadd.f32 %v287_v45, %v202_v51  ;;  %v304_v7 = vadd.f32 %v288_v46, %v203_v40  ;;  %v305_v9 = vadd.f32 %v289_v59, %v204_v48 }
  0x89   :  { %v297_v33 = vmul.f32 %v11627_v32, %v8024_v26  ;;  %v298_v35 = vmul.f32 %v11628_v34, %v8024_v26  ;;  %v306_v5 = vadd.f32 %v290_v44, %v205_v41  ;;  %v307_v37 = vadd.f32 %v291_v1, %v206_v61 }
  0x8a   :  { %v308_v38 = vadd.f32 %v292_v2, %v207_v52  ;;  %v309_v39 = vadd.f32 %v293_v3, %v208_v42  ;;  %v310_v30 = vadd.f32 %v294_v4, %v209_v6  ;;  %v311_v0 = vadd.f32 %v295_v8, %v210_v43 }
  0x8b   :  { %v312_v29 = vadd.f32 %v296_v10, %v211_v14  ;;  %v313_v12 = vadd.f32 %v297_v33, %v212_v15  ;;  %v314_v32 = vadd.f32 %v298_v35, %v213_v31  ;;  %v11630_v6 = vrot.slane %v7776_v11, %v7725_v60 }
  0x8c   :  { %v11631_v46 = vrot.slane %v7794_v16, %v7725_v60  ;;  %v11632_v49 = vrot.slane %v7798_v17, %v7725_v60  ;;  %v11633_v1 = vrot.slane %v7802_v18, %v7725_v60  ;;  %v11634_v3 = vrot.slane %v7806_v19, %v7725_v60 }
  0x8d   :  { %v387_v44 = vmul.f32 %v11630_v6, %v8159_v54  ;;  %v11635_v8 = vrot.slane %v7810_v20, %v7725_v60  ;;  %v11636_v41 = vrot.slane %v7814_v21, %v7725_v60  ;;  %v11637_v43 = vrot.slane %v7818_v22, %v7725_v60 }
  0x8e   :  { %v388_v48 = vmul.f32 %v11631_v46, %v8159_v54  ;;  %v389_v51 = vmul.f32 %v11632_v49, %v8159_v54  ;;  %v390_v2 = vmul.f32 %v11633_v1, %v8159_v54  ;;  %v391_v4 = vmul.f32 %v11634_v3, %v8159_v54  ;;  %v11643_v1 = vld [vmem:[#allocation29_spill] sm:$0xff] }
  0x8f   :  { %v392_v40 = vmul.f32 %v11635_v8, %v8159_v54  ;;  %v393_v42 = vmul.f32 %v11636_v41, %v8159_v54  ;;  %v394_v10 = vmul.f32 %v11637_v43, %v8159_v54  ;;  %v11638_v14 = vrot.slane %v7822_v23, %v7725_v60 }
  0x90   :  { %v11639_v31 = vrot.slane %v7826_v24, %v7725_v60  ;;  %v11640_v34 = vrot.slane %v7830_v25, %v7725_v60  ;;  %v11641_v6 = vmov %v7838_v28  ;;  %v11644_v3 = vrot.slane %v11643_v1, %v7725_v60 }
  0x91   :  { %v395_v15 = vmul.f32 %v11638_v14, %v8159_v54  ;;  %v11642_v46 = vrot.slane %v11641_v6, %v7725_v60  ;;  %v403_v41 = vadd.f32 %v387_v44, %v302_v36  ;;  %v404_v43 = vadd.f32 %v388_v48, %v303_v27  ;;  %v8225_v14 = vpop.permute.xlu0 %419  ;;  %v11646_v6 = vld [vmem:[#allocation11_spill] sm:$0xff] }
  0x92   :  { %v396_v33 = vmul.f32 %v11639_v31, %v8159_v54  ;;  %v397_v35 = vmul.f32 %v11640_v34, %v8159_v54  ;;  %v399_v8 = vmul.f32 %v11644_v3, %v8159_v54  ;;  %11645 = vst [vmem:[#allocation29_spill] sm:$0xff] %v8225_v14  ;;  %v405_v31 = vadd.f32 %v389_v51, %v304_v7  ;;  %v11647_v3 = vld [vmem:[#allocation8_spill] sm:$0xff] }
  0x93   :  { %v398_v49 = vmul.f32 %v11642_v46, %v8159_v54  ;;  %v406_v59 = vadd.f32 %v390_v2, %v305_v9  ;;  %v407_v52 = vadd.f32 %v391_v4, %v306_v5  ;;  %v408_v61 = vadd.f32 %v392_v40, %v307_v37  ;;  %v11650_v9 = vld [vmem:[#allocation12_spill] sm:$0xff] }
  0x94   :  { %v409_v45 = vadd.f32 %v393_v42, %v308_v38  ;;  %v410_v34 = vadd.f32 %v394_v10, %v309_v39  ;;  %v411_v47 = vadd.f32 %v395_v15, %v310_v30  ;;  %v412_v28 = vadd.f32 %v396_v33, %v311_v0  ;;  %v11651_v0 = vld [vmem:[#allocation13_spill] sm:$0xff] }
  0x95   :  { %v413_v26 = vadd.f32 %v397_v35, %v312_v29  ;;  %v414_v53 = vadd.f32 %v398_v49, %v313_v12  ;;  %v415_v46 = vadd.f32 %v399_v8, %v314_v32  ;;  %v11648_v27 = vrot.slane %v11647_v3, %v7725_v60  ;;  %v11660_v49 = vld [vmem:[#allocation14_spill] sm:$0xff] }
  0x96   :  { %v11649_v5 = vrot.slane %v7705_v55, %v7725_v60  ;;  %v11652_v29 = vrot.slane %v7710_v56, %v7725_v60  ;;  %v11653_v38 = vrot.slane %v7715_v57, %v7725_v60  ;;  %v11654_v32 = vrot.slane %v7720_v58, %v7725_v60  ;;  %v11665_v12 = vld [vmem:[#allocation6_spill] sm:$0xff] }
  0x97   :  { %v488_v36 = vmul.f32 %v11648_v27, %v8225_v14  ;;  %v11655_v48 = vrot.slane %v7733_v62, %v7725_v60  ;;  %v11656_v2 = vrot.slane %v7738_v63, %v7725_v60  ;;  %v11657_v40 = vrot.slane %v11646_v6, %v7725_v60 }
  0x98   :  { %v489_v7 = vmul.f32 %v11649_v5, %v8225_v14  ;;  %v490_v37 = vmul.f32 %v11652_v29, %v8225_v14  ;;  %v491_v39 = vmul.f32 %v11653_v38, %v8225_v14  ;;  %v492_v44 = vmul.f32 %v11654_v32, %v8225_v14  ;;  %v11662_v5 = vld [vmem:[#allocation16_spill] sm:$0xff] }
  0x99   :  { %v493_v51 = vmul.f32 %v11655_v48, %v8225_v14  ;;  %v494_v4 = vmul.f32 %v11656_v2, %v8225_v14  ;;  %v495_v42 = vmul.f32 %v11657_v40, %v8225_v14  ;;  %v11658_v10 = vrot.slane %v11650_v9, %v7725_v60 }
  0x9a   :  { %v11659_v33 = vrot.slane %v11651_v0, %v7725_v60  ;;  %v11661_v8 = vrot.slane %v11660_v49, %v7725_v60  ;;  %v11663_v29 = vrot.slane %v11662_v5, %v7725_v60  ;;  %v11664_v32 = vrot.slane %v7786_v13, %v7725_v60  ;;  %v8292_v0 = vpop.permute.xlu1 %520 }
  0x9b   :  { %v496_v15 = vmul.f32 %v11658_v10, %v8225_v14  ;;  %v504_v40 = vadd.f32 %v488_v36, %v403_v41  ;;  %v505_v10 = vadd.f32 %v489_v7, %v404_v43  ;;  %v506_v30 = vadd.f32 %v490_v37, %v405_v31  ;;  %11667 = vst [vmem:[#allocation36_spill] sm:$0xff] %v8292_v0 }
  0x9c   :  { %v497_v35 = vmul.f32 %v11659_v33, %v8225_v14  ;;  %v498_v27 = vmul.f32 %v11661_v8, %v8225_v14  ;;  %v499_v38 = vmul.f32 %v11663_v29, %v8225_v14  ;;  %v500_v48 = vmul.f32 %v11664_v32, %v8225_v14 }
  0x9d   :  { %v8290_v8 = vsub.s32 5, %v11665_v12  ;;  %v507_v25 = vadd.f32 %v491_v39, %v406_v59  ;;  %v508_v54 = vadd.f32 %v492_v44, %v407_v52  ;;  %v509_v29 = vadd.f32 %v493_v51, %v408_v61  ;;  %v8358_v59 = vpop.permute.xlu0 %621 }
  0x9e   :  { %v510_v9 = vadd.f32 %v494_v4, %v409_v45  ;;  %v511_v60 = vadd.f32 %v495_v42, %v410_v34  ;;  %v512_v32 = vadd.f32 %v496_v15, %v411_v47  ;;  %v513_v14 = vadd.f32 %v497_v35, %v412_v28  ;;  %11684 = vst [vmem:[#allocation37_spill] sm:$0xff] %v8358_v59 }
  0x9f   :  { %11666 = vst [vmem:[#allocation8_spill] sm:$0xff] %v8290_v8  ;;  %v514_v6 = vadd.f32 %v498_v27, %v413_v26  ;;  %v515_v2 = vadd.f32 %v499_v38, %v414_v53  ;;  %v516_v41 = vadd.f32 %v500_v48, %v415_v46  ;;  %v11668_v26 = vld [vmem:[#allocation10_spill] sm:$0xff] }
  0xa0   :  { %v11669_v53 = vrot.slane %v7776_v11, %v11668_v26  ;;  %v11670_v47 = vrot.slane %v7794_v16, %v11668_v26  ;;  %v11671_v31 = vrot.slane %v7798_v17, %v11668_v26  ;;  %v11672_v7 = vrot.slane %v7802_v18, %v11668_v26 }
  0xa1   :  { %v11673_v39 = vrot.slane %v7806_v19, %v11668_v26  ;;  %v11674_v51 = vrot.slane %v7810_v20, %v11668_v26  ;;  %v11675_v42 = vrot.slane %v7814_v21, %v11668_v26  ;;  %v11676_v35 = vrot.slane %v7818_v22, %v11668_v26 }
  0xa2   :  { %v589_v28 = vmul.f32 %v11669_v53, %v8292_v0  ;;  %v590_v52 = vmul.f32 %v11670_v47, %v8292_v0  ;;  %v591_v34 = vmul.f32 %v11671_v31, %v8292_v0  ;;  %v592_v37 = vmul.f32 %v11672_v7, %v8292_v0  ;;  %v11679_v31 = vld [vmem:[#allocation27_spill] sm:$0xff] }
  0xa3   :  { %v593_v44 = vmul.f32 %v11673_v39, %v8292_v0  ;;  %v594_v4 = vmul.f32 %v11674_v51, %v8292_v0  ;;  %v595_v15 = vmul.f32 %v11675_v42, %v8292_v0  ;;  %v596_v27 = vmul.f32 %v11676_v35, %v8292_v0  ;;  %v11681_v51 = vld [vmem:[#allocation28_spill] sm:$0xff] }
  0xa4   :  { %v11677_v38 = vrot.slane %v7822_v23, %v11668_v26  ;;  %v11678_v53 = vrot.slane %v7826_v24, %v11668_v26  ;;  %v11680_v7 = vrot.slane %v11679_v31, %v11668_v26  ;;  %v11682_v42 = vrot.slane %v11681_v51, %v11668_v26 }
  0xa5   :  { %v11683_v46 = vrot.slane %v11643_v1, %v11668_v26  ;;  %v605_v45 = vadd.f32 %v589_v28, %v504_v40  ;;  %v606_v61 = vadd.f32 %v590_v52, %v505_v10  ;;  %v608_v36 = vadd.f32 %v592_v37, %v507_v25 }
  0xa6   :  { %v597_v48 = vmul.f32 %v11677_v38, %v8292_v0  ;;  %v598_v47 = vmul.f32 %v11678_v53, %v8292_v0  ;;  %v599_v39 = vmul.f32 %v11680_v7, %v8292_v0  ;;  %v600_v35 = vmul.f32 %v11682_v42, %v8292_v0 }
  0xa7   :  { %v601_v38 = vmul.f32 %v11683_v46, %v8292_v0  ;;  %v607_v53 = vadd.f32 %v591_v34, %v506_v30  ;;  %v609_v43 = vadd.f32 %v593_v44, %v508_v54  ;;  %v610_v33 = vadd.f32 %v594_v4, %v509_v29  ;;  %v11692_v46 = vld [vmem:[#allocation11_spill] sm:$0xff]  ;;  %v11694_v4 = vld [vmem:[#allocation12_spill] sm:$0xff] }
  0xa8   :  { %v611_v12 = vadd.f32 %v595_v15, %v510_v9  ;;  %v612_v7 = vadd.f32 %v596_v27, %v511_v60  ;;  %v613_v19 = vadd.f32 %v597_v48, %v512_v32  ;;  %v614_v18 = vadd.f32 %v598_v47, %v513_v14  ;;  %v11696_v48 = vld [vmem:[#allocation13_spill] sm:$0xff]  ;;  %v8424_v60 = vpop.permute.xlu1 %722 }
  0xa9   :  { %v615_v17 = vadd.f32 %v599_v39, %v514_v6  ;;  %v616_v16 = vadd.f32 %v600_v35, %v515_v2  ;;  %v617_v42 = vadd.f32 %v601_v38, %v516_v41  ;;  %v11685_v40 = vrot.slane %v11647_v3, %v11668_v26  ;;  %11701 = vst [vmem:[#allocation38_spill] sm:$0xff] %v8424_v60 }
  0xaa   :  { %v11686_v54 = vrot.slane %v7705_v55, %v11668_v26  ;;  %v11687_v14 = vrot.slane %v7710_v56, %v11668_v26  ;;  %v11688_v30 = vrot.slane %v7715_v57, %v11668_v26  ;;  %v11689_v29 = vrot.slane %v7720_v58, %v11668_v26 }
  0xab   :  { %v690_v10 = vmul.f32 %v11685_v40, %v8358_v59  ;;  %v11690_v41 = vrot.slane %v7733_v62, %v11668_v26  ;;  %v11691_v52 = vrot.slane %v7738_v63, %v11668_v26  ;;  %v11693_v37 = vrot.slane %v11692_v46, %v11668_v26 }
  0xac   :  { %v691_v25 = vmul.f32 %v11686_v54, %v8358_v59  ;;  %v692_v9 = vmul.f32 %v11687_v14, %v8358_v59  ;;  %v693_v2 = vmul.f32 %v11688_v30, %v8358_v59  ;;  %v694_v32 = vmul.f32 %v11689_v29, %v8358_v59 }
  0xad   :  { %v695_v28 = vmul.f32 %v11690_v41, %v8358_v59  ;;  %v696_v34 = vmul.f32 %v11691_v52, %v8358_v59  ;;  %v697_v44 = vmul.f32 %v11693_v37, %v8358_v59  ;;  %v11695_v15 = vrot.slane %v11694_v4, %v11668_v26 }
  0xae   :  { %v11697_v47 = vrot.slane %v11696_v48, %v11668_v26  ;;  %v11698_v35 = vrot.slane %v11660_v49, %v11668_v26  ;;  %v11699_v40 = vrot.slane %v11662_v5, %v11668_v26  ;;  %v11700_v14 = vrot.slane %v7786_v13, %v11668_v26 }
  0xaf   :  { %v698_v27 = vmul.f32 %v11695_v15, %v8358_v59  ;;  %v706_v41 = vadd.f32 %v690_v10, %v605_v45  ;;  %v707_v52 = vadd.f32 %v691_v25, %v606_v61  ;;  %v710_v6 = vadd.f32 %v694_v32, %v609_v43  ;;  %v11702_v25 = vld [vmem:[#allocation31_spill] sm:$0xff]  ;;  %v11709_v32 = vld [vmem:[#allocation20_spill] sm:$0xff] }
  0xb0   :  { %v699_v39 = vmul.f32 %v11697_v47, %v8358_v59  ;;  %v700_v38 = vmul.f32 %v11698_v35, %v8358_v59  ;;  %v701_v54 = vmul.f32 %v11699_v40, %v8358_v59  ;;  %v702_v30 = vmul.f32 %v11700_v14, %v8358_v59 }
  0xb1   :  { %v708_v47 = vadd.f32 %v692_v9, %v607_v53  ;;  %v709_v35 = vadd.f32 %v693_v2, %v608_v36  ;;  %v711_v40 = vadd.f32 %v695_v28, %v610_v33  ;;  %v712_v50 = vadd.f32 %v696_v34, %v611_v12  ;;  %v8490_v33 = vpop.permute.xlu0 %823 }
  0xb2   :  { %v713_v0 = vadd.f32 %v697_v44, %v612_v7  ;;  %v714_v14 = vadd.f32 %v698_v27, %v613_v19  ;;  %v715_v59 = vadd.f32 %v699_v39, %v614_v18  ;;  %v716_v26 = vadd.f32 %v700_v38, %v615_v17  ;;  %v11703_v17 = vld [vmem:[#allocation30_spill] sm:$0xff]  ;;  %v11707_v7 = vld [vmem:[#allocation19_spill] sm:$0xff]  ;;  %v11711_v44 = vld [vmem:[#allocation21_spill] sm:$0xff]  ;;  %11721 = vst [vmem:[#allocation39_spill] sm:$0xff] %v8490_v33 }
  0xb3   :  { %v717_v29 = vadd.f32 %v701_v54, %v616_v16  ;;  %v718_v45 = vadd.f32 %v702_v30, %v617_v42  ;;  %v11704_v16 = vrot.slane %v7776_v11, %v11703_v17  ;;  %v11705_v19 = vld [vmem:[#allocation18_spill] sm:$0xff]  ;;  %v11708_v42 = vrot.slane %v11707_v7, %v11703_v17 }
  0xb4   :  { %v11706_v43 = vrot.slane %v11705_v19, %v11703_v17  ;;  %v11710_v28 = vrot.slane %v11709_v32, %v11703_v17  ;;  %v11712_v27 = vrot.slane %v11711_v44, %v11703_v17  ;;  %v11713_v38 = vrot.slane %v7810_v20, %v11703_v17 }
  0xb5   :  { %v791_v18 = vmul.f32 %v11704_v16, %v8424_v60  ;;  %v793_v9 = vmul.f32 %v11708_v42, %v8424_v60  ;;  %v11714_v30 = vrot.slane %v7814_v21, %v11703_v17  ;;  %v11717_v10 = vrot.slane %v7826_v24, %v11703_v17 }
  0xb6   :  { %v792_v53 = vmul.f32 %v11706_v43, %v8424_v60  ;;  %v794_v34 = vmul.f32 %v11710_v28, %v8424_v60  ;;  %v795_v39 = vmul.f32 %v11712_v27, %v8424_v60  ;;  %v796_v54 = vmul.f32 %v11713_v38, %v8424_v60 }
  0xb7   :  { %v797_v16 = vmul.f32 %v11714_v30, %v8424_v60  ;;  %v11715_v43 = vrot.slane %v7818_v22, %v11703_v17  ;;  %v11716_v28 = vrot.slane %v7822_v23, %v11703_v17  ;;  %v800_v38 = vmul.f32 %v11717_v10, %v8424_v60 }
  0xb8   :  { %v11718_v61 = vrot.slane %v11679_v31, %v11703_v17  ;;  %v11719_v15 = vrot.slane %v11681_v51, %v11703_v17  ;;  %v11720_v37 = vrot.slane %v11643_v1, %v11703_v17  ;;  %v807_v2 = vadd.f32 %v791_v18, %v706_v41 }
  0xb9   :  { %v798_v42 = vmul.f32 %v11715_v43, %v8424_v60  ;;  %v799_v27 = vmul.f32 %v11716_v28, %v8424_v60  ;;  %v808_v12 = vadd.f32 %v792_v53, %v707_v52  ;;  %v809_v10 = vadd.f32 %v793_v9, %v708_v47 }
  0xba   :  { %v801_v30 = vmul.f32 %v11718_v61, %v8424_v60  ;;  %v802_v43 = vmul.f32 %v11719_v15, %v8424_v60  ;;  %v803_v28 = vmul.f32 %v11720_v37, %v8424_v60  ;;  %v810_v36 = vadd.f32 %v794_v34, %v709_v35 }
  0xbb   :  { %v811_v8 = vadd.f32 %v795_v39, %v710_v6  ;;  %v812_v24 = vadd.f32 %v796_v54, %v711_v40  ;;  %v813_v31 = vadd.f32 %v797_v16, %v712_v50  ;;  %v814_v61 = vadd.f32 %v798_v42, %v713_v0 }
  0xbc   :  { %v815_v23 = vadd.f32 %v799_v27, %v714_v14  ;;  %v816_v22 = vadd.f32 %v800_v38, %v715_v59  ;;  %v817_v21 = vadd.f32 %v801_v30, %v716_v26  ;;  %v818_v51 = vadd.f32 %v802_v43, %v717_v29 }
  0xbd   :  { %v819_v15 = vadd.f32 %v803_v28, %v718_v45  ;;  %v11722_v41 = vrot.slane %v11647_v3, %v11703_v17  ;;  %v11723_v6 = vrot.slane %v7705_v55, %v11703_v17  ;;  %v11724_v59 = vrot.slane %v7710_v56, %v11703_v17 }
  0xbe   :  { %v11725_v29 = vrot.slane %v7715_v57, %v11703_v17  ;;  %v11726_v35 = vrot.slane %v7720_v58, %v11703_v17  ;;  %v11727_v14 = vrot.slane %v7733_v62, %v11703_v17  ;;  %v11728_v18 = vrot.slane %v7738_v63, %v11703_v17 }
  0xbf   :  { %v892_v52 = vmul.f32 %v11722_v41, %v8490_v33  ;;  %v893_v37 = vmul.f32 %v11723_v6, %v8490_v33  ;;  %v894_v26 = vmul.f32 %v11724_v59, %v8490_v33  ;;  %v11729_v9 = vrot.slane %v11692_v46, %v11703_v17 }
  0xc0   :  { %v895_v47 = vmul.f32 %v11725_v29, %v8490_v33  ;;  %v896_v40 = vmul.f32 %v11726_v35, %v8490_v33  ;;  %v897_v45 = vmul.f32 %v11727_v14, %v8490_v33  ;;  %v898_v53 = vmul.f32 %v11728_v18, %v8490_v33  ;;  %v11735_v14 = vld [vmem:[#allocation6_spill] sm:$0xff] }
  0xc1   :  { %v899_v34 = vmul.f32 %v11729_v9, %v8490_v33  ;;  %v11730_v39 = vrot.slane %v11694_v4, %v11703_v17  ;;  %v11731_v16 = vrot.slane %v11696_v48, %v11703_v17  ;;  %v11732_v27 = vrot.slane %v11660_v49, %v11703_v17 }
  0xc2   :  { %v11733_v30 = vrot.slane %v11662_v5, %v11703_v17  ;;  %v11734_v28 = vrot.slane %v7786_v13, %v11703_v17  ;;  %v1067_v6 = vrot.slane %v11692_v46, %v11702_v25  ;;  %v908_v59 = vadd.f32 %v892_v52, %v807_v2 }
  0xc3   :  { %v900_v54 = vmul.f32 %v11730_v39, %v8490_v33  ;;  %v901_v42 = vmul.f32 %v11731_v16, %v8490_v33  ;;  %v902_v38 = vmul.f32 %v11732_v27, %v8490_v33  ;;  %v909_v29 = vadd.f32 %v893_v37, %v808_v12 }
  0xc4   :  { %v903_v43 = vmul.f32 %v11733_v30, %v8490_v33  ;;  %v904_v41 = vmul.f32 %v11734_v28, %v8490_v33  ;;  %v1071_v35 = vrot.slane %v11694_v4, %v11702_v25  ;;  %v8555_v18 = vsub.s32 6, %v11735_v14  ;;  %v8557_v30 = vpop.permute.xlu1 %924  ;;  %v11755_v14 = vld [vmem:[#allocation28_spill] sm:$0xff] }
  0xc5   :  { %v910_v9 = vadd.f32 %v894_v26, %v809_v10  ;;  %v911_v39 = vadd.f32 %v895_v47, %v810_v36  ;;  %v912_v16 = vadd.f32 %v896_v40, %v811_v8  ;;  %v913_v27 = vadd.f32 %v897_v45, %v812_v24  ;;  %11737 = vst [vmem:[#allocation41_spill] sm:$0xff] %v8557_v30  ;;  %v11743_v40 = vld [vmem:[#allocation22_spill] sm:$0xff] }
  0xc6   :  { %11736 = vst [vmem:[#allocation40_spill] sm:$0xff] %v8555_v18  ;;  %v914_v0 = vadd.f32 %v898_v53, %v813_v31  ;;  %v915_v50 = vadd.f32 %v899_v34, %v814_v61  ;;  %v916_v28 = vadd.f32 %v900_v54, %v815_v23  ;;  %v917_v20 = vadd.f32 %v901_v42, %v816_v22  ;;  %v11745_v34 = vld [vmem:[#allocation23_spill] sm:$0xff] }
  0xc7   :  { %v918_v33 = vadd.f32 %v902_v38, %v817_v21  ;;  %v919_v60 = vadd.f32 %v903_v43, %v818_v51  ;;  %v920_v2 = vadd.f32 %v904_v41, %v819_v15  ;;  %v1075_v12 = vrot.slane %v11696_v48, %v11702_v25  ;;  %v11747_v38 = vld [vmem:[#allocation24_spill] sm:$0xff]  ;;  %v11753_v61 = vld [vmem:[#allocation27_spill] sm:$0xff]  ;;  %v8623_v48 = vpop.permute.xlu0 %1025 }
  0xc8   :  { %v1079_v52 = vrot.slane %v11660_v49, %v11702_v25  ;;  %v1083_v36 = vrot.slane %v11662_v5, %v11702_v25  ;;  %v1087_v24 = vrot.slane %v7786_v13, %v11702_v25  ;;  %v11738_v21 = vrot.slane %v7776_v11, %v11702_v25  ;;  %11758 = vst [vmem:[#allocation42_spill] sm:$0xff] %v8623_v48 }
  0xc9   :  { %v11739_v23 = vrot.slane %v11705_v19, %v11702_v25  ;;  %v11740_v51 = vrot.slane %v11707_v7, %v11702_v25  ;;  %v11741_v15 = vrot.slane %v11709_v32, %v11702_v25  ;;  %v11742_v26 = vrot.slane %v11711_v44, %v11702_v25 }
  0xca   :  { %v993_v22 = vmul.f32 %v11738_v21, %v8557_v30  ;;  %v11744_v45 = vrot.slane %v11743_v40, %v11702_v25  ;;  %v11746_v54 = vrot.slane %v11745_v34, %v11702_v25  ;;  %v11748_v43 = vrot.slane %v11747_v38, %v11702_v25  ;;  %v11749_v21 = vld [vmem:[#allocation25_spill] sm:$0xff] }
  0xcb   :  { %v994_v31 = vmul.f32 %v11739_v23, %v8557_v30  ;;  %v995_v10 = vmul.f32 %v11740_v51, %v8557_v30  ;;  %v996_v37 = vmul.f32 %v11741_v15, %v8557_v30  ;;  %v997_v47 = vmul.f32 %v11742_v26, %v8557_v30  ;;  %v11751_v15 = vld [vmem:[#allocation26_spill] sm:$0xff] }
  0xcc   :  { %v998_v53 = vmul.f32 %v11744_v45, %v8557_v30  ;;  %v999_v42 = vmul.f32 %v11746_v54, %v8557_v30  ;;  %v1000_v41 = vmul.f32 %v11748_v43, %v8557_v30  ;;  %v11750_v23 = vrot.slane %v11749_v21, %v11702_v25 }
  0xcd   :  { %v11752_v26 = vrot.slane %v11751_v15, %v11702_v25  ;;  %v11754_v8 = vrot.slane %v11753_v61, %v11702_v25  ;;  %v11756_v17 = vrot.slane %v11755_v14, %v11702_v25  ;;  %v11757_v13 = vrot.slane %v11643_v1, %v11702_v25 }
  0xce   :  { %v1001_v51 = vmul.f32 %v11750_v23, %v8557_v30  ;;  %v1009_v5 = vadd.f32 %v993_v22, %v908_v59  ;;  %v1010_v49 = vadd.f32 %v994_v31, %v909_v29  ;;  %v1012_v4 = vadd.f32 %v996_v37, %v911_v39 }
  0xcf   :  { %v1002_v45 = vmul.f32 %v11752_v26, %v8557_v30  ;;  %v1003_v54 = vmul.f32 %v11754_v8, %v8557_v30  ;;  %v1004_v43 = vmul.f32 %v11756_v17, %v8557_v30  ;;  %v1005_v23 = vmul.f32 %v11757_v13, %v8557_v30 }
  0xd0   :  { %v1011_v26 = vadd.f32 %v995_v10, %v910_v9  ;;  %v1013_v46 = vadd.f32 %v997_v47, %v912_v16  ;;  %v1014_v19 = vadd.f32 %v998_v53, %v913_v27  ;;  %v1015_v11 = vadd.f32 %v999_v42, %v914_v0 }
  0xd1   :  { %v1016_v8 = vadd.f32 %v1000_v41, %v915_v50  ;;  %v1017_v61 = vadd.f32 %v1001_v51, %v916_v28  ;;  %v1018_v15 = vadd.f32 %v1002_v45, %v917_v20  ;;  %v1019_v21 = vadd.f32 %v1003_v54, %v918_v33 }
  0xd2   :  { %v1020_v14 = vadd.f32 %v1004_v43, %v919_v60  ;;  %v1021_v17 = vadd.f32 %v1005_v23, %v920_v2  ;;  %v11759_v13 = vrot.slane %v11647_v3, %v11702_v25  ;;  %v11760_v29 = vrot.slane %v7705_v55, %v11702_v25 }
  0xd3   :  { %v11761_v60 = vrot.slane %v7710_v56, %v11702_v25  ;;  %v11762_v0 = vrot.slane %v7715_v57, %v11702_v25  ;;  %v11763_v16 = vrot.slane %v7720_v58, %v11702_v25  ;;  %v11764_v28 = vrot.slane %v7733_v62, %v11702_v25 }
  0xd4   :  { %v1094_v59 = vmul.f32 %v11759_v13, %v8623_v48  ;;  %v1095_v9 = vmul.f32 %v11760_v29, %v8623_v48  ;;  %v11765_v22 = vrot.slane %v7738_v63, %v11702_v25  ;;  %v1101_v10 = vmul.f32 %v1067_v6, %v8623_v48 }
  0xd5   :  { %v1096_v33 = vmul.f32 %v11761_v60, %v8623_v48  ;;  %v1097_v39 = vmul.f32 %v11762_v0, %v8623_v48  ;;  %v1098_v27 = vmul.f32 %v11763_v16, %v8623_v48  ;;  %v1099_v2 = vmul.f32 %v11764_v28, %v8623_v48 }
  0xd6   :  { %v1100_v31 = vmul.f32 %v11765_v22, %v8623_v48  ;;  %v1102_v37 = vmul.f32 %v1071_v35, %v8623_v48  ;;  %v1103_v47 = vmul.f32 %v1075_v12, %v8623_v48  ;;  %v1104_v53 = vmul.f32 %v1079_v52, %v8623_v48  ;;  %v8671_v52 = vpop.permute.xlu1 %1126 }
  0xd7   :  { %v1105_v42 = vmul.f32 %v1083_v36, %v8623_v48  ;;  %v1106_v41 = vmul.f32 %v1087_v24, %v8623_v48  ;;  %v1110_v45 = vadd.f32 %v1094_v59, %v1009_v5  ;;  %v1111_v54 = vadd.f32 %v1095_v9, %v1010_v49  ;;  %v11767_v49 = vld [vmem:[#allocation25_spill] sm:$0xff]  ;;  %v11768_v9 = vld [vmem:[#allocation26_spill] sm:$0xff] }
  0xd8   :  { %v11766_v6 = vmov %v11747_v38  ;;  %v1112_v35 = vadd.f32 %v1096_v33, %v1011_v26  ;;  %v1113_v13 = vadd.f32 %v1097_v39, %v1012_v4  ;;  %v1114_v12 = vadd.f32 %v1098_v27, %v1013_v46  ;;  %v11769_v26 = vld [vmem:[#allocation27_spill] sm:$0xff]  ;;  %v11770_v46 = vld [vmem:[#allocation28_spill] sm:$0xff] }
  0xd9   :  { %v1115_v29 = vadd.f32 %v1099_v2, %v1014_v19  ;;  %v1116_v36 = vadd.f32 %v1100_v31, %v1015_v11  ;;  %v1117_v60 = vadd.f32 %v1101_v10, %v1016_v8  ;;  %v1118_v24 = vadd.f32 %v1102_v37, %v1017_v61  ;;  %v11771_v61 = vld [vmem:[#allocation15_spill] sm:$0xff]  ;;  %v11774_v8 = vld [vmem:[#allocation18_spill] sm:$0xff] }
  0xda   :  { %v1119_v0 = vadd.f32 %v1103_v47, %v1018_v15  ;;  %v1120_v16 = vadd.f32 %v1104_v53, %v1019_v21  ;;  %v1121_v28 = vadd.f32 %v1105_v42, %v1020_v14  ;;  %v1122_v5 = vadd.f32 %v1106_v41, %v1021_v17  ;;  %v11772_v21 = vld [vmem:[#allocation8_spill] sm:$0xff]  ;;  %v8737_v48 = vpop.permute.xlu1 %1328 }
  0xdb   :  { %v11773_v14 = vrot.slane %v11771_v61, %v11772_v21  ;;  %v11775_v17 = vrot.slane %v11774_v8, %v11772_v21  ;;  %v11776_v39 = vrot.slane %v11707_v7, %v11772_v21  ;;  %v1241_v2 = vrot.slane %v11647_v3, %v11772_v21 }
  0xdc   :  { %v11777_v31 = vrot.slane %v11709_v32, %v11772_v21  ;;  %v11778_v37 = vrot.slane %v11711_v44, %v11772_v21  ;;  %v11779_v53 = vrot.slane %v11743_v40, %v11772_v21  ;;  %v11780_v41 = vrot.slane %v11745_v34, %v11772_v21 }
  0xdd   :  { %v1195_v15 = vmul.f32 %v11773_v14, %v8671_v52  ;;  %v1196_v33 = vmul.f32 %v11775_v17, %v8671_v52  ;;  %v1197_v27 = vmul.f32 %v11776_v39, %v8671_v52  ;;  %v11781_v14 = vrot.slane %v11766_v6, %v11772_v21 }
  0xde   :  { %v1198_v10 = vmul.f32 %v11777_v31, %v8671_v52  ;;  %v1199_v47 = vmul.f32 %v11778_v37, %v8671_v52  ;;  %v1200_v42 = vmul.f32 %v11779_v53, %v8671_v52  ;;  %v1201_v3 = vmul.f32 %v11780_v41, %v8671_v52 }
  0xdf   :  { %v1202_v17 = vmul.f32 %v11781_v14, %v8671_v52  ;;  %v11782_v39 = vrot.slane %v11767_v49, %v11772_v21  ;;  %v11783_v37 = vrot.slane %v11768_v9, %v11772_v21  ;;  %v11784_v11 = vrot.slane %v11769_v26, %v11772_v21 }
  0xe0   :  { %v11785_v19 = vrot.slane %v11770_v46, %v11772_v21  ;;  %v11786_v4 = vrot.slane %v11643_v1, %v11772_v21  ;;  %v1211_v22 = vadd.f32 %v1195_v15, %v1110_v45  ;;  %v1212_v59 = vadd.f32 %v1196_v33, %v1111_v54 }
  0xe1   :  { %v1203_v31 = vmul.f32 %v11782_v39, %v8671_v52  ;;  %v1204_v53 = vmul.f32 %v11783_v37, %v8671_v52  ;;  %v1205_v41 = vmul.f32 %v11784_v11, %v8671_v52  ;;  %v1213_v23 = vadd.f32 %v1197_v27, %v1112_v35 }
  0xe2   :  { %v1206_v14 = vmul.f32 %v11785_v19, %v8671_v52  ;;  %v1207_v39 = vmul.f32 %v11786_v4, %v8671_v52  ;;  %v1214_v43 = vadd.f32 %v1198_v10, %v1113_v13  ;;  %v1215_v37 = vadd.f32 %v1199_v47, %v1114_v12  ;;  %v8749_v12 = vpop.permute.xlu0 %1227 }
  0xe3   :  { %v1216_v51 = vadd.f32 %v1200_v42, %v1115_v29  ;;  %v1217_v20 = vadd.f32 %v1201_v3, %v1116_v36  ;;  %v1218_v50 = vadd.f32 %v1202_v17, %v1117_v60  ;;  %v1219_v38 = vadd.f32 %v1203_v31, %v1118_v24  ;;  %v11787_v36 = vld [vmem:[#allocation11_spill] sm:$0xff]  ;;  %v11788_v60 = vld [vmem:[#allocation12_spill] sm:$0xff]  ;;  %v11789_v24 = vld [vmem:[#allocation13_spill] sm:$0xff] }
  0xe4   :  { %v1220_v11 = vadd.f32 %v1204_v53, %v1119_v0  ;;  %v1221_v30 = vadd.f32 %v1205_v41, %v1120_v16  ;;  %v1222_v25 = vadd.f32 %v1206_v14, %v1121_v28  ;;  %v1223_v19 = vadd.f32 %v1207_v39, %v1122_v5  ;;  %v11792_v28 = vld [vmem:[#allocation16_spill] sm:$0xff]  ;;  %v11793_v5 = vld [vmem:[#allocation17_spill] sm:$0xff] }
  0xe5   :  { %v1245_v46 = vrot.slane %v7705_v55, %v11772_v21  ;;  %v1249_v45 = vrot.slane %v7710_v56, %v11772_v21  ;;  %v1253_v54 = vrot.slane %v7715_v57, %v11772_v21  ;;  %v1257_v35 = vrot.slane %v7720_v58, %v11772_v21 }
  0xe6   :  { %v1261_v13 = vrot.slane %v7733_v62, %v11772_v21  ;;  %v1265_v29 = vrot.slane %v7738_v63, %v11772_v21  ;;  %v1269_v55 = vrot.slane %v11787_v36, %v11772_v21  ;;  %v1273_v56 = vrot.slane %v11788_v60, %v11772_v21  ;;  %v11791_v62 = vld [vmem:[#allocation14_spill] sm:$0xff] }
  0xe7   :  { %v1277_v57 = vrot.slane %v11789_v24, %v11772_v21  ;;  %v11790_v58 = vrot.slane %v11771_v61, %v8555_v18  ;;  %v1281_v16 = vrot.slane %v11791_v62, %v11772_v21  ;;  %v1285_v63 = vrot.slane %v11792_v28, %v11772_v21 }
  0xe8   :  { %v1289_v4 = vrot.slane %v11793_v5, %v11772_v21  ;;  %v11794_v15 = vrot.slane %v11774_v8, %v8555_v18  ;;  %v11795_v27 = vrot.slane %v11707_v7, %v8555_v18  ;;  %v11796_v47 = vrot.slane %v11709_v32, %v8555_v18 }
  0xe9   :  { %v1397_v0 = vmul.f32 %v11790_v58, %v8737_v48  ;;  %v11797_v3 = vrot.slane %v11711_v44, %v8555_v18  ;;  %v11798_v31 = vrot.slane %v11743_v40, %v8555_v18  ;;  %v11799_v41 = vrot.slane %v11745_v34, %v8555_v18 }
  0xea   :  { %v1398_v33 = vmul.f32 %v11794_v15, %v8737_v48  ;;  %v1399_v10 = vmul.f32 %v11795_v27, %v8737_v48  ;;  %v1400_v42 = vmul.f32 %v11796_v47, %v8737_v48  ;;  %v1296_v39 = vmul.f32 %v1241_v2, %v8749_v12 }
  0xeb   :  { %v1401_v17 = vmul.f32 %v11797_v3, %v8737_v48  ;;  %v1402_v53 = vmul.f32 %v11798_v31, %v8737_v48  ;;  %v1403_v14 = vmul.f32 %v11799_v41, %v8737_v48  ;;  %v1297_v36 = vmul.f32 %v1245_v46, %v8749_v12 }
  0xec   :  { %v1298_v60 = vmul.f32 %v1249_v45, %v8749_v12  ;;  %v1299_v24 = vmul.f32 %v1253_v54, %v8749_v12  ;;  %v1300_v58 = vmul.f32 %v1257_v35, %v8749_v12  ;;  %v1301_v62 = vmul.f32 %v1261_v13, %v8749_v12 }
  0xed   :  { %v1302_v28 = vmul.f32 %v1265_v29, %v8749_v12  ;;  %v1303_v5 = vmul.f32 %v1269_v55, %v8749_v12  ;;  %v1304_v15 = vmul.f32 %v1273_v56, %v8749_v12  ;;  %v1305_v27 = vmul.f32 %v1277_v57, %v8749_v12 }
  0xee   :  { %v11800_v46 = vrot.slane %v11766_v6, %v8555_v18  ;;  %v1306_v45 = vmul.f32 %v1281_v16, %v8749_v12  ;;  %v1307_v54 = vmul.f32 %v1285_v63, %v8749_v12  ;;  %v1308_v35 = vmul.f32 %v1289_v4, %v8749_v12 }
  0xef   :  { %v11801_v13 = vrot.slane %v11767_v49, %v8555_v18  ;;  %v11802_v55 = vrot.slane %v11768_v9, %v8555_v18  ;;  %v1312_v57 = vadd.f32 %v1296_v39, %v1211_v22  ;;  %v1313_v47 = vadd.f32 %v1297_v36, %v1212_v59  ;;  %v11819_v39 = vld [vmem:[#allocation34_spill] sm:$0xff] }
  0xf0   :  { %v1404_v2 = vmul.f32 %v11800_v46, %v8737_v48  ;;  %v1314_v3 = vadd.f32 %v1298_v60, %v1213_v23  ;;  %v1315_v31 = vadd.f32 %v1299_v24, %v1214_v43  ;;  %v1316_v41 = vadd.f32 %v1300_v58, %v1215_v37  ;;  %v11820_v60 = vld [vmem:[#allocation33_spill] sm:$0xff] }
  0xf1   :  { %v1405_v29 = vmul.f32 %v11801_v13, %v8737_v48  ;;  %v1406_v56 = vmul.f32 %v11802_v55, %v8737_v48  ;;  %v1317_v16 = vadd.f32 %v1301_v62, %v1216_v51  ;;  %v1318_v46 = vadd.f32 %v1302_v28, %v1217_v20  ;;  %v11804_v55 = vld [vmem:[#allocation28_spill] sm:$0xff]  ;;  %v11821_v58 = vld [vmem:[#allocation9_spill] sm:$0xff] }
  0xf2   :  { %v1319_v63 = vadd.f32 %v1303_v5, %v1218_v50  ;;  %v1320_v6 = vadd.f32 %v1304_v15, %v1219_v38  ;;  %v1321_v4 = vadd.f32 %v1305_v27, %v1220_v11  ;;  %v11803_v49 = vrot.slane %v11769_v26, %v8555_v18  ;;  %v11822_v27 = vld [vmem:[#allocation35_spill] sm:$0xff] }
  0xf3   :  { %v1322_v34 = vadd.f32 %v1306_v45, %v1221_v30  ;;  %v1323_v40 = vadd.f32 %v1307_v54, %v1222_v25  ;;  %v1324_v44 = vadd.f32 %v1308_v35, %v1223_v19  ;;  %v11805_v59 = vrot.slane %v11804_v55, %v8555_v18  ;;  %v11823_v35 = vld [vmem:[#allocation29_spill] sm:$0xff] }
  0xf4   :  { %v1407_v13 = vmul.f32 %v11803_v49, %v8737_v48  ;;  %v11806_v20 = vrot.slane %v11643_v1, %v8555_v18  ;;  %v8830_v38 = vadd.f32 %v1397_v0, %v1312_v57  ;;  %v8832_v51 = vadd.f32 %v1398_v33, %v1313_v47 }
  0xf5   :  { %v1408_v23 = vmul.f32 %v11805_v59, %v8737_v48  ;;  %v8834_v43 = vadd.f32 %v1399_v10, %v1314_v3  ;;  %v8836_v49 = vadd.f32 %v1400_v42, %v1315_v31  ;;  %v8838_v25 = vadd.f32 %v1401_v17, %v1316_v41  ;;  %v8859_v42 = vld [vmem:[%s11351_s0] sm:$0xff] }
  0xf6   :  { %v1409_v50 = vmul.f32 %v11806_v20, %v8737_v48  ;;  %11807 = vst [vmem:[#allocation27_spill] sm:$0xff] %v8832_v51  ;;  %v8840_v30 = vadd.f32 %v1402_v53, %v1317_v16  ;;  %v8842_v22 = vadd.f32 %v1403_v14, %v1318_v46  ;;  %v8844_v37 = vadd.f32 %v1404_v2, %v1319_v63  ;;  %v11817_v53 = vld [vmem:[#allocation7_spill] sm:$0xff]  ;;  %v11818_v14 = vld [vmem:[#allocation32_spill] sm:$0xff] }
  0xf7   :  { %11808 = vst [vmem:[#allocation15_spill] sm:$0xff] %v8834_v43  ;;  %11809 = vst [vmem:[#allocation8_spill] sm:$0xff] %v8836_v49  ;;  %v8846_v11 = vadd.f32 %v1405_v29, %v1320_v6  ;;  %v8848_v19 = vadd.f32 %v1406_v56, %v1321_v4  ;;  %v8850_v0 = vadd.f32 %v1407_v13, %v1322_v34  ;;  %v11824_v56 = vld [vmem:[#allocation10_spill] sm:$0xff]  ;;  %v11825_v46 = vld [vmem:[#allocation36_spill] sm:$0xff] }
  0xf8   :  { %11810 = vst [vmem:[#allocation18_spill] sm:$0xff] %v8838_v25  ;;  %11811 = vst [vmem:[#allocation11_spill] sm:$0xff] %v8840_v30  ;;  %v8852_v33 = vadd.f32 %v1408_v23, %v1323_v40  ;;  %v8854_v10 = vadd.f32 %v1409_v50, %v1324_v44  ;;  %v8863_v17 = vmul.f32 %v8859_v42, %v8859_v42  ;;  %v8873_v44 = vld [vmem:[%s11351_s0 + $0xf0] sm:$0xff]  ;;  %v11826_v23 = vld [vmem:[#allocation37_spill] sm:$0xff]  ;;  %v8975_v25 = vpop.permute.xlu1 %1530 }
  0xf9   :  { %11812 = vst [vmem:[#allocation12_spill] sm:$0xff] %v8842_v22  ;;  %11813 = vst [vmem:[#allocation13_spill] sm:$0xff] %v8844_v37  ;;  %v223_v34 = vrot.slane %v8859_v42, %v11817_v53  ;;  %v8881_v28 = vmul.f32 %v8873_v44, %v8873_v44  ;;  %v425_v15 = vrot.slane %v8859_v42, %v11821_v58 }
  0xfa   :  { %11814 = vst [vmem:[#allocation14_spill] sm:$0xff] %v8846_v11  ;;  %11815 = vst [vmem:[#allocation16_spill] sm:$0xff] %v8848_v19  ;;  %v122_v6 = vrot.slane %v8863_v17, %v11817_v53  ;;  %v324_v62 = vrot.slane %v8863_v17, %v11821_v58  ;;  %v526_v57 = vrot.slane %v8863_v17, %v11824_v56 }
  0xfb   :  { %11816 = vst [vmem:[#allocation17_spill] sm:$0xff] %v8850_v0  ;;  %v284_v24 = vmul.f32 %v223_v34, %v11820_v60  ;;  %v182_v45 = vrot.slane %v8881_v28, %v11817_v53  ;;  %v486_v29 = vmul.f32 %v425_v15, %v11823_v35  ;;  %v283_v47 = vrot.slane %v8873_v44, %v11817_v53  ;;  %v11827_v34 = vld [vmem:[#allocation30_spill] sm:$0xff] }
  0xfc   :  { %v183_v40 = vmul.f32 %v122_v6, %v11818_v14  ;;  %v385_v2 = vmul.f32 %v324_v62, %v11822_v27  ;;  %v627_v41 = vrot.slane %v8859_v42, %v11824_v56  ;;  %v587_v63 = vmul.f32 %v526_v57, %v11825_v46  ;;  %v11829_v57 = vld [vmem:[#allocation39_spill] sm:$0xff]  ;;  %11835 = vst [vmem:[#allocation7_spill] sm:$0xff] %v8975_v25  ;;  %v9007_v11 = vpop.permute.xlu1 %1748 }
  0xfd   :  { %v198_v3 = vmul.f32 %v182_v45, %v11818_v14  ;;  %v299_v4 = vmul.f32 %v283_v47, %v11820_v60  ;;  %v384_v13 = vrot.slane %v8881_v28, %v11821_v58  ;;  %v485_v6 = vrot.slane %v8873_v44, %v11821_v58 }
  0xfe   :  { %v199_v36 = vadd.f32 %v183_v40, %v11819_v39  ;;  %v688_v20 = vmul.f32 %v627_v41, %v11826_v23  ;;  %v728_v40 = vrot.slane %v8863_v17, %v11827_v34  ;;  %v829_v62 = vrot.slane %v8859_v42, %v11827_v34  ;;  %v11830_v41 = vld [vmem:[#allocation31_spill] sm:$0xff] }
  0xff   :  { %v214_v16 = vadd.f32 %v198_v3, %v11819_v39  ;;  %v501_v15 = vmul.f32 %v485_v6, %v11823_v35 }
 0x100   :  { %v300_v5 = vadd.f32 %v284_v24, %v199_v36  ;;  %v400_v36 = vmul.f32 %v384_v13, %v11822_v27  ;;  %v890_v47 = vmul.f32 %v829_v62, %v11829_v57  ;;  %v1031_v13 = vrot.slane %v8859_v42, %v11830_v41 }
 0x101   :  { %v315_v50 = vadd.f32 %v299_v4, %v214_v16  ;;  %v930_v16 = vrot.slane %v8863_v17, %v11830_v41 }
 0x102   :  { %v401_v54 = vadd.f32 %v385_v2, %v300_v5  ;;  %v11828_v2 = vld [vmem:[#allocation38_spill] sm:$0xff] }
 0x103   :  { %v416_v5 = vadd.f32 %v400_v36, %v315_v50  ;;  %v789_v45 = vmul.f32 %v728_v40, %v11828_v2  ;;  %v11831_v50 = vld [vmem:[#allocation41_spill] sm:$0xff]  ;;  %v788_v40 = vrot.slane %v8881_v28, %v11827_v34 }
 0x104   :  { %v502_v31 = vadd.f32 %v486_v29, %v401_v54  ;;  %v586_v54 = vrot.slane %v8881_v28, %v11824_v56  ;;  %v991_v6 = vmul.f32 %v930_v16, %v11831_v50 }
 0x105   :  { %v517_v3 = vadd.f32 %v501_v15, %v416_v5  ;;  %v889_v15 = vrot.slane %v8873_v44, %v11827_v34 }
 0x106   :  { %v603_v59 = vadd.f32 %v587_v63, %v502_v31  ;;  %v687_v31 = vrot.slane %v8873_v44, %v11824_v56  ;;  %v602_v63 = vmul.f32 %v586_v54, %v11825_v46  ;;  %v804_v54 = vmul.f32 %v788_v40, %v11828_v2 }
 0x107   :  { %v905_v16 = vmul.f32 %v889_v15, %v11829_v57  ;;  %v1091_v40 = vrot.slane %v8873_v44, %v11830_v41 }
 0x108   :  { %v704_v24 = vadd.f32 %v688_v20, %v603_v59  ;;  %v618_v59 = vadd.f32 %v602_v63, %v517_v3  ;;  %v703_v20 = vmul.f32 %v687_v31, %v11826_v23  ;;  %v8936_v3 = vld [vmem:[%s11351_s0 + $0x10] sm:$0xff] }
 0x109   :  { %v227_v22 = vrot.slane %v8936_v3, %v11817_v53 }
 0x10a   :  { %v805_v29 = vadd.f32 %v789_v45, %v704_v24  ;;  %v11832_v24 = vld [vmem:[#allocation42_spill] sm:$0xff]  ;;  %v719_v5 = vadd.f32 %v703_v20, %v618_v59  ;;  %v1132_v45 = vrot.slane %v8863_v17, %v11772_v21 }
 0x10b   :  { %v1092_v62 = vmul.f32 %v1031_v13, %v11832_v24  ;;  %v8944_v13 = vmul.f32 %v8936_v3, %v8936_v3 }
 0x10c   :  { %v906_v4 = vadd.f32 %v890_v47, %v805_v29  ;;  %v1233_v47 = vrot.slane %v8859_v42, %v11772_v21  ;;  %v820_v31 = vadd.f32 %v804_v54, %v719_v5  ;;  %v1193_v63 = vmul.f32 %v1132_v45, %v8671_v52 }
 0x10d   :  { %v126_v5 = vrot.slane %v8944_v13, %v11817_v53  ;;  %v1435_v45 = vrot.slane %v8859_v42, %v8555_v18 }
 0x10e   :  { %v1007_v36 = vadd.f32 %v991_v6, %v906_v4  ;;  %v990_v4 = vrot.slane %v8881_v28, %v11830_v41  ;;  %v1294_v20 = vmul.f32 %v1233_v47, %v8749_v12  ;;  %v921_v6 = vadd.f32 %v905_v16, %v820_v31  ;;  %v8957_v47 = vpop.permute.xlu0 %1429  ;;  %v11834_v16 = vld [vmem:[#allocation6_spill] sm:$0xff] }
 0x10f   :  { %11833 = vst [vmem:[#allocation28_spill] sm:$0xff] %v8957_v47 }
 0x110   :  { %v1108_v29 = vadd.f32 %v1092_v62, %v1007_v36  ;;  %v1334_v36 = vrot.slane %v8863_v17, %v8555_v18  ;;  %v1006_v62 = vmul.f32 %v990_v4, %v11831_v50  ;;  %v1192_v4 = vrot.slane %v8881_v28, %v11772_v21 }
 0x112   :  { %v1209_v59 = vadd.f32 %v1193_v63, %v1108_v29  ;;  %v1022_v54 = vadd.f32 %v1006_v62, %v921_v6  ;;  %v1107_v29 = vmul.f32 %v1091_v40, %v11832_v24  ;;  %v1395_v31 = vmul.f32 %v1334_v36, %v8737_v48 }
 0x113   :  { %v8961_v63 = vsub.s32 7, %v11834_v16  ;;  %v1496_v6 = vmul.f32 %v1435_v45, %v8957_v47  ;;  %v1293_v40 = vrot.slane %v8873_v44, %v11772_v21  ;;  %v1208_v37 = vmul.f32 %v1192_v4, %v8671_v52 }
 0x114   :  { %v1310_v15 = vadd.f32 %v1294_v20, %v1209_v59  ;;  %v184_v59 = vmul.f32 %v126_v5, %v11818_v14  ;;  %v1123_v62 = vadd.f32 %v1107_v29, %v1022_v54  ;;  %v8980_v14 = vld [vmem:[%s11351_s0 + $0x8] sm:$0xff]  ;;  %v285_v5 = vmul.f32 %v227_v22, %v11820_v60  ;;  %v8988_v29 = vpop.permute.xlu0 %1631 }
 0x115   :  { %v1536_v30 = vrot.slane %v8863_v17, %v8961_v63  ;;  %v1309_v17 = vmul.f32 %v1293_v40, %v8749_v12  ;;  %11836 = vst [vmem:[#allocation32_spill] sm:$0xff] %v8988_v29  ;;  %v429_v4 = vrot.slane %v8936_v3, %v11821_v58  ;;  %v8995_v22 = vmul.f32 %v8980_v14, %v8980_v14 }
 0x116   :  { %v1411_v20 = vadd.f32 %v1395_v31, %v1310_v15  ;;  %v200_v36 = vadd.f32 %v184_v59, %v11819_v39  ;;  %v328_v15 = vrot.slane %v8944_v13, %v11821_v58  ;;  %v1637_v39 = vrot.slane %v8859_v42, %v8961_v63 }
 0x117   :  { %v1224_v54 = vadd.f32 %v1208_v37, %v1123_v62  ;;  %v1597_v59 = vmul.f32 %v1536_v30, %v8975_v25  ;;  %v1394_v60 = vrot.slane %v8881_v28, %v8555_v18  ;;  %v1495_v62 = vrot.slane %v8873_v44, %v8555_v18 }
 0x118   :  { %v1512_v45 = vadd.f32 %v1496_v6, %v1411_v20  ;;  %v301_v31 = vadd.f32 %v285_v5, %v200_v36  ;;  %v386_v42 = vmul.f32 %v328_v15, %v11822_v27  ;;  %v1698_v20 = vmul.f32 %v1637_v39, %v8988_v29 }
 0x119   :  { %v1325_v6 = vadd.f32 %v1309_v17, %v1224_v54  ;;  %v487_v36 = vmul.f32 %v429_v4, %v11823_v35  ;;  %v1754_v30 = vrot.slane %v8995_v22, %v11817_v53  ;;  %v1410_v5 = vmul.f32 %v1394_v60, %v8737_v48  ;;  %v9014_v17 = vpop.permute.xlu0 %1849 }
 0x11a   :  { %v1613_v37 = vadd.f32 %v1597_v59, %v1512_v45  ;;  %v402_v40 = vadd.f32 %v386_v42, %v301_v31  ;;  %v530_v27 = vrot.slane %v8944_v13, %v11824_v56  ;;  %v1855_v45 = vrot.slane %v8980_v14, %v11817_v53  ;;  %11837 = vst [vmem:[#allocation34_spill] sm:$0xff] %v9014_v17  ;;  %v9025_v42 = vld [vmem:[%s11351_s0 + $0xf8] sm:$0xff] }
 0x11b   :  { %v1426_v39 = vadd.f32 %v1410_v5, %v1325_v6  ;;  %v1511_v54 = vmul.f32 %v1495_v62, %v8957_v47  ;;  %v631_v31 = vrot.slane %v8936_v3, %v11824_v56  ;;  %v1815_v4 = vmul.f32 %v1754_v30, %v9007_v11  ;;  %v9038_v5 = vpop.permute.xlu1 %1950 }
 0x11c   :  { %v1714_v15 = vadd.f32 %v1698_v20, %v1613_v37  ;;  %v503_v35 = vadd.f32 %v487_v36, %v402_v40  ;;  %v1596_v59 = vrot.slane %v8881_v28, %v8961_v63  ;;  %v588_v60 = vmul.f32 %v530_v27, %v11825_v46 }
 0x11d   :  { %v1916_v20 = vmul.f32 %v1855_v45, %v9014_v17  ;;  %v1527_v6 = vadd.f32 %v1511_v54, %v1426_v39  ;;  %v1697_v62 = vrot.slane %v8873_v44, %v8961_v63  ;;  %v689_v36 = vmul.f32 %v631_v31, %v11826_v23  ;;  %v9045_v39 = vpop.permute.xlu0 %2051 }
 0x11e   :  { %v1831_v37 = vadd.f32 %v1815_v4, %v1714_v15  ;;  %v604_v40 = vadd.f32 %v588_v60, %v503_v35  ;;  %v1956_v28 = vrot.slane %v8995_v22, %v11821_v58  ;;  %v1612_v46 = vmul.f32 %v1596_v59, %v8975_v25  ;;  %11838 = vst [vmem:[#allocation33_spill] sm:$0xff] %v9045_v39 }
 0x11f   :  { %v9036_v30 = vmul.f32 %v9025_v42, %v9025_v42  ;;  %v732_v27 = vrot.slane %v8944_v13, %v11827_v34  ;;  %v2057_v44 = vrot.slane %v8980_v14, %v11821_v58  ;;  %v1713_v23 = vmul.f32 %v1697_v62, %v8988_v29 }
 0x120   :  { %v1932_v15 = vadd.f32 %v1916_v20, %v1831_v37  ;;  %v1628_v45 = vadd.f32 %v1612_v46, %v1527_v6  ;;  %v705_v54 = vadd.f32 %v689_v36, %v604_v40  ;;  %v833_v35 = vrot.slane %v8936_v3, %v11827_v34  ;;  %v9060_v46 = vpop.permute.xlu1 %2152 }
 0x121   :  { %v2017_v31 = vmul.f32 %v1956_v28, %v9038_v5  ;;  %v1814_v4 = vrot.slane %v9036_v30, %v11817_v53  ;;  %v790_v59 = vmul.f32 %v732_v27, %v11828_v2  ;;  %v2118_v37 = vmul.f32 %v2057_v44, %v9045_v39  ;;  %11839 = vst [vmem:[#allocation35_spill] sm:$0xff] %v9060_v46 }
 0x122   :  { %v1729_v20 = vadd.f32 %v1713_v23, %v1628_v45  ;;  %v1915_v6 = vrot.slane %v9025_v42, %v11817_v53  ;;  %v891_v40 = vmul.f32 %v833_v35, %v11829_v57  ;;  %v2158_v36 = vrot.slane %v8995_v22, %v11824_v56  ;;  %v9067_v23 = vpop.permute.xlu0 %2253 }
 0x123   :  { %v2033_v60 = vadd.f32 %v2017_v31, %v1932_v15  ;;  %v806_v62 = vadd.f32 %v790_v59, %v705_v54  ;;  %v1830_v28 = vmul.f32 %v1814_v4, %v9007_v11  ;;  %v934_v2 = vrot.slane %v8944_v13, %v11830_v41  ;;  %11840 = vst [vmem:[#allocation29_spill] sm:$0xff] %v9067_v23 }
 0x124   :  { %v2259_v15 = vrot.slane %v8980_v14, %v11824_v56  ;;  %v1931_v45 = vmul.f32 %v1915_v6, %v9014_v17  ;;  %v1035_v54 = vrot.slane %v8936_v3, %v11830_v41  ;;  %v2219_v35 = vmul.f32 %v2158_v36, %v9060_v46 }
 0x125   :  { %v2134_v27 = vadd.f32 %v2118_v37, %v2033_v60  ;;  %v1846_v44 = vadd.f32 %v1830_v28, %v1729_v20  ;;  %v907_v57 = vadd.f32 %v891_v40, %v806_v62  ;;  %v2016_v31 = vrot.slane %v9036_v30, %v11821_v58  ;;  %v9082_v28 = vpop.permute.xlu1 %2354 }
 0x126   :  { %v992_v4 = vmul.f32 %v934_v2, %v11831_v50  ;;  %v2320_v60 = vmul.f32 %v2259_v15, %v9067_v23  ;;  %v2117_v20 = vrot.slane %v9025_v42, %v11821_v58  ;;  %v1093_v62 = vmul.f32 %v1035_v54, %v11832_v24  ;;  %11841 = vst [vmem:[#allocation36_spill] sm:$0xff] %v9082_v28 }
 0x127   :  { %v2235_v59 = vadd.f32 %v2219_v35, %v2134_v27  ;;  %v1947_v37 = vadd.f32 %v1931_v45, %v1846_v44  ;;  %v2360_v40 = vrot.slane %v8995_v22, %v11827_v34  ;;  %v2032_v36 = vmul.f32 %v2016_v31, %v9038_v5  ;;  %v9089_v45 = vpop.permute.xlu0 %2455 }
 0x128   :  { %v1008_v6 = vadd.f32 %v992_v4, %v907_v57  ;;  %v1136_v50 = vrot.slane %v8944_v13, %v11772_v21  ;;  %v2461_v27 = vrot.slane %v8980_v14, %v11827_v34  ;;  %v2133_v44 = vmul.f32 %v2117_v20, %v9045_v39 }
 0x129   :  { %v2336_v2 = vadd.f32 %v2320_v60, %v2235_v59  ;;  %v2048_v15 = vadd.f32 %v2032_v36, %v1947_v37  ;;  %v1237_v57 = vrot.slane %v8936_v3, %v11772_v21  ;;  %v2421_v54 = vmul.f32 %v2360_v40, %v9082_v28  ;;  %v9104_v36 = vpop.permute.xlu1 %2556 }
 0x12a   :  { %v1109_v24 = vadd.f32 %v1093_v62, %v1008_v6  ;;  %v2218_v35 = vrot.slane %v9036_v30, %v11824_v56  ;;  %v1194_v31 = vmul.f32 %v1136_v50, %v8671_v52  ;;  %v2522_v59 = vmul.f32 %v2461_v27, %v9089_v45  ;;  %11842 = vst [vmem:[#allocation37_spill] sm:$0xff] %v9104_v36 }
 0x12b   :  { %v2437_v4 = vadd.f32 %v2421_v54, %v2336_v2  ;;  %v2149_v60 = vadd.f32 %v2133_v44, %v2048_v15  ;;  %v2319_v37 = vrot.slane %v9025_v42, %v11824_v56  ;;  %v1295_v6 = vmul.f32 %v1237_v57, %v8749_v12  ;;  %v9111_v44 = vpop.permute.xlu0 %2657 }
 0x12c   :  { %v1210_v20 = vadd.f32 %v1194_v31, %v1109_v24  ;;  %v2562_v62 = vrot.slane %v8995_v22, %v11830_v41  ;;  %v2234_v40 = vmul.f32 %v2218_v35, %v9060_v46  ;;  %v1338_v52 = vrot.slane %v8944_v13, %v8555_v18 }
 0x12d   :  { %v2538_v50 = vadd.f32 %v2522_v59, %v2437_v4  ;;  %v2663_v2 = vrot.slane %v8980_v14, %v11830_v41  ;;  %v2335_v15 = vmul.f32 %v2319_v37, %v9067_v23  ;;  %v1439_v24 = vrot.slane %v8936_v3, %v8555_v18 }
 0x12e   :  { %v2250_v27 = vadd.f32 %v2234_v40, %v2149_v60  ;;  %v1311_v12 = vadd.f32 %v1295_v6, %v1210_v20  ;;  %v2623_v57 = vmul.f32 %v2562_v62, %v9104_v36  ;;  %v2420_v54 = vrot.slane %v9036_v30, %v11827_v34  ;;  %v9126_v40 = vpop.permute.xlu1 %2758 }
 0x12f   :  { %v1396_v35 = vmul.f32 %v1338_v52, %v8737_v48  ;;  %v2724_v4 = vmul.f32 %v2663_v2, %v9111_v44  ;;  %v2521_v60 = vrot.slane %v9025_v42, %v11827_v34  ;;  %v1497_v20 = vmul.f32 %v1439_v24, %v8957_v47  ;;  %v9135_v2 = vld [vmem:[%s11351_s0 + $0x18] sm:$0xff] }
 0x130   :  { %v2639_v31 = vadd.f32 %v2623_v57, %v2538_v50  ;;  %v2351_v59 = vadd.f32 %v2335_v15, %v2250_v27  ;;  %v2764_v6 = vrot.slane %v8995_v22, %v11772_v21  ;;  %v2436_v62 = vmul.f32 %v2420_v54, %v9082_v28 }
 0x131   :  { %v1412_v37 = vadd.f32 %v1396_v35, %v1311_v12  ;;  %v1540_v48 = vrot.slane %v8944_v13, %v8961_v63  ;;  %v2865_v50 = vrot.slane %v8980_v14, %v11772_v21  ;;  %v2537_v15 = vmul.f32 %v2521_v60, %v9089_v45  ;;  %v9138_v12 = vpop.permute.xlu0 %2859 }
 0x132   :  { %v2740_v52 = vadd.f32 %v2724_v4, %v2639_v31  ;;  %v2452_v27 = vadd.f32 %v2436_v62, %v2351_v59  ;;  %11843 = vst [vmem:[#allocation38_spill] sm:$0xff] %v9138_v12  ;;  %v1641_v57 = vrot.slane %v8936_v3, %v8961_v63  ;;  %v2825_v13 = vmul.f32 %v2764_v6, %v9126_v40  ;;  %v7453_v62 = vld [vmem:[%s11351_s0 + $0xe0] sm:$0xff] }
 0x133   :  { %v1513_v24 = vadd.f32 %v1497_v20, %v1412_v37  ;;  %v2622_v54 = vrot.slane %v9036_v30, %v11830_v41  ;;  %v1598_v35 = vmul.f32 %v1540_v48, %v8975_v25  ;;  %v9148_v31 = vmul.f32 %v9135_v2, %v9135_v2 }
 0x134   :  { %v2841_v4 = vadd.f32 %v2825_v13, %v2740_v52  ;;  %v2926_v59 = vmul.f32 %v2865_v50, %v9138_v12  ;;  %v2553_v60 = vadd.f32 %v2537_v15, %v2452_v27  ;;  %v2723_v37 = vrot.slane %v9025_v42, %v11830_v41  ;;  %v9161_v13 = vpop.permute.xlu1 %2960 }
 0x135   :  { %v1614_v20 = vadd.f32 %v1598_v35, %v1513_v24  ;;  %v1699_v3 = vmul.f32 %v1641_v57, %v8988_v29  ;;  %v2966_v6 = vrot.slane %v8995_v22, %v8555_v18  ;;  %v1491_v48 = vrot.slane %v7453_v62, %v8555_v18  ;;  %11844 = vst [vmem:[#allocation39_spill] sm:$0xff] %v9161_v13  ;;  %v9168_v35 = vpop.permute.xlu0 %3061 }
 0x136   :  { %v2638_v52 = vmul.f32 %v2622_v54, %v9104_v36  ;;  %v1758_v50 = vrot.slane %v9148_v31, %v11817_v53  ;;  %v2942_v27 = vadd.f32 %v2926_v59, %v2841_v4  ;;  %v3067_v15 = vrot.slane %v8980_v14, %v8555_v18  ;;  %11845 = vst [vmem:[#allocation31_spill] sm:$0xff] %v9168_v35 }
 0x137   :  { %v2739_v57 = vmul.f32 %v2723_v37, %v9111_v44  ;;  %v1715_v49 = vadd.f32 %v1699_v3, %v1614_v20  ;;  %v1859_v19 = vrot.slane %v9135_v2, %v11817_v53  ;;  %v3027_v54 = vmul.f32 %v2966_v6, %v9161_v13 }
 0x138   :  { %v2654_v24 = vadd.f32 %v2638_v52, %v2553_v60  ;;  %v1510_v43 = vmul.f32 %v1491_v48, %v8957_v47  ;;  %v2824_v16 = vrot.slane %v9036_v30, %v11772_v21  ;;  %v1816_v4 = vmul.f32 %v1758_v50, %v9007_v11  ;;  %v9189_v50 = vld [vmem:[%s11351_s0 + $0xe8] sm:$0xff] }
 0x139   :  { %v3043_v59 = vadd.f32 %v3027_v54, %v2942_v27  ;;  %v3128_v60 = vmul.f32 %v3067_v15, %v9168_v35  ;;  %v1592_v37 = vrot.slane %v11643_v1, %v8961_v63  ;;  %v2925_v20 = vrot.slane %v9025_v42, %v11772_v21  ;;  %v9192_v1 = vpop.permute.xlu1 %3162 }
 0x13a   :  { %v2755_v52 = vadd.f32 %v2739_v57, %v2654_v24  ;;  %v1832_v3 = vadd.f32 %v1816_v4, %v1715_v49  ;;  %v1917_v6 = vmul.f32 %v1859_v19, %v9014_v17  ;;  %v3168_v48 = vrot.slane %v8995_v22, %v8961_v63  ;;  %v9201_v57 = vpop.permute.xlu0 %3263 }
 0x13b   :  { %v1526_v0 = vadd.f32 %v1510_v43, %v8854_v10  ;;  %v2840_v27 = vmul.f32 %v2824_v16, %v9126_v40  ;;  %v1693_v15 = vrot.slane %v7453_v62, %v8961_v63  ;;  %v1960_v49 = vrot.slane %v9148_v31, %v11821_v58 }
 0x13c   :  { %v3144_v19 = vadd.f32 %v3128_v60, %v3043_v59  ;;  %v3269_v22 = vrot.slane %v8980_v14, %v8961_v63  ;;  %v1611_v43 = vmul.f32 %v1592_v37, %v8975_v25  ;;  %v2941_v24 = vmul.f32 %v2925_v20, %v9138_v12 }
 0x13d   :  { %v2856_v10 = vadd.f32 %v2840_v27, %v2755_v52  ;;  %v9205_v16 = vmul.f32 %v9189_v50, %v9189_v50  ;;  %v1933_v54 = vadd.f32 %v1917_v6, %v1832_v3  ;;  %v2061_v62 = vrot.slane %v9135_v2, %v11821_v58 }
 0x13e   :  { %v3229_v4 = vmul.f32 %v3168_v48, %v9192_v1  ;;  %v1627_v59 = vadd.f32 %v1611_v43, %v1526_v0  ;;  %v3026_v14 = vrot.slane %v9036_v30, %v8555_v18  ;;  %v1712_v60 = vmul.f32 %v1693_v15, %v8988_v29 }
 0x13f   :  { %v2018_v37 = vmul.f32 %v1960_v49, %v9038_v5  ;;  %v3330_v20 = vmul.f32 %v3269_v22, %v9201_v57  ;;  %v2957_v27 = vadd.f32 %v2941_v24, %v2856_v10  ;;  %v3127_v3 = vrot.slane %v9025_v42, %v8555_v18 }
 0x140   :  { %v3245_v52 = vadd.f32 %v3229_v4, %v3144_v19  ;;  %v1810_v6 = vrot.slane %v9205_v16, %v11817_v53  ;;  %v2119_v0 = vmul.f32 %v2061_v62, %v9045_v39  ;;  %v3042_v48 = vmul.f32 %v3026_v14, %v9161_v13 }
 0x141   :  { %v2034_v51 = vadd.f32 %v2018_v37, %v1933_v54  ;;  %v1728_v43 = vadd.f32 %v1712_v60, %v1627_v59  ;;  %v1911_v15 = vrot.slane %v9189_v50, %v11817_v53  ;;  %v2162_v49 = vrot.slane %v9148_v31, %v11824_v56 }
 0x142   :  { %v9225_v19 = vadd.f32 %v3330_v20, %v3245_v52  ;;  %v3058_v22 = vadd.f32 %v3042_v48, %v2957_v27  ;;  %v3143_v10 = vmul.f32 %v3127_v3, %v9168_v35  ;;  %v1829_v24 = vmul.f32 %v1810_v6, %v9007_v11 }
 0x143   :  { %v2135_v4 = vadd.f32 %v2119_v0, %v2034_v51  ;;  %v2263_v54 = vrot.slane %v9135_v2, %v11824_v56  ;;  %v3228_v62 = vrot.slane %v9036_v30, %v8961_v63  ;;  %v1930_v14 = vmul.f32 %v1911_v15, %v9014_v17 }
 0x144   :  { %v1845_v59 = vadd.f32 %v1829_v24, %v1728_v43  ;;  %v2220_v60 = vmul.f32 %v2162_v49, %v9060_v46  ;;  %v3362_v37 = vrot.slane %v9225_v19, 4  ;;  %v3159_v52 = vadd.f32 %v3143_v10, %v3058_v22 }
 0x145   :  { %v3329_v20 = vrot.slane %v9025_v42, %v8961_v63  ;;  %v2012_v51 = vrot.slane %v9205_v16, %v11821_v58  ;;  %v2321_v3 = vmul.f32 %v2263_v54, %v9067_v23  ;;  %v3244_v6 = vmul.f32 %v3228_v62, %v9192_v1 }
 0x146   :  { %v2236_v27 = vadd.f32 %v2220_v60, %v2135_v4  ;;  %v1946_v30 = vadd.f32 %v1930_v14, %v1845_v59  ;;  %v2113_v0 = vrot.slane %v9189_v50, %v11821_v58  ;;  %v2364_v48 = vrot.slane %v9148_v31, %v11827_v34 }
 0x147   :  { %v3363_v43 = vmax.f32 %v9225_v19, %v3362_v37  ;;  %v3260_v15 = vadd.f32 %v3244_v6, %v3159_v52  ;;  %v3345_v42 = vmul.f32 %v3329_v20, %v9201_v57  ;;  %v2031_v49 = vmul.f32 %v2012_v51, %v9038_v5 }
 0x148   :  { %v2337_v22 = vadd.f32 %v2321_v3, %v2236_v27  ;;  %v2465_v10 = vrot.slane %v9135_v2, %v11827_v34  ;;  %v2132_v4 = vmul.f32 %v2113_v0, %v9045_v39  ;;  %v2422_v54 = vmul.f32 %v2364_v48, %v9082_v28 }
 0x149   :  { %v2047_v24 = vadd.f32 %v2031_v49, %v1946_v30  ;;  %v3364_v62 = vrot.slane %v3363_v43, 2  ;;  %v9253_v59 = vadd.f32 %v3345_v42, %v3260_v15  ;;  %v2214_v14 = vrot.slane %v9205_v16, %v11824_v56 }
 0x14a   :  { %v2438_v60 = vadd.f32 %v2422_v54, %v2337_v22  ;;  %v2523_v37 = vmul.f32 %v2465_v10, %v9089_v45  ;;  %v2315_v20 = vrot.slane %v9189_v50, %v11824_v56  ;;  %v2566_v51 = vrot.slane %v9148_v31, %v11830_v41 }
 0x14b   :  { %v2148_v52 = vadd.f32 %v2132_v4, %v2047_v24  ;;  %v3365_v27 = vmax.f32 %v3363_v43, %v3364_v62  ;;  %v3452_v3 = vrot.slane %v9253_v59, 4  ;;  %v2233_v6 = vmul.f32 %v2214_v14, %v9060_v46 }
 0x14c   :  { %v2539_v30 = vadd.f32 %v2523_v37, %v2438_v60  ;;  %v2667_v0 = vrot.slane %v9135_v2, %v11830_v41  ;;  %v2334_v15 = vmul.f32 %v2315_v20, %v9067_v23  ;;  %v2624_v42 = vmul.f32 %v2566_v51, %v9104_v36  ;;  %v7454_v60 = vld [vmem:[%s11351_s0 + $0x20] sm:$0xff] }
 0x14d   :  { %v2249_v48 = vadd.f32 %v2233_v6, %v2148_v52  ;;  %v3366_v49 = vrot.slane %v3365_v27, 1  ;;  %v3453_v22 = vmax.f32 %v9253_v59, %v3452_v3  ;;  %v1544_v10 = vrot.slane %v11771_v61, %v8961_v63 }
 0x14e   :  { %v2416_v43 = vrot.slane %v9205_v16, %v11827_v34  ;;  %v2640_v24 = vadd.f32 %v2624_v42, %v2539_v30  ;;  %v2725_v4 = vmul.f32 %v2667_v0, %v9111_v44  ;;  %v1443_v61 = vrot.slane %v7454_v60, %v8555_v18 }
 0x14f   :  { %v2350_v37 = vadd.f32 %v2334_v15, %v2249_v48  ;;  %v2517_v52 = vrot.slane %v9189_v50, %v11827_v34  ;;  %v2768_v20 = vrot.slane %v9148_v31, %v11772_v21  ;;  %v3367_v51 = vmax.f32 %v3365_v27, %v3366_v49  ;;  %v9314_v49 = vld [vmem:[%s11351_s0 + $0x30] sm:$0xff] }
 0x150   :  { %v3454_v62 = vrot.slane %v3453_v22, 2  ;;  %v2435_v15 = vmul.f32 %v2416_v43, %v9082_v28  ;;  %v2741_v32 = vadd.f32 %v2725_v4, %v2640_v24  ;;  %v2869_v7 = vrot.slane %v9135_v2, %v11772_v21 }
 0x151   :  { %v1498_v14 = vmul.f32 %v1443_v61, %v8957_v47  ;;  %v2536_v48 = vmul.f32 %v2517_v52, %v9089_v45  ;;  %v2826_v43 = vmul.f32 %v2768_v20, %v9126_v40  ;;  %v3458_v24 = vsub.f32 %v9225_v19, %v3367_v51  ;;  %v9321_v61 = vld [vmem:[%s11351_s0 + $0xd0] sm:$0xff]  ;;  %v9335_v20 = vld [vmem:[%s11351_s0 + $0x28] sm:$0xff]  ;;  %v9350_v52 = vld [vmem:[%s11351_s0 + $0x60] sm:$0xff] }
 0x152   :  { %v2451_v42 = vadd.f32 %v2435_v15, %v2350_v37  ;;  %v1588_v4 = vrot.slane %v11804_v55, %v8961_v63  ;;  %v1487_v37 = vrot.slane %v9321_v61, %v8555_v18  ;;  %v3455_v19 = vmax.f32 %v3453_v22, %v3454_v62  ;;  %v9328_v55 = vld [vmem:[%s11351_s0 + $0x40] sm:$0xff]  ;;  %v9343_v22 = vld [vmem:[%s11351_s0 + $0x50] sm:$0xff]  ;;  %11853 = vst [vmem:[#allocation43_spill] sm:$0xff] %v9350_v52 }
 0x153   :  { %11851 = vst [vmem:[#allocation41_spill] sm:$0xff] %v9328_v55  ;;  %v2618_v51 = vrot.slane %v9205_v16, %v11830_v41  ;;  %v2842_v15 = vadd.f32 %v2826_v43, %v2741_v32  ;;  %v2927_v0 = vmul.f32 %v2869_v7, %v9138_v12  ;;  %11852 = vst [vmem:[#allocation42_spill] sm:$0xff] %v9343_v22  ;;  %v3474_v62 = vmul.f32 1.442695, %v3458_v24  ;;  %v9381_v24 = vld [vmem:[%s11351_s0 + $0x90] sm:$0xff] }
 0x154   :  { %v1514_v32 = vadd.f32 %v1498_v14, %v8830_v38  ;;  %v1645_v7 = vrot.slane %v7454_v60, %v8961_v63  ;;  %v2552_v43 = vadd.f32 %v2536_v48, %v2451_v42  ;;  %v2719_v30 = vrot.slane %v9189_v50, %v11830_v41  ;;  %v9369_v42 = vpop.permute.xlu1 %3542  ;;  %11855 = vst [vmem:[#allocation45_spill] sm:$0xff] %v9381_v24  ;;  %v9396_v48 = vld [vmem:[%s11351_s0 + $0xd8] sm:$0xff] }
 0x155   :  { %v2970_v54 = vrot.slane %v9148_v31, %v8555_v18  ;;  %v1599_v3 = vmul.f32 %v1544_v10, %v8975_v25  ;;  %v1509_v27 = vmul.f32 %v1487_v37, %v8957_v47  ;;  %v9364_v22 = vmul.f32 %v9335_v20, %v9335_v20  ;;  %v9374_v10 = vld [vmem:[%s11351_s0 + $0x70] sm:$0xff] }
 0x156   :  { %v3456_v6 = vrot.slane %v3455_v19, 1  ;;  %v2637_v38 = vmul.f32 %v2618_v51, %v9104_v36  ;;  %v2943_v14 = vadd.f32 %v2927_v0, %v2842_v15  ;;  %v3071_v60 = vrot.slane %v9135_v2, %v8555_v18  ;;  %11854 = vst [vmem:[#allocation44_spill] sm:$0xff] %v9374_v10  ;;  %v9389_v15 = vld [vmem:[%s11351_s0 + $0xa0] sm:$0xff] }
 0x157   :  { %7327 = vpow2.f32 %v3474_v62  ;;  %v1615_v37 = vadd.f32 %v1599_v3, %v1514_v32  ;;  %v1700_v51 = vmul.f32 %v1645_v7, %v8988_v29  ;;  %11856 = vst [vmem:[#allocation46_spill] sm:$0xff] %v9389_v15  ;;  %v2738_v52 = vmul.f32 %v2719_v30, %v9111_v44  ;;  %v9404_v7 = vld [vmem:[%s11351_s0 + $0x38] sm:$0xff]  ;;  %v9413_v30 = vld [vmem:[%s11351_s0 + $0xb0] sm:$0xff] }
 0x158   :  { %v2653_v10 = vadd.f32 %v2637_v38, %v2552_v43  ;;  %v3028_v3 = vmul.f32 %v2970_v54, %v9161_v13  ;;  %v1525_v32 = vadd.f32 %v1509_v27, %v8852_v33  ;;  %11857 = vst [vmem:[#allocation47_spill] sm:$0xff] %v9404_v7  ;;  %v1762_v0 = vrot.slane %v9364_v22, %v11817_v53  ;;  %v9420_v38 = vpop.permute.xlu0 %3607  ;;  %v9432_v33 = vld [vmem:[%s11351_s0 + $0x48] sm:$0xff] }
 0x159   :  { %v1689_v62 = vrot.slane %v9321_v61, %v8961_v63  ;;  %v3457_v24 = vmax.f32 %v3455_v19, %v3456_v6  ;;  %11858 = vst [vmem:[#allocation48_spill] sm:$0xff] %v9413_v30  ;;  %v2820_v54 = vrot.slane %v9205_v16, %v11772_v21  ;;  %v3129_v43 = vmul.f32 %v3071_v60, %v9168_v35 }
 0x15a   :  { %v3044_v27 = vadd.f32 %v3028_v3, %v2943_v14  ;;  %11859 = vst [vmem:[#allocation49_spill] sm:$0xff] %v9420_v38  ;;  %v1610_v15 = vmul.f32 %v1588_v4, %v8975_v25  ;;  %v9425_v6 = vmul.f32 %v9396_v48, %v9396_v48  ;;  %v1716_v61 = vadd.f32 %v1700_v51, %v1615_v37  ;;  %v9442_v37 = vpop.permute.xlu1 %3612 }
 0x15b   :  { %v1863_v19 = vrot.slane %v9335_v20, %v11817_v53  ;;  %11860 = vst [vmem:[#allocation50_spill] sm:$0xff] %v9432_v33  ;;  %v9436_v14 = vmul.f32 %v9404_v7, %v9404_v7  ;;  %v2754_v60 = vadd.f32 %v2738_v52, %v2653_v10  ;;  %v2921_v4 = vrot.slane %v9189_v50, %v11772_v21  ;;  %v9450_v7 = vld [vmem:[%s11351_s0 + $0xc0] sm:$0xff] }
 0x15c   :  { %v3172_v3 = vrot.slane %v9148_v31, %v8961_v63  ;;  %11861 = vst [vmem:[#allocation51_spill] sm:$0xff] %v9442_v37  ;;  %v1817_v51 = vmul.f32 %v1762_v0, %v9007_v11  ;;  %v1626_v9 = vadd.f32 %v1610_v15, %v1525_v32  ;;  %v1711_v30 = vmul.f32 %v1689_v62, %v8988_v29 }
 0x15d   :  { %v3473_v55 = vsub.f32 %v9253_v59, %v3457_v24  ;;  %v1483_v52 = vrot.slane %v9450_v7, %v8555_v18  ;;  %v2839_v10 = vmul.f32 %v2820_v54, %v9126_v40  ;;  %v3145_v31 = vadd.f32 %v3129_v43, %v3044_v27  ;;  %v9468_v43 = vpop.permute.xlu0 %3617 }
 0x15e   :  { %v3273_v38 = vrot.slane %v9135_v2, %v8961_v63  ;;  %v9459_v0 = vmul.f32 %v9432_v33, %v9432_v33  ;;  %v1806_v59 = vrot.slane %v9425_v6, %v11817_v53  ;;  %v1833_v24 = vadd.f32 %v1817_v51, %v1716_v61  ;;  %11863 = vst [vmem:[#allocation53_spill] sm:$0xff] %v9468_v43 }
 0x15f   :  { %v1918_v15 = vmul.f32 %v1863_v19, %v9014_v17  ;;  %v2855_v32 = vadd.f32 %v2839_v10, %v2754_v60  ;;  %v2940_v54 = vmul.f32 %v2921_v4, %v9138_v12  ;;  %v3230_v27 = vmul.f32 %v3172_v3, %v9192_v1  ;;  %v9479_v3 = vpop.permute.xlu1 %3622 }
 0x160   :  { %11862 = vst [vmem:[#allocation52_spill] sm:$0xff] %v9459_v0  ;;  %v1727_v2 = vadd.f32 %v1711_v30, %v1626_v9  ;;  %v1964_v33 = vrot.slane %v9364_v22, %v11821_v58  ;;  %v1907_v0 = vrot.slane %v9396_v48, %v11817_v53  ;;  %v3504_v61 = vmul.f32 1.442695, %v3473_v55  ;;  %11864 = vst [vmem:[#allocation54_spill] sm:$0xff] %v9479_v3 }
 0x161   :  { %v1649_v19 = vrot.slane %v9314_v49, %v8961_v63  ;;  %v3022_v60 = vrot.slane %v9205_v16, %v8555_v18  ;;  %v3246_v51 = vadd.f32 %v3230_v27, %v3145_v31  ;;  %v3331_v4 = vmul.f32 %v3273_v38, %v9201_v57  ;;  %v9501_v30 = vpop.permute.xlu0 %3627 }
 0x162   :  { %v1828_v9 = vmul.f32 %v1806_v59, %v9007_v11  ;;  %v1934_v62 = vadd.f32 %v1918_v15, %v1833_v24  ;;  %v2065_v55 = vrot.slane %v9335_v20, %v11821_v58  ;;  %v2956_v43 = vadd.f32 %v2940_v54, %v2855_v32  ;;  %11866 = vst [vmem:[#allocation55_spill] sm:$0xff] %v9501_v30 }
 0x163   :  { %v3123_v37 = vrot.slane %v9189_v50, %v8555_v18  ;;  %v2019_v38 = vmul.f32 %v1964_v33, %v9038_v5  ;;  %v1929_v3 = vmul.f32 %v1907_v0, %v9014_v17  ;;  %7329 = vpow2.f32 %v3504_v61 }
 0x164   :  { %v7328_v10 = vpop.eup %7327  ;;  %v1844_v27 = vadd.f32 %v1828_v9, %v1727_v2  ;;  %v11865_v59 = vrot.slane %v9314_v49, %v8555_v18  ;;  %v3041_v15 = vmul.f32 %v3022_v60, %v9161_v13  ;;  %v9498_v32 = vadd.f32 %v3331_v4, %v3246_v51  ;;  %v9512_v9 = vpop.permute.xlu1 %3632 }
 0x165   :  { %v9489_v31 = vmul.f32 %v7328_v10, %v9369_v42  ;;  %v2008_v42 = vrot.slane %v9425_v6, %v11821_v58  ;;  %v2035_v33 = vadd.f32 %v2019_v38, %v1934_v62  ;;  %v2120_v0 = vmul.f32 %v2065_v55, %v9045_v39  ;;  %11868 = vst [vmem:[#allocation56_spill] sm:$0xff] %v9512_v9  ;;  %v11869_v38 = vld [vmem:[#allocation27_spill] sm:$0xff] }
 0x166   :  { %v1499_v24 = vmul.f32 %v11865_v59, %v8957_v47  ;;  %v7498_v2 = vmov 1966171168   ;;  %v11867_v49 = vrot.slane %v11774_v8, %v8961_v63  ;;  %v3057_v60 = vadd.f32 %v3041_v15, %v2956_v43 }
 0x167   :  { %v3546_v54 = vrot.slane %v9489_v31, 4  ;;  %v3558_v61 = vunpack.c.l.s4 %v7498_v2  ;;  %v3142_v51 = vmul.f32 %v3123_v37, %v9168_v35  ;;  %v1508_v59 = vmul.f32 %v1483_v52, %v8957_v47 }
 0x168   :  { %v1600_v10 = vmul.f32 %v11867_v49, %v8975_v25  ;;  %v1945_v17 = vadd.f32 %v1929_v3, %v1844_v27  ;;  %v2166_v62 = vrot.slane %v9364_v22, %v11824_v56  ;;  %v2109_v55 = vrot.slane %v9396_v48, %v11821_v58  ;;  %v11872_v58 = vld [vmem:[#allocation17_spill] sm:$0xff] }
 0x169   :  { %v3547_v4 = vadd.f32 %v3546_v54, %v9489_v31  ;;  %v1515_v2 = vadd.f32 %v1499_v24, %v11869_v38  ;;  %v3224_v8 = vrot.slane %v9205_v16, %v8961_v63  ;;  %v3368_v37 = vrot.slane %v9498_v32, 4  ;;  %v9532_v38 = vpop.permute.xlu0 %5428 }
 0x16a   :  { %v11870_v15 = vrot.slane %v11769_v26, %v8961_v63  ;;  %v2030_v3 = vmul.f32 %v2008_v42, %v9038_v5  ;;  %v2136_v27 = vadd.f32 %v2120_v0, %v2035_v33  ;;  %v3559_v54 = vunpack.c.0.s8 %v3558_v61  ;;  %11871 = vst [vmem:[#allocation27_spill] sm:$0xff] %v9532_v38  ;;  %v9540_v42 = vld [vmem:[%s11351_s0 + $0xc8] sm:$0xff] }
 0x16b   :  { %v3548_v43 = vrot.slane %v3547_v4, 2  ;;  %v2267_v49 = vrot.slane %v9335_v20, %v11824_v56  ;;  %v3158_v47 = vadd.f32 %v3142_v51, %v3057_v60  ;;  %v3325_v24 = vrot.slane %v9189_v50, %v8961_v63  ;;  %v9544_v60 = vpop.permute.xlu1 %5433 }
 0x16c   :  { %v1609_v52 = vmul.f32 %v11870_v15, %v8975_v25  ;;  %v1524_v9 = vadd.f32 %v1508_v59, %v11872_v58  ;;  %v2221_v35 = vmul.f32 %v2166_v62, %v9060_v46  ;;  %v2046_v26 = vadd.f32 %v2030_v3, %v1945_v17  ;;  %11873 = vst [vmem:[#allocation17_spill] sm:$0xff] %v9544_v60 }
 0x16d   :  { %v3549_v16 = vadd.f32 %v3548_v43, %v3547_v4  ;;  %v2131_v15 = vmul.f32 %v2109_v55, %v9045_v39  ;;  %v1616_v33 = vadd.f32 %v1600_v10, %v1515_v2  ;;  %v3243_v0 = vmul.f32 %v3224_v8, %v9192_v1  ;;  %v11874_v4 = vld [vmem:[#allocation6_spill] sm:$0xff] }
 0x16e   :  { %v3369_v50 = vmax.f32 %v9498_v32, %v3368_v37  ;;  %v1701_v58 = vmul.f32 %v1649_v19, %v8988_v29  ;;  %v2210_v17 = vrot.slane %v9425_v6, %v11824_v56  ;;  %v2237_v51 = vadd.f32 %v2221_v35, %v2136_v27 }
 0x16f   :  { %v3550_v61 = vrot.slane %v3549_v16, 1  ;;  %v9550_v59 = vsub.s32 %v3559_v54, %v11874_v4  ;;  %v2322_v62 = vmul.f32 %v2267_v49, %v9067_v23  ;;  %v3259_v55 = vadd.f32 %v3243_v0, %v3158_v47  ;;  %v9572_v49 = vpop.permute.xlu0 %3637 }
 0x170   :  { %v3344_v10 = vmul.f32 %v3325_v24, %v9201_v57  ;;  %v9556_v8 = vmul.f32 %v9540_v42, %v9540_v42  ;;  %v11875_v19 = vrot.slane %v9436_v14, %v11817_v53  ;;  %v9564_v35 = vadd.f32 %v1609_v52, %v1524_v9  ;;  %v9566_v3 = vpop.eup %7329  ;;  %11877 = vst [vmem:[#allocation57_spill] sm:$0xff] %v9572_v49 }
 0x171   :  { %v3551_v2 = vadd.f32 %v3550_v61, %v3549_v16  ;;  %v2147_v43 = vadd.f32 %v2131_v15, %v2046_v26  ;;  %11876 = vst [vmem:[#allocation6_spill] sm:$0xff] %v9566_v3  ;;  %v2368_v47 = vrot.slane %v9364_v22, %v11827_v34  ;;  %v2311_v27 = vrot.slane %v9396_v48, %v11824_v56 }
 0x172   :  { %v9562_v37 = vmul.f32 %v11875_v19, %v9007_v11  ;;  %v3370_v54 = vrot.slane %v3369_v50, 2  ;;  %v11878_v24 = vrot.slane %v9450_v7, %v8961_v63  ;;  %v9580_v9 = vadd.f32 %v1701_v58, %v1616_v33 }
 0x173   :  { %7331 = vrcp.f32 %v3551_v2  ;;  %v5384_v52 = vrot.slane %v9566_v3, %v9550_v59  ;;  %v5377_v26 = vcombine.high %v9566_v3, %v9566_v3  ;;  %v2232_v15 = vmul.f32 %v2210_v17, %v9060_v46  ;;  %v9591_v2 = vpop.permute.xlu1 %5438  ;;  %v9605_v56 = vpop.permute.xlu0 %3642 }
 0x174   :  { %v9578_v16 = vmul.f32 %v11878_v24, %v8988_v29  ;;  %v2338_v0 = vadd.f32 %v2322_v62, %v2237_v51  ;;  %v2469_v61 = vrot.slane %v9335_v20, %v11827_v34  ;;  %v9589_v4 = vadd.f32 %v3344_v10, %v3259_v55  ;;  %11879 = vst [vmem:[#allocation58_spill] sm:$0xff] %v9591_v2 }
 0x175   :  { %v2412_v7 = vrot.slane %v9425_v6, %v11827_v34  ;;  %v5392_v33 = vcombine.high %v5384_v52, %v5384_v52  ;;  %v5400_v58 = vrot.slane %v5384_v52, %v9550_v59  ;;  %v5391_v19 = vrot.slane %v5377_v26, %v9550_v59  ;;  %11880 = vst [vmem:[#allocation59_spill] sm:$0xff] %v9605_v56 }
 0x176   :  { %v2423_v24 = vmul.f32 %v2368_v47, %v9082_v28  ;;  %v2248_v3 = vadd.f32 %v2232_v15, %v2147_v43  ;;  %v2333_v17 = vmul.f32 %v2311_v27, %v9067_v23  ;;  %v3371_v51 = vmax.f32 %v3369_v50, %v3370_v54 }
 0x177   :  { %v5414_v62 = vrot.slane %v5392_v33, %v9550_v59  ;;  %v5469_v55 = vrot.slane %v5400_v58, %v11817_v53  ;;  %v5422_v10 = vcombine.high %v5400_v58, %v5400_v58  ;;  %v5393_v29 = vcombine.high %v5391_v19, %v5391_v19  ;;  %v9613_v58 = vpop.permute.xlu1 %5443 }
 0x178   :  { %v2570_v25 = vrot.slane %v9364_v22, %v11830_v41  ;;  %v2439_v46 = vadd.f32 %v2423_v24, %v2338_v0  ;;  %v2524_v52 = vmul.f32 %v2469_v61, %v9089_v45  ;;  %v3446_v26 = vrot.slane %v9589_v4, 4  ;;  %11881 = vst [vmem:[#allocation60_spill] sm:$0xff] %v9613_v58 }
 0x179   :  { %v5473_v43 = vrot.slane %v5414_v62, %v11817_v53  ;;  %v5477_v50 = vrot.slane %v5422_v10, %v11817_v53  ;;  %v5424_v47 = vcombine.high %v5414_v62, %v5414_v62  ;;  %v5407_v27 = vrot.slane %v5391_v19, %v9550_v59 }
 0x17a   :  { %v2434_v54 = vmul.f32 %v2412_v7, %v9082_v28  ;;  %v2349_v15 = vadd.f32 %v2333_v17, %v2248_v3  ;;  %v2614_v33 = vrot.slane %v9425_v6, %v11830_v41  ;;  %v3372_v0 = vrot.slane %v3371_v51, 1 }
 0x17b   :  { %v5507_v61 = vmul.f32 %v5473_v43, %v9544_v60  ;;  %v5506_v24 = vmul.f32 %v5469_v55, %v9532_v38  ;;  %v5481_v23 = vrot.slane %v5424_v47, %v11817_v53  ;;  %v5421_v10 = vrot.slane %v5393_v29, %v9550_v59  ;;  %v9638_v38 = vpop.permute.xlu1 %5453 }
 0x17c   :  { %v2625_v62 = vmul.f32 %v2570_v25, %v9104_v36  ;;  %v2540_v19 = vadd.f32 %v2524_v52, %v2439_v46  ;;  %v2671_v3 = vrot.slane %v9335_v20, %v11830_v41  ;;  %v3447_v7 = vmax.f32 %v9589_v4, %v3446_v26  ;;  %v9632_v52 = vpop.permute.xlu0 %5448  ;;  %11883 = vst [vmem:[#allocation62_spill] sm:$0xff] %v9638_v38 }
 0x17d   :  { %v5514_v17 = vadd.f32 %v5507_v61, %v5506_v24  ;;  %v5508_v28 = vmul.f32 %v5477_v50, %v9591_v2  ;;  %v5423_v39 = vcombine.high %v5407_v27, %v5407_v27  ;;  %v5485_v43 = vrot.slane %v5407_v27, %v11817_v53  ;;  %11882 = vst [vmem:[#allocation61_spill] sm:$0xff] %v9632_v52 }
 0x17e   :  { %v9626_v55 = vmul.f32 %v2614_v33, %v9104_v36  ;;  %v2513_v29 = vrot.slane %v9396_v48, %v11827_v34  ;;  %v2772_v25 = vrot.slane %v9364_v22, %v11772_v21  ;;  %v3373_v46 = vmax.f32 %v3371_v51, %v3372_v0 }
 0x17f   :  { %v5515_v26 = vadd.f32 %v5514_v17, %v5508_v28  ;;  %v5509_v61 = vmul.f32 %v5481_v23, %v9613_v58  ;;  %v5425_v50 = vcombine.high %v5421_v10, %v5421_v10  ;;  %v5489_v24 = vrot.slane %v5421_v10, %v11817_v53 }
 0x180   :  { %v7332_v47 = vpop.eup %7331  ;;  %v2450_v27 = vadd.f32 %v2434_v54, %v2349_v15  ;;  %v2641_v2 = vadd.f32 %v2625_v62, %v2540_v19  ;;  %v2726_v33 = vmul.f32 %v2671_v3, %v9111_v44  ;;  %v3448_v36 = vrot.slane %v3447_v7, 2 }
 0x181   :  { %v3553_v60 = vmul.f32 %v7332_v47, %v9489_v31  ;;  %v5493_v51 = vrot.slane %v5423_v39, %v11817_v53  ;;  %v5510_v0 = vmul.f32 %v5485_v43, %v9632_v52  ;;  %v5516_v34 = vadd.f32 %v5515_v26, %v5509_v61  ;;  %v9657_v61 = vpop.permute.xlu1 %5463 }
 0x182   :  { %v2535_v28 = vmul.f32 %v2513_v29, %v9089_v45  ;;  %v2827_v23 = vmul.f32 %v2772_v25, %v9126_v40  ;;  %v3459_v15 = vsub.f32 %v9498_v32, %v3373_v46  ;;  %v5497_v31 = vrot.slane %v5425_v50, %v11817_v53  ;;  %v9650_v29 = vpop.permute.xlu0 %5458  ;;  %11885 = vst [vmem:[#allocation64_spill] sm:$0xff] %v9657_v61 }
 0x183   :  { %v3563_v10 = vrot.slane %v3553_v60, %v9550_v59  ;;  %3554 = vst [vmem:[#allocation3] sm:$0xff] %v3553_v60  ;;  %v3556_v54 = vcombine.high %v3553_v60, %v3553_v60  ;;  %v5511_v62 = vmul.f32 %v5489_v24, %v9638_v38  ;;  %v5517_v19 = vadd.f32 %v5516_v34, %v5510_v0 }
 0x184   :  { %v2742_v3 = vadd.f32 %v2726_v33, %v2641_v2  ;;  %11884 = vst [vmem:[#allocation63_spill] sm:$0xff] %v9650_v29  ;;  %v2873_v25 = vrot.slane %v9335_v20, %v11772_v21  ;;  %v3449_v47 = vmax.f32 %v3447_v7, %v3448_v36  ;;  %v5512_v60 = vmul.f32 %v5493_v51, %v9650_v29 }
 0x185   :  { %v3571_v39 = vcombine.high %v3563_v10, %v3563_v10  ;;  %v3579_v17 = vrot.slane %v3563_v10, %v9550_v59  ;;  %v3570_v43 = vrot.slane %v3556_v54, %v9550_v59  ;;  %v5518_v32 = vadd.f32 %v5517_v19, %v5511_v62 }
 0x186   :  { %v3476_v50 = vmul.f32 1.442695, %v3459_v15  ;;  %v5513_v33 = vmul.f32 %v5497_v31, %v9657_v61  ;;  %v2843_v10 = vadd.f32 %v2827_v23, %v2742_v3  ;;  %v2928_v54 = vmul.f32 %v2873_v25, %v9138_v12  ;;  %v11886_v15 = vld [vmem:[#allocation51_spill] sm:$0xff] }
 0x187   :  { %v3593_v46 = vrot.slane %v3571_v39, %v9550_v59  ;;  %v3648_v26 = vrot.slane %v3579_v17, %v11817_v53  ;;  %v3601_v34 = vcombine.high %v3579_v17, %v3579_v17  ;;  %v3572_v2 = vcombine.high %v3570_v43, %v3570_v43 }
 0x188   :  { %v3586_v24 = vrot.slane %v3570_v43, %v9550_v59  ;;  %v5519_v0 = vadd.f32 %v5518_v32, %v5512_v60  ;;  %v3450_v62 = vrot.slane %v3449_v47, 1  ;;  %v2551_v17 = vadd.f32 %v2535_v28, %v2450_v27  ;;  %v11887_v43 = vld [vmem:[#allocation49_spill] sm:$0xff] }
 0x189   :  { %v3652_v36 = vrot.slane %v3593_v46, %v11817_v53  ;;  %v3603_v7 = vcombine.high %v3593_v46, %v3593_v46  ;;  %v3656_v51 = vrot.slane %v3601_v34, %v11817_v53  ;;  %v3600_v19 = vrot.slane %v3572_v2, %v9550_v59  ;;  %v11888_v32 = vld [vmem:[#allocation53_spill] sm:$0xff] }
 0x18a   :  { %v9665_v39 = vadd.f32 %v5519_v0, %v5513_v33  ;;  %v3685_v38 = vmul.f32 %v3648_v26, %v11887_v43  ;;  %v2715_v23 = vrot.slane %v9396_v48, %v11830_v41  ;;  %v2974_v3 = vrot.slane %v9364_v22, %v8555_v18  ;;  %v11889_v0 = vld [vmem:[#allocation54_spill] sm:$0xff] }
 0x18b   :  { %v3686_v29 = vmul.f32 %v3652_v36, %v11886_v15  ;;  %v3660_v31 = vrot.slane %v3603_v7, %v11817_v53  ;;  %7333 = vpow2.f32 %v3476_v50  ;;  %v3664_v25 = vrot.slane %v3586_v24, %v11817_v53 }
 0x18c   :  { %v3687_v46 = vmul.f32 %v3656_v51, %v11888_v32  ;;  %v3602_v34 = vcombine.high %v3586_v24, %v3586_v24  ;;  %v5521_v27 = vrot.slane %v9665_v39, 4  ;;  %v2944_v28 = vadd.f32 %v2928_v54, %v2843_v10 }
 0x18d   :  { %v3693_v60 = vadd.f32 %v3686_v29, %v3685_v38  ;;  %v3075_v26 = vrot.slane %v9335_v20, %v8555_v18  ;;  %v3451_v2 = vmax.f32 %v3449_v47, %v3450_v62  ;;  %v3668_v33 = vrot.slane %v3600_v19, %v11817_v53  ;;  %v11890_v38 = vld [vmem:[#allocation47_spill] sm:$0xff] }
 0x18e   :  { %v3688_v36 = vmul.f32 %v3660_v31, %v11889_v0  ;;  %v3604_v15 = vcombine.high %v3600_v19, %v3600_v19  ;;  %v5522_v50 = vadd.f32 %v5521_v27, %v9665_v39  ;;  %v1867_v29 = vrot.slane %v11890_v38, %v11817_v53  ;;  %v11892_v0 = vld [vmem:[#allocation56_spill] sm:$0xff] }
 0x18f   :  { %v3694_v7 = vadd.f32 %v3693_v60, %v3687_v46  ;;  %v2652_v24 = vadd.f32 %v9626_v55, %v2551_v17  ;;  %v2737_v51 = vmul.f32 %v2715_v23, %v9111_v44  ;;  %v3029_v10 = vmul.f32 %v2974_v3, %v9161_v13  ;;  %v11891_v60 = vld [vmem:[#allocation31_spill] sm:$0xff] }
 0x190   :  { %v3689_v54 = vmul.f32 %v3664_v25, %v9501_v30  ;;  %v3672_v62 = vrot.slane %v3602_v34, %v11817_v53  ;;  %v5523_v32 = vrot.slane %v5522_v50, 2  ;;  %v2816_v19 = vrot.slane %v9425_v6, %v11772_v21 }
 0x191   :  { %v3695_v47 = vadd.f32 %v3694_v7, %v3688_v36  ;;  %v3045_v31 = vadd.f32 %v3029_v10, %v2944_v28  ;;  %v3130_v46 = vmul.f32 %v3075_v26, %v11891_v60  ;;  %v3472_v27 = vsub.f32 %v9589_v4, %v3451_v2  ;;  %v11893_v36 = vld [vmem:[#allocation34_spill] sm:$0xff] }
 0x192   :  { %v3690_v55 = vmul.f32 %v3668_v33, %v11892_v0  ;;  %v3676_v23 = vrot.slane %v3604_v15, %v11817_v53  ;;  %v5524_v3 = vadd.f32 %v5523_v32, %v5522_v50  ;;  %v1834_v25 = vadd.f32 %v9562_v37, %v9580_v9  ;;  %v11894_v33 = vld [vmem:[#allocation9_spill] sm:$0xff] }
 0x193   :  { %v3696_v17 = vadd.f32 %v3695_v47, %v3689_v54  ;;  %v1919_v34 = vmul.f32 %v1867_v29, %v11893_v36  ;;  %v2753_v7 = vadd.f32 %v2737_v51, %v2652_v24  ;;  %v2917_v30 = vrot.slane %v9396_v48, %v11772_v21 }
 0x194   :  { %v3176_v28 = vrot.slane %v9364_v22, %v8961_v63  ;;  %v3691_v4 = vmul.f32 %v3672_v62, %v9572_v49  ;;  %v5525_v2 = vrot.slane %v5524_v3, 1  ;;  %v1968_v15 = vrot.slane %v9436_v14, %v11894_v33  ;;  %v11915_v49 = vld [vmem:[#allocation15_spill] sm:$0xff] }
 0x195   :  { %v3697_v26 = vadd.f32 %v3696_v17, %v3690_v55  ;;  %v2838_v32 = vmul.f32 %v2816_v19, %v9126_v40  ;;  %v3146_v50 = vadd.f32 %v3130_v46, %v3045_v31  ;;  %v3277_v37 = vrot.slane %v9335_v20, %v8961_v63  ;;  %v9718_v19 = vld [vmem:[%s11351_s0 + $0x58] sm:$0xff] }
 0x196   :  { %v3502_v9 = vmul.f32 1.442695, %v3472_v27  ;;  %v3692_v24 = vmul.f32 %v3676_v23, %v9605_v56  ;;  %v5526_v51 = vadd.f32 %v5525_v2, %v5524_v3  ;;  %v1802_v22 = vrot.slane %v9556_v8, %v11817_v53  ;;  %11896 = vst [vmem:[#allocation65_spill] sm:$0xff] %v9718_v19  ;;  %v9725_v27 = vld [vmem:[%s11351_s0 + $0xb8] sm:$0xff]  ;;  %v11909_v56 = vld [vmem:[#allocation7_spill] sm:$0xff] }
 0x197   :  { %v3698_v29 = vadd.f32 %v3697_v26, %v3691_v4  ;;  %v1935_v10 = vadd.f32 %v1919_v34, %v1834_v25  ;;  %v2069_v54 = vrot.slane %v11890_v38, %v11894_v33  ;;  %v2854_v47 = vadd.f32 %v2838_v32, %v2753_v7  ;;  %11897 = vst [vmem:[#allocation66_spill] sm:$0xff] %v9725_v27 }
 0x198   :  { %v9713_v62 = vpop.eup %7333  ;;  %v2939_v20 = vmul.f32 %v2917_v30, %v9138_v12  ;;  %v3231_v31 = vmul.f32 %v3176_v28, %v9192_v1  ;;  %7335 = vrcp.f32 %v5526_v51  ;;  %v1726_v55 = vadd.f32 %v9578_v16, %v9564_v35  ;;  %v11899_v28 = vld [vmem:[#allocation33_spill] sm:$0xff] }
 0x199   :  { %11895 = vst [vmem:[#allocation47_spill] sm:$0xff] %v9713_v62  ;;  %v3699_v46 = vadd.f32 %v3698_v29, %v3692_v24  ;;  %v2020_v17 = vmul.f32 %v1968_v15, %v9038_v5  ;;  %v1903_v23 = vrot.slane %v9540_v42, %v11817_v53  ;;  %v3018_v30 = vrot.slane %v9425_v6, %v8555_v18  ;;  %v11902_v24 = vld [vmem:[#allocation10_spill] sm:$0xff] }
 0x19a   :  { %v3247_v3 = vadd.f32 %v3231_v31, %v3146_v50  ;;  %v3332_v25 = vmul.f32 %v3277_v37, %v9201_v57  ;;  %7337 = vpow2.f32 %v3502_v9  ;;  %v9740_v7 = vmul.f32 %v9718_v19, %v9718_v19  ;;  %v11901_v50 = vld [vmem:[#allocation52_spill] sm:$0xff] }
 0x19b   :  { %v9736_v34 = vmul.f32 %v9713_v62, %v3699_v46  ;;  %v1827_v35 = vmul.f32 %v1802_v22, %v9007_v11  ;;  %v2036_v16 = vadd.f32 %v2020_v17, %v1935_v10  ;;  %v2121_v4 = vmul.f32 %v2069_v54, %v11899_v28  ;;  %v11903_v22 = vld [vmem:[#allocation41_spill] sm:$0xff]  ;;  %v11904_v31 = vld [vmem:[#allocation48_spill] sm:$0xff] }
 0x19c   :  { %11898 = vst [vmem:[#allocation67_spill] sm:$0xff] %v9740_v7  ;;  %v9746_v26 = vmul.f32 %v9725_v27, %v9725_v27  ;;  %v2955_v2 = vadd.f32 %v2939_v20, %v2854_v47  ;;  %v3119_v15 = vrot.slane %v9396_v48, %v8555_v18  ;;  %v1770_v37 = vrot.slane %v11901_v50, %v11817_v53  ;;  %v11910_v50 = vld [vmem:[#allocation19_spill] sm:$0xff] }
 0x19d   :  { %v3703_v32 = vrot.slane %v9736_v34, 4  ;;  %v1843_v9 = vadd.f32 %v1827_v35, %v1726_v55  ;;  %v1928_v29 = vmul.f32 %v1903_v23, %v11893_v36  ;;  %v2170_v51 = vrot.slane %v9436_v14, %v11902_v24  ;;  %v11905_v35 = vld [vmem:[#allocation28_spill] sm:$0xff] }
 0x19e   :  { %11900 = vst [vmem:[#allocation33_spill] sm:$0xff] %v9746_v26  ;;  %v1653_v10 = vrot.slane %v11903_v22, %v8961_v63  ;;  %v3040_v54 = vmul.f32 %v3018_v30, %v9161_v13  ;;  %v9759_v47 = vadd.f32 %v3332_v25, %v3247_v3  ;;  %v1681_v46 = vrot.slane %v11904_v31, %v8961_v63  ;;  %v11908_v26 = vld [vmem:[#allocation35_spill] sm:$0xff] }
 0x19f   :  { %v3704_v20 = vadd.f32 %v3703_v32, %v9736_v34  ;;  %v2004_v55 = vrot.slane %v9556_v8, %v11894_v33  ;;  %v2137_v17 = vadd.f32 %v2121_v4, %v2036_v16  ;;  %v2271_v23 = vrot.slane %v11890_v38, %v11902_v24 }
 0x1a0   :  { %v11906_v62 = vrot.slane %v11903_v22, %v8555_v18  ;;  %v3056_v30 = vadd.f32 %v3040_v54, %v2955_v2  ;;  %v3141_v3 = vmul.f32 %v3119_v15, %v11891_v60  ;;  %v11907_v32 = vrot.slane %v11904_v31, %v8555_v18  ;;  %v11912_v31 = vld [vmem:[#allocation26_spill] sm:$0xff]  ;;  %v11916_v60 = vld [vmem:[#allocation16_spill] sm:$0xff] }
 0x1a1   :  { %v3705_v25 = vrot.slane %v3704_v20, 2  ;;  %v1944_v27 = vadd.f32 %v1928_v29, %v1843_v9  ;;  %v2222_v16 = vmul.f32 %v2170_v51, %v11908_v26  ;;  %v2105_v4 = vrot.slane %v9540_v42, %v11894_v33 }
 0x1a2   :  { %v1500_v19 = vmul.f32 %v11906_v62, %v11905_v35  ;;  %v1507_v7 = vmul.f32 %v11907_v32, %v11905_v35  ;;  %v11911_v22 = vrot.slane %v11910_v50, %v8961_v63  ;;  %v3220_v2 = vrot.slane %v9425_v6, %v8961_v63  ;;  %v11914_v35 = vld [vmem:[#allocation29_spill] sm:$0xff] }
 0x1a3   :  { %v3374_v15 = vrot.slane %v9759_v47, 4  ;;  %v3706_v54 = vadd.f32 %v3705_v25, %v3704_v20  ;;  %v11913_v9 = vrot.slane %v11912_v31, %v8961_v63  ;;  %v2029_v51 = vmul.f32 %v2004_v55, %v9038_v5  ;;  %v11917_v31 = vld [vmem:[#allocation30_spill] sm:$0xff] }
 0x1a4   :  { %v1601_v62 = vmul.f32 %v11911_v22, %v11909_v56  ;;  %v2238_v32 = vadd.f32 %v2222_v16, %v2137_v17  ;;  %v2323_v33 = vmul.f32 %v2271_v23, %v11914_v35  ;;  %v1516_v36 = vadd.f32 %v1500_v19, %v11915_v49 }
 0x1a5   :  { %v1608_v29 = vmul.f32 %v11913_v9, %v11909_v56  ;;  %v3157_v50 = vadd.f32 %v3141_v3, %v3056_v30  ;;  %v3321_v22 = vrot.slane %v9396_v48, %v8961_v63  ;;  %v3707_v6 = vrot.slane %v3706_v54, 1  ;;  %v7336_v0 = vpop.eup %7335 }
 0x1a6   :  { %v1523_v20 = vadd.f32 %v1507_v7, %v11916_v60  ;;  %v2045_v25 = vadd.f32 %v2029_v51, %v1944_v27  ;;  %v2130_v13 = vmul.f32 %v2105_v4, %v11899_v28  ;;  %v2372_v9 = vrot.slane %v9436_v14, %v11917_v31  ;;  %v11920_v4 = vld [vmem:[#allocation36_spill] sm:$0xff] }
 0x1a7   :  { %v3242_v55 = vmul.f32 %v3220_v2, %v9192_v1  ;;  %v3375_v17 = vmax.f32 %v9759_v47, %v3374_v15  ;;  %v3708_v23 = vadd.f32 %v3707_v6, %v3706_v54  ;;  %v9803_v49 = vmul.f32 %v7336_v0, %v9665_v39  ;;  %v9805_v19 = vpop.eup %7337 }
 0x1a8   :  { %11919 = vst [vmem:[#allocation41_spill] sm:$0xff] %v9805_v19  ;;  %v9808_v48 = vmul.f32 %v1770_v37, %v9007_v11  ;;  %v2206_v60 = vrot.slane %v9556_v8, %v11902_v24  ;;  %v2339_v27 = vadd.f32 %v2323_v33, %v2238_v32  ;;  %v2473_v7 = vrot.slane %v11890_v38, %v11917_v31  ;;  %v11921_v32 = vld [vmem:[#allocation32_spill] sm:$0xff] }
 0x1a9   :  { %11918 = vst [vmem:[#allocation10_spill] sm:$0xff] %v9803_v49  ;;  %v3258_v30 = vadd.f32 %v3242_v55, %v3157_v50  ;;  %v3343_v3 = vmul.f32 %v3321_v22, %v9201_v57  ;;  %7339 = vrcp.f32 %v3708_v23  ;;  %v5541_v39 = vmul.f32 %v9805_v19, %v9803_v49 }
 0x1aa   :  { %v1617_v0 = vadd.f32 %v1601_v62, %v1516_v36  ;;  %v2146_v16 = vadd.f32 %v2130_v13, %v2045_v25  ;;  %v2424_v2 = vmul.f32 %v2372_v9, %v11920_v4  ;;  %v2307_v37 = vrot.slane %v9540_v42, %v11902_v24 }
 0x1ab   :  { %v9820_v15 = vadd.f32 %v1608_v29, %v1523_v20  ;;  %v3376_v33 = vrot.slane %v3375_v17, 2  ;;  %v5543_v54 = vcombine.high %v5541_v39, %v5541_v39  ;;  %v5550_v51 = vrot.slane %v5541_v39, %v9550_v59 }
 0x1ac   :  { %v1702_v50 = vmul.f32 %v1653_v10, %v11921_v32  ;;  %v2231_v22 = vmul.f32 %v2206_v60, %v11908_v26  ;;  %v2440_v6 = vadd.f32 %v2424_v2, %v2339_v27  ;;  %v2525_v55 = vmul.f32 %v2473_v7, %v9089_v45 }
 0x1ad   :  { %v9826_v36 = vadd.f32 %v3343_v3, %v3258_v30  ;;  %v5557_v13 = vrot.slane %v5543_v54, %v9550_v59  ;;  %v5558_v62 = vcombine.high %v5550_v51, %v5550_v51  ;;  %v5566_v25 = vrot.slane %v5550_v51, %v9550_v59 }
 0x1ae   :  { %v9831_v29 = vmul.f32 %v1681_v46, %v11921_v32  ;;  %v2408_v20 = vrot.slane %v9556_v8, %v11917_v31  ;;  %v2247_v9 = vadd.f32 %v2231_v22, %v2146_v16  ;;  %v2332_v10 = vmul.f32 %v2307_v37, %v11914_v35 }
 0x1af   :  { %v2574_v23 = vrot.slane %v9436_v14, %v11830_v41  ;;  %v3377_v60 = vmax.f32 %v3375_v17, %v3376_v33  ;;  %v5580_v27 = vrot.slane %v5558_v62, %v9550_v59  ;;  %v5588_v7 = vcombine.high %v5566_v25, %v5566_v25 }
 0x1b0   :  { %v2610_v30 = vrot.slane %v9556_v8, %v11830_v41  ;;  %v2541_v3 = vadd.f32 %v2525_v55, %v2440_v6  ;;  %v5559_v39 = vcombine.high %v5557_v13, %v5557_v13  ;;  %v5595_v46 = vrot.slane %v5566_v25, %v11817_v53  ;;  %v11922_v55 = vld [vmem:[#allocation37_spill] sm:$0xff] }
 0x1b1   :  { %v2675_v2 = vrot.slane %v11890_v38, %v11830_v41  ;;  %v3440_v16 = vrot.slane %v9826_v36, 4  ;;  %v5590_v37 = vcombine.high %v5580_v27, %v5580_v27  ;;  %v5599_v54 = vrot.slane %v5580_v27, %v11817_v53  ;;  %v11923_v27 = vld [vmem:[#allocation27_spill] sm:$0xff] }
 0x1b2   :  { %v9846_v51 = vadd.f32 %v1702_v50, %v1617_v0  ;;  %v2433_v17 = vmul.f32 %v2408_v20, %v11920_v4  ;;  %v5573_v33 = vrot.slane %v5557_v13, %v9550_v59  ;;  %v5603_v22 = vrot.slane %v5588_v7, %v11817_v53  ;;  %v11924_v50 = vld [vmem:[#allocation17_spill] sm:$0xff] }
 0x1b3   :  { %v2348_v6 = vadd.f32 %v2332_v10, %v2247_v9  ;;  %v2626_v62 = vmul.f32 %v2574_v23, %v11922_v55  ;;  %v2509_v25 = vrot.slane %v9540_v42, %v11917_v31  ;;  %v3378_v49 = vrot.slane %v3377_v60, 1  ;;  %v11925_v31 = vld [vmem:[#allocation58_spill] sm:$0xff] }
 0x1b4   :  { %v5587_v19 = vrot.slane %v5559_v39, %v9550_v59  ;;  %v5607_v32 = vrot.slane %v5590_v37, %v11817_v53  ;;  %v5632_v0 = vmul.f32 %v5595_v46, %v11923_v27  ;;  %v5633_v35 = vmul.f32 %v5599_v54, %v11924_v50 }
 0x1b5   :  { %v9859_v20 = vmul.f32 %v2610_v30, %v11922_v55  ;;  %v2642_v13 = vadd.f32 %v2626_v62, %v2541_v3  ;;  %v2727_v9 = vmul.f32 %v2675_v2, %v9111_v44  ;;  %v3441_v10 = vmax.f32 %v9826_v36, %v3440_v16 }
 0x1b6   :  { %v7340_v23 = vpop.eup %7339  ;;  %v5589_v7 = vcombine.high %v5573_v33, %v5573_v33  ;;  %v5611_v4 = vrot.slane %v5573_v33, %v11817_v53  ;;  %v5634_v39 = vmul.f32 %v5603_v22, %v11925_v31  ;;  %v5640_v56 = vadd.f32 %v5633_v35, %v5632_v0  ;;  %v11926_v0 = vld [vmem:[#allocation62_spill] sm:$0xff] }
 0x1b7   :  { %v2449_v37 = vadd.f32 %v2433_v17, %v2348_v6  ;;  %v2534_v46 = vmul.f32 %v2509_v25, %v9089_v45  ;;  %v3379_v27 = vmax.f32 %v3377_v60, %v3378_v49  ;;  %v3710_v54 = vmul.f32 %v7340_v23, %v9736_v34 }
 0x1b8   :  { %v5591_v30 = vcombine.high %v5587_v19, %v5587_v19  ;;  %v5615_v3 = vrot.slane %v5587_v19, %v11817_v53  ;;  %v5635_v2 = vmul.f32 %v5607_v32, %v9613_v58  ;;  %v5641_v62 = vadd.f32 %v5640_v56, %v5634_v39 }
 0x1b9   :  { %v2776_v16 = vrot.slane %v9436_v14, %v11772_v21  ;;  %v3442_v50 = vrot.slane %v3441_v10, 2  ;;  %v3714_v33 = vcombine.high %v3710_v54, %v3710_v54  ;;  %v3721_v22 = vrot.slane %v3710_v54, %v9550_v59  ;;  %3712 = vst [vmem:[#allocation3 + $0x8] sm:$0xff] %v3710_v54  ;;  %v11927_v54 = vld [vmem:[#allocation63_spill] sm:$0xff] }
 0x1ba   :  { %v2743_v35 = vadd.f32 %v2727_v9, %v2642_v13  ;;  %v5619_v17 = vrot.slane %v5589_v7, %v11817_v53  ;;  %v5636_v49 = vmul.f32 %v5611_v4, %v9632_v52  ;;  %v5642_v34 = vadd.f32 %v5641_v62, %v5635_v2 }
 0x1bb   :  { %v3460_v60 = vsub.f32 %v9759_v47, %v3379_v27  ;;  %v3728_v19 = vrot.slane %v3714_v33, %v9550_v59  ;;  %v3729_v32 = vcombine.high %v3721_v22, %v3721_v22  ;;  %v3737_v56 = vrot.slane %v3721_v22, %v9550_v59 }
 0x1bc   :  { %v2877_v6 = vrot.slane %v11890_v38, %v11772_v21  ;;  %v5623_v25 = vrot.slane %v5591_v30, %v11817_v53  ;;  %v5637_v23 = vmul.f32 %v5615_v3, %v11926_v0  ;;  %v5643_v13 = vadd.f32 %v5642_v34, %v5636_v49 }
 0x1bd   :  { %v3443_v9 = vmax.f32 %v3441_v10, %v3442_v50  ;;  %v3730_v7 = vcombine.high %v3728_v19, %v3728_v19  ;;  %v3751_v4 = vrot.slane %v3729_v32, %v9550_v59  ;;  %v3759_v39 = vcombine.high %v3737_v56, %v3737_v56 }
 0x1be   :  { %v2828_v47 = vmul.f32 %v2776_v16, %v9126_v40  ;;  %v3766_v27 = vrot.slane %v3737_v56, %v11817_v53  ;;  %v5638_v2 = vmul.f32 %v5619_v17, %v11927_v54  ;;  %v5644_v62 = vadd.f32 %v5643_v13, %v5637_v23 }
 0x1bf   :  { %v3478_v33 = vmul.f32 1.442695, %v3460_v60  ;;  %v3744_v22 = vrot.slane %v3728_v19, %v9550_v59  ;;  %v3761_v52 = vcombine.high %v3751_v4, %v3751_v4  ;;  %v3770_v30 = vrot.slane %v3751_v4, %v11817_v53  ;;  %v11928_v19 = vld [vmem:[#allocation51_spill] sm:$0xff] }
 0x1c0   :  { %v2550_v3 = vadd.f32 %v2534_v46, %v2449_v37  ;;  %v3774_v50 = vrot.slane %v3759_v39, %v11817_v53  ;;  %v5639_v10 = vmul.f32 %v5623_v25, %v9657_v61  ;;  %v5645_v49 = vadd.f32 %v5644_v62, %v5638_v2  ;;  %v11929_v25 = vld [vmem:[#allocation53_spill] sm:$0xff] }
 0x1c1   :  { %v2844_v34 = vadd.f32 %v2828_v47, %v2743_v35  ;;  %v2929_v16 = vmul.f32 %v2877_v6, %v9138_v12  ;;  %v3444_v32 = vrot.slane %v3443_v9, 1  ;;  %v3758_v56 = vrot.slane %v3730_v7, %v9550_v59 }
 0x1c2   :  { %v3778_v17 = vrot.slane %v3761_v52, %v11817_v53  ;;  %v3803_v60 = vmul.f32 %v3766_v27, %v11887_v43  ;;  %v3804_v23 = vmul.f32 %v3770_v30, %v11928_v19  ;;  %v9894_v13 = vadd.f32 %v5645_v49, %v5639_v10  ;;  %v11930_v30 = vld [vmem:[#allocation54_spill] sm:$0xff] }
 0x1c3   :  { %v2711_v37 = vrot.slane %v9540_v42, %v11830_v41  ;;  %v2978_v46 = vrot.slane %v9436_v14, %v8555_v18  ;;  %7341 = vpow2.f32 %v3478_v33  ;;  %v3760_v35 = vcombine.high %v3744_v22, %v3744_v22 }
 0x1c4   :  { %v3782_v6 = vrot.slane %v3744_v22, %v11817_v53  ;;  %v3805_v7 = vmul.f32 %v3774_v50, %v11929_v25  ;;  %v3811_v4 = vadd.f32 %v3804_v23, %v3803_v60  ;;  %v5647_v52 = vrot.slane %v9894_v13, 4  ;;  %v11931_v22 = vld [vmem:[#allocation50_spill] sm:$0xff] }
 0x1c5   :  { %v2945_v39 = vadd.f32 %v2929_v16, %v2844_v34  ;;  %v3079_v47 = vrot.slane %v11890_v38, %v8555_v18  ;;  %v3445_v27 = vmax.f32 %v3443_v9, %v3444_v32  ;;  %v3762_v2 = vcombine.high %v3758_v56, %v3758_v56  ;;  %v11932_v34 = vld [vmem:[#allocation39_spill] sm:$0xff] }
 0x1c6   :  { %v3786_v62 = vrot.slane %v3758_v56, %v11817_v53  ;;  %v3806_v10 = vmul.f32 %v3778_v17, %v11930_v30  ;;  %v3812_v49 = vadd.f32 %v3811_v4, %v3805_v7  ;;  %v5648_v33 = vadd.f32 %v5647_v52, %v9894_v13  ;;  %v11933_v9 = vld [vmem:[#allocation55_spill] sm:$0xff] }
 0x1c7   :  { %v1871_v19 = vrot.slane %v11931_v22, %v11817_v53  ;;  %v2651_v50 = vadd.f32 %v9859_v20, %v2550_v3  ;;  %v2736_v60 = vmul.f32 %v2711_v37, %v9111_v44  ;;  %v3030_v16 = vmul.f32 %v2978_v46, %v11932_v34  ;;  %v11934_v4 = vld [vmem:[#allocation31_spill] sm:$0xff]  ;;  %v11935_v3 = vld [vmem:[#allocation56_spill] sm:$0xff] }
 0x1c8   :  { %v3790_v23 = vrot.slane %v3760_v35, %v11817_v53  ;;  %v3807_v32 = vmul.f32 %v3782_v6, %v11933_v9  ;;  %v3813_v25 = vadd.f32 %v3812_v49, %v3806_v10  ;;  %v5649_v56 = vrot.slane %v5648_v33, 2  ;;  %v11936_v6 = vld [vmem:[#allocation34_spill] sm:$0xff] }
 0x1c9   :  { %v2812_v17 = vrot.slane %v9556_v8, %v11772_v21  ;;  %v3046_v7 = vadd.f32 %v3030_v16, %v2945_v39  ;;  %v3131_v52 = vmul.f32 %v3079_v47, %v11934_v4  ;;  %v3471_v30 = vsub.f32 %v9826_v36, %v3445_v27  ;;  %v11937_v47 = vld [vmem:[#allocation57_spill] sm:$0xff] }
 0x1ca   :  { %v3794_v20 = vrot.slane %v3762_v2, %v11817_v53  ;;  %v3808_v37 = vmul.f32 %v3786_v62, %v11935_v3  ;;  %v3814_v43 = vadd.f32 %v3813_v25, %v3807_v32  ;;  %v5650_v46 = vadd.f32 %v5649_v56, %v5648_v33  ;;  %v11938_v16 = vld [vmem:[#allocation9_spill] sm:$0xff]  ;;  %v11939_v62 = vld [vmem:[#allocation52_spill] sm:$0xff] }
 0x1cb   :  { %v1835_v35 = vadd.f32 %v9808_v48, %v9846_v51  ;;  %v1920_v10 = vmul.f32 %v1871_v19, %v11936_v6  ;;  %v2752_v49 = vadd.f32 %v2736_v60, %v2651_v50  ;;  %v2913_v9 = vrot.slane %v9540_v42, %v11772_v21  ;;  %v11940_v19 = vld [vmem:[#allocation59_spill] sm:$0xff] }
 0x1cc   :  { %v3180_v39 = vrot.slane %v9436_v14, %v8961_v63  ;;  %v3809_v36 = vmul.f32 %v3790_v23, %v11937_v47  ;;  %v3815_v27 = vadd.f32 %v3814_v43, %v3808_v37  ;;  %v5651_v2 = vrot.slane %v5650_v46, 1  ;;  %v11941_v14 = vld [vmem:[#allocation33_spill] sm:$0xff] }
 0x1cd   :  { %v1972_v25 = vrot.slane %v11939_v62, %v11938_v16  ;;  %v2837_v33 = vmul.f32 %v2812_v17, %v9126_v40  ;;  %v3147_v32 = vadd.f32 %v3131_v52, %v3046_v7  ;;  %v3281_v48 = vrot.slane %v11890_v38, %v8961_v63  ;;  %v9944_v17 = vld [vmem:[%s11351_s0 + $0x68] sm:$0xff] }
 0x1ce   :  { %v3500_v51 = vmul.f32 1.442695, %v3471_v30  ;;  %v3810_v50 = vmul.f32 %v3794_v20, %v11940_v19  ;;  %v3816_v60 = vadd.f32 %v3815_v27, %v3809_v36  ;;  %v5652_v56 = vadd.f32 %v5651_v2, %v5650_v46  ;;  %11943 = vst [vmem:[#allocation35_spill] sm:$0xff] %v9944_v17  ;;  %v9951_v52 = vld [vmem:[%s11351_s0 + $0xa8] sm:$0xff]  ;;  %v11945_v46 = vld [vmem:[#allocation66_spill] sm:$0xff] }
 0x1cf   :  { %v1798_v3 = vrot.slane %v11941_v14, %v11817_v53  ;;  %v1936_v23 = vadd.f32 %v1920_v10, %v1835_v35  ;;  %v2073_v43 = vrot.slane %v11931_v22, %v11938_v16  ;;  %v2853_v37 = vadd.f32 %v2837_v33, %v2752_v49  ;;  %11944 = vst [vmem:[#allocation19_spill] sm:$0xff] %v9951_v52  ;;  %v11954_v19 = vld [vmem:[#allocation7_spill] sm:$0xff] }
 0x1d0   :  { %v9939_v47 = vpop.eup %7341  ;;  %v2938_v38 = vmul.f32 %v2913_v9, %v9138_v12  ;;  %v3232_v30 = vmul.f32 %v3180_v39, %v9192_v1  ;;  %v3817_v7 = vadd.f32 %v3816_v60, %v3810_v50  ;;  %7343 = vrcp.f32 %v5652_v56  ;;  %v7465_v56 = vld [vmem:[%s11351_s0 + $0x50] sm:$0xff] }
 0x1d1   :  { %11942 = vst [vmem:[#allocation48_spill] sm:$0xff] %v9939_v47  ;;  %v1725_v22 = vadd.f32 %v9831_v29, %v9820_v15  ;;  %v2021_v20 = vmul.f32 %v1972_v25, %v9038_v5  ;;  %v1899_v35 = vrot.slane %v11945_v46, %v11817_v53  ;;  %v3014_v9 = vrot.slane %v9556_v8, %v8555_v18 }
 0x1d2   :  { %v3248_v10 = vadd.f32 %v3232_v30, %v3147_v32  ;;  %v3333_v49 = vmul.f32 %v3281_v48, %v9201_v57  ;;  %7345 = vpow2.f32 %v3500_v51  ;;  %v9962_v39 = vmul.f32 %v9939_v47, %v3817_v7  ;;  %v11948_v48 = vld [vmem:[#allocation67_spill] sm:$0xff]  ;;  %v7466_v30 = vld [vmem:[%s11351_s0 + $0xa0] sm:$0xff] }
 0x1d3   :  { %v9966_v36 = vmul.f32 %v9944_v17, %v9944_v17  ;;  %v1826_v15 = vmul.f32 %v1798_v3, %v9007_v11  ;;  %v2037_v29 = vadd.f32 %v2021_v20, %v1936_v23  ;;  %v2122_v27 = vmul.f32 %v2073_v43, %v11899_v28  ;;  %v11952_v17 = vld [vmem:[#allocation46_spill] sm:$0xff] }
 0x1d4   :  { %v9972_v2 = vmul.f32 %v9951_v52, %v9951_v52  ;;  %v2954_v25 = vadd.f32 %v2938_v38, %v2853_v37  ;;  %v3115_v33 = vrot.slane %v9540_v42, %v8555_v18  ;;  %v3821_v32 = vrot.slane %v9962_v39, 4 }
 0x1d5   :  { %11946 = vst [vmem:[#allocation26_spill] sm:$0xff] %v9966_v36  ;;  %v1774_v51 = vrot.slane %v11948_v48, %v11817_v53  ;;  %v1842_v50 = vadd.f32 %v1826_v15, %v1725_v22  ;;  %v1927_v60 = vmul.f32 %v1899_v35, %v11936_v6  ;;  %v2174_v3 = vrot.slane %v11939_v62, %v11902_v24  ;;  %v9999_v35 = vld [vmem:[%s11351_s0 + $0x48] sm:$0xff]  ;;  %v11955_v48 = vld [vmem:[#allocation20_spill] sm:$0xff] }
 0x1d6   :  { %11947 = vst [vmem:[#allocation15_spill] sm:$0xff] %v9972_v2  ;;  %v1657_v23 = vrot.slane %v7465_v56, %v8961_v63  ;;  %v3039_v43 = vmul.f32 %v3014_v9, %v11932_v34  ;;  %v9987_v37 = vadd.f32 %v3333_v49, %v3248_v10  ;;  %v3822_v38 = vadd.f32 %v3821_v32, %v9962_v39  ;;  %v11949_v10 = vld [vmem:[#allocation28_spill] sm:$0xff]  ;;  %v11950_v49 = vld [vmem:[#allocation42_spill] sm:$0xff] }
 0x1d7   :  { %v1677_v7 = vrot.slane %v7466_v30, %v8961_v63  ;;  %v2000_v22 = vrot.slane %v11941_v14, %v11938_v16  ;;  %v2138_v20 = vadd.f32 %v2122_v27, %v2037_v29  ;;  %v2275_v9 = vrot.slane %v9999_v35, %v11902_v24  ;;  %v11960_v6 = vld [vmem:[#allocation8_spill] sm:$0xff] }
 0x1d8   :  { %v11951_v15 = vrot.slane %v11950_v49, %v8555_v18  ;;  %v3055_v56 = vadd.f32 %v3039_v43, %v2954_v25  ;;  %v3140_v30 = vmul.f32 %v3115_v33, %v11934_v4  ;;  %v3823_v47 = vrot.slane %v3822_v38, 2 }
 0x1d9   :  { %v11953_v29 = vrot.slane %v11952_v17, %v8555_v18  ;;  %v1943_v36 = vadd.f32 %v1927_v60, %v1842_v50  ;;  %v2223_v52 = vmul.f32 %v2174_v3, %v11908_v26  ;;  %v2101_v2 = vrot.slane %v11945_v46, %v11938_v16  ;;  %v11957_v17 = vld [vmem:[#allocation25_spill] sm:$0xff]  ;;  %v11961_v18 = vld [vmem:[#allocation14_spill] sm:$0xff] }
 0x1da   :  { %v1501_v32 = vmul.f32 %v11951_v15, %v11949_v10  ;;  %v11956_v49 = vrot.slane %v11955_v48, %v8961_v63  ;;  %v3216_v25 = vrot.slane %v9556_v8, %v8961_v63  ;;  %v3380_v33 = vrot.slane %v9987_v37, 4 }
 0x1db   :  { %v1506_v27 = vmul.f32 %v11953_v29, %v11949_v10  ;;  %v3824_v43 = vadd.f32 %v3823_v47, %v3822_v38  ;;  %v11958_v50 = vrot.slane %v11957_v17, %v8961_v63  ;;  %v2028_v3 = vmul.f32 %v2000_v22, %v9038_v5  ;;  %v11959_v10 = vld [vmem:[#allocation29_spill] sm:$0xff]  ;;  %v11962_v17 = vld [vmem:[#allocation30_spill] sm:$0xff] }
 0x1dc   :  { %v1602_v15 = vmul.f32 %v11956_v49, %v11954_v19  ;;  %v2239_v29 = vadd.f32 %v2223_v52, %v2138_v20  ;;  %v2324_v16 = vmul.f32 %v2275_v9, %v11959_v10  ;;  %v1517_v4 = vadd.f32 %v1501_v32, %v11960_v6 }
 0x1dd   :  { %v1607_v60 = vmul.f32 %v11958_v50, %v11954_v19  ;;  %v3156_v48 = vadd.f32 %v3140_v30, %v3055_v56  ;;  %v3317_v49 = vrot.slane %v9540_v42, %v8961_v63  ;;  %v3825_v8 = vrot.slane %v3824_v43, 1  ;;  %v7344_v34 = vpop.eup %7343 }
 0x1de   :  { %v1522_v47 = vadd.f32 %v1506_v27, %v11961_v18  ;;  %v2044_v38 = vadd.f32 %v2028_v3, %v1943_v36  ;;  %v2129_v12 = vmul.f32 %v2101_v2, %v11899_v28  ;;  %v2376_v50 = vrot.slane %v11939_v62, %v11962_v17  ;;  %v11965_v27 = vld [vmem:[#allocation36_spill] sm:$0xff] }
 0x1df   :  { %v3241_v52 = vmul.f32 %v3216_v25, %v9192_v1  ;;  %v3381_v22 = vmax.f32 %v9987_v37, %v3380_v33  ;;  %v3826_v20 = vadd.f32 %v3825_v8, %v3824_v43  ;;  %v10038_v6 = vmul.f32 %v7344_v34, %v9894_v13  ;;  %v10040_v9 = vpop.eup %7345 }
 0x1e0   :  { %11964 = vst [vmem:[#allocation37_spill] sm:$0xff] %v10040_v9  ;;  %v10043_v42 = vmul.f32 %v1774_v51, %v9007_v11  ;;  %v2202_v18 = vrot.slane %v11941_v14, %v11902_v24  ;;  %v2340_v36 = vadd.f32 %v2324_v16, %v2239_v29  ;;  %v2477_v2 = vrot.slane %v9999_v35, %v11962_v17  ;;  %v11966_v29 = vld [vmem:[#allocation32_spill] sm:$0xff] }
 0x1e1   :  { %11963 = vst [vmem:[#allocation16_spill] sm:$0xff] %v10038_v6  ;;  %v3257_v32 = vadd.f32 %v3241_v52, %v3156_v48  ;;  %v3342_v56 = vmul.f32 %v3317_v49, %v9201_v57  ;;  %7347 = vrcp.f32 %v3826_v20  ;;  %v5667_v13 = vmul.f32 %v10040_v9, %v10038_v6 }
 0x1e2   :  { %v1618_v34 = vadd.f32 %v1602_v15, %v1517_v4  ;;  %v2145_v30 = vadd.f32 %v2129_v12, %v2044_v38  ;;  %v2425_v25 = vmul.f32 %v2376_v50, %v11965_v27  ;;  %v2303_v51 = vrot.slane %v11945_v46, %v11902_v24 }
 0x1e3   :  { %v10055_v33 = vadd.f32 %v1607_v60, %v1522_v47  ;;  %v3382_v16 = vrot.slane %v3381_v22, 2  ;;  %v5669_v43 = vcombine.high %v5667_v13, %v5667_v13  ;;  %v5676_v3 = vrot.slane %v5667_v13, %v9550_v59 }
 0x1e4   :  { %v1703_v48 = vmul.f32 %v1657_v23, %v11966_v29  ;;  %v2230_v49 = vmul.f32 %v2202_v18, %v11908_v26  ;;  %v2441_v8 = vadd.f32 %v2425_v25, %v2340_v36  ;;  %v2526_v52 = vmul.f32 %v2477_v2, %v9089_v45 }
 0x1e5   :  { %v10061_v4 = vadd.f32 %v3342_v56, %v3257_v32  ;;  %v5683_v12 = vrot.slane %v5669_v43, %v9550_v59  ;;  %v5684_v15 = vcombine.high %v5676_v3, %v5676_v3  ;;  %v5692_v38 = vrot.slane %v5676_v3, %v9550_v59 }
 0x1e6   :  { %v10066_v60 = vmul.f32 %v1677_v7, %v11966_v29  ;;  %v2404_v47 = vrot.slane %v11941_v14, %v11962_v17  ;;  %v2246_v50 = vadd.f32 %v2230_v49, %v2145_v30  ;;  %v2331_v23 = vmul.f32 %v2303_v51, %v11959_v10 }
 0x1e7   :  { %v2578_v20 = vrot.slane %v11939_v62, %v11830_v41  ;;  %v3383_v18 = vmax.f32 %v3381_v22, %v3382_v16  ;;  %v5706_v36 = vrot.slane %v5684_v15, %v9550_v59  ;;  %v5714_v2 = vcombine.high %v5692_v38, %v5692_v38 }
 0x1e8   :  { %v2606_v32 = vrot.slane %v11941_v14, %v11830_v41  ;;  %v2542_v56 = vadd.f32 %v2526_v52, %v2441_v8  ;;  %v5685_v13 = vcombine.high %v5683_v12, %v5683_v12  ;;  %v5721_v7 = vrot.slane %v5692_v38, %v11817_v53 }
 0x1e9   :  { %v2679_v25 = vrot.slane %v9999_v35, %v11830_v41  ;;  %v3434_v30 = vrot.slane %v10061_v4, 4  ;;  %v5716_v51 = vcombine.high %v5706_v36, %v5706_v36  ;;  %v5725_v43 = vrot.slane %v5706_v36, %v11817_v53  ;;  %v11967_v36 = vld [vmem:[#allocation27_spill] sm:$0xff] }
 0x1ea   :  { %v10081_v3 = vadd.f32 %v1703_v48, %v1618_v34  ;;  %v2432_v22 = vmul.f32 %v2404_v47, %v11965_v27  ;;  %v5699_v16 = vrot.slane %v5683_v12, %v9550_v59  ;;  %v5729_v49 = vrot.slane %v5714_v2, %v11817_v53  ;;  %v11968_v48 = vld [vmem:[#allocation17_spill] sm:$0xff] }
 0x1eb   :  { %v2347_v8 = vadd.f32 %v2331_v23, %v2246_v50  ;;  %v2627_v52 = vmul.f32 %v2578_v20, %v11922_v55  ;;  %v2505_v15 = vrot.slane %v11945_v46, %v11962_v17  ;;  %v3384_v38 = vrot.slane %v3383_v18, 1 }
 0x1ec   :  { %v5713_v6 = vrot.slane %v5685_v13, %v9550_v59  ;;  %v5733_v9 = vrot.slane %v5716_v51, %v11817_v53  ;;  %v5758_v34 = vmul.f32 %v5721_v7, %v11967_v36  ;;  %v5759_v29 = vmul.f32 %v5725_v43, %v11968_v48 }
 0x1ed   :  { %v10094_v47 = vmul.f32 %v2606_v32, %v11922_v55  ;;  %v2643_v12 = vadd.f32 %v2627_v52, %v2542_v56  ;;  %v2728_v50 = vmul.f32 %v2679_v25, %v9111_v44  ;;  %v3435_v23 = vmax.f32 %v10061_v4, %v3434_v30 }
 0x1ee   :  { %v7348_v20 = vpop.eup %7347  ;;  %v5715_v2 = vcombine.high %v5699_v16, %v5699_v16  ;;  %v5737_v27 = vrot.slane %v5699_v16, %v11817_v53  ;;  %v5760_v13 = vmul.f32 %v5729_v49, %v11925_v31  ;;  %v5766_v17 = vadd.f32 %v5759_v29, %v5758_v34 }
 0x1ef   :  { %v2448_v51 = vadd.f32 %v2432_v22, %v2347_v8  ;;  %v2533_v7 = vmul.f32 %v2505_v15, %v9089_v45  ;;  %v3385_v36 = vmax.f32 %v3383_v18, %v3384_v38  ;;  %v3828_v43 = vmul.f32 %v7348_v20, %v9962_v39  ;;  %v11969_v18 = vld [vmem:[#allocation61_spill] sm:$0xff] }
 0x1f0   :  { %v5717_v32 = vcombine.high %v5713_v6, %v5713_v6  ;;  %v5741_v56 = vrot.slane %v5713_v6, %v11817_v53  ;;  %v5761_v25 = vmul.f32 %v5733_v9, %v9613_v58  ;;  %v5767_v52 = vadd.f32 %v5766_v17, %v5760_v13 }
 0x1f1   :  { %v2780_v30 = vrot.slane %v11939_v62, %v11772_v21  ;;  %v3436_v48 = vrot.slane %v3435_v23, 2  ;;  %v3832_v16 = vcombine.high %v3828_v43, %v3828_v43  ;;  %v3839_v49 = vrot.slane %v3828_v43, %v9550_v59  ;;  %3830 = vst [vmem:[#allocation3 + $0x10] sm:$0xff] %v3828_v43 }
 0x1f2   :  { %v2744_v29 = vadd.f32 %v2728_v50, %v2643_v12  ;;  %v5745_v22 = vrot.slane %v5715_v2, %v11817_v53  ;;  %v5762_v8 = vmul.f32 %v5737_v27, %v11969_v18  ;;  %v5768_v39 = vadd.f32 %v5767_v52, %v5761_v25 }
 0x1f3   :  { %v3461_v15 = vsub.f32 %v9987_v37, %v3385_v36  ;;  %v3846_v6 = vrot.slane %v3832_v16, %v9550_v59  ;;  %v3847_v9 = vcombine.high %v3839_v49, %v3839_v49  ;;  %v3855_v17 = vrot.slane %v3839_v49, %v9550_v59 }
 0x1f4   :  { %v2881_v38 = vrot.slane %v9999_v35, %v11772_v21  ;;  %v5749_v34 = vrot.slane %v5717_v32, %v11817_v53  ;;  %v5763_v20 = vmul.f32 %v5741_v56, %v11926_v0  ;;  %v5769_v12 = vadd.f32 %v5768_v39, %v5762_v8 }
 0x1f5   :  { %v3437_v50 = vmax.f32 %v3435_v23, %v3436_v48  ;;  %v3848_v2 = vcombine.high %v3846_v6, %v3846_v6  ;;  %v3869_v27 = vrot.slane %v3847_v9, %v9550_v59  ;;  %v3877_v13 = vcombine.high %v3855_v17, %v3855_v17  ;;  %v11970_v9 = vld [vmem:[#allocation38_spill] sm:$0xff] }
 0x1f6   :  { %v2829_v37 = vmul.f32 %v2780_v30, %v9126_v40  ;;  %v3884_v36 = vrot.slane %v3855_v17, %v11817_v53  ;;  %v5764_v43 = vmul.f32 %v5745_v22, %v11927_v54  ;;  %v5770_v25 = vadd.f32 %v5769_v12, %v5763_v20 }
 0x1f7   :  { %v3480_v52 = vmul.f32 1.442695, %v3461_v15  ;;  %v3862_v16 = vrot.slane %v3846_v6, %v9550_v59  ;;  %v3879_v49 = vcombine.high %v3869_v27, %v3869_v27  ;;  %v3888_v32 = vrot.slane %v3869_v27, %v11817_v53  ;;  %v11971_v15 = vld [vmem:[#allocation49_spill] sm:$0xff]  ;;  %v11972_v6 = vld [vmem:[#allocation51_spill] sm:$0xff] }
 0x1f8   :  { %v2549_v56 = vadd.f32 %v2533_v7, %v2448_v51  ;;  %v3892_v48 = vrot.slane %v3877_v13, %v11817_v53  ;;  %v5765_v23 = vmul.f32 %v5749_v34, %v9657_v61  ;;  %v5771_v8 = vadd.f32 %v5770_v25, %v5764_v43  ;;  %v11973_v7 = vld [vmem:[#allocation40_spill] sm:$0xff]  ;;  %v11974_v27 = vld [vmem:[#allocation53_spill] sm:$0xff] }
 0x1f9   :  { %v2845_v39 = vadd.f32 %v2829_v37, %v2744_v29  ;;  %v2930_v30 = vmul.f32 %v2881_v38, %v11970_v9  ;;  %v3438_v0 = vrot.slane %v3437_v50, 1  ;;  %v3876_v17 = vrot.slane %v3848_v2, %v9550_v59 }
 0x1fa   :  { %v3896_v22 = vrot.slane %v3879_v49, %v11817_v53  ;;  %v3921_v20 = vmul.f32 %v3884_v36, %v11971_v15  ;;  %v3922_v12 = vmul.f32 %v3888_v32, %v11972_v6  ;;  %v10129_v54 = vadd.f32 %v5771_v8, %v5765_v23  ;;  %v11975_v23 = vld [vmem:[#allocation54_spill] sm:$0xff] }
 0x1fb   :  { %v2707_v51 = vrot.slane %v11945_v46, %v11830_v41  ;;  %v2982_v34 = vrot.slane %v11939_v62, %v11973_v7  ;;  %7349 = vpow2.f32 %v3480_v52  ;;  %v3878_v29 = vcombine.high %v3862_v16, %v3862_v16 }
 0x1fc   :  { %v3900_v38 = vrot.slane %v3862_v16, %v11817_v53  ;;  %v3923_v2 = vmul.f32 %v3892_v48, %v11974_v27  ;;  %v3929_v13 = vadd.f32 %v3922_v12, %v3921_v20  ;;  %v5773_v37 = vrot.slane %v10129_v54, 4  ;;  %v11976_v16 = vld [vmem:[#allocation65_spill] sm:$0xff] }
 0x1fd   :  { %v2946_v36 = vadd.f32 %v2930_v30, %v2845_v39  ;;  %v3083_v43 = vrot.slane %v9999_v35, %v11973_v7  ;;  %v3439_v25 = vmax.f32 %v3437_v50, %v3438_v0  ;;  %v3880_v49 = vcombine.high %v3876_v17, %v3876_v17  ;;  %v11977_v39 = vld [vmem:[#allocation39_spill] sm:$0xff] }
 0x1fe   :  { %v3904_v32 = vrot.slane %v3876_v17, %v11817_v53  ;;  %v3924_v8 = vmul.f32 %v3896_v22, %v11975_v23  ;;  %v3930_v6 = vadd.f32 %v3929_v13, %v3923_v2  ;;  %v5774_v52 = vadd.f32 %v5773_v37, %v10129_v54  ;;  %v11978_v0 = vld [vmem:[#allocation55_spill] sm:$0xff] }
 0x1ff   :  { %v1875_v15 = vrot.slane %v11976_v16, %v11817_v53  ;;  %v2650_v48 = vadd.f32 %v10094_v47, %v2549_v56  ;;  %v2735_v20 = vmul.f32 %v2707_v51, %v9111_v44  ;;  %v3031_v30 = vmul.f32 %v2982_v34, %v11977_v39  ;;  %v11979_v13 = vld [vmem:[#allocation31_spill] sm:$0xff]  ;;  %v11980_v56 = vld [vmem:[#allocation56_spill] sm:$0xff] }
 0x200   :  { %v3908_v12 = vrot.slane %v3878_v29, %v11817_v53  ;;  %v3925_v50 = vmul.f32 %v3900_v38, %v11978_v0  ;;  %v3931_v27 = vadd.f32 %v3930_v6, %v3924_v8  ;;  %v5775_v17 = vrot.slane %v5774_v52, 2  ;;  %v11981_v38 = vld [vmem:[#allocation34_spill] sm:$0xff] }
 0x201   :  { %v2808_v22 = vrot.slane %v11941_v14, %v11772_v21  ;;  %v3047_v2 = vadd.f32 %v3031_v30, %v2946_v36  ;;  %v3132_v37 = vmul.f32 %v3083_v43, %v11979_v13  ;;  %v3470_v23 = vsub.f32 %v10061_v4, %v3439_v25  ;;  %v11982_v43 = vld [vmem:[#allocation57_spill] sm:$0xff] }
 0x202   :  { %v3912_v47 = vrot.slane %v3880_v49, %v11817_v53  ;;  %v3926_v51 = vmul.f32 %v3904_v32, %v11980_v56  ;;  %v3932_v61 = vadd.f32 %v3931_v27, %v3925_v50  ;;  %v5776_v34 = vadd.f32 %v5775_v17, %v5774_v52  ;;  %v11983_v30 = vld [vmem:[#allocation9_spill] sm:$0xff]  ;;  %v11984_v32 = vld [vmem:[#allocation67_spill] sm:$0xff] }
 0x203   :  { %v1836_v29 = vadd.f32 %v10043_v42, %v10081_v3  ;;  %v1921_v6 = vmul.f32 %v1875_v15, %v11981_v38  ;;  %v2751_v8 = vadd.f32 %v2735_v20, %v2650_v48  ;;  %v2909_v0 = vrot.slane %v11945_v46, %v11772_v21  ;;  %v11985_v15 = vld [vmem:[#allocation59_spill] sm:$0xff] }
 0x204   :  { %v3184_v36 = vrot.slane %v11939_v62, %v8961_v63  ;;  %v3927_v4 = vmul.f32 %v3908_v12, %v11982_v43  ;;  %v3933_v25 = vadd.f32 %v3932_v61, %v3926_v51  ;;  %v5777_v49 = vrot.slane %v5776_v34, 1  ;;  %v11986_v62 = vld [vmem:[#allocation15_spill] sm:$0xff] }
 0x205   :  { %v1976_v27 = vrot.slane %v11984_v32, %v11983_v30  ;;  %v2836_v52 = vmul.f32 %v2808_v22, %v9126_v40  ;;  %v3148_v50 = vadd.f32 %v3132_v37, %v3047_v2  ;;  %v3285_v42 = vrot.slane %v9999_v35, %v8961_v63  ;;  %v10179_v22 = vld [vmem:[%s11351_s0 + $0x78] sm:$0xff] }
 0x206   :  { %v3498_v3 = vmul.f32 1.442695, %v3470_v23  ;;  %v3928_v48 = vmul.f32 %v3912_v47, %v11985_v15  ;;  %v3934_v20 = vadd.f32 %v3933_v25, %v3927_v4  ;;  %v5778_v17 = vadd.f32 %v5777_v49, %v5776_v34  ;;  %11988 = vst [vmem:[#allocation50_spill] sm:$0xff] %v10179_v22  ;;  %v10186_v37 = vld [vmem:[%s11351_s0 + $0x98] sm:$0xff]  ;;  %v12003_v15 = vld [vmem:[#allocation18_spill] sm:$0xff] }
 0x207   :  { %v1794_v56 = vrot.slane %v11986_v62, %v11817_v53  ;;  %v1937_v12 = vadd.f32 %v1921_v6, %v1836_v29  ;;  %v2077_v61 = vrot.slane %v11976_v16, %v11983_v30  ;;  %v2852_v51 = vadd.f32 %v2836_v52, %v2751_v8  ;;  %11989 = vst [vmem:[#allocation52_spill] sm:$0xff] %v10186_v37  ;;  %v11990_v29 = vld [vmem:[#allocation19_spill] sm:$0xff] }
 0x208   :  { %v10174_v43 = vpop.eup %7349  ;;  %v2937_v35 = vmul.f32 %v2909_v0, %v11970_v9  ;;  %v3233_v23 = vmul.f32 %v3184_v36, %v9192_v1  ;;  %v3935_v2 = vadd.f32 %v3934_v20, %v3928_v48  ;;  %7351 = vrcp.f32 %v5778_v17 }
 0x209   :  { %11987 = vst [vmem:[#allocation58_spill] sm:$0xff] %v10174_v43  ;;  %v1724_v47 = vadd.f32 %v10066_v60, %v10055_v33  ;;  %v2022_v34 = vmul.f32 %v1976_v27, %v9038_v5  ;;  %v1895_v6 = vrot.slane %v11990_v29, %v11817_v53  ;;  %v3010_v0 = vrot.slane %v11941_v14, %v11973_v7 }
 0x20a   :  { %v3249_v8 = vadd.f32 %v3233_v23, %v3148_v50  ;;  %v3334_v36 = vmul.f32 %v3285_v42, %v9201_v57  ;;  %7353 = vpow2.f32 %v3498_v3  ;;  %v10197_v4 = vmul.f32 %v10174_v43, %v3935_v2  ;;  %v11993_v3 = vld [vmem:[#allocation26_spill] sm:$0xff]  ;;  %v7469_v2 = vld [vmem:[%s11351_s0 + $0x90] sm:$0xff]  ;;  %v11995_v43 = vld [vmem:[#allocation43_spill] sm:$0xff] }
 0x20b   :  { %v10201_v25 = vmul.f32 %v10179_v22, %v10179_v22  ;;  %v1825_v33 = vmul.f32 %v1794_v56, %v9007_v11  ;;  %v2038_v60 = vadd.f32 %v2022_v34, %v1937_v12  ;;  %v2123_v49 = vmul.f32 %v2077_v61, %v11899_v28  ;;  %v7468_v12 = vld [vmem:[%s11351_s0 + $0x60] sm:$0xff] }
 0x20c   :  { %v10207_v27 = vmul.f32 %v10186_v37, %v10186_v37  ;;  %v2953_v52 = vadd.f32 %v2937_v35, %v2852_v51  ;;  %v3111_v50 = vrot.slane %v11945_v46, %v11973_v7  ;;  %v3939_v42 = vrot.slane %v10197_v4, 4 }
 0x20d   :  { %11991 = vst [vmem:[#allocation33_spill] sm:$0xff] %v10201_v25  ;;  %v1778_v48 = vrot.slane %v11993_v3, %v11817_v53  ;;  %v1841_v20 = vadd.f32 %v1825_v33, %v1724_v47  ;;  %v1926_v17 = vmul.f32 %v1895_v6, %v11981_v38  ;;  %v2178_v56 = vrot.slane %v11984_v32, %v11902_v24  ;;  %v11997_v25 = vld [vmem:[#allocation45_spill] sm:$0xff] }
 0x20e   :  { %11992 = vst [vmem:[#allocation66_spill] sm:$0xff] %v10207_v27  ;;  %v1661_v61 = vrot.slane %v7468_v12, %v8961_v63  ;;  %v3038_v51 = vmul.f32 %v3010_v0, %v11977_v39  ;;  %v10222_v35 = vadd.f32 %v3334_v36, %v3249_v8  ;;  %v3940_v23 = vadd.f32 %v3939_v42, %v10197_v4  ;;  %v11994_v12 = vld [vmem:[#allocation28_spill] sm:$0xff]  ;;  %v12004_v38 = vld [vmem:[#allocation13_spill] sm:$0xff] }
 0x20f   :  { %v1673_v47 = vrot.slane %v7469_v2, %v8961_v63  ;;  %v1996_v34 = vrot.slane %v11986_v62, %v11983_v30  ;;  %v2139_v6 = vadd.f32 %v2123_v49, %v2038_v60  ;;  %v2279_v33 = vrot.slane %v11976_v16, %v11902_v24  ;;  %v11999_v49 = vld [vmem:[#allocation21_spill] sm:$0xff] }
 0x210   :  { %v11996_v0 = vrot.slane %v11995_v43, %v11973_v7  ;;  %v3054_v36 = vadd.f32 %v3038_v51, %v2953_v52  ;;  %v3139_v42 = vmul.f32 %v3111_v50, %v11979_v13  ;;  %v3941_v22 = vrot.slane %v3940_v23, 2 }
 0x211   :  { %v11998_v2 = vrot.slane %v11997_v25, %v11973_v7  ;;  %v1942_v27 = vadd.f32 %v1926_v17, %v1841_v20  ;;  %v2224_v60 = vmul.f32 %v2178_v56, %v11908_v26  ;;  %v2097_v16 = vrot.slane %v11990_v29, %v11983_v30  ;;  %v12001_v25 = vld [vmem:[#allocation24_spill] sm:$0xff] }
 0x212   :  { %v1502_v8 = vmul.f32 %v11996_v0, %v11994_v12  ;;  %v12000_v43 = vrot.slane %v11999_v49, %v8961_v63  ;;  %v3212_v52 = vrot.slane %v11941_v14, %v8961_v63  ;;  %v3386_v50 = vrot.slane %v10222_v35, 4 }
 0x213   :  { %v1505_v37 = vmul.f32 %v11998_v2, %v11994_v12  ;;  %v3942_v51 = vadd.f32 %v3941_v22, %v3940_v23  ;;  %v12002_v20 = vrot.slane %v12001_v25, %v8961_v63  ;;  %v2027_v56 = vmul.f32 %v1996_v34, %v9038_v5  ;;  %v12005_v25 = vld [vmem:[#allocation30_spill] sm:$0xff] }
 0x214   :  { %v1603_v0 = vmul.f32 %v12000_v43, %v11954_v19  ;;  %v2240_v2 = vadd.f32 %v2224_v60, %v2139_v6  ;;  %v2325_v12 = vmul.f32 %v2279_v33, %v11959_v10  ;;  %v1518_v3 = vadd.f32 %v1502_v8, %v12003_v15 }
 0x215   :  { %v1606_v17 = vmul.f32 %v12002_v20, %v11954_v19  ;;  %v3155_v49 = vadd.f32 %v3139_v42, %v3054_v36  ;;  %v3313_v43 = vrot.slane %v11945_v46, %v8961_v63  ;;  %v3943_v14 = vrot.slane %v3942_v51, 1  ;;  %v7352_v30 = vpop.eup %7351 }
 0x216   :  { %v1521_v22 = vadd.f32 %v1505_v37, %v12004_v38  ;;  %v2043_v23 = vadd.f32 %v2027_v56, %v1942_v27  ;;  %v2128_v13 = vmul.f32 %v2097_v16, %v11899_v28  ;;  %v2380_v20 = vrot.slane %v11984_v32, %v12005_v25  ;;  %v10280_v27 = vld [vmem:[%s11351_s0 + $0x58] sm:$0xff]  ;;  %v12008_v16 = vld [vmem:[#allocation36_spill] sm:$0xff] }
 0x217   :  { %v3240_v34 = vmul.f32 %v3212_v52, %v9192_v1  ;;  %v3387_v6 = vmax.f32 %v10222_v35, %v3386_v50  ;;  %v3944_v33 = vadd.f32 %v3943_v14, %v3942_v51  ;;  %v10268_v15 = vmul.f32 %v7352_v30, %v10129_v54  ;;  %v10270_v8 = vpop.eup %7353 }
 0x218   :  { %12007 = vst [vmem:[#allocation46_spill] sm:$0xff] %v10270_v8  ;;  %v10273_v46 = vmul.f32 %v1778_v48, %v9007_v11  ;;  %v2198_v38 = vrot.slane %v11986_v62, %v11902_v24  ;;  %v2341_v37 = vadd.f32 %v2325_v12, %v2240_v2  ;;  %v2481_v36 = vrot.slane %v10280_v27, %v12005_v25 }
 0x219   :  { %12006 = vst [vmem:[#allocation42_spill] sm:$0xff] %v10268_v15  ;;  %v3256_v42 = vadd.f32 %v3240_v34, %v3155_v49  ;;  %v3341_v54 = vmul.f32 %v3313_v43, %v9201_v57  ;;  %7355 = vrcp.f32 %v3944_v33  ;;  %v5793_v30 = vmul.f32 %v10270_v8, %v10268_v15  ;;  %v12009_v49 = vld [vmem:[#allocation32_spill] sm:$0xff] }
 0x21a   :  { %v1619_v48 = vadd.f32 %v1603_v0, %v1518_v3  ;;  %v2144_v60 = vadd.f32 %v2128_v13, %v2043_v23  ;;  %v2426_v52 = vmul.f32 %v2380_v20, %v12008_v16  ;;  %v2299_v12 = vrot.slane %v11990_v29, %v11902_v24 }
 0x21b   :  { %v10290_v50 = vadd.f32 %v1606_v17, %v1521_v22  ;;  %v3388_v51 = vrot.slane %v3387_v6, 2  ;;  %v5795_v56 = vcombine.high %v5793_v30, %v5793_v30  ;;  %v5802_v2 = vrot.slane %v5793_v30, %v9550_v59 }
 0x21c   :  { %v1704_v14 = vmul.f32 %v1661_v61, %v12009_v49  ;;  %v2229_v43 = vmul.f32 %v2198_v38, %v11908_v26  ;;  %v2442_v34 = vadd.f32 %v2426_v52, %v2341_v37  ;;  %v2527_v33 = vmul.f32 %v2481_v36, %v9089_v45 }
 0x21d   :  { %v10296_v3 = vadd.f32 %v3341_v54, %v3256_v42  ;;  %v5809_v13 = vrot.slane %v5795_v56, %v9550_v59  ;;  %v5810_v0 = vcombine.high %v5802_v2, %v5802_v2  ;;  %v5818_v23 = vrot.slane %v5802_v2, %v9550_v59 }
 0x21e   :  { %v10301_v17 = vmul.f32 %v1673_v47, %v12009_v49  ;;  %v2400_v22 = vrot.slane %v11986_v62, %v12005_v25  ;;  %v2245_v20 = vadd.f32 %v2229_v43, %v2144_v60  ;;  %v2330_v61 = vmul.f32 %v2299_v12, %v11959_v10 }
 0x21f   :  { %v2582_v38 = vrot.slane %v11984_v32, %v11830_v41  ;;  %v3389_v37 = vmax.f32 %v3387_v6, %v3388_v51  ;;  %v5832_v36 = vrot.slane %v5810_v0, %v9550_v59  ;;  %v5840_v42 = vcombine.high %v5818_v23, %v5818_v23 }
 0x220   :  { %v2602_v54 = vrot.slane %v11986_v62, %v11830_v41  ;;  %v2543_v30 = vadd.f32 %v2527_v33, %v2442_v34  ;;  %v5811_v52 = vcombine.high %v5809_v13, %v5809_v13  ;;  %v5847_v47 = vrot.slane %v5818_v23, %v11817_v53 }
 0x221   :  { %v2683_v56 = vrot.slane %v10280_v27, %v11830_v41  ;;  %v3428_v60 = vrot.slane %v10296_v3, 4  ;;  %v5842_v12 = vcombine.high %v5832_v36, %v5832_v36  ;;  %v5851_v2 = vrot.slane %v5832_v36, %v11817_v53  ;;  %v12010_v36 = vld [vmem:[#allocation27_spill] sm:$0xff] }
 0x222   :  { %v10316_v43 = vadd.f32 %v1704_v14, %v1619_v48  ;;  %v2431_v6 = vmul.f32 %v2400_v22, %v12008_v16  ;;  %v5825_v51 = vrot.slane %v5809_v13, %v9550_v59  ;;  %v5855_v0 = vrot.slane %v5840_v42, %v11817_v53  ;;  %v12011_v14 = vld [vmem:[#allocation17_spill] sm:$0xff] }
 0x223   :  { %v2346_v34 = vadd.f32 %v2330_v61, %v2245_v20  ;;  %v2628_v33 = vmul.f32 %v2582_v38, %v11922_v55  ;;  %v2501_v23 = vrot.slane %v11990_v29, %v12005_v25  ;;  %v3390_v15 = vrot.slane %v3389_v37, 1 }
 0x224   :  { %v5839_v8 = vrot.slane %v5811_v52, %v9550_v59  ;;  %v5859_v49 = vrot.slane %v5842_v12, %v11817_v53  ;;  %v5884_v48 = vmul.f32 %v5847_v47, %v12010_v36  ;;  %v5885_v10 = vmul.f32 %v5851_v2, %v12011_v14 }
 0x225   :  { %v10329_v22 = vmul.f32 %v2602_v54, %v11922_v55  ;;  %v2644_v13 = vadd.f32 %v2628_v33, %v2543_v30  ;;  %v2729_v20 = vmul.f32 %v2683_v56, %v9111_v44  ;;  %v3429_v61 = vmax.f32 %v10296_v3, %v3428_v60 }
 0x226   :  { %v7356_v38 = vpop.eup %7355  ;;  %v5841_v42 = vcombine.high %v5825_v51, %v5825_v51  ;;  %v5863_v16 = vrot.slane %v5825_v51, %v11817_v53  ;;  %v5886_v52 = vmul.f32 %v5855_v0, %v11925_v31  ;;  %v5892_v25 = vadd.f32 %v5885_v10, %v5884_v48  ;;  %v12012_v48 = vld [vmem:[#allocation62_spill] sm:$0xff] }
 0x227   :  { %v2447_v12 = vadd.f32 %v2431_v6, %v2346_v34  ;;  %v2532_v47 = vmul.f32 %v2501_v23, %v9089_v45  ;;  %v3391_v36 = vmax.f32 %v3389_v37, %v3390_v15  ;;  %v3946_v2 = vmul.f32 %v7356_v38, %v10197_v4 }
 0x228   :  { %v5843_v54 = vcombine.high %v5839_v8, %v5839_v8  ;;  %v5867_v30 = vrot.slane %v5839_v8, %v11817_v53  ;;  %v5887_v56 = vmul.f32 %v5859_v49, %v9613_v58  ;;  %v5893_v33 = vadd.f32 %v5892_v25, %v5886_v52 }
 0x229   :  { %v2784_v60 = vrot.slane %v11984_v32, %v11772_v21  ;;  %v3430_v14 = vrot.slane %v3429_v61, 2  ;;  %v3950_v51 = vcombine.high %v3946_v2, %v3946_v2  ;;  %v3957_v0 = vrot.slane %v3946_v2, %v9550_v59  ;;  %3948 = vst [vmem:[#allocation3 + $0x18] sm:$0xff] %v3946_v2  ;;  %v12013_v2 = vld [vmem:[#allocation63_spill] sm:$0xff] }
 0x22a   :  { %v2745_v10 = vadd.f32 %v2729_v20, %v2644_v13  ;;  %v5871_v6 = vrot.slane %v5841_v42, %v11817_v53  ;;  %v5888_v15 = vmul.f32 %v5863_v16, %v11969_v18  ;;  %v5894_v4 = vadd.f32 %v5893_v33, %v5887_v56 }
 0x22b   :  { %v3462_v37 = vsub.f32 %v10222_v35, %v3391_v36  ;;  %v3964_v8 = vrot.slane %v3950_v51, %v9550_v59  ;;  %v3965_v49 = vcombine.high %v3957_v0, %v3957_v0  ;;  %v3973_v25 = vrot.slane %v3957_v0, %v9550_v59 }
 0x22c   :  { %v2885_v34 = vrot.slane %v10280_v27, %v11772_v21  ;;  %v5875_v23 = vrot.slane %v5843_v54, %v11817_v53  ;;  %v5889_v38 = vmul.f32 %v5867_v30, %v12012_v48  ;;  %v5895_v13 = vadd.f32 %v5894_v4, %v5888_v15 }
 0x22d   :  { %v3431_v20 = vmax.f32 %v3429_v61, %v3430_v14  ;;  %v3966_v42 = vcombine.high %v3964_v8, %v3964_v8  ;;  %v3987_v16 = vrot.slane %v3965_v49, %v9550_v59  ;;  %v3995_v52 = vcombine.high %v3973_v25, %v3973_v25  ;;  %v12014_v61 = vld [vmem:[#allocation64_spill] sm:$0xff] }
 0x22e   :  { %v2830_v35 = vmul.f32 %v2784_v60, %v9126_v40  ;;  %v4002_v36 = vrot.slane %v3973_v25, %v11817_v53  ;;  %v5890_v56 = vmul.f32 %v5871_v6, %v12013_v2  ;;  %v5896_v33 = vadd.f32 %v5895_v13, %v5889_v38 }
 0x22f   :  { %v3482_v51 = vmul.f32 1.442695, %v3462_v37  ;;  %v3980_v0 = vrot.slane %v3964_v8, %v9550_v59  ;;  %v3997_v18 = vcombine.high %v3987_v16, %v3987_v16  ;;  %v4006_v54 = vrot.slane %v3987_v16, %v11817_v53  ;;  %v12015_v37 = vld [vmem:[#allocation49_spill] sm:$0xff]  ;;  %v12016_v8 = vld [vmem:[#allocation51_spill] sm:$0xff] }
 0x230   :  { %v2548_v30 = vadd.f32 %v2532_v47, %v2447_v12  ;;  %v4010_v14 = vrot.slane %v3995_v52, %v11817_v53  ;;  %v5891_v15 = vmul.f32 %v5875_v23, %v12014_v61  ;;  %v5897_v4 = vadd.f32 %v5896_v33, %v5890_v56  ;;  %v12017_v23 = vld [vmem:[#allocation53_spill] sm:$0xff] }
 0x231   :  { %v2846_v49 = vadd.f32 %v2830_v35, %v2745_v10  ;;  %v2931_v60 = vmul.f32 %v2885_v34, %v11970_v9  ;;  %v3432_v48 = vrot.slane %v3431_v20, 1  ;;  %v3994_v25 = vrot.slane %v3966_v42, %v9550_v59 }
 0x232   :  { %v4014_v6 = vrot.slane %v3997_v18, %v11817_v53  ;;  %v4039_v38 = vmul.f32 %v4002_v36, %v12015_v37  ;;  %v4040_v13 = vmul.f32 %v4006_v54, %v12016_v8  ;;  %v10364_v2 = vadd.f32 %v5897_v4, %v5891_v15  ;;  %v12018_v54 = vld [vmem:[#allocation54_spill] sm:$0xff] }
 0x233   :  { %v2703_v12 = vrot.slane %v11990_v29, %v11830_v41  ;;  %v2986_v47 = vrot.slane %v11984_v32, %v11973_v7  ;;  %7357 = vpow2.f32 %v3482_v51  ;;  %v3996_v10 = vcombine.high %v3980_v0, %v3980_v0 }
 0x234   :  { %v4018_v34 = vrot.slane %v3980_v0, %v11817_v53  ;;  %v4041_v42 = vmul.f32 %v4010_v14, %v12017_v23  ;;  %v4047_v16 = vadd.f32 %v4040_v13, %v4039_v38  ;;  %v5899_v18 = vrot.slane %v10364_v2, 4  ;;  %v12019_v0 = vld [vmem:[#allocation35_spill] sm:$0xff] }
 0x235   :  { %v2947_v52 = vadd.f32 %v2931_v60, %v2846_v49  ;;  %v3087_v35 = vrot.slane %v10280_v27, %v11973_v7  ;;  %v3433_v36 = vmax.f32 %v3431_v20, %v3432_v48  ;;  %v3998_v56 = vcombine.high %v3994_v25, %v3994_v25  ;;  %v12020_v48 = vld [vmem:[#allocation55_spill] sm:$0xff] }
 0x236   :  { %v4022_v33 = vrot.slane %v3994_v25, %v11817_v53  ;;  %v4042_v15 = vmul.f32 %v4014_v6, %v12018_v54  ;;  %v4048_v4 = vadd.f32 %v4047_v16, %v4041_v42  ;;  %v5900_v51 = vadd.f32 %v5899_v18, %v10364_v2  ;;  %v12021_v16 = vld [vmem:[#allocation31_spill] sm:$0xff] }
 0x237   :  { %v1879_v8 = vrot.slane %v12019_v0, %v11817_v53  ;;  %v2649_v14 = vadd.f32 %v10329_v22, %v2548_v30  ;;  %v2734_v38 = vmul.f32 %v2703_v12, %v9111_v44  ;;  %v3032_v49 = vmul.f32 %v2986_v47, %v11977_v39  ;;  %v12022_v30 = vld [vmem:[#allocation56_spill] sm:$0xff] }
 0x238   :  { %v4026_v60 = vrot.slane %v3996_v10, %v11817_v53  ;;  %v4043_v20 = vmul.f32 %v4018_v34, %v12020_v48  ;;  %v4049_v13 = vadd.f32 %v4048_v4, %v4042_v15  ;;  %v5901_v25 = vrot.slane %v5900_v51, 2  ;;  %v12023_v34 = vld [vmem:[#allocation34_spill] sm:$0xff] }
 0x239   :  { %v2804_v6 = vrot.slane %v11986_v62, %v11772_v21  ;;  %v3048_v42 = vadd.f32 %v3032_v49, %v2947_v52  ;;  %v3133_v18 = vmul.f32 %v3087_v35, %v12021_v16  ;;  %v3469_v54 = vsub.f32 %v10296_v3, %v3433_v36  ;;  %v12024_v35 = vld [vmem:[#allocation57_spill] sm:$0xff] }
 0x23a   :  { %v4030_v22 = vrot.slane %v3998_v56, %v11817_v53  ;;  %v4044_v12 = vmul.f32 %v4022_v33, %v12022_v30  ;;  %v4050_v23 = vadd.f32 %v4049_v13, %v4043_v20  ;;  %v5902_v47 = vadd.f32 %v5901_v25, %v5900_v51  ;;  %v12025_v49 = vld [vmem:[#allocation9_spill] sm:$0xff]  ;;  %v12026_v33 = vld [vmem:[#allocation26_spill] sm:$0xff] }
 0x23b   :  { %v1837_v10 = vadd.f32 %v10273_v46, %v10316_v43  ;;  %v1922_v15 = vmul.f32 %v1879_v8, %v12023_v34  ;;  %v2750_v4 = vadd.f32 %v2734_v38, %v2649_v14  ;;  %v2905_v48 = vrot.slane %v11990_v29, %v11772_v21  ;;  %v12027_v8 = vld [vmem:[#allocation59_spill] sm:$0xff] }
 0x23c   :  { %v3188_v52 = vrot.slane %v11984_v32, %v8961_v63  ;;  %v4045_v3 = vmul.f32 %v4026_v60, %v12024_v35  ;;  %v4051_v36 = vadd.f32 %v4050_v23, %v4044_v12  ;;  %v5903_v56 = vrot.slane %v5902_v47, 1  ;;  %v12028_v32 = vld [vmem:[#allocation66_spill] sm:$0xff] }
 0x23d   :  { %v1980_v20 = vrot.slane %v12026_v33, %v12025_v49  ;;  %v2835_v51 = vmul.f32 %v2804_v6, %v9126_v40  ;;  %v3149_v13 = vadd.f32 %v3133_v18, %v3048_v42  ;;  %v3289_v46 = vrot.slane %v10280_v27, %v8961_v63 }
 0x23e   :  { %v3496_v43 = vmul.f32 1.442695, %v3469_v54  ;;  %v4046_v14 = vmul.f32 %v4030_v22, %v12027_v8  ;;  %v4052_v38 = vadd.f32 %v4051_v36, %v4045_v3  ;;  %v5904_v25 = vadd.f32 %v5903_v56, %v5902_v47  ;;  %v10416_v54 = vld [vmem:[%s11351_s0 + $0x88] sm:$0xff]  ;;  %v12031_v47 = vld [vmem:[#allocation52_spill] sm:$0xff]  ;;  %v10432_v3 = vld [vmem:[%s11351_s0 + $0x80] sm:$0xff] }
 0x23f   :  { %v1790_v30 = vrot.slane %v12028_v32, %v11817_v53  ;;  %v1938_v60 = vadd.f32 %v1922_v15, %v1837_v10  ;;  %v2081_v23 = vrot.slane %v12019_v0, %v12025_v49  ;;  %v2851_v12 = vadd.f32 %v2835_v51, %v2750_v4  ;;  %12030 = vst [vmem:[#allocation20_spill] sm:$0xff] %v10416_v54 }
 0x240   :  { %v10409_v35 = vpop.eup %7357  ;;  %v2936_v6 = vmul.f32 %v2905_v48, %v11970_v9  ;;  %v3234_v42 = vmul.f32 %v3188_v52, %v9192_v1  ;;  %v4053_v27 = vadd.f32 %v4052_v38, %v4046_v14  ;;  %7359 = vrcp.f32 %v5904_v25 }
 0x241   :  { %12029 = vst [vmem:[#allocation7_spill] sm:$0xff] %v10409_v35  ;;  %v1723_v18 = vadd.f32 %v10301_v17, %v10290_v50  ;;  %v2023_v22 = vmul.f32 %v1980_v20, %v9038_v5  ;;  %v1891_v10 = vrot.slane %v12031_v47, %v11817_v53  ;;  %v3006_v48 = vrot.slane %v11986_v62, %v11973_v7 }
 0x242   :  { %v3250_v15 = vadd.f32 %v3234_v42, %v3149_v13  ;;  %v3335_v4 = vmul.f32 %v3289_v46, %v9201_v57  ;;  %7361 = vpow2.f32 %v3496_v43  ;;  %v10427_v52 = vmul.f32 %v10409_v35, %v4053_v27  ;;  %v12033_v43 = vld [vmem:[#allocation33_spill] sm:$0xff]  ;;  %v12035_v35 = vld [vmem:[#allocation44_spill] sm:$0xff] }
 0x243   :  { %v1467_v50 = vrot.slane %v10432_v3, %v11973_v7  ;;  %v1824_v17 = vmul.f32 %v1790_v30, %v9007_v11  ;;  %v2039_v36 = vadd.f32 %v2023_v22, %v1938_v60  ;;  %v2124_v56 = vmul.f32 %v2081_v23, %v11899_v28  ;;  %v7472_v60 = vld [vmem:[%s11351_s0 + $0x70] sm:$0xff] }
 0x244   :  { %v10440_v20 = vmul.f32 %v10416_v54, %v10416_v54  ;;  %v2952_v51 = vadd.f32 %v2936_v6, %v2851_v12  ;;  %v3107_v13 = vrot.slane %v11990_v29, %v11973_v7  ;;  %v4057_v46 = vrot.slane %v10427_v52, 4 }
 0x245   :  { %v1782_v14 = vrot.slane %v12033_v43, %v11817_v53  ;;  %v1840_v38 = vadd.f32 %v1824_v17, %v1723_v18  ;;  %v1925_v25 = vmul.f32 %v1891_v10, %v12023_v34  ;;  %v2182_v30 = vrot.slane %v12026_v33, %v11902_v24  ;;  %v12034_v17 = vld [vmem:[#allocation28_spill] sm:$0xff]  ;;  %v12042_v43 = vld [vmem:[#allocation11_spill] sm:$0xff] }
 0x246   :  { %12032 = vst [vmem:[#allocation25_spill] sm:$0xff] %v10440_v20  ;;  %v1665_v23 = vrot.slane %v7472_v60, %v8961_v63  ;;  %v3037_v12 = vmul.f32 %v3006_v48, %v11977_v39  ;;  %v10455_v6 = vadd.f32 %v3335_v4, %v3250_v15  ;;  %v4058_v42 = vadd.f32 %v4057_v46, %v10427_v52 }
 0x247   :  { %v1669_v27 = vrot.slane %v10432_v3, %v8961_v63  ;;  %v1992_v18 = vrot.slane %v12028_v32, %v12025_v49  ;;  %v2140_v22 = vadd.f32 %v2124_v56, %v2039_v36  ;;  %v2283_v10 = vrot.slane %v12019_v0, %v11902_v24  ;;  %v12037_v56 = vld [vmem:[#allocation22_spill] sm:$0xff] }
 0x248   :  { %v12036_v60 = vrot.slane %v12035_v35, %v11973_v7  ;;  %v3053_v48 = vadd.f32 %v3037_v12, %v2952_v51  ;;  %v3138_v15 = vmul.f32 %v3107_v13, %v12021_v16  ;;  %v4059_v4 = vrot.slane %v4058_v42, 2  ;;  %v12039_v12 = vld [vmem:[#allocation23_spill] sm:$0xff]  ;;  %v12043_v16 = vld [vmem:[#allocation12_spill] sm:$0xff] }
 0x249   :  { %v1504_v46 = vmul.f32 %v1467_v50, %v12034_v17  ;;  %v1941_v20 = vadd.f32 %v1925_v25, %v1840_v38  ;;  %v2225_v3 = vmul.f32 %v2182_v30, %v11908_v26  ;;  %v2093_v36 = vrot.slane %v12031_v47, %v12025_v49 }
 0x24a   :  { %v1503_v54 = vmul.f32 %v12036_v60, %v12034_v17  ;;  %v12038_v0 = vrot.slane %v12037_v56, %v8961_v63  ;;  %v3208_v35 = vrot.slane %v11986_v62, %v8961_v63  ;;  %v3392_v51 = vrot.slane %v10455_v6, 4  ;;  %v12041_v17 = vld [vmem:[#allocation29_spill] sm:$0xff] }
 0x24b   :  { %v4060_v13 = vadd.f32 %v4059_v4, %v4058_v42  ;;  %v12040_v50 = vrot.slane %v12039_v12, %v8961_v63  ;;  %v2026_v25 = vmul.f32 %v1992_v18, %v9038_v5  ;;  %v2241_v30 = vadd.f32 %v2225_v3, %v2140_v22  ;;  %v12044_v12 = vld [vmem:[#allocation30_spill] sm:$0xff] }
 0x24c   :  { %v1604_v8 = vmul.f32 %v12038_v0, %v11954_v19  ;;  %v2326_v60 = vmul.f32 %v2283_v10, %v12041_v17  ;;  %v1519_v49 = vadd.f32 %v1503_v54, %v12042_v43  ;;  %v3154_v56 = vadd.f32 %v3138_v15, %v3053_v48  ;;  %v10508_v48 = vld [vmem:[%s11351_s0 + $0x68] sm:$0xff] }
 0x24d   :  { %v1605_v38 = vmul.f32 %v12040_v50, %v11954_v19  ;;  %v3309_v0 = vrot.slane %v11990_v29, %v8961_v63  ;;  %v4061_v62 = vrot.slane %v4060_v13, 1  ;;  %v7360_v34 = vpop.eup %7359  ;;  %v1520_v42 = vadd.f32 %v1504_v46, %v12043_v16 }
 0x24e   :  { %v2042_v4 = vadd.f32 %v2026_v25, %v1941_v20  ;;  %v2127_v39 = vmul.f32 %v2093_v36, %v11899_v28  ;;  %v2384_v19 = vrot.slane %v12026_v33, %v12044_v12  ;;  %v3239_v18 = vmul.f32 %v3208_v35, %v9192_v1  ;;  %v12047_v36 = vld [vmem:[#allocation36_spill] sm:$0xff] }
 0x24f   :  { %v3393_v22 = vmax.f32 %v10455_v6, %v3392_v51  ;;  %v4062_v10 = vadd.f32 %v4061_v62, %v4060_v13  ;;  %v10496_v54 = vmul.f32 %v7360_v34, %v10364_v2  ;;  %v10498_v43 = vpop.eup %7361  ;;  %v10501_v29 = vmul.f32 %v1782_v14, %v9007_v11 }
 0x250   :  { %12046 = vst [vmem:[#allocation14_spill] sm:$0xff] %v10498_v43  ;;  %v2194_v16 = vrot.slane %v12028_v32, %v11902_v24  ;;  %v2342_v20 = vadd.f32 %v2326_v60, %v2241_v30  ;;  %v2485_v15 = vrot.slane %v10508_v48, %v12044_v12  ;;  %v3255_v46 = vadd.f32 %v3239_v18, %v3154_v56  ;;  %v12048_v60 = vld [vmem:[#allocation32_spill] sm:$0xff] }
 0x251   :  { %12045 = vst [vmem:[#allocation8_spill] sm:$0xff] %v10496_v54  ;;  %v3340_v2 = vmul.f32 %v3309_v0, %v9201_v57  ;;  %7363 = vrcp.f32 %v4062_v10  ;;  %v5919_v34 = vmul.f32 %v10498_v43, %v10496_v54  ;;  %v1620_v14 = vadd.f32 %v1604_v8, %v1519_v49 }
 0x252   :  { %v2143_v3 = vadd.f32 %v2127_v39, %v2042_v4  ;;  %v2427_v35 = vmul.f32 %v2384_v19, %v12047_v36  ;;  %v2295_v51 = vrot.slane %v12031_v47, %v11902_v24  ;;  %v10518_v13 = vadd.f32 %v1605_v38, %v1520_v42 }
 0x253   :  { %v3394_v50 = vrot.slane %v3393_v22, 2  ;;  %v5921_v25 = vcombine.high %v5919_v34, %v5919_v34  ;;  %v5928_v30 = vrot.slane %v5919_v34, %v9550_v59  ;;  %v1705_v56 = vmul.f32 %v1665_v23, %v12048_v60 }
 0x254   :  { %v2228_v0 = vmul.f32 %v2194_v16, %v11908_v26  ;;  %v2443_v62 = vadd.f32 %v2427_v35, %v2342_v20  ;;  %v2528_v18 = vmul.f32 %v2485_v15, %v9089_v45  ;;  %v10524_v49 = vadd.f32 %v3340_v2, %v3255_v46 }
 0x255   :  { %v5935_v39 = vrot.slane %v5921_v25, %v9550_v59  ;;  %v5936_v8 = vcombine.high %v5928_v30, %v5928_v30  ;;  %v5944_v4 = vrot.slane %v5928_v30, %v9550_v59  ;;  %v10529_v38 = vmul.f32 %v1669_v27, %v12048_v60 }
 0x256   :  { %v2396_v42 = vrot.slane %v12028_v32, %v12044_v12  ;;  %v2244_v19 = vadd.f32 %v2228_v0, %v2143_v3  ;;  %v2329_v23 = vmul.f32 %v2295_v51, %v12041_v17  ;;  %v2586_v10 = vrot.slane %v12026_v33, %v11830_v41 }
 0x257   :  { %v3395_v16 = vmax.f32 %v3393_v22, %v3394_v50  ;;  %v5958_v20 = vrot.slane %v5936_v8, %v9550_v59  ;;  %v5966_v15 = vcombine.high %v5944_v4, %v5944_v4  ;;  %v2598_v46 = vrot.slane %v12028_v32, %v11830_v41 }
 0x258   :  { %v2544_v2 = vadd.f32 %v2528_v18, %v2443_v62  ;;  %v5937_v34 = vcombine.high %v5935_v39, %v5935_v39  ;;  %v5973_v27 = vrot.slane %v5944_v4, %v11817_v53  ;;  %v2687_v35 = vrot.slane %v10508_v48, %v11830_v41 }
 0x259   :  { %v3422_v3 = vrot.slane %v10524_v49, 4  ;;  %v5968_v51 = vcombine.high %v5958_v20, %v5958_v20  ;;  %v5977_v25 = vrot.slane %v5958_v20, %v11817_v53  ;;  %v10544_v30 = vadd.f32 %v1705_v56, %v1620_v14  ;;  %v12049_v20 = vld [vmem:[#allocation27_spill] sm:$0xff]  ;;  %v12050_v56 = vld [vmem:[#allocation17_spill] sm:$0xff] }
 0x25a   :  { %v2430_v22 = vmul.f32 %v2396_v42, %v12047_v36  ;;  %v5951_v50 = vrot.slane %v5935_v39, %v9550_v59  ;;  %v5981_v60 = vrot.slane %v5966_v15, %v11817_v53  ;;  %v2345_v0 = vadd.f32 %v2329_v23, %v2244_v19 }
 0x25b   :  { %v2629_v62 = vmul.f32 %v2586_v10, %v11922_v55  ;;  %v2497_v18 = vrot.slane %v12031_v47, %v12044_v12  ;;  %v3396_v8 = vrot.slane %v3395_v16, 1  ;;  %v5965_v4 = vrot.slane %v5937_v34, %v9550_v59 }
 0x25c   :  { %v5985_v54 = vrot.slane %v5968_v51, %v11817_v53  ;;  %v6010_v14 = vmul.f32 %v5973_v27, %v12049_v20  ;;  %v6011_v43 = vmul.f32 %v5977_v25, %v12050_v56  ;;  %v10557_v42 = vmul.f32 %v2598_v46, %v11922_v55 }
 0x25d   :  { %v2645_v39 = vadd.f32 %v2629_v62, %v2544_v2  ;;  %v2730_v19 = vmul.f32 %v2687_v35, %v9111_v44  ;;  %v3423_v23 = vmax.f32 %v10524_v49, %v3422_v3  ;;  %v5967_v15 = vcombine.high %v5951_v50, %v5951_v50 }
 0x25e   :  { %v7364_v10 = vpop.eup %7363  ;;  %v5989_v36 = vrot.slane %v5951_v50, %v11817_v53  ;;  %v6012_v34 = vmul.f32 %v5981_v60, %v11925_v31  ;;  %v6018_v12 = vadd.f32 %v6011_v43, %v6010_v14  ;;  %v2446_v51 = vadd.f32 %v2430_v22, %v2345_v0 }
 0x25f   :  { %v2531_v27 = vmul.f32 %v2497_v18, %v9089_v45  ;;  %v3397_v20 = vmax.f32 %v3395_v16, %v3396_v8  ;;  %v4064_v25 = vmul.f32 %v7364_v10, %v10427_v52  ;;  %v5969_v46 = vcombine.high %v5965_v4, %v5965_v4  ;;  %v12051_v16 = vld [vmem:[#allocation61_spill] sm:$0xff]  ;;  %v12052_v10 = vld [vmem:[#allocation62_spill] sm:$0xff] }
 0x260   :  { %v5993_v2 = vrot.slane %v5965_v4, %v11817_v53  ;;  %v6013_v35 = vmul.f32 %v5985_v54, %v9613_v58  ;;  %v6019_v62 = vadd.f32 %v6018_v12, %v6012_v34  ;;  %v2788_v3 = vrot.slane %v12026_v33, %v11772_v21 }
 0x261   :  { %v3424_v56 = vrot.slane %v3423_v23, 2  ;;  %v4068_v50 = vcombine.high %v4064_v25, %v4064_v25  ;;  %v4075_v60 = vrot.slane %v4064_v25, %v9550_v59  ;;  %4066 = vst [vmem:[#allocation3 + $0x20] sm:$0xff] %v4064_v25  ;;  %v2746_v43 = vadd.f32 %v2730_v19, %v2645_v39 }
 0x262   :  { %v5997_v22 = vrot.slane %v5967_v15, %v11817_v53  ;;  %v6014_v0 = vmul.f32 %v5989_v36, %v12051_v16  ;;  %v6020_v52 = vadd.f32 %v6019_v62, %v6013_v35  ;;  %v3463_v18 = vsub.f32 %v10455_v6, %v3397_v20  ;;  %v12053_v35 = vld [vmem:[#allocation63_spill] sm:$0xff] }
 0x263   :  { %v4082_v8 = vrot.slane %v4068_v50, %v9550_v59  ;;  %v4083_v54 = vcombine.high %v4075_v60, %v4075_v60  ;;  %v4091_v12 = vrot.slane %v4075_v60, %v9550_v59  ;;  %v2889_v4 = vrot.slane %v10508_v48, %v11772_v21 }
 0x264   :  { %v6001_v14 = vrot.slane %v5969_v46, %v11817_v53  ;;  %v6015_v34 = vmul.f32 %v5993_v2, %v12052_v10  ;;  %v6021_v39 = vadd.f32 %v6020_v52, %v6014_v0  ;;  %v3425_v19 = vmax.f32 %v3423_v23, %v3424_v56 }
 0x265   :  { %v4084_v15 = vcombine.high %v4082_v8, %v4082_v8  ;;  %v4105_v36 = vrot.slane %v4083_v54, %v9550_v59  ;;  %v4113_v25 = vcombine.high %v4091_v12, %v4091_v12  ;;  %v2831_v6 = vmul.f32 %v2788_v3, %v9126_v40 }
 0x266   :  { %v4120_v20 = vrot.slane %v4091_v12, %v11817_v53  ;;  %v6016_v62 = vmul.f32 %v5997_v22, %v12053_v35  ;;  %v6022_v50 = vadd.f32 %v6021_v39, %v6015_v34  ;;  %v3484_v60 = vmul.f32 1.442695, %v3463_v18 }
 0x267   :  { %v4098_v16 = vrot.slane %v4082_v8, %v9550_v59  ;;  %v4115_v58 = vcombine.high %v4105_v36, %v4105_v36  ;;  %v4124_v46 = vrot.slane %v4105_v36, %v11817_v53  ;;  %v2547_v2 = vadd.f32 %v2531_v27, %v2446_v51  ;;  %v12054_v8 = vld [vmem:[#allocation51_spill] sm:$0xff] }
 0x268   :  { %v4128_v56 = vrot.slane %v4113_v25, %v11817_v53  ;;  %v6017_v23 = vmul.f32 %v6001_v14, %v12014_v61  ;;  %v6023_v0 = vadd.f32 %v6022_v50, %v6016_v62  ;;  %v2847_v52 = vadd.f32 %v2831_v6, %v2746_v43  ;;  %v12055_v14 = vld [vmem:[#allocation53_spill] sm:$0xff] }
 0x269   :  { %v2932_v3 = vmul.f32 %v2889_v4, %v11970_v9  ;;  %v3426_v54 = vrot.slane %v3425_v19, 1  ;;  %v4112_v12 = vrot.slane %v4084_v15, %v9550_v59  ;;  %v4132_v22 = vrot.slane %v4115_v58, %v11817_v53 }
 0x26a   :  { %v4157_v18 = vmul.f32 %v4120_v20, %v12015_v37  ;;  %v4158_v34 = vmul.f32 %v4124_v46, %v12054_v8  ;;  %v10592_v39 = vadd.f32 %v6023_v0, %v6017_v23  ;;  %v2699_v51 = vrot.slane %v12031_v47, %v11830_v41  ;;  %v12056_v46 = vld [vmem:[#allocation54_spill] sm:$0xff] }
 0x26b   :  { %v2990_v27 = vrot.slane %v12026_v33, %v11973_v7  ;;  %7365 = vpow2.f32 %v3484_v60  ;;  %v4114_v43 = vcombine.high %v4098_v16, %v4098_v16  ;;  %v4136_v4 = vrot.slane %v4098_v16, %v11817_v53  ;;  %v12057_v16 = vld [vmem:[#allocation50_spill] sm:$0xff] }
 0x26c   :  { %v4159_v15 = vmul.f32 %v4128_v56, %v12055_v14  ;;  %v4165_v36 = vadd.f32 %v4158_v34, %v4157_v18  ;;  %v6025_v58 = vrot.slane %v10592_v39, 4  ;;  %v2948_v25 = vadd.f32 %v2932_v3, %v2847_v52  ;;  %v12058_v52 = vld [vmem:[#allocation39_spill] sm:$0xff] }
 0x26d   :  { %v3091_v6 = vrot.slane %v10508_v48, %v11973_v7  ;;  %v3427_v20 = vmax.f32 %v3425_v19, %v3426_v54  ;;  %v4116_v62 = vcombine.high %v4112_v12, %v4112_v12  ;;  %v4140_v50 = vrot.slane %v4112_v12, %v11817_v53  ;;  %v12059_v19 = vld [vmem:[#allocation55_spill] sm:$0xff] }
 0x26e   :  { %v4160_v23 = vmul.f32 %v4132_v22, %v12056_v46  ;;  %v4166_v0 = vadd.f32 %v4165_v36, %v4159_v15  ;;  %v6026_v60 = vadd.f32 %v6025_v58, %v10592_v39  ;;  %v1883_v8 = vrot.slane %v12057_v16, %v11817_v53  ;;  %v12060_v36 = vld [vmem:[#allocation31_spill] sm:$0xff] }
 0x26f   :  { %v2648_v56 = vadd.f32 %v10557_v42, %v2547_v2  ;;  %v2733_v18 = vmul.f32 %v2699_v51, %v9111_v44  ;;  %v3033_v3 = vmul.f32 %v2990_v27, %v12058_v52  ;;  %v4144_v34 = vrot.slane %v4114_v43, %v11817_v53  ;;  %v12061_v2 = vld [vmem:[#allocation56_spill] sm:$0xff] }
 0x270   :  { %v4161_v54 = vmul.f32 %v4136_v4, %v12059_v19  ;;  %v4167_v14 = vadd.f32 %v4166_v0, %v4160_v23  ;;  %v6027_v12 = vrot.slane %v6026_v60, 2  ;;  %v2800_v22 = vrot.slane %v12028_v32, %v11772_v21  ;;  %v12062_v4 = vld [vmem:[#allocation34_spill] sm:$0xff] }
 0x271   :  { %v3049_v15 = vadd.f32 %v3033_v3, %v2948_v25  ;;  %v3134_v58 = vmul.f32 %v3091_v6, %v12060_v36  ;;  %v3468_v46 = vsub.f32 %v10524_v49, %v3427_v20  ;;  %v4148_v42 = vrot.slane %v4116_v62, %v11817_v53  ;;  %v12063_v6 = vld [vmem:[#allocation57_spill] sm:$0xff] }
 0x272   :  { %v4162_v51 = vmul.f32 %v4140_v50, %v12061_v2  ;;  %v4168_v37 = vadd.f32 %v4167_v14, %v4161_v54  ;;  %v6028_v27 = vadd.f32 %v6027_v12, %v6026_v60  ;;  %v1838_v43 = vadd.f32 %v10501_v29, %v10544_v30  ;;  %v12064_v3 = vld [vmem:[#allocation9_spill] sm:$0xff] }
 0x273   :  { %v1923_v23 = vmul.f32 %v1883_v8, %v12062_v4  ;;  %v2749_v0 = vadd.f32 %v2733_v18, %v2648_v56  ;;  %v2901_v19 = vrot.slane %v12031_v47, %v11772_v21  ;;  %v3192_v25 = vrot.slane %v12026_v33, %v8961_v63  ;;  %v12065_v50 = vld [vmem:[#allocation33_spill] sm:$0xff]  ;;  %v12066_v8 = vld [vmem:[#allocation59_spill] sm:$0xff] }
 0x274   :  { %v4163_v49 = vmul.f32 %v4144_v34, %v12063_v6  ;;  %v4169_v20 = vadd.f32 %v4168_v37, %v4162_v51  ;;  %v6029_v62 = vrot.slane %v6028_v27, 1  ;;  %v1984_v14 = vrot.slane %v12065_v50, %v12064_v3  ;;  %v12067_v33 = vld [vmem:[#allocation25_spill] sm:$0xff] }
 0x275   :  { %v2834_v60 = vmul.f32 %v2800_v22, %v9126_v40  ;;  %v3150_v54 = vadd.f32 %v3134_v58, %v3049_v15  ;;  %v3293_v29 = vrot.slane %v10508_v48, %v8961_v63  ;;  %v3494_v30 = vmul.f32 1.442695, %v3468_v46 }
 0x276   :  { %v4164_v56 = vmul.f32 %v4148_v42, %v12066_v8  ;;  %v4170_v18 = vadd.f32 %v4169_v20, %v4163_v49  ;;  %v6030_v12 = vadd.f32 %v6029_v62, %v6028_v27  ;;  %v1786_v2 = vrot.slane %v12067_v33, %v11817_v53  ;;  %v12068_v42 = vld [vmem:[#allocation20_spill] sm:$0xff] }
 0x277   :  { %v1939_v34 = vadd.f32 %v1923_v23, %v1838_v43  ;;  %v2085_v37 = vrot.slane %v12057_v16, %v12064_v3  ;;  %v2850_v51 = vadd.f32 %v2834_v60, %v2749_v0  ;;  %v2935_v22 = vmul.f32 %v2901_v19, %v11970_v9 }
 0x278   :  { %v10637_v6 = vpop.eup %7365  ;;  %v3235_v15 = vmul.f32 %v3192_v25, %v9192_v1  ;;  %v4171_v48 = vadd.f32 %v4170_v18, %v4164_v56  ;;  %7367 = vrcp.f32 %v6030_v12  ;;  %v1722_v46 = vadd.f32 %v10529_v38, %v10518_v13 }
 0x279   :  { %v2024_v58 = vmul.f32 %v1984_v14, %v9038_v5  ;;  %v1887_v27 = vrot.slane %v12068_v42, %v11817_v53  ;;  %v3002_v43 = vrot.slane %v12028_v32, %v11973_v7  ;;  %v3336_v0 = vmul.f32 %v3293_v29, %v9201_v57 }
 0x27a   :  { %v3251_v23 = vadd.f32 %v3235_v15, %v3150_v54  ;;  %7369 = vpow2.f32 %v3494_v30  ;;  %v10650_v19 = vmul.f32 %v10637_v6, %v4171_v48  ;;  %v1823_v25 = vmul.f32 %v1786_v2, %v9007_v11 }
 0x27b   :  { %v2040_v49 = vadd.f32 %v2024_v58, %v1939_v34  ;;  %v2125_v13 = vmul.f32 %v2085_v37, %v11899_v28  ;;  %v2951_v38 = vadd.f32 %v2935_v22, %v2850_v51  ;;  %v3103_v20 = vrot.slane %v12031_v47, %v11973_v7 }
 0x27c   :  { %v4175_v62 = vrot.slane %v10650_v19, 4  ;;  %v1839_v14 = vadd.f32 %v1823_v25, %v1722_v46  ;;  %v1924_v60 = vmul.f32 %v1887_v27, %v12062_v4  ;;  %v2186_v54 = vrot.slane %v12065_v50, %v11902_v24 }
 0x27d   :  { %v3036_v29 = vmul.f32 %v3002_v43, %v12058_v52  ;;  %v10661_v30 = vadd.f32 %v3336_v0, %v3251_v23  ;;  %v1988_v2 = vrot.slane %v12067_v33, %v12064_v3  ;;  %v2141_v56 = vadd.f32 %v2125_v13, %v2040_v49 }
 0x27e   :  { %v4176_v11 = vadd.f32 %v4175_v62, %v10650_v19  ;;  %v2287_v18 = vrot.slane %v12057_v16, %v11902_v24  ;;  %v3137_v34 = vmul.f32 %v3103_v20, %v12060_v36  ;;  %v1940_v37 = vadd.f32 %v1924_v60, %v1839_v14 }
 0x27f   :  { %v3052_v12 = vadd.f32 %v3036_v29, %v2951_v38  ;;  %v2226_v51 = vmul.f32 %v2186_v54, %v11908_v26  ;;  %v2089_v22 = vrot.slane %v12068_v42, %v12064_v3  ;;  %v3204_v15 = vrot.slane %v12028_v32, %v8961_v63  ;;  %v12069_v38 = vld [vmem:[#allocation30_spill] sm:$0xff] }
 0x280   :  { %v4177_v4 = vrot.slane %v4176_v11, 2  ;;  %v3398_v48 = vrot.slane %v10661_v30, 4  ;;  %v2025_v58 = vmul.f32 %v1988_v2, %v9038_v5  ;;  %v2327_v43 = vmul.f32 %v2287_v18, %v12041_v17  ;;  %v12070_v18 = vld [vmem:[#allocation36_spill] sm:$0xff] }
 0x281   :  { %v2242_v27 = vadd.f32 %v2226_v51, %v2141_v56  ;;  %v3153_v23 = vadd.f32 %v3137_v34, %v3052_v12  ;;  %v3305_v0 = vrot.slane %v12031_v47, %v8961_v63  ;;  %v2126_v3 = vmul.f32 %v2089_v22, %v11899_v28 }
 0x282   :  { %v4178_v46 = vadd.f32 %v4177_v4, %v4176_v11  ;;  %v2041_v13 = vadd.f32 %v2025_v58, %v1940_v37  ;;  %v2388_v32 = vrot.slane %v12065_v50, %v12069_v38  ;;  %v3238_v20 = vmul.f32 %v3204_v15, %v9192_v1 }
 0x283   :  { %v3399_v62 = vmax.f32 %v10661_v30, %v3398_v48  ;;  %v2190_v47 = vrot.slane %v12067_v33, %v11902_v24  ;;  %v2343_v54 = vadd.f32 %v2327_v43, %v2242_v27  ;;  %v2489_v28 = vrot.slane %v12057_v16, %v12069_v38 }
 0x284   :  { %v4179_v25 = vrot.slane %v4178_v46, 1  ;;  %v3254_v29 = vadd.f32 %v3238_v20, %v3153_v23  ;;  %v3339_v11 = vmul.f32 %v3305_v0, %v9201_v57  ;;  %v2142_v56 = vadd.f32 %v2126_v3, %v2041_v13  ;;  %v10718_v20 = vld [vmem:[%s11351_s0 + $0x78] sm:$0xff]  ;;  %s7499_s0 = smov [#allocation3]  }
 0x285   :  { %v7368_v49 = vpop.eup %7367  ;;  %v2291_v12 = vrot.slane %v12068_v42, %v11902_v24  ;;  %v3400_v34 = vrot.slane %v3399_v62, 2  ;;  %v2227_v51 = vmul.f32 %v2190_v47, %v11908_v26  ;;  %v2529_v22 = vmul.f32 %v2489_v28, %v9089_v45  ;;  %s7309_s17 = sshll.u32 %s7499_s0, 4  ;;  %s7310_s17 = int_to_ptr.vmem [resolvable:$true] %s7309_s17 }
 0x286   :  { %v4180_v5 = vadd.f32 %v4179_v25, %v4178_v46  ;;  %v10685_v14 = vmul.f32 %v7368_v49, %v10592_v39  ;;  %v2428_v39 = vmul.f32 %v2388_v32, %v12070_v18  ;;  %v10702_v15 = vadd.f32 %v3339_v11, %v3254_v29  ;;  %s7475_s18 = scalar_lea.vmem %s7310_s17, 2048  ;;  %p7480_p1 = scmp.lt.s32.totalorder %s7310_s17, %s7310_s17 }
 0x287   :  { %v10687_v60 = vpop.eup %7369  ;;  %v2392_v27 = vrot.slane %v12067_v33, %v12069_v38  ;;  %v2243_v24 = vadd.f32 %v2227_v51, %v2142_v56  ;;  %v2328_v43 = vmul.f32 %v2291_v12, %v12041_v17  ;;  %v2590_v23 = vrot.slane %v12065_v50, %v11830_v41  ;;  %v12072_v51 = vld [vmem:[#allocation17_spill] sm:$0xff]  ;;  %p7476_p0 = scmp.ne.s32.totalorder %s7310_s17, %s7475_s18  ;;  %p7481_p2 = scmp.lt.s32.totalorder %s7475_s18, %s7475_s18 }
 0x288   :  { %7371 = vrcp.f32 %v4180_v5  ;;  %v6045_v2 = vmul.f32 %v10687_v60, %v10685_v14  ;;  %v2444_v16 = vadd.f32 %v2428_v39, %v2343_v54  ;;  %v3401_v26 = vmax.f32 %v3399_v62, %v3400_v34 }
 0x289   :  { %v2594_v49 = vrot.slane %v12067_v33, %v11830_v41  ;;  %v2691_v17 = vrot.slane %v10718_v20, %v11830_v41  ;;  %v3416_v62 = vrot.slane %v10702_v15, 4  ;;  %v2429_v54 = vmul.f32 %v2392_v27, %v12070_v18  ;;  %p7482_p3 = por %p7481_p2, %p7480_p1 }
 0x28a   :  { %v6047_v4 = vcombine.high %v6045_v2, %v6045_v2  ;;  %v6054_v37 = vrot.slane %v6045_v2, %v9550_v59  ;;  %v2545_v13 = vadd.f32 %v2529_v22, %v2444_v16  ;;  %v2344_v11 = vadd.f32 %v2328_v43, %v2243_v24 }
 0x28b   :  { %v2630_v2 = vmul.f32 %v2590_v23, %v11922_v55  ;;  %v2493_v56 = vrot.slane %v12068_v42, %v12069_v38  ;;  %v3402_v39 = vrot.slane %v3401_v26, 1  ;;  %v10735_v18 = vmul.f32 %v2594_v49, %v11922_v55  ;;  %p7483_p4 = pnand %p7482_p3, %p7476_p0 }
 0x28c   :  { %v6061_v48 = vrot.slane %v6047_v4, %v9550_v59  ;;  %v6062_v46 = vcombine.high %v6054_v37, %v6054_v37  ;;  %v6070_v58 = vrot.slane %v6054_v37, %v9550_v59  ;;  %v12071_v4 = vld [vmem:[#allocation27_spill] sm:$0xff]  ;;  %v2445_v23 = vadd.f32 %v2429_v54, %v2344_v11 }
 0x28d   :  { %v2646_v22 = vadd.f32 %v2630_v2, %v2545_v13  ;;  %v12073_v13 = vld [vmem:[#allocation60_spill] sm:$0xff] }
 0x28e   :  { %v6084_v0 = vrot.slane %v6062_v46, %v9550_v59  ;;  %v6092_v25 = vcombine.high %v6070_v58, %v6070_v58  ;;  %v6063_v3 = vcombine.high %v6061_v48, %v6061_v48  ;;  %v6099_v32 = vrot.slane %v6070_v58, %v11817_v53 }
 0x28f   :  { %v6077_v28 = vrot.slane %v6061_v48, %v9550_v59  ;;  %v2731_v48 = vmul.f32 %v2691_v17, %v9111_v44  ;;  %v3417_v46 = vmax.f32 %v10702_v15, %v3416_v62  ;;  %v2792_v62 = vrot.slane %v12065_v50, %v11772_v21 }
 0x290   :  { %v6094_v5 = vcombine.high %v6084_v0, %v6084_v0  ;;  %v6103_v47 = vrot.slane %v6084_v0, %v11817_v53  ;;  %v6107_v29 = vrot.slane %v6092_v25, %v11817_v53  ;;  %v6091_v12 = vrot.slane %v6063_v3, %v9550_v59 }
 0x291   :  { %v6136_v37 = vmul.f32 %v6099_v32, %v12071_v4  ;;  %v6093_v27 = vcombine.high %v6077_v28, %v6077_v28  ;;  %v6115_v38 = vrot.slane %v6077_v28, %v11817_v53  ;;  %v2530_v0 = vmul.f32 %v2493_v56, %v9089_v45 }
 0x292   :  { %v6111_v34 = vrot.slane %v6094_v5, %v11817_v53  ;;  %v6137_v16 = vmul.f32 %v6103_v47, %v12072_v51  ;;  %v6138_v24 = vmul.f32 %v6107_v29, %v11925_v31  ;;  %v3403_v25 = vmax.f32 %v3401_v26, %v3402_v39  ;;  %v12074_v26 = vld [vmem:[#allocation61_spill] sm:$0xff] }
 0x293   :  { %v6095_v55 = vcombine.high %v6091_v12, %v6091_v12  ;;  %v6119_v49 = vrot.slane %v6091_v12, %v11817_v53  ;;  %v3418_v5 = vrot.slane %v3417_v46, 2  ;;  %v2747_v54 = vadd.f32 %v2731_v48, %v2646_v22 }
 0x294   :  { %v6144_v43 = vadd.f32 %v6137_v16, %v6136_v37  ;;  %v6139_v32 = vmul.f32 %v6111_v34, %v12073_v13  ;;  %v6123_v45 = vrot.slane %v6093_v27, %v11817_v53  ;;  %v6140_v29 = vmul.f32 %v6115_v38, %v12074_v26 }
 0x295   :  { %v7372_v58 = vpop.eup %7371  ;;  %v3464_v11 = vsub.f32 %v10661_v30, %v3403_v25  ;;  %v2893_v12 = vrot.slane %v10718_v20, %v11772_v21  ;;  %v6127_v34 = vrot.slane %v6095_v55, %v11817_v53  ;;  %v6141_v37 = vmul.f32 %v6119_v49, %v12052_v10 }
 0x296   :  { %v4182_v3 = vmul.f32 %v7372_v58, %v10650_v19  ;;  %v6145_v17 = vadd.f32 %v6144_v43, %v6138_v24  ;;  %v3419_v22 = vmax.f32 %v3417_v46, %v3418_v5  ;;  %v2832_v30 = vmul.f32 %v2792_v62, %v9126_v40 }
 0x297   :  { %v6142_v24 = vmul.f32 %v6123_v45, %v12053_v35  ;;  %v3486_v25 = vmul.f32 1.442695, %v3464_v11  ;;  %v2546_v49 = vadd.f32 %v2530_v0, %v2445_v23  ;;  %v2933_v62 = vmul.f32 %v2893_v12, %v11970_v9 }
 0x298   :  { %v4186_v47 = vcombine.high %v4182_v3, %v4182_v3  ;;  %v4193_v28 = vrot.slane %v4182_v3, %v9550_v59  ;;  %4184 = vst [vmem:[#allocation3 + $0x28] sm:$0xff] %v4182_v3  ;;  %v6146_v19 = vadd.f32 %v6145_v17, %v6139_v32  ;;  %v6143_v17 = vmul.f32 %v6127_v34, %v12014_v61  ;;  %v12077_v34 = vld [vmem:[#allocation53_spill] sm:$0xff] }
 0x299   :  { %v2695_v23 = vrot.slane %v12068_v42, %v11830_v41  ;;  %v2994_v0 = vrot.slane %v12065_v50, %v11973_v7  ;;  %7373 = vpow2.f32 %v3486_v25 }
 0x29a   :  { %v4200_v2 = vrot.slane %v4186_v47, %v9550_v59  ;;  %v4201_v56 = vcombine.high %v4193_v28, %v4193_v28  ;;  %v4209_v39 = vrot.slane %v4193_v28, %v9550_v59  ;;  %v6147_v16 = vadd.f32 %v6146_v19, %v6140_v29  ;;  %v12075_v19 = vld [vmem:[#allocation49_spill] sm:$0xff] }
 0x29b   :  { %v2848_v47 = vadd.f32 %v2832_v30, %v2747_v54  ;;  %v3420_v28 = vrot.slane %v3419_v22, 1 }
 0x29c   :  { %v4202_v48 = vcombine.high %v4200_v2, %v4200_v2  ;;  %v4223_v58 = vrot.slane %v4201_v56, %v9550_v59  ;;  %v4231_v27 = vcombine.high %v4209_v39, %v4209_v39  ;;  %v4238_v38 = vrot.slane %v4209_v39, %v11817_v53 }
 0x29d   :  { %v6148_v43 = vadd.f32 %v6147_v16, %v6141_v37  ;;  %v4216_v3 = vrot.slane %v4200_v2, %v9550_v59  ;;  %v12076_v2 = vld [vmem:[#allocation51_spill] sm:$0xff]  ;;  %v3421_v30 = vmax.f32 %v3419_v22, %v3420_v28  ;;  %v2796_v28 = vrot.slane %v12067_v33, %v11772_v21 }
 0x29e   :  { %v4233_v32 = vcombine.high %v4223_v58, %v4223_v58  ;;  %v4242_v55 = vrot.slane %v4223_v58, %v11817_v53  ;;  %v4246_v46 = vrot.slane %v4231_v27, %v11817_v53  ;;  %v4230_v29 = vrot.slane %v4202_v48, %v9550_v59 }
 0x29f   :  { %v6149_v5 = vadd.f32 %v6148_v43, %v6142_v24  ;;  %v4275_v11 = vmul.f32 %v4238_v38, %v12075_v19  ;;  %v4232_v54 = vcombine.high %v4216_v3, %v4216_v3  ;;  %v4254_v12 = vrot.slane %v4216_v3, %v11817_v53  ;;  %v12078_v24 = vld [vmem:[#allocation54_spill] sm:$0xff] }
 0x2a0   :  { %v4250_v45 = vrot.slane %v4233_v32, %v11817_v53  ;;  %v4276_v56 = vmul.f32 %v4242_v55, %v12076_v2  ;;  %v4277_v37 = vmul.f32 %v4246_v46, %v12077_v34  ;;  %v2949_v58 = vadd.f32 %v2933_v62, %v2848_v47 }
 0x2a1   :  { %v10770_v39 = vadd.f32 %v6149_v5, %v6143_v17  ;;  %v3095_v27 = vrot.slane %v10718_v20, %v11973_v7  ;;  %v4234_v38 = vcombine.high %v4230_v29, %v4230_v29  ;;  %v4258_v41 = vrot.slane %v4230_v29, %v11817_v53  ;;  %v12079_v5 = vld [vmem:[#allocation55_spill] sm:$0xff] }
 0x2a2   :  { %v4283_v16 = vadd.f32 %v4276_v56, %v4275_v11  ;;  %v4278_v43 = vmul.f32 %v4250_v45, %v12078_v24  ;;  %v2647_v3 = vadd.f32 %v10735_v18, %v2546_v49  ;;  %v2732_v55 = vmul.f32 %v2695_v23, %v9111_v44  ;;  %v12080_v49 = vld [vmem:[#allocation56_spill] sm:$0xff] }
 0x2a3   :  { %v6151_v48 = vrot.slane %v10770_v39, 4  ;;  %v3034_v46 = vmul.f32 %v2994_v0, %v12058_v52  ;;  %v4262_v17 = vrot.slane %v4232_v54, %v11817_v53  ;;  %v4279_v47 = vmul.f32 %v4254_v12, %v12079_v5 }
 0x2a4   :  { %v4284_v32 = vadd.f32 %v4283_v16, %v4277_v37  ;;  %v3135_v45 = vmul.f32 %v3095_v27, %v12060_v36  ;;  %v3467_v11 = vsub.f32 %v10702_v15, %v3421_v30  ;;  %v4266_v18 = vrot.slane %v4234_v38, %v11817_v53  ;;  %v12081_v37 = vld [vmem:[#allocation57_spill] sm:$0xff] }
 0x2a5   :  { %v6152_v25 = vadd.f32 %v6151_v48, %v10770_v39  ;;  %v3050_v29 = vadd.f32 %v3034_v46, %v2949_v58  ;;  %v4280_v44 = vmul.f32 %v4258_v41, %v12080_v49  ;;  %v2748_v0 = vadd.f32 %v2732_v55, %v2647_v3 }
 0x2a6   :  { %v4285_v62 = vadd.f32 %v4284_v32, %v4278_v43  ;;  %v2897_v54 = vrot.slane %v12068_v42, %v11772_v21  ;;  %v3196_v12 = vrot.slane %v12065_v50, %v8961_v63  ;;  %v4281_v16 = vmul.f32 %v4262_v17, %v12081_v37  ;;  %v10804_v21 = vpop.eup %7373 }
 0x2a7   :  { %v6153_v22 = vrot.slane %v6152_v25, 2  ;;  %v2833_v27 = vmul.f32 %v2796_v28, %v9126_v40  ;;  %v3151_v15 = vadd.f32 %v3135_v45, %v3050_v29  ;;  %v3297_v30 = vrot.slane %v10718_v20, %v8961_v63 }
 0x2a8   :  { %v4286_v56 = vadd.f32 %v4285_v62, %v4279_v47  ;;  %v3492_v38 = vmul.f32 1.442695, %v3467_v11  ;;  %v4282_v41 = vmul.f32 %v4266_v18, %v12066_v8  ;;  %v2934_v50 = vmul.f32 %v2897_v54, %v11970_v9 }
 0x2a9   :  { %v6154_v23 = vadd.f32 %v6153_v22, %v6152_v25  ;;  %v2849_v25 = vadd.f32 %v2833_v27, %v2748_v0  ;;  %v3236_v3 = vmul.f32 %v3196_v12, %v9192_v1  ;;  %v2998_v40 = vrot.slane %v12067_v33, %v11973_v7 }
 0x2aa   :  { %v4287_v48 = vadd.f32 %v4286_v56, %v4280_v44  ;;  %v3337_v20 = vmul.f32 %v3297_v30, %v9201_v57  ;;  %v3099_v62 = vrot.slane %v12068_v42, %v11973_v7  ;;  %v3200_v44 = vrot.slane %v12067_v33, %v8961_v63 }
 0x2ab   :  { %v6155_v58 = vrot.slane %v6154_v23, 1  ;;  %v3252_v46 = vadd.f32 %v3236_v3, %v3151_v15  ;;  %v2950_v47 = vadd.f32 %v2934_v50, %v2849_v25  ;;  %v3035_v9 = vmul.f32 %v2998_v40, %v12058_v52 }
 0x2ac   :  { %v4288_v43 = vadd.f32 %v4287_v48, %v4281_v16  ;;  %v3136_v11 = vmul.f32 %v3099_v62, %v12060_v36  ;;  %v3301_v7 = vrot.slane %v12068_v42, %v8961_v63  ;;  %v3237_v52 = vmul.f32 %v3200_v44, %v9192_v1 }
 0x2ad   :  { %v6156_v32 = vadd.f32 %v6155_v58, %v6154_v23  ;;  %v10815_v28 = vadd.f32 %v3337_v20, %v3252_v46  ;;  %v3051_v45 = vadd.f32 %v3035_v9, %v2950_v47 }
 0x2ae   :  { %v4289_v55 = vadd.f32 %v4288_v43, %v4282_v41  ;;  %v3338_v27 = vmul.f32 %v3301_v7, %v9201_v57 }
 0x2af   :  { %7375 = vrcp.f32 %v6156_v32  ;;  %v3404_v56 = vrot.slane %v10815_v28, 4  ;;  %v3152_v0 = vadd.f32 %v3136_v11, %v3051_v45 }
 0x2b0   :  { %7377 = vpow2.f32 %v3492_v38  ;;  %v4292_v17 = vmul.f32 %v10804_v21, %v4289_v55 }
 0x2b1   :  { %v3405_v16 = vmax.f32 %v10815_v28, %v3404_v56  ;;  %v3253_v33 = vadd.f32 %v3237_v52, %v3152_v0 }
 0x2b2   :  { %v4293_v22 = vrot.slane %v4292_v17, 4 }
 0x2b3   :  { %v3406_v63 = vrot.slane %v3405_v16, 2  ;;  %v10834_v1 = vadd.f32 %v3338_v27, %v3253_v33 }
 0x2b4   :  { %v4294_v29 = vadd.f32 %v4293_v22, %v4292_v17 }
 0x2b5   :  { %v3407_v43 = vmax.f32 %v3405_v16, %v3406_v63  ;;  %v3410_v3 = vrot.slane %v10834_v1, 4 }
 0x2b6   :  { %v4295_v18 = vrot.slane %v4294_v29, 2 }
 0x2b7   :  { %v3408_v47 = vrot.slane %v3407_v43, 1  ;;  %v3411_v45 = vmax.f32 %v10834_v1, %v3410_v3 }
 0x2b8   :  { %v4296_v23 = vadd.f32 %v4295_v18, %v4294_v29 }
 0x2b9   :  { %v3409_v0 = vmax.f32 %v3407_v43, %v3408_v47 }
 0x2ba   :  { %v4297_v54 = vrot.slane %v4296_v23, 1 }
 0x2bc   :  { %v7376_v12 = vpop.eup %7375  ;;  %v4298_v48 = vadd.f32 %v4297_v54, %v4296_v23 }
 0x2bd   :  { %v10826_v36 = vmul.f32 %v7376_v12, %v10770_v39  ;;  %v10828_v58 = vpop.eup %7377 }
 0x2be   :  { %7379 = vrcp.f32 %v4298_v48  ;;  %v3412_v48 = vrot.slane %v3411_v45, 2 }
 0x2bf   :  { %v6171_v15 = vmul.f32 %v10828_v58, %v10826_v36 }
 0x2c1   :  { %v6173_v42 = vcombine.high %v6171_v15, %v6171_v15  ;;  %v6180_v30 = vrot.slane %v6171_v15, %v9550_v59 }
 0x2c3   :  { %v6187_v38 = vrot.slane %v6173_v42, %v9550_v59  ;;  %v6188_v41 = vcombine.high %v6180_v30, %v6180_v30  ;;  %v6196_v39 = vrot.slane %v6180_v30, %v9550_v59 }
 0x2c5   :  { %v6210_v32 = vrot.slane %v6188_v41, %v9550_v59  ;;  %v6218_v25 = vcombine.high %v6196_v39, %v6196_v39  ;;  %v6189_v57 = vcombine.high %v6187_v38, %v6187_v38  ;;  %v6225_v50 = vrot.slane %v6196_v39, %v11817_v53 }
 0x2c6   :  { %v6203_v46 = vrot.slane %v6187_v38, %v9550_v59 }
 0x2c7   :  { %v6220_v55 = vcombine.high %v6210_v32, %v6210_v32  ;;  %v6229_v40 = vrot.slane %v6210_v32, %v11817_v53  ;;  %v6233_v20 = vrot.slane %v6218_v25, %v11817_v53  ;;  %v6217_v62 = vrot.slane %v6189_v57, %v9550_v59 }
 0x2c8   :  { %v6262_v9 = vmul.f32 %v6225_v50, %v12071_v4  ;;  %v6219_v18 = vcombine.high %v6203_v46, %v6203_v46  ;;  %v6241_v44 = vrot.slane %v6203_v46, %v11817_v53  ;;  %v3413_v25 = vmax.f32 %v3411_v45, %v3412_v48 }
 0x2c9   :  { %v6237_v22 = vrot.slane %v6220_v55, %v11817_v53  ;;  %v6263_v29 = vmul.f32 %v6229_v40, %v12072_v51  ;;  %v6264_v56 = vmul.f32 %v6233_v20, %v11925_v31  ;;  %v6221_v54 = vcombine.high %v6217_v62, %v6217_v62 }
 0x2ca   :  { %v6245_v12 = vrot.slane %v6217_v62, %v11817_v53  ;;  %v6249_v15 = vrot.slane %v6219_v18, %v11817_v53  ;;  %v6266_v63 = vmul.f32 %v6241_v44, %v12074_v26  ;;  %v3414_v45 = vrot.slane %v3413_v25, 1 }
 0x2cb   :  { %v7380_v11 = vpop.eup %7379  ;;  %v6270_v23 = vadd.f32 %v6263_v29, %v6262_v9  ;;  %v6265_v52 = vmul.f32 %v6237_v22, %v12073_v13  ;;  %v6253_v39 = vrot.slane %v6221_v54, %v11817_v53 }
 0x2cc   :  { %v10851_v7 = vmul.f32 %v7380_v11, %v4292_v17  ;;  %v3465_v17 = vsub.f32 %v10815_v28, %v3409_v0  ;;  %v6267_v43 = vmul.f32 %v6245_v12, %v12052_v10  ;;  %v6268_v40 = vmul.f32 %v6249_v15, %v12053_v35 }
 0x2cd   :  { %v6271_v16 = vadd.f32 %v6270_v23, %v6264_v56  ;;  %v6269_v9 = vmul.f32 %v6253_v39, %v12014_v61  ;;  %v3415_v48 = vmax.f32 %v3413_v25, %v3414_v45 }
 0x2ce   :  { %v4304_v33 = vcombine.high %v10851_v7, %v10851_v7  ;;  %v4311_v27 = vrot.slane %v10851_v7, %v9550_v59  ;;  %v3488_v46 = vmul.f32 1.442695, %v3465_v17 }
 0x2cf   :  { %v6272_v42 = vadd.f32 %v6271_v16, %v6265_v52  ;;  %v3466_v39 = vsub.f32 %v10834_v1, %v3415_v48 }
 0x2d0   :  { %v4318_v30 = vrot.slane %v4304_v33, %v9550_v59  ;;  %v4319_v38 = vcombine.high %v4311_v27, %v4311_v27  ;;  %v4327_v41 = vrot.slane %v4311_v27, %v9550_v59  ;;  %7381 = vpow2.f32 %v3488_v46 }
 0x2d1   :  { %v6273_v32 = vadd.f32 %v6272_v42, %v6266_v63 }
 0x2d2   :  { %v4320_v57 = vcombine.high %v4318_v30, %v4318_v30  ;;  %v4341_v50 = vrot.slane %v4319_v38, %v9550_v59  ;;  %v4349_v3 = vcombine.high %v4327_v41, %v4327_v41  ;;  %v4356_v55 = vrot.slane %v4327_v41, %v11817_v53 }
 0x2d3   :  { %v6274_v28 = vadd.f32 %v6273_v32, %v6267_v43  ;;  %v4334_v20 = vrot.slane %v4318_v30, %v9550_v59 }
 0x2d4   :  { %v4351_v47 = vcombine.high %v4341_v50, %v4341_v50  ;;  %v4360_v62 = vrot.slane %v4341_v50, %v11817_v53  ;;  %v4364_v22 = vrot.slane %v4349_v3, %v11817_v53  ;;  %v4348_v11 = vrot.slane %v4320_v57, %v9550_v59 }
 0x2d5   :  { %v6275_v29 = vadd.f32 %v6274_v28, %v6268_v40  ;;  %v4393_v44 = vmul.f32 %v4356_v55, %v12075_v19  ;;  %v4350_v0 = vcombine.high %v4334_v20, %v4334_v20  ;;  %v4372_v54 = vrot.slane %v4334_v20, %v11817_v53 }
 0x2d6   :  { %v4368_v18 = vrot.slane %v4351_v47, %v11817_v53  ;;  %v4394_v56 = vmul.f32 %v4360_v62, %v12076_v2  ;;  %v4395_v12 = vmul.f32 %v4364_v22, %v12077_v34  ;;  %v4352_v33 = vcombine.high %v4348_v11, %v4348_v11 }
 0x2d7   :  { %v6276_v23 = vadd.f32 %v6275_v29, %v6269_v9  ;;  %v4376_v27 = vrot.slane %v4348_v11, %v11817_v53  ;;  %v4380_v17 = vrot.slane %v4350_v0, %v11817_v53  ;;  %v4397_v30 = vmul.f32 %v4372_v54, %v12079_v5 }
 0x2d8   :  { %v4401_v52 = vadd.f32 %v4394_v56, %v4393_v44  ;;  %v4396_v15 = vmul.f32 %v4368_v18, %v12078_v24  ;;  %v4384_v43 = vrot.slane %v4352_v33, %v11817_v53  ;;  %v3490_v40 = vmul.f32 1.442695, %v3466_v39 }
 0x2d9   :  { %v6277_v16 = vrot.slane %v6276_v23, 4  ;;  %v4398_v32 = vmul.f32 %v4376_v27, %v12080_v49  ;;  %v4399_v50 = vmul.f32 %v4380_v17, %v12081_v37 }
 0x2da   :  { %v4402_v63 = vadd.f32 %v4401_v52, %v4395_v12  ;;  %v4400_v28 = vmul.f32 %v4384_v43, %v12066_v8 }
 0x2db   :  { %v6278_v42 = vadd.f32 %v6277_v16, %v6276_v23 }
 0x2dc   :  { %v4403_v38 = vadd.f32 %v4402_v63, %v4396_v15 }
 0x2dd   :  { %v6279_v41 = vrot.slane %v6278_v42, 2  ;;  %v10888_v47 = vpop.eup %7381 }
 0x2de   :  { %v4404_v25 = vadd.f32 %v4403_v38, %v4397_v30 }
 0x2df   :  { %v6280_v57 = vadd.f32 %v6279_v41, %v6278_v42 }
 0x2e0   :  { %v4405_v3 = vadd.f32 %v4404_v25, %v4398_v32 }
 0x2e1   :  { %v6281_v55 = vrot.slane %v6280_v57, 1 }
 0x2e2   :  { %v4406_v46 = vadd.f32 %v4405_v3, %v4399_v50 }
 0x2e3   :  { %v6282_v20 = vadd.f32 %v6281_v55, %v6280_v57 }
 0x2e4   :  { %v4407_v62 = vadd.f32 %v4406_v46, %v4400_v28 }
 0x2e5   :  { %7383 = vrcp.f32 %v6282_v20 }
 0x2e6   :  { %7385 = vpow2.f32 %v3490_v40  ;;  %v4410_v1 = vmul.f32 %v10888_v47, %v4407_v62 }
 0x2e8   :  { %v4411_v22 = vrot.slane %v4410_v1, 4 }
 0x2ea   :  { %v4412_v9 = vadd.f32 %v4411_v22, %v4410_v1 }
 0x2ec   :  { %v4413_v29 = vrot.slane %v4412_v9, 2 }
 0x2ee   :  { %v4414_v45 = vadd.f32 %v4413_v29, %v4412_v9 }
 0x2f0   :  { %v4415_v11 = vrot.slane %v4414_v45, 1 }
 0x2f2   :  { %v7384_v18 = vpop.eup %7383  ;;  %v4416_v44 = vadd.f32 %v4415_v11, %v4414_v45 }
 0x2f3   :  { %v10891_v56 = vmul.f32 %v7384_v18, %v6276_v23  ;;  %v10893_v0 = vpop.eup %7385 }
 0x2f4   :  { %7387 = vrcp.f32 %v4416_v44 }
 0x2f5   :  { %v6297_v54 = vmul.f32 %v10893_v0, %v10891_v56 }
 0x2f7   :  { %v6299_v12 = vcombine.high %v6297_v54, %v6297_v54  ;;  %v6306_v52 = vrot.slane %v6297_v54, %v9550_v59 }
 0x2f9   :  { %v6313_v16 = vrot.slane %v6299_v12, %v9550_v59  ;;  %v6314_v48 = vcombine.high %v6306_v52, %v6306_v52  ;;  %v6322_v33 = vrot.slane %v6306_v52, %v9550_v59 }
 0x2fb   :  { %v6336_v27 = vrot.slane %v6314_v48, %v9550_v59  ;;  %v6344_v15 = vcombine.high %v6322_v33, %v6322_v33  ;;  %v6315_v63 = vcombine.high %v6313_v16, %v6313_v16  ;;  %v6351_v23 = vrot.slane %v6322_v33, %v11817_v53 }
 0x2fc   :  { %v6329_v30 = vrot.slane %v6313_v16, %v9550_v59 }
 0x2fd   :  { %v6346_v42 = vcombine.high %v6336_v27, %v6336_v27  ;;  %v6355_v17 = vrot.slane %v6336_v27, %v11817_v53  ;;  %v6359_v38 = vrot.slane %v6344_v15, %v11817_v53  ;;  %v6343_v41 = vrot.slane %v6315_v63, %v9550_v59 }
 0x2fe   :  { %v6388_v43 = vmul.f32 %v6351_v23, %v12071_v4  ;;  %v6345_v57 = vcombine.high %v6329_v30, %v6329_v30  ;;  %v6367_v50 = vrot.slane %v6329_v30, %v11817_v53 }
 0x2ff   :  { %v6363_v39 = vrot.slane %v6346_v42, %v11817_v53  ;;  %v6389_v32 = vmul.f32 %v6355_v17, %v12072_v51  ;;  %v6390_v3 = vmul.f32 %v6359_v38, %v11925_v31  ;;  %v6347_v28 = vcombine.high %v6343_v41, %v6343_v41 }
 0x300   :  { %v6371_v46 = vrot.slane %v6343_v41, %v11817_v53  ;;  %v6375_v29 = vrot.slane %v6345_v57, %v11817_v53  ;;  %v6392_v45 = vmul.f32 %v6367_v50, %v12074_v26 }
 0x301   :  { %v7388_v25 = vpop.eup %7387  ;;  %v6396_v55 = vadd.f32 %v6389_v32, %v6388_v43  ;;  %v6391_v20 = vmul.f32 %v6363_v39, %v12073_v13  ;;  %v6379_v54 = vrot.slane %v6347_v28, %v11817_v53 }
 0x302   :  { %v10911_v40 = vmul.f32 %v7388_v25, %v4410_v1  ;;  %v6393_v12 = vmul.f32 %v6371_v46, %v12052_v10  ;;  %v6394_v15 = vmul.f32 %v6375_v29, %v12053_v35 }
 0x303   :  { %v6397_v62 = vadd.f32 %v6396_v55, %v6390_v3  ;;  %v6395_v38 = vmul.f32 %v6379_v54, %v12014_v61 }
 0x304   :  { %v4422_v22 = vcombine.high %v10911_v40, %v10911_v40  ;;  %v4429_v9 = vrot.slane %v10911_v40, %v9550_v59 }
 0x305   :  { %v6398_v11 = vadd.f32 %v6397_v62, %v6391_v20 }
 0x306   :  { %v4436_v1 = vrot.slane %v4422_v22, %v9550_v59  ;;  %v4437_v18 = vcombine.high %v4429_v9, %v4429_v9  ;;  %v4445_v44 = vrot.slane %v4429_v9, %v9550_v59 }
 0x307   :  { %v6399_v52 = vadd.f32 %v6398_v11, %v6392_v45 }
 0x308   :  { %v4438_v16 = vcombine.high %v4436_v1, %v4436_v1  ;;  %v4459_v48 = vrot.slane %v4437_v18, %v9550_v59  ;;  %v4467_v33 = vcombine.high %v4445_v44, %v4445_v44  ;;  %v4474_v27 = vrot.slane %v4445_v44, %v11817_v53 }
 0x309   :  { %v6400_v63 = vadd.f32 %v6399_v52, %v6393_v12  ;;  %v4452_v23 = vrot.slane %v4436_v1, %v9550_v59 }
 0x30a   :  { %v4469_v42 = vcombine.high %v4459_v48, %v4459_v48  ;;  %v4478_v17 = vrot.slane %v4459_v48, %v11817_v53  ;;  %v4482_v30 = vrot.slane %v4467_v33, %v11817_v53  ;;  %v4466_v39 = vrot.slane %v4438_v16, %v9550_v59 }
 0x30b   :  { %v6401_v41 = vadd.f32 %v6400_v63, %v6394_v15  ;;  %v4511_v32 = vmul.f32 %v4474_v27, %v12075_v19  ;;  %v4468_v50 = vcombine.high %v4452_v23, %v4452_v23  ;;  %v4490_v3 = vrot.slane %v4452_v23, %v11817_v53 }
 0x30c   :  { %v4486_v43 = vrot.slane %v4469_v42, %v11817_v53  ;;  %v4512_v25 = vmul.f32 %v4478_v17, %v12076_v2  ;;  %v4513_v55 = vmul.f32 %v4482_v30, %v12077_v34  ;;  %v4470_v20 = vcombine.high %v4466_v39, %v4466_v39 }
 0x30d   :  { %v6402_v57 = vadd.f32 %v6401_v41, %v6395_v38  ;;  %v4494_v62 = vrot.slane %v4466_v39, %v11817_v53  ;;  %v4498_v45 = vrot.slane %v4468_v50, %v11817_v53  ;;  %v4515_v11 = vmul.f32 %v4490_v3, %v12079_v5 }
 0x30e   :  { %v4519_v28 = vadd.f32 %v4512_v25, %v4511_v32  ;;  %v4514_v22 = vmul.f32 %v4486_v43, %v12078_v24  ;;  %v4502_v44 = vrot.slane %v4470_v20, %v11817_v53 }
 0x30f   :  { %v6403_v46 = vrot.slane %v6402_v57, 4  ;;  %v4516_v54 = vmul.f32 %v4494_v62, %v12080_v49  ;;  %v4517_v16 = vmul.f32 %v4498_v45, %v12081_v37 }
 0x310   :  { %v4520_v9 = vadd.f32 %v4519_v28, %v4513_v55  ;;  %v4518_v27 = vmul.f32 %v4502_v44, %v12066_v8 }
 0x311   :  { %v6404_v29 = vadd.f32 %v6403_v46, %v6402_v57 }
 0x312   :  { %v4521_v1 = vadd.f32 %v4520_v9, %v4514_v22 }
 0x313   :  { %v6405_v18 = vrot.slane %v6404_v29, 2 }
 0x314   :  { %v4522_v12 = vadd.f32 %v4521_v1, %v4515_v11 }
 0x315   :  { %v6406_v52 = vadd.f32 %v6405_v18, %v6404_v29 }
 0x316   :  { %v4523_v48 = vadd.f32 %v4522_v12, %v4516_v54 }
 0x317   :  { %v6407_v33 = vrot.slane %v6406_v52, 1 }
 0x318   :  { %v4524_v15 = vadd.f32 %v4523_v48, %v4517_v16 }
 0x319   :  { %v6408_v63 = vadd.f32 %v6407_v33, %v6406_v52 }
 0x31a   :  { %v4525_v23 = vadd.f32 %v4524_v15, %v4518_v27 }
 0x31b   :  { %7389 = vrcp.f32 %v6408_v63 }
 0x31c   :  { %v4528_v42 = vmul.f32 %v10893_v0, %v4525_v23 }
 0x31e   :  { %v4529_v17 = vrot.slane %v4528_v42, 4 }
 0x320   :  { %v4530_v30 = vadd.f32 %v4529_v17, %v4528_v42 }
 0x322   :  { %v4531_v38 = vrot.slane %v4530_v30, 2 }
 0x324   :  { %v4532_v41 = vadd.f32 %v4531_v38, %v4530_v30 }
 0x326   :  { %v4533_v39 = vrot.slane %v4532_v41, 1 }
 0x328   :  { %v7390_v43 = vpop.eup %7389  ;;  %v4534_v32 = vadd.f32 %v4533_v39, %v4532_v41 }
 0x329   :  { %v6410_v25 = vmul.f32 %v7390_v43, %v6402_v57 }
 0x32a   :  { %7391 = vrcp.f32 %v4534_v32 }
 0x32b   :  { %v10948_v50 = vmul.f32 %v6410_v25, %v10911_v40  ;;  %v6423_v3 = vmul.f32 %v10888_v47, %v6410_v25 }
 0x32d   :  { %v6413_v55 = vrot.slane %v10948_v50, 4  ;;  %v6425_v28 = vcombine.high %v6423_v3, %v6423_v3  ;;  %v6432_v46 = vrot.slane %v6423_v3, %v9550_v59 }
 0x32f   :  { %v6414_v0 = vadd.f32 %v6413_v55, %v10948_v50  ;;  %v6440_v20 = vcombine.high %v6432_v46, %v6432_v46  ;;  %v6448_v62 = vrot.slane %v6432_v46, %v9550_v59  ;;  %v6439_v22 = vrot.slane %v6425_v28, %v9550_v59 }
 0x331   :  { %v6415_v9 = vrot.slane %v6414_v0, 2  ;;  %v6462_v57 = vrot.slane %v6440_v20, %v9550_v59  ;;  %v6470_v29 = vcombine.high %v6448_v62, %v6448_v62  ;;  %v6477_v40 = vrot.slane %v6448_v62, %v11817_v53 }
 0x332   :  { %v6441_v11 = vcombine.high %v6439_v22, %v6439_v22  ;;  %v6455_v1 = vrot.slane %v6439_v22, %v9550_v59 }
 0x333   :  { %v6416_v45 = vadd.f32 %v6415_v9, %v6414_v0  ;;  %v6472_v47 = vcombine.high %v6462_v57, %v6462_v57  ;;  %v6481_v18 = vrot.slane %v6462_v57, %v11817_v53  ;;  %v6485_v44 = vrot.slane %v6470_v29, %v11817_v53 }
 0x334   :  { %v6514_v52 = vmul.f32 %v6477_v40, %v12071_v4  ;;  %v6469_v27 = vrot.slane %v6441_v11, %v9550_v59  ;;  %v6493_v15 = vrot.slane %v6455_v1, %v11817_v53  ;;  %v6471_v32 = vcombine.high %v6455_v1, %v6455_v1 }
 0x335   :  { %v6417_v54 = vrot.slane %v6416_v45, 1  ;;  %v6489_v12 = vrot.slane %v6472_v47, %v11817_v53  ;;  %v6515_v16 = vmul.f32 %v6481_v18, %v12072_v51  ;;  %v6516_v63 = vmul.f32 %v6485_v44, %v11925_v31 }
 0x336   :  { %v6473_v25 = vcombine.high %v6469_v27, %v6469_v27  ;;  %v6497_v3 = vrot.slane %v6469_v27, %v11817_v53  ;;  %v6518_v55 = vmul.f32 %v6493_v15, %v12074_v26  ;;  %v6501_v57 = vrot.slane %v6471_v32, %v11817_v53 }
 0x337   :  { %v6418_v48 = vadd.f32 %v6417_v54, %v6416_v45  ;;  %v7392_v33 = vpop.eup %7391  ;;  %v6522_v23 = vadd.f32 %v6515_v16, %v6514_v52  ;;  %v6517_v30 = vmul.f32 %v6489_v12, %v12073_v13 }
 0x338   :  { %v4536_v17 = vmul.f32 %v7392_v33, %v4528_v42  ;;  %v6519_v45 = vmul.f32 %v6497_v3, %v12052_v10  ;;  %v6505_v18 = vrot.slane %v6473_v25, %v11817_v53  ;;  %v6520_v16 = vmul.f32 %v6501_v57, %v12053_v35 }
 0x339   :  { %7393 = vrcp.f32 %v6418_v48  ;;  %v6523_v38 = vadd.f32 %v6522_v23, %v6516_v63 }
 0x33a   :  { %v4540_v41 = vcombine.high %v4536_v17, %v4536_v17  ;;  %v4547_v39 = vrot.slane %v4536_v17, %v9550_v59  ;;  %v10970_v43 = vmul.f32 %v10891_v56, %v4536_v17  ;;  %v6521_v17 = vmul.f32 %v6505_v18, %v12014_v61 }
 0x33b   :  { %v6524_v28 = vadd.f32 %v6523_v38, %v6517_v30 }
 0x33c   :  { %v4554_v46 = vrot.slane %v4540_v41, %v9550_v59  ;;  %v4555_v42 = vcombine.high %v4547_v39, %v4547_v39  ;;  %v4563_v0 = vrot.slane %v4547_v39, %v9550_v59  ;;  %v6287_v20 = vrot.slane %v10970_v43, 4 }
 0x33d   :  { %v6525_v62 = vadd.f32 %v6524_v28, %v6518_v55 }
 0x33e   :  { %v4556_v22 = vcombine.high %v4554_v46, %v4554_v46  ;;  %v4577_v9 = vrot.slane %v4555_v42, %v9550_v59  ;;  %v4585_v56 = vcombine.high %v4563_v0, %v4563_v0  ;;  %v4592_v29 = vrot.slane %v4563_v0, %v11817_v53 }
 0x33f   :  { %v6288_v40 = vadd.f32 %v6287_v20, %v10970_v43  ;;  %v4570_v47 = vrot.slane %v4554_v46, %v9550_v59  ;;  %v6526_v12 = vadd.f32 %v6525_v62, %v6519_v45 }
 0x340   :  { %v4587_v11 = vcombine.high %v4577_v9, %v4577_v9  ;;  %v4596_v1 = vrot.slane %v4577_v9, %v11817_v53  ;;  %v4600_v44 = vrot.slane %v4585_v56, %v11817_v53  ;;  %v4584_v52 = vrot.slane %v4556_v22, %v9550_v59 }
 0x341   :  { %v6289_v54 = vrot.slane %v6288_v40, 2  ;;  %v4629_v33 = vmul.f32 %v4592_v29, %v12075_v19  ;;  %v4586_v63 = vcombine.high %v4570_v47, %v4570_v47  ;;  %v4608_v23 = vrot.slane %v4570_v47, %v11817_v53 }
 0x342   :  { %v4604_v48 = vrot.slane %v4587_v11, %v11817_v53  ;;  %v4630_v27 = vmul.f32 %v4596_v1, %v12076_v2  ;;  %v4631_v38 = vmul.f32 %v4600_v44, %v12077_v34  ;;  %v6527_v32 = vadd.f32 %v6526_v12, %v6520_v16 }
 0x343   :  { %v6290_v15 = vadd.f32 %v6289_v54, %v6288_v40  ;;  %v4588_v25 = vcombine.high %v4584_v52, %v4584_v52  ;;  %v4612_v3 = vrot.slane %v4584_v52, %v11817_v53  ;;  %v4616_v20 = vrot.slane %v4586_v63, %v11817_v53 }
 0x344   :  { %v4637_v41 = vadd.f32 %v4630_v27, %v4629_v33  ;;  %v4632_v28 = vmul.f32 %v4604_v48, %v12078_v24  ;;  %v6528_v0 = vadd.f32 %v6527_v32, %v6521_v17  ;;  %v4633_v62 = vmul.f32 %v4608_v23, %v12079_v5 }
 0x345   :  { %v6291_v39 = vrot.slane %v6290_v15, 1  ;;  %v4620_v56 = vrot.slane %v4588_v25, %v11817_v53  ;;  %v4634_v57 = vmul.f32 %v4612_v3, %v12080_v49 }
 0x346   :  { %v7394_v30 = vpop.eup %7393  ;;  %v4638_v46 = vadd.f32 %v4637_v41, %v4631_v38  ;;  %v6529_v9 = vrot.slane %v6528_v0, 4 }
 0x347   :  { %v6420_v55 = vmul.f32 %v7394_v30, %v10948_v50  ;;  %v6292_v42 = vadd.f32 %v6291_v39, %v6290_v15  ;;  %v4635_v50 = vmul.f32 %v4616_v20, %v12081_v37  ;;  %v4636_v11 = vmul.f32 %v4620_v56, %v12066_v8 }
 0x348   :  { %v4639_v22 = vadd.f32 %v4638_v46, %v4632_v28  ;;  %v6530_v40 = vadd.f32 %v6529_v9, %v6528_v0 }
 0x349   :  { %6421 = vst [vmem:[#allocation3 + $0x38] sm:$0xff] %v6420_v55  ;;  %7395 = vrcp.f32 %v6292_v42 }
 0x34a   :  { %v4640_v29 = vadd.f32 %v4639_v22, %v4633_v62  ;;  %v6531_v47 = vrot.slane %v6530_v40, 2 }
 0x34c   :  { %v4641_v45 = vadd.f32 %v4640_v29, %v4634_v57  ;;  %v6532_v18 = vadd.f32 %v6531_v47, %v6530_v40 }
 0x34e   :  { %v4642_v1 = vadd.f32 %v4641_v45, %v4635_v50  ;;  %v6533_v54 = vrot.slane %v6532_v18, 1 }
 0x350   :  { %v4643_v44 = vadd.f32 %v4642_v1, %v4636_v11  ;;  %v6534_v52 = vadd.f32 %v6533_v54, %v6532_v18 }
 0x352   :  { %v4646_v12 = vmul.f32 %v10828_v58, %v4643_v44  ;;  %7397 = vrcp.f32 %v6534_v52 }
 0x354   :  { %v4647_v16 = vrot.slane %v4646_v12, 4 }
 0x356   :  { %v7396_v48 = vpop.eup %7395  ;;  %v4648_v33 = vadd.f32 %v4647_v16, %v4646_v12 }
 0x357   :  { %v6294_v27 = vmul.f32 %v7396_v48, %v10970_v43 }
 0x358   :  { %v4649_v15 = vrot.slane %v4648_v33, 2 }
 0x359   :  { %6295 = vst [vmem:[#allocation3 + $0x40] sm:$0xff] %v6294_v27 }
 0x35a   :  { %v4650_v63 = vadd.f32 %v4649_v15, %v4648_v33 }
 0x35c   :  { %v4651_v23 = vrot.slane %v4650_v63, 1 }
 0x35e   :  { %v4652_v17 = vadd.f32 %v4651_v23, %v4650_v63 }
 0x35f   :  { %v7398_v30 = vpop.eup %7397 }
 0x360   :  { %7399 = vrcp.f32 %v4652_v17  ;;  %v6536_v38 = vmul.f32 %v7398_v30, %v6528_v0 }
 0x362   :  { %v11006_v41 = vmul.f32 %v6536_v38, %v10851_v7  ;;  %v6549_v58 = vmul.f32 %v10804_v21, %v6536_v38 }
 0x364   :  { %v6539_v39 = vrot.slane %v11006_v41, 4  ;;  %v6558_v32 = vrot.slane %v6549_v58, %v9550_v59  ;;  %v6551_v25 = vcombine.high %v6549_v58, %v6549_v58 }
 0x366   :  { %v6540_v43 = vadd.f32 %v6539_v39, %v11006_v41  ;;  %v6566_v3 = vcombine.high %v6558_v32, %v6558_v32  ;;  %v6574_v55 = vrot.slane %v6558_v32, %v9550_v59  ;;  %v6565_v42 = vrot.slane %v6551_v25, %v9550_v59 }
 0x368   :  { %v6541_v28 = vrot.slane %v6540_v43, 2  ;;  %v6588_v46 = vrot.slane %v6566_v3, %v9550_v59  ;;  %v6596_v20 = vcombine.high %v6574_v55, %v6574_v55  ;;  %v6603_v21 = vrot.slane %v6574_v55, %v11817_v53 }
 0x369   :  { %v6567_v56 = vcombine.high %v6565_v42, %v6565_v42  ;;  %v6581_v11 = vrot.slane %v6565_v42, %v9550_v59 }
 0x36a   :  { %v6542_v0 = vadd.f32 %v6541_v28, %v6540_v43  ;;  %v6607_v62 = vrot.slane %v6588_v46, %v11817_v53  ;;  %v6598_v57 = vcombine.high %v6588_v46, %v6588_v46  ;;  %v6611_v1 = vrot.slane %v6596_v20, %v11817_v53 }
 0x36b   :  { %v6640_v18 = vmul.f32 %v6603_v21, %v12071_v4  ;;  %v6595_v16 = vrot.slane %v6567_v56, %v9550_v59  ;;  %v6597_v17 = vcombine.high %v6581_v11, %v6581_v11  ;;  %v6619_v32 = vrot.slane %v6581_v11, %v11817_v53 }
 0x36c   :  { %v6543_v9 = vrot.slane %v6542_v0, 1  ;;  %v6641_v29 = vmul.f32 %v6607_v62, %v12072_v51  ;;  %v6615_v15 = vrot.slane %v6598_v57, %v11817_v53  ;;  %v6642_v30 = vmul.f32 %v6611_v1, %v11925_v31 }
 0x36d   :  { %v7400_v7 = vpop.eup %7399  ;;  %v6599_v28 = vcombine.high %v6595_v16, %v6595_v16  ;;  %v6623_v46 = vrot.slane %v6595_v16, %v11817_v53  ;;  %v6644_v56 = vmul.f32 %v6619_v32, %v12074_v26 }
 0x36e   :  { %v4654_v22 = vmul.f32 %v7400_v7, %v4646_v12  ;;  %v6544_v47 = vadd.f32 %v6543_v9, %v6542_v0  ;;  %v6648_v48 = vadd.f32 %v6641_v29, %v6640_v18  ;;  %v6643_v42 = vmul.f32 %v6615_v15, %v12073_v13 }
 0x36f   :  { %v6627_v9 = vrot.slane %v6597_v17, %v11817_v53  ;;  %v6631_v1 = vrot.slane %v6599_v28, %v11817_v53  ;;  %v6645_v18 = vmul.f32 %v6623_v46, %v12052_v10 }
 0x370   :  { %v4658_v40 = vcombine.high %v4654_v22, %v4654_v22  ;;  %v4665_v50 = vrot.slane %v4654_v22, %v9550_v59  ;;  %v11020_v45 = vmul.f32 %v10826_v36, %v4654_v22  ;;  %7401 = vrcp.f32 %v6544_v47 }
 0x371   :  { %v6649_v3 = vadd.f32 %v6648_v48, %v6642_v30  ;;  %v6646_v48 = vmul.f32 %v6627_v9, %v12053_v35 }
 0x372   :  { %v4672_v44 = vrot.slane %v4658_v40, %v9550_v59  ;;  %v4673_v54 = vcombine.high %v4665_v50, %v4665_v50  ;;  %v4681_v12 = vrot.slane %v4665_v50, %v9550_v59  ;;  %v6161_v52 = vrot.slane %v11020_v45, 4 }
 0x373   :  { %v6650_v50 = vadd.f32 %v6649_v3, %v6643_v42 }
 0x374   :  { %v4674_v36 = vcombine.high %v4672_v44, %v4672_v44  ;;  %v4695_v33 = vrot.slane %v4673_v54, %v9550_v59  ;;  %v4703_v27 = vcombine.high %v4681_v12, %v4681_v12  ;;  %v4710_v63 = vrot.slane %v4681_v12, %v11817_v53 }
 0x375   :  { %v6162_v23 = vadd.f32 %v6161_v52, %v11020_v45  ;;  %v4688_v38 = vrot.slane %v4672_v44, %v9550_v59  ;;  %v6651_v52 = vadd.f32 %v6650_v50, %v6644_v56 }
 0x376   :  { %v4705_v58 = vcombine.high %v4695_v33, %v4695_v33  ;;  %v4714_v39 = vrot.slane %v4695_v33, %v11817_v53  ;;  %v4718_v25 = vrot.slane %v4703_v27, %v11817_v53  ;;  %v4702_v55 = vrot.slane %v4674_v36, %v9550_v59 }
 0x377   :  { %v6163_v43 = vrot.slane %v6162_v23, 2  ;;  %v4747_v7 = vmul.f32 %v4710_v63, %v12075_v19  ;;  %v4704_v62 = vcombine.high %v4688_v38, %v4688_v38  ;;  %v4726_v22 = vrot.slane %v4688_v38, %v11817_v53 }
 0x378   :  { %v4722_v0 = vrot.slane %v4705_v58, %v11817_v53  ;;  %v4748_v20 = vmul.f32 %v4714_v39, %v12076_v2  ;;  %v4749_v57 = vmul.f32 %v4718_v25, %v12077_v34  ;;  %v4706_v47 = vcombine.high %v4702_v55, %v4702_v55 }
 0x379   :  { %v6164_v21 = vadd.f32 %v6163_v43, %v6162_v23  ;;  %v4730_v11 = vrot.slane %v4702_v55, %v11817_v53  ;;  %v4734_v16 = vrot.slane %v4704_v62, %v11817_v53  ;;  %v4751_v36 = vmul.f32 %v4726_v22, %v12079_v5 }
 0x37a   :  { %v4755_v29 = vadd.f32 %v4748_v20, %v4747_v7  ;;  %v4750_v44 = vmul.f32 %v4722_v0, %v12078_v24  ;;  %v6652_v27 = vadd.f32 %v6651_v52, %v6645_v18  ;;  %v4738_v63 = vrot.slane %v4706_v47, %v11817_v53 }
 0x37b   :  { %v6165_v40 = vrot.slane %v6164_v21, 1  ;;  %v6647_v23 = vmul.f32 %v6631_v1, %v12014_v61  ;;  %v4752_v17 = vmul.f32 %v4730_v11, %v12080_v49  ;;  %v4753_v39 = vmul.f32 %v4734_v16, %v12081_v37  ;;  %v6663_v11 = vld [vmem:[#allocation3 + $0x28] sm:$0xff] }
 0x37c   :  { %v4756_v54 = vadd.f32 %v4755_v29, %v4749_v57  ;;  %v6653_v58 = vadd.f32 %v6652_v27, %v6646_v48  ;;  %v4754_v43 = vmul.f32 %v4738_v63, %v12066_v8 }
 0x37d   :  { %v6166_v12 = vadd.f32 %v6165_v40, %v6164_v21  ;;  %v7402_v15 = vpop.eup %7401 }
 0x37e   :  { %v4757_v33 = vadd.f32 %v4756_v54, %v4750_v44  ;;  %v6546_v38 = vmul.f32 %v7402_v15, %v11006_v41  ;;  %v6654_v25 = vadd.f32 %v6653_v58, %v6647_v23 }
 0x37f   :  { %7403 = vrcp.f32 %v6166_v12 }
 0x380   :  { %v4758_v30 = vadd.f32 %v4757_v33, %v4751_v36  ;;  %6547 = vst [vmem:[#allocation3 + $0x30] sm:$0xff] %v6546_v38  ;;  %v6655_v55 = vrot.slane %v6654_v25, 4 }
 0x382   :  { %v4759_v32 = vadd.f32 %v4758_v30, %v4752_v17  ;;  %v6656_v46 = vadd.f32 %v6655_v55, %v6654_v25 }
 0x384   :  { %v4760_v3 = vadd.f32 %v4759_v32, %v4753_v39  ;;  %v6657_v0 = vrot.slane %v6656_v46, 2 }
 0x386   :  { %v4761_v28 = vadd.f32 %v4760_v3, %v4754_v43  ;;  %v6658_v20 = vadd.f32 %v6657_v0, %v6656_v46 }
 0x388   :  { %v4764_v42 = vmul.f32 %v10687_v60, %v4761_v28  ;;  %v6659_v22 = vrot.slane %v6658_v20, 1 }
 0x38a   :  { %v4765_v7 = vrot.slane %v4764_v42, 4  ;;  %v6660_v56 = vadd.f32 %v6659_v22, %v6658_v20 }
 0x38c   :  { %v7404_v21 = vpop.eup %7403  ;;  %v4766_v62 = vadd.f32 %v4765_v7, %v4764_v42  ;;  %7405 = vrcp.f32 %v6660_v56 }
 0x38d   :  { %v6168_v41 = vmul.f32 %v7404_v21, %v11020_v45 }
 0x38e   :  { %v4767_v9 = vrot.slane %v4766_v62, 2 }
 0x38f   :  { %6169 = vst [vmem:[#allocation3 + $0x48] sm:$0xff] %v6168_v41 }
 0x390   :  { %v4768_v57 = vadd.f32 %v4767_v9, %v4766_v62 }
 0x392   :  { %v4769_v29 = vrot.slane %v4768_v57, 1 }
 0x394   :  { %v4770_v40 = vadd.f32 %v4769_v29, %v4768_v57 }
 0x396   :  { %7407 = vrcp.f32 %v4770_v40 }
 0x399   :  { %v7406_v50 = vpop.eup %7405 }
 0x39a   :  { %v6662_v47 = vmul.f32 %v7406_v50, %v6654_v25 }
 0x39c   :  { %v11063_v60 = vmul.f32 %v6663_v11, %v6662_v47  ;;  %v6675_v1 = vmul.f32 %v10637_v6, %v6662_v47 }
 0x39e   :  { %v6665_v18 = vrot.slane %v11063_v60, 4  ;;  %v6684_v45 = vrot.slane %v6675_v1, %v9550_v59  ;;  %v6677_v52 = vcombine.high %v6675_v1, %v6675_v1 }
 0x3a0   :  { %v6666_v12 = vadd.f32 %v6665_v18, %v11063_v60  ;;  %v6692_v27 = vcombine.high %v6684_v45, %v6684_v45  ;;  %v6691_v39 = vrot.slane %v6677_v52, %v9550_v59  ;;  %v6700_v25 = vrot.slane %v6684_v45, %v9550_v59 }
 0x3a2   :  { %v6667_v33 = vrot.slane %v6666_v12, 2  ;;  %v6714_v28 = vrot.slane %v6692_v27, %v9550_v59  ;;  %v6693_v21 = vcombine.high %v6691_v39, %v6691_v39  ;;  %v6707_v62 = vrot.slane %v6691_v39, %v9550_v59 }
 0x3a3   :  { %v7408_v44 = vpop.eup %7407  ;;  %v6722_v56 = vcombine.high %v6700_v25, %v6700_v25  ;;  %v6729_v18 = vrot.slane %v6700_v25, %v11817_v53 }
 0x3a4   :  { %v4772_v54 = vmul.f32 %v7408_v44, %v4764_v42  ;;  %v6668_v17 = vadd.f32 %v6667_v33, %v6666_v12  ;;  %v6724_v50 = vcombine.high %v6714_v28, %v6714_v28  ;;  %v6733_v12 = vrot.slane %v6714_v28, %v11817_v53 }
 0x3a6   :  { %v4776_v16 = vcombine.high %v4772_v54, %v4772_v54  ;;  %v4783_v48 = vrot.slane %v4772_v54, %v9550_v59  ;;  %v11071_v36 = vmul.f32 %v10685_v14, %v4772_v54  ;;  %v6669_v0 = vrot.slane %v6668_v17, 1 }
 0x3a8   :  { %v4790_v15 = vrot.slane %v4776_v16, %v9550_v59  ;;  %v4791_v6 = vcombine.high %v4783_v48, %v4783_v48  ;;  %v4799_v63 = vrot.slane %v4783_v48, %v9550_v59  ;;  %v6035_v23 = vrot.slane %v11071_v36, 4 }
 0x3a9   :  { %v6670_v1 = vadd.f32 %v6669_v0, %v6668_v17  ;;  %v6737_v48 = vrot.slane %v6722_v56, %v11817_v53  ;;  %v6767_v17 = vmul.f32 %v6733_v12, %v12072_v51 }
 0x3aa   :  { %v4792_v30 = vcombine.high %v4790_v15, %v4790_v15  ;;  %v4813_v38 = vrot.slane %v4791_v6, %v9550_v59  ;;  %v4821_v58 = vcombine.high %v4799_v63, %v4799_v63  ;;  %v4828_v32 = vrot.slane %v4799_v63, %v11817_v53 }
 0x3ab   :  { %v6036_v14 = vadd.f32 %v6035_v23, %v11071_v36  ;;  %v4806_v43 = vrot.slane %v4790_v15, %v9550_v59  ;;  %7409 = vrcp.f32 %v6670_v1  ;;  %v6721_v15 = vrot.slane %v6693_v21, %v9550_v59 }
 0x3ac   :  { %v4823_v3 = vcombine.high %v4813_v38, %v4813_v38  ;;  %v4832_v55 = vrot.slane %v4813_v38, %v11817_v53  ;;  %v4836_v46 = vrot.slane %v4821_v58, %v11817_v53  ;;  %v4820_v7 = vrot.slane %v4792_v30, %v9550_v59 }
 0x3ad   :  { %v6037_v42 = vrot.slane %v6036_v14, 2  ;;  %v4865_v41 = vmul.f32 %v4828_v32, %v12075_v19  ;;  %v4822_v57 = vcombine.high %v4806_v43, %v4806_v43  ;;  %v4844_v29 = vrot.slane %v4806_v43, %v11817_v53 }
 0x3ae   :  { %v4840_v20 = vrot.slane %v4823_v3, %v11817_v53  ;;  %v4866_v22 = vmul.f32 %v4832_v55, %v12076_v2  ;;  %v4867_v40 = vmul.f32 %v4836_v46, %v12077_v34  ;;  %v4824_v44 = vcombine.high %v4820_v7, %v4820_v7 }
 0x3af   :  { %v6038_v9 = vadd.f32 %v6037_v42, %v6036_v14  ;;  %v4848_v45 = vrot.slane %v4820_v7, %v11817_v53  ;;  %v4852_v33 = vrot.slane %v4822_v57, %v11817_v53  ;;  %v4869_v27 = vmul.f32 %v4844_v29, %v12079_v5  ;;  %v12082_v57 = vld [vmem:[#allocation14_spill] sm:$0xff] }
 0x3b0   :  { %v4873_v47 = vadd.f32 %v4866_v22, %v4865_v41  ;;  %v4868_v54 = vmul.f32 %v4840_v20, %v12078_v24  ;;  %v6741_v6 = vrot.slane %v6724_v50, %v11817_v53  ;;  %v6766_v23 = vmul.f32 %v6729_v18, %v12071_v4 }
 0x3b1   :  { %v6039_v11 = vrot.slane %v6038_v9, 1  ;;  %v4856_v30 = vrot.slane %v4824_v44, %v11817_v53  ;;  %v4870_v38 = vmul.f32 %v4848_v45, %v12080_v49  ;;  %v6723_v58 = vcombine.high %v6707_v62, %v6707_v62 }
 0x3b2   :  { %v4874_v52 = vadd.f32 %v4873_v47, %v4867_v40  ;;  %v6745_v32 = vrot.slane %v6707_v62, %v11817_v53  ;;  %v6768_v14 = vmul.f32 %v6737_v48, %v11925_v31  ;;  %v6774_v25 = vadd.f32 %v6767_v17, %v6766_v23 }
 0x3b3   :  { %v6040_v16 = vadd.f32 %v6039_v11, %v6038_v9  ;;  %v4871_v43 = vmul.f32 %v4852_v33, %v12081_v37  ;;  %v6725_v3 = vcombine.high %v6721_v15, %v6721_v15  ;;  %v6749_v28 = vrot.slane %v6721_v15, %v11817_v53 }
 0x3b4   :  { %v4875_v63 = vadd.f32 %v4874_v52, %v4868_v54  ;;  %v6769_v46 = vmul.f32 %v6741_v6, %v12073_v13  ;;  %v6775_v42 = vadd.f32 %v6774_v25, %v6768_v14  ;;  %v4872_v0 = vmul.f32 %v4856_v30, %v12066_v8 }
 0x3b5   :  { %7411 = vrcp.f32 %v6040_v16  ;;  %v6753_v20 = vrot.slane %v6723_v58, %v11817_v53  ;;  %v6770_v21 = vmul.f32 %v6745_v32, %v12074_v26  ;;  %v6757_v22 = vrot.slane %v6725_v3, %v11817_v53 }
 0x3b6   :  { %v4876_v39 = vadd.f32 %v4875_v63, %v4869_v27  ;;  %v6776_v62 = vadd.f32 %v6775_v42, %v6769_v46  ;;  %v6771_v9 = vmul.f32 %v6749_v28, %v12052_v10 }
 0x3b7   :  { %v6772_v40 = vmul.f32 %v6753_v20, %v12053_v35  ;;  %v6773_v18 = vmul.f32 %v6757_v22, %v12014_v61  ;;  %v6789_v22 = vld [vmem:[#allocation3 + $0x20] sm:$0xff] }
 0x3b8   :  { %v4877_v55 = vadd.f32 %v4876_v39, %v4870_v38  ;;  %v6777_v56 = vadd.f32 %v6776_v62, %v6770_v21  ;;  %v7410_v47 = vpop.eup %7409  ;;  %v12083_v39 = vld [vmem:[#allocation8_spill] sm:$0xff] }
 0x3b9   :  { %v6672_v1 = vmul.f32 %v7410_v47, %v11063_v60 }
 0x3ba   :  { %v4878_v7 = vadd.f32 %v4877_v55, %v4871_v43  ;;  %v6778_v50 = vadd.f32 %v6777_v56, %v6771_v9 }
 0x3bb   :  { %6673 = vst [vmem:[#allocation3 + $0x28] sm:$0xff] %v6672_v1 }
 0x3bc   :  { %v4879_v41 = vadd.f32 %v4878_v7, %v4872_v0  ;;  %v6779_v44 = vadd.f32 %v6778_v50, %v6772_v40 }
 0x3be   :  { %v4882_v29 = vmul.f32 %v12082_v57, %v4879_v41  ;;  %v6780_v52 = vadd.f32 %v6779_v44, %v6773_v18 }
 0x3c0   :  { %v4883_v11 = vrot.slane %v4882_v29, 4  ;;  %v6781_v48 = vrot.slane %v6780_v52, 4 }
 0x3c2   :  { %v7412_v45 = vpop.eup %7411  ;;  %v4884_v54 = vadd.f32 %v4883_v11, %v4882_v29  ;;  %v6782_v27 = vadd.f32 %v6781_v48, %v6780_v52 }
 0x3c3   :  { %v6042_v12 = vmul.f32 %v7412_v45, %v11071_v36 }
 0x3c4   :  { %v4885_v16 = vrot.slane %v4884_v54, 2  ;;  %v6783_v6 = vrot.slane %v6782_v27, 2 }
 0x3c5   :  { %6043 = vst [vmem:[#allocation3 + $0x50] sm:$0xff] %v6042_v12 }
 0x3c6   :  { %v4886_v33 = vadd.f32 %v4885_v16, %v4884_v54  ;;  %v6784_v23 = vadd.f32 %v6783_v6, %v6782_v27 }
 0x3c8   :  { %v4887_v15 = vrot.slane %v4886_v33, 1  ;;  %v6785_v60 = vrot.slane %v6784_v23, 1 }
 0x3ca   :  { %v4888_v63 = vadd.f32 %v4887_v15, %v4886_v33  ;;  %v6786_v17 = vadd.f32 %v6785_v60, %v6784_v23 }
 0x3cc   :  { %7413 = vrcp.f32 %v4888_v63 }
 0x3cd   :  { %7415 = vrcp.f32 %v6786_v17 }
 0x3d9   :  { %v7414_v30 = vpop.eup %7413 }
 0x3da   :  { %v4890_v38 = vmul.f32 %v7414_v30, %v4882_v29  ;;  %v7416_v14 = vpop.eup %7415  ;;  %v12084_v29 = vld [vmem:[#allocation7_spill] sm:$0xff] }
 0x3db   :  { %v6788_v28 = vmul.f32 %v7416_v14, %v6780_v52 }
 0x3dc   :  { %v4894_v58 = vcombine.high %v4890_v38, %v4890_v38  ;;  %v4901_v36 = vrot.slane %v4890_v38, %v9550_v59  ;;  %v11122_v32 = vmul.f32 %v12083_v39, %v4890_v38 }
 0x3dd   :  { %v11133_v57 = vmul.f32 %v6789_v22, %v6788_v28  ;;  %v6801_v40 = vmul.f32 %v12084_v29, %v6788_v28 }
 0x3de   :  { %v4908_v25 = vrot.slane %v4894_v58, %v9550_v59  ;;  %v4909_v43 = vcombine.high %v4901_v36, %v4901_v36  ;;  %v4917_v3 = vrot.slane %v4901_v36, %v9550_v59  ;;  %v5909_v55 = vrot.slane %v11122_v32, 4 }
 0x3df   :  { %v6791_v16 = vrot.slane %v11133_v57, 4  ;;  %v6803_v48 = vcombine.high %v6801_v40, %v6801_v40  ;;  %v6810_v15 = vrot.slane %v6801_v40, %v9550_v59 }
 0x3e0   :  { %v4910_v46 = vcombine.high %v4908_v25, %v4908_v25  ;;  %v4931_v42 = vrot.slane %v4909_v43, %v9550_v59  ;;  %v4939_v0 = vcombine.high %v4917_v3, %v4917_v3  ;;  %v4946_v7 = vrot.slane %v4917_v3, %v11817_v53 }
 0x3e1   :  { %v5910_v20 = vadd.f32 %v5909_v55, %v11122_v32  ;;  %v4924_v21 = vrot.slane %v4908_v25, %v9550_v59  ;;  %v6792_v60 = vadd.f32 %v6791_v16, %v11133_v57  ;;  %v6817_v30 = vrot.slane %v6803_v48, %v9550_v59 }
 0x3e2   :  { %v4941_v62 = vcombine.high %v4931_v42, %v4931_v42  ;;  %v4950_v41 = vrot.slane %v4931_v42, %v11817_v53  ;;  %v4954_v9 = vrot.slane %v4939_v0, %v11817_v53  ;;  %v4938_v50 = vrot.slane %v4910_v46, %v9550_v59 }
 0x3e3   :  { %v5911_v56 = vrot.slane %v5910_v20, 2  ;;  %v4983_v11 = vmul.f32 %v4946_v7, %v12075_v19  ;;  %v4940_v44 = vcombine.high %v4924_v21, %v4924_v21  ;;  %v4962_v45 = vrot.slane %v4924_v21, %v11817_v53 }
 0x3e4   :  { %v4958_v47 = vrot.slane %v4941_v62, %v11817_v53  ;;  %v4984_v1 = vmul.f32 %v4950_v41, %v12076_v2  ;;  %v4985_v54 = vmul.f32 %v4954_v9, %v12077_v34  ;;  %v4942_v33 = vcombine.high %v4938_v50, %v4938_v50 }
 0x3e5   :  { %v5912_v18 = vadd.f32 %v5911_v56, %v5910_v20  ;;  %v4966_v27 = vrot.slane %v4938_v50, %v11817_v53  ;;  %v4970_v17 = vrot.slane %v4940_v44, %v11817_v53  ;;  %v6818_v38 = vcombine.high %v6810_v15, %v6810_v15 }
 0x3e6   :  { %v4991_v12 = vadd.f32 %v4984_v1, %v4983_v11  ;;  %v4986_v6 = vmul.f32 %v4958_v47, %v12078_v24  ;;  %v6826_v58 = vrot.slane %v6810_v15, %v9550_v59  ;;  %v4987_v36 = vmul.f32 %v4962_v45, %v12079_v5 }
 0x3e7   :  { %v5913_v52 = vrot.slane %v5912_v18, 1  ;;  %v6793_v14 = vrot.slane %v6792_v60, 2  ;;  %v6840_v25 = vrot.slane %v6818_v38, %v9550_v59  ;;  %v4974_v3 = vrot.slane %v4942_v33, %v11817_v53 }
 0x3e8   :  { %v4992_v63 = vadd.f32 %v4991_v12, %v4985_v54  ;;  %v6848_v43 = vcombine.high %v6826_v58, %v6826_v58  ;;  %v4988_v55 = vmul.f32 %v4966_v27, %v12080_v49  ;;  %v6819_v42 = vcombine.high %v6817_v30, %v6817_v30 }
 0x3e9   :  { %v5914_v23 = vadd.f32 %v5913_v52, %v5912_v18  ;;  %v6794_v46 = vadd.f32 %v6793_v14, %v6792_v60  ;;  %v6850_v0 = vcombine.high %v6840_v25, %v6840_v25  ;;  %v6855_v7 = vrot.slane %v6826_v58, %v11817_v53  ;;  %v12085_v52 = vld [vmem:[#allocation46_spill] sm:$0xff] }
 0x3ea   :  { %v4993_v39 = vadd.f32 %v4992_v63, %v4986_v6  ;;  %v6859_v20 = vrot.slane %v6840_v25, %v11817_v53  ;;  %v4989_v21 = vmul.f32 %v4970_v17, %v12081_v37  ;;  %v6833_v22 = vrot.slane %v6817_v30, %v9550_v59 }
 0x3eb   :  { %7417 = vrcp.f32 %v5914_v23  ;;  %v6795_v41 = vrot.slane %v6794_v46, 1  ;;  %v6863_v9 = vrot.slane %v6848_v43, %v11817_v53  ;;  %v4990_v56 = vmul.f32 %v4974_v3, %v12066_v8 }
 0x3ec   :  { %v4994_v28 = vadd.f32 %v4993_v39, %v4987_v36  ;;  %v6893_v50 = vmul.f32 %v6859_v20, %v12072_v51  ;;  %v6847_v47 = vrot.slane %v6819_v42, %v9550_v59  ;;  %v6867_v11 = vrot.slane %v6850_v0, %v11817_v53 }
 0x3ed   :  { %v6796_v40 = vadd.f32 %v6795_v41, %v6794_v46  ;;  %v6892_v1 = vmul.f32 %v6855_v7, %v12071_v4  ;;  %v6849_v44 = vcombine.high %v6833_v22, %v6833_v22  ;;  %v6871_v45 = vrot.slane %v6833_v22, %v11817_v53 }
 0x3ee   :  { %v4995_v62 = vadd.f32 %v4994_v28, %v4988_v55  ;;  %v6894_v54 = vmul.f32 %v6863_v9, %v11925_v31  ;;  %v6851_v48 = vcombine.high %v6847_v47, %v6847_v47  ;;  %v6875_v33 = vrot.slane %v6847_v47, %v11817_v53  ;;  %v12086_v47 = vld [vmem:[#allocation42_spill] sm:$0xff] }
 0x3ef   :  { %7419 = vrcp.f32 %v6796_v40  ;;  %v6900_v12 = vadd.f32 %v6893_v50, %v6892_v1  ;;  %v6895_v27 = vmul.f32 %v6867_v11, %v12073_v13  ;;  %v6879_v23 = vrot.slane %v6849_v44, %v11817_v53 }
 0x3f0   :  { %v4996_v29 = vadd.f32 %v4995_v62, %v4989_v21  ;;  %v6896_v60 = vmul.f32 %v6871_v45, %v12074_v26  ;;  %v6883_v58 = vrot.slane %v6851_v48, %v11817_v53  ;;  %v6897_v36 = vmul.f32 %v6875_v33, %v12052_v10 }
 0x3f1   :  { %v6901_v15 = vadd.f32 %v6900_v12, %v6894_v54  ;;  %v6898_v25 = vmul.f32 %v6879_v23, %v12053_v35 }
 0x3f2   :  { %v4997_v18 = vadd.f32 %v4996_v29, %v4990_v56  ;;  %v6899_v55 = vmul.f32 %v6883_v58, %v12014_v61 }
 0x3f3   :  { %v6902_v17 = vadd.f32 %v6901_v15, %v6895_v27 }
 0x3f4   :  { %v5000_v16 = vmul.f32 %v12085_v52, %v4997_v18 }
 0x3f5   :  { %v6903_v39 = vadd.f32 %v6902_v17, %v6896_v60 }
 0x3f6   :  { %v5001_v6 = vrot.slane %v5000_v16, 4 }
 0x3f7   :  { %v6904_v43 = vadd.f32 %v6903_v39, %v6897_v36 }
 0x3f8   :  { %v7418_v63 = vpop.eup %7417  ;;  %v5002_v30 = vadd.f32 %v5001_v6, %v5000_v16 }
 0x3f9   :  { %v5916_v38 = vmul.f32 %v7418_v63, %v11122_v32  ;;  %v6905_v28 = vadd.f32 %v6904_v43, %v6898_v25 }
 0x3fa   :  { %v5003_v14 = vrot.slane %v5002_v30, 2 }
 0x3fb   :  { %5917 = vst [vmem:[#allocation3 + $0x58] sm:$0xff] %v5916_v38  ;;  %v6906_v0 = vadd.f32 %v6905_v28, %v6899_v55 }
 0x3fc   :  { %v5004_v3 = vadd.f32 %v5003_v14, %v5002_v30  ;;  %v7420_v42 = vpop.eup %7419 }
 0x3fd   :  { %v6798_v32 = vmul.f32 %v7420_v42, %v11133_v57  ;;  %v6907_v20 = vrot.slane %v6906_v0, 4 }
 0x3fe   :  { %v5005_v46 = vrot.slane %v5004_v3, 1 }
 0x3ff   :  { %6799 = vst [vmem:[#allocation3 + $0x20] sm:$0xff] %v6798_v32  ;;  %v6908_v21 = vadd.f32 %v6907_v20, %v6906_v0  ;;  %v12087_v20 = vld [vmem:[#allocation58_spill] sm:$0xff] }
 0x400   :  { %v5006_v7 = vadd.f32 %v5005_v46, %v5004_v3  ;;  %v6915_v46 = vld [vmem:[#allocation3 + $0x18] sm:$0xff] }
 0x401   :  { %v6909_v62 = vrot.slane %v6908_v21, 2 }
 0x402   :  { %7421 = vrcp.f32 %v5006_v7 }
 0x403   :  { %v6910_v41 = vadd.f32 %v6909_v62, %v6908_v21 }
 0x405   :  { %v6911_v22 = vrot.slane %v6910_v41, 1 }
 0x407   :  { %v6912_v9 = vadd.f32 %v6911_v22, %v6910_v41 }
 0x409   :  { %7423 = vrcp.f32 %v6912_v9 }
 0x40f   :  { %v7422_v56 = vpop.eup %7421 }
 0x410   :  { %v5008_v29 = vmul.f32 %v7422_v56, %v5000_v16 }
 0x412   :  { %v5012_v40 = vcombine.high %v5008_v29, %v5008_v29  ;;  %v5019_v50 = vrot.slane %v5008_v29, %v9550_v59  ;;  %v11179_v11 = vmul.f32 %v12086_v47, %v5008_v29 }
 0x414   :  { %v5026_v1 = vrot.slane %v5012_v40, %v9550_v59  ;;  %v5027_v57 = vcombine.high %v5019_v50, %v5019_v50  ;;  %v5035_v18 = vrot.slane %v5019_v50, %v9550_v59  ;;  %v5783_v44 = vrot.slane %v11179_v11, 4 }
 0x416   :  { %v5028_v45 = vcombine.high %v5026_v1, %v5026_v1  ;;  %v5049_v54 = vrot.slane %v5027_v57, %v9550_v59  ;;  %v5057_v12 = vcombine.high %v5035_v18, %v5035_v18  ;;  %v5064_v52 = vrot.slane %v5035_v18, %v11817_v53  ;;  %v7424_v63 = vpop.eup %7423 }
 0x417   :  { %v5784_v16 = vadd.f32 %v5783_v44, %v11179_v11  ;;  %v5042_v48 = vrot.slane %v5026_v1, %v9550_v59  ;;  %v6914_v43 = vmul.f32 %v7424_v63, %v6906_v0 }
 0x418   :  { %v5059_v33 = vcombine.high %v5049_v54, %v5049_v54  ;;  %v5068_v27 = vrot.slane %v5049_v54, %v11817_v53  ;;  %v5072_v15 = vrot.slane %v5057_v12, %v11817_v53  ;;  %v5056_v23 = vrot.slane %v5028_v45, %v9550_v59 }
 0x419   :  { %v5785_v6 = vrot.slane %v5784_v16, 2  ;;  %v5101_v17 = vmul.f32 %v5064_v52, %v12075_v19  ;;  %v5058_v58 = vcombine.high %v5042_v48, %v5042_v48  ;;  %v5080_v36 = vrot.slane %v5042_v48, %v11817_v53 }
 0x41a   :  { %v5076_v60 = vrot.slane %v5059_v33, %v11817_v53  ;;  %v5102_v30 = vmul.f32 %v5068_v27, %v12076_v2  ;;  %v5103_v39 = vmul.f32 %v5072_v15, %v12077_v34  ;;  %v5060_v3 = vcombine.high %v5056_v23, %v5056_v23 }
 0x41b   :  { %v5786_v38 = vadd.f32 %v5785_v6, %v5784_v16  ;;  %v5084_v55 = vrot.slane %v5056_v23, %v11817_v53  ;;  %v11198_v32 = vmul.f32 %v6915_v46, %v6914_v43  ;;  %v6927_v21 = vmul.f32 %v12087_v20, %v6914_v43 }
 0x41c   :  { %v5109_v14 = vadd.f32 %v5102_v30, %v5101_v17  ;;  %v5104_v28 = vmul.f32 %v5076_v60, %v12078_v24  ;;  %v5088_v62 = vrot.slane %v5058_v58, %v11817_v53  ;;  %v5105_v41 = vmul.f32 %v5080_v36, %v12079_v5  ;;  %v12088_v36 = vld [vmem:[#allocation37_spill] sm:$0xff] }
 0x41d   :  { %v5787_v25 = vrot.slane %v5786_v38, 1  ;;  %v6917_v0 = vrot.slane %v11198_v32, 4  ;;  %v6929_v9 = vcombine.high %v6927_v21, %v6927_v21  ;;  %v5092_v56 = vrot.slane %v5060_v3, %v11817_v53 }
 0x41e   :  { %v5110_v42 = vadd.f32 %v5109_v14, %v5103_v39  ;;  %v6936_v29 = vrot.slane %v6927_v21, %v9550_v59  ;;  %v5106_v40 = vmul.f32 %v5084_v55, %v12080_v49  ;;  %v5107_v44 = vmul.f32 %v5088_v62, %v12081_v37 }
 0x41f   :  { %v5788_v7 = vadd.f32 %v5787_v25, %v5786_v38  ;;  %v6918_v47 = vadd.f32 %v6917_v0, %v11198_v32  ;;  %v6943_v1 = vrot.slane %v6929_v9, %v9550_v59  ;;  %v5108_v48 = vmul.f32 %v5092_v56, %v12066_v8 }
 0x420   :  { %v5111_v22 = vadd.f32 %v5110_v42, %v5104_v28  ;;  %v6944_v57 = vcombine.high %v6936_v29, %v6936_v29  ;;  %v6952_v18 = vrot.slane %v6936_v29, %v9550_v59 }
 0x421   :  { %7425 = vrcp.f32 %v5788_v7  ;;  %v6919_v54 = vrot.slane %v6918_v47, 2  ;;  %v6945_v12 = vcombine.high %v6943_v1, %v6943_v1  ;;  %v6959_v6 = vrot.slane %v6943_v1, %v9550_v59 }
 0x422   :  { %v5112_v50 = vadd.f32 %v5111_v22, %v5105_v41  ;;  %v6966_v52 = vrot.slane %v6944_v57, %v9550_v59  ;;  %v6974_v16 = vcombine.high %v6952_v18, %v6952_v18  ;;  %v6981_v15 = vrot.slane %v6952_v18, %v11817_v53 }
 0x423   :  { %v6920_v27 = vadd.f32 %v6919_v54, %v6918_v47  ;;  %v6973_v38 = vrot.slane %v6945_v12, %v9550_v59  ;;  %v6975_v3 = vcombine.high %v6959_v6, %v6959_v6  ;;  %v6997_v55 = vrot.slane %v6959_v6, %v11817_v53 }
 0x424   :  { %v5113_v45 = vadd.f32 %v5112_v50, %v5106_v40  ;;  %v6976_v63 = vcombine.high %v6966_v52, %v6966_v52  ;;  %v6985_v23 = vrot.slane %v6966_v52, %v11817_v53  ;;  %v6989_v30 = vrot.slane %v6974_v16, %v11817_v53 }
 0x425   :  { %v6921_v17 = vrot.slane %v6920_v27, 1  ;;  %v7018_v43 = vmul.f32 %v6981_v15, %v12071_v4  ;;  %v6977_v20 = vcombine.high %v6973_v38, %v6973_v38  ;;  %v7001_v21 = vrot.slane %v6973_v38, %v11817_v53 }
 0x426   :  { %v5114_v33 = vadd.f32 %v5113_v45, %v5107_v44  ;;  %v7019_v58 = vmul.f32 %v6985_v23, %v12072_v51  ;;  %v6993_v25 = vrot.slane %v6976_v63, %v11817_v53  ;;  %v7020_v46 = vmul.f32 %v6989_v30, %v11925_v31 }
 0x427   :  { %v6922_v14 = vadd.f32 %v6921_v17, %v6920_v27  ;;  %v7005_v56 = vrot.slane %v6975_v3, %v11817_v53  ;;  %v7022_v29 = vmul.f32 %v6997_v55, %v12074_v26  ;;  %v7009_v47 = vrot.slane %v6977_v20, %v11817_v53 }
 0x428   :  { %v5115_v60 = vadd.f32 %v5114_v33, %v5108_v48  ;;  %v7026_v42 = vadd.f32 %v7019_v58, %v7018_v43  ;;  %v7021_v22 = vmul.f32 %v6993_v25, %v12073_v13  ;;  %v7023_v1 = vmul.f32 %v7001_v21, %v12052_v10  ;;  %v12089_v58 = vld [vmem:[#allocation16_spill] sm:$0xff] }
 0x429   :  { %7427 = vrcp.f32 %v6922_v14  ;;  %v7024_v44 = vmul.f32 %v7005_v56, %v12053_v35  ;;  %v7025_v54 = vmul.f32 %v7009_v47, %v12014_v61 }
 0x42a   :  { %v5118_v39 = vmul.f32 %v12088_v36, %v5115_v60  ;;  %v7027_v0 = vadd.f32 %v7026_v42, %v7020_v46 }
 0x42c   :  { %v5119_v28 = vrot.slane %v5118_v39, 4  ;;  %v7028_v40 = vadd.f32 %v7027_v0, %v7021_v22 }
 0x42e   :  { %v7426_v7 = vpop.eup %7425  ;;  %v5120_v62 = vadd.f32 %v5119_v28, %v5118_v39  ;;  %v7029_v57 = vadd.f32 %v7028_v40, %v7022_v29 }
 0x42f   :  { %v5790_v41 = vmul.f32 %v7426_v7, %v11179_v11 }
 0x430   :  { %v5121_v9 = vrot.slane %v5120_v62, 2  ;;  %v7030_v11 = vadd.f32 %v7029_v57, %v7023_v1 }
 0x431   :  { %5791 = vst [vmem:[#allocation3 + $0x60] sm:$0xff] %v5790_v41 }
 0x432   :  { %v5122_v50 = vadd.f32 %v5121_v9, %v5120_v62  ;;  %v7031_v12 = vadd.f32 %v7030_v11, %v7024_v44 }
 0x434   :  { %v5123_v18 = vrot.slane %v5122_v50, 1  ;;  %v7032_v52 = vadd.f32 %v7031_v12, %v7025_v54 }
 0x436   :  { %v5124_v45 = vadd.f32 %v5123_v18, %v5122_v50  ;;  %v7428_v16 = vpop.eup %7427  ;;  %v7033_v33 = vrot.slane %v7032_v52, 4 }
 0x437   :  { %v6924_v48 = vmul.f32 %v7428_v16, %v11198_v32  ;;  %v7041_v16 = vld [vmem:[#allocation3 + $0x10] sm:$0xff] }
 0x438   :  { %7429 = vrcp.f32 %v5124_v45  ;;  %v7034_v27 = vadd.f32 %v7033_v33, %v7032_v52  ;;  %v12090_v33 = vld [vmem:[#allocation48_spill] sm:$0xff] }
 0x439   :  { %6925 = vst [vmem:[#allocation3 + $0x18] sm:$0xff] %v6924_v48 }
 0x43a   :  { %v7035_v15 = vrot.slane %v7034_v27, 2 }
 0x43c   :  { %v7036_v6 = vadd.f32 %v7035_v15, %v7034_v27 }
 0x43e   :  { %v7037_v63 = vrot.slane %v7036_v6, 1 }
 0x440   :  { %v7038_v23 = vadd.f32 %v7037_v63, %v7036_v6 }
 0x442   :  { %7431 = vrcp.f32 %v7038_v23 }
 0x445   :  { %v7430_v60 = vpop.eup %7429 }
 0x446   :  { %v5126_v17 = vmul.f32 %v7430_v60, %v5118_v39 }
 0x448   :  { %v5130_v30 = vcombine.high %v5126_v17, %v5126_v17  ;;  %v5137_v38 = vrot.slane %v5126_v17, %v9550_v59  ;;  %v11236_v36 = vmul.f32 %v12089_v58, %v5126_v17 }
 0x44a   :  { %v5144_v14 = vrot.slane %v5130_v30, %v9550_v59  ;;  %v5145_v25 = vcombine.high %v5137_v38, %v5137_v38  ;;  %v5153_v32 = vrot.slane %v5137_v38, %v9550_v59  ;;  %v5657_v43 = vrot.slane %v11236_v36, 4 }
 0x44c   :  { %v5146_v3 = vcombine.high %v5144_v14, %v5144_v14  ;;  %v5167_v55 = vrot.slane %v5145_v25, %v9550_v59  ;;  %v5175_v28 = vcombine.high %v5153_v32, %v5153_v32  ;;  %v5182_v39 = vrot.slane %v5153_v32, %v11817_v53 }
 0x44d   :  { %v5658_v46 = vadd.f32 %v5657_v43, %v11236_v36  ;;  %v5160_v42 = vrot.slane %v5144_v14, %v9550_v59 }
 0x44e   :  { %v5177_v7 = vcombine.high %v5167_v55, %v5167_v55  ;;  %v5186_v20 = vrot.slane %v5167_v55, %v11817_v53  ;;  %v5190_v21 = vrot.slane %v5175_v28, %v11817_v53  ;;  %v5174_v41 = vrot.slane %v5146_v3, %v9550_v59 }
 0x44f   :  { %v5659_v62 = vrot.slane %v5658_v46, 2  ;;  %v5219_v0 = vmul.f32 %v5182_v39, %v12075_v19  ;;  %v5176_v29 = vcombine.high %v5160_v42, %v5160_v42  ;;  %v7432_v40 = vpop.eup %7431  ;;  %v5198_v50 = vrot.slane %v5160_v42, %v11817_v53 }
 0x450   :  { %v5194_v22 = vrot.slane %v5177_v7, %v11817_v53  ;;  %v5220_v9 = vmul.f32 %v5186_v20, %v12076_v2  ;;  %v5221_v47 = vmul.f32 %v5190_v21, %v12077_v34  ;;  %v5178_v18 = vcombine.high %v5174_v41, %v5174_v41 }
 0x451   :  { %v5660_v56 = vadd.f32 %v5659_v62, %v5658_v46  ;;  %v7040_v44 = vmul.f32 %v7432_v40, %v7032_v52  ;;  %v5202_v11 = vrot.slane %v5174_v41, %v11817_v53  ;;  %v5206_v15 = vrot.slane %v5176_v29, %v11817_v53  ;;  %v12091_v29 = vld [vmem:[#allocation41_spill] sm:$0xff] }
 0x452   :  { %v5227_v1 = vadd.f32 %v5220_v9, %v5219_v0  ;;  %v5222_v45 = vmul.f32 %v5194_v22, %v12078_v24  ;;  %v5223_v6 = vmul.f32 %v5198_v50, %v12079_v5  ;;  %v5210_v17 = vrot.slane %v5178_v18, %v11817_v53 }
 0x453   :  { %v5661_v57 = vrot.slane %v5660_v56, 1  ;;  %v11255_v48 = vmul.f32 %v7041_v16, %v7040_v44  ;;  %v7053_v27 = vmul.f32 %v12090_v33, %v7040_v44  ;;  %v5224_v30 = vmul.f32 %v5202_v11, %v12080_v49 }
 0x454   :  { %v5228_v54 = vadd.f32 %v5227_v1, %v5221_v47  ;;  %v5225_v43 = vmul.f32 %v5206_v15, %v12081_v37  ;;  %v5226_v39 = vmul.f32 %v5210_v17, %v12066_v8 }
 0x455   :  { %v5662_v12 = vadd.f32 %v5661_v57, %v5660_v56  ;;  %v7043_v23 = vrot.slane %v11255_v48, 4  ;;  %v7055_v52 = vcombine.high %v7053_v27, %v7053_v27  ;;  %v7062_v60 = vrot.slane %v7053_v27, %v9550_v59 }
 0x456   :  { %v5229_v63 = vadd.f32 %v5228_v54, %v5222_v45 }
 0x457   :  { %7433 = vrcp.f32 %v5662_v12  ;;  %v7044_v58 = vadd.f32 %v7043_v23, %v11255_v48  ;;  %v7069_v14 = vrot.slane %v7055_v52, %v9550_v59  ;;  %v7070_v25 = vcombine.high %v7062_v60, %v7062_v60 }
 0x458   :  { %v5230_v38 = vadd.f32 %v5229_v63, %v5223_v6  ;;  %v7078_v32 = vrot.slane %v7062_v60, %v9550_v59 }
 0x459   :  { %v7045_v55 = vrot.slane %v7044_v58, 2  ;;  %v7092_v28 = vrot.slane %v7070_v25, %v9550_v59  ;;  %v7071_v20 = vcombine.high %v7069_v14, %v7069_v14  ;;  %v7085_v22 = vrot.slane %v7069_v14, %v9550_v59 }
 0x45a   :  { %v5231_v3 = vadd.f32 %v5230_v38, %v5224_v30  ;;  %v7100_v42 = vcombine.high %v7078_v32, %v7078_v32  ;;  %v7107_v62 = vrot.slane %v7078_v32, %v11817_v53 }
 0x45b   :  { %v7046_v7 = vadd.f32 %v7045_v55, %v7044_v58  ;;  %v7102_v21 = vcombine.high %v7092_v28, %v7092_v28  ;;  %v7111_v0 = vrot.slane %v7092_v28, %v11817_v53  ;;  %v7099_v1 = vrot.slane %v7071_v20, %v9550_v59 }
 0x45c   :  { %v5232_v46 = vadd.f32 %v5231_v3, %v5225_v43  ;;  %v7115_v56 = vrot.slane %v7100_v42, %v11817_v53  ;;  %v7144_v18 = vmul.f32 %v7107_v62, %v12071_v4  ;;  %v7101_v11 = vcombine.high %v7085_v22, %v7085_v22 }
 0x45d   :  { %v7047_v9 = vrot.slane %v7046_v7, 1  ;;  %v7145_v50 = vmul.f32 %v7111_v0, %v12072_v51  ;;  %v7119_v57 = vrot.slane %v7102_v21, %v11817_v53  ;;  %v7123_v54 = vrot.slane %v7085_v22, %v11817_v53 }
 0x45e   :  { %v5233_v41 = vadd.f32 %v5232_v46, %v5226_v39  ;;  %v7146_v12 = vmul.f32 %v7115_v56, %v11925_v31  ;;  %v7103_v15 = vcombine.high %v7099_v1, %v7099_v1  ;;  %v7127_v6 = vrot.slane %v7099_v1, %v11817_v53 }
 0x45f   :  { %v7048_v47 = vadd.f32 %v7047_v9, %v7046_v7  ;;  %v7152_v16 = vadd.f32 %v7145_v50, %v7144_v18  ;;  %v7147_v63 = vmul.f32 %v7119_v57, %v12073_v13  ;;  %v7131_v60 = vrot.slane %v7101_v11, %v11817_v53  ;;  %v12092_v50 = vld [vmem:[#allocation10_spill] sm:$0xff] }
 0x460   :  { %v5236_v40 = vmul.f32 %v12091_v29, %v5233_v41  ;;  %v7148_v17 = vmul.f32 %v7123_v54, %v12074_v26  ;;  %v7135_v58 = vrot.slane %v7103_v15, %v11817_v53  ;;  %v7149_v14 = vmul.f32 %v7127_v6, %v12052_v10 }
 0x461   :  { %7435 = vrcp.f32 %v7048_v47  ;;  %v7153_v23 = vadd.f32 %v7152_v16, %v7146_v12  ;;  %v7150_v32 = vmul.f32 %v7131_v60, %v12053_v35 }
 0x462   :  { %v5237_v44 = vrot.slane %v5236_v40, 4  ;;  %v7151_v55 = vmul.f32 %v7135_v58, %v12014_v61 }
 0x463   :  { %v7154_v30 = vadd.f32 %v7153_v23, %v7147_v63 }
 0x464   :  { %v7434_v45 = vpop.eup %7433  ;;  %v5238_v33 = vadd.f32 %v5237_v44, %v5236_v40 }
 0x465   :  { %v5664_v27 = vmul.f32 %v7434_v45, %v11236_v36  ;;  %v7155_v25 = vadd.f32 %v7154_v30, %v7148_v17 }
 0x466   :  { %v5239_v52 = vrot.slane %v5238_v33, 2 }
 0x467   :  { %5665 = vst [vmem:[#allocation3 + $0x68] sm:$0xff] %v5664_v27  ;;  %v7156_v43 = vadd.f32 %v7155_v25, %v7149_v14 }
 0x468   :  { %v5240_v38 = vadd.f32 %v5239_v52, %v5238_v33 }
 0x469   :  { %v7157_v28 = vadd.f32 %v7156_v43, %v7150_v32 }
 0x46a   :  { %v5241_v36 = vrot.slane %v5240_v38, 1 }
 0x46b   :  { %v7158_v39 = vadd.f32 %v7157_v28, %v7151_v55 }
 0x46c   :  { %v5242_v3 = vadd.f32 %v5241_v36, %v5240_v38 }
 0x46d   :  { %v7159_v7 = vrot.slane %v7158_v39, 4 }
 0x46e   :  { %7437 = vrcp.f32 %v5242_v3  ;;  %v7436_v46 = vpop.eup %7435 }
 0x46f   :  { %v7050_v42 = vmul.f32 %v7436_v46, %v11255_v48  ;;  %v7160_v20 = vadd.f32 %v7159_v7, %v7158_v39  ;;  %v7167_v46 = vld [vmem:[#allocation3 + $0x8] sm:$0xff] }
 0x471   :  { %7051 = vst [vmem:[#allocation3 + $0x10] sm:$0xff] %v7050_v42  ;;  %v7161_v21 = vrot.slane %v7160_v20, 2 }
 0x473   :  { %v7162_v62 = vadd.f32 %v7161_v21, %v7160_v20 }
 0x475   :  { %v7163_v41 = vrot.slane %v7162_v62, 1 }
 0x477   :  { %v7164_v0 = vadd.f32 %v7163_v41, %v7162_v62 }
 0x479   :  { %7439 = vrcp.f32 %v7164_v0 }
 0x47b   :  { %v7438_v22 = vpop.eup %7437 }
 0x47c   :  { %v5244_v9 = vmul.f32 %v7438_v22, %v5236_v40 }
 0x47e   :  { %v5248_v56 = vcombine.high %v5244_v9, %v5244_v9  ;;  %v5255_v29 = vrot.slane %v5244_v9, %v9550_v59  ;;  %v11293_v47 = vmul.f32 %v12092_v50, %v5244_v9 }
 0x480   :  { %v5262_v1 = vrot.slane %v5248_v56, %v9550_v59  ;;  %v5263_v57 = vcombine.high %v5255_v29, %v5255_v29  ;;  %v5271_v48 = vrot.slane %v5255_v29, %v9550_v59  ;;  %v5531_v18 = vrot.slane %v11293_v47, 4 }
 0x482   :  { %v5264_v44 = vcombine.high %v5262_v1, %v5262_v1  ;;  %v5285_v11 = vrot.slane %v5263_v57, %v9550_v59  ;;  %v5293_v45 = vcombine.high %v5271_v48, %v5271_v48  ;;  %v5300_v40 = vrot.slane %v5271_v48, %v11817_v53 }
 0x483   :  { %v5532_v54 = vadd.f32 %v5531_v18, %v11293_v47  ;;  %v5278_v12 = vrot.slane %v5262_v1, %v9550_v59 }
 0x484   :  { %v5295_v16 = vcombine.high %v5285_v11, %v5285_v11  ;;  %v5304_v33 = vrot.slane %v5285_v11, %v11817_v53  ;;  %v5308_v27 = vrot.slane %v5293_v45, %v11817_v53  ;;  %v5292_v6 = vrot.slane %v5264_v44, %v9550_v59 }
 0x485   :  { %v5533_v15 = vrot.slane %v5532_v54, 2  ;;  %v5337_v23 = vmul.f32 %v5300_v40, %v12075_v19  ;;  %v5294_v17 = vcombine.high %v5278_v12, %v5278_v12  ;;  %v5316_v30 = vrot.slane %v5278_v12, %v11817_v53  ;;  %v12094_v12 = vld [vmem:[#allocation6_spill] sm:$0xff] }
 0x486   :  { %v5312_v63 = vrot.slane %v5295_v16, %v11817_v53  ;;  %v5338_v52 = vmul.f32 %v5304_v33, %v12076_v2  ;;  %v5339_v38 = vmul.f32 %v5308_v27, %v12077_v34  ;;  %v7440_v25 = vpop.eup %7439  ;;  %v5296_v36 = vcombine.high %v5292_v6, %v5292_v6  ;;  %v12093_v34 = vld [vmem:[#allocation47_spill] sm:$0xff] }
 0x487   :  { %v5534_v60 = vadd.f32 %v5533_v15, %v5532_v54  ;;  %v5320_v32 = vrot.slane %v5292_v6, %v11817_v53  ;;  %v7166_v28 = vmul.f32 %v7440_v25, %v7158_v39  ;;  %v5324_v19 = vrot.slane %v5294_v17, %v11817_v53 }
 0x488   :  { %v5345_v58 = vadd.f32 %v5338_v52, %v5337_v23  ;;  %v5340_v43 = vmul.f32 %v5312_v63, %v12078_v24  ;;  %v5341_v2 = vmul.f32 %v5316_v30, %v12079_v5  ;;  %v5328_v21 = vrot.slane %v5296_v36, %v11817_v53 }
 0x489   :  { %v5535_v14 = vrot.slane %v5534_v60, 1  ;;  %v11314_v7 = vmul.f32 %v7167_v46, %v7166_v28  ;;  %v7179_v20 = vmul.f32 %v12093_v34, %v7166_v28  ;;  %v5342_v62 = vmul.f32 %v5320_v32, %v12080_v49 }
 0x48a   :  { %v5346_v3 = vadd.f32 %v5345_v58, %v5339_v38  ;;  %v5343_v0 = vmul.f32 %v5324_v19, %v12081_v37  ;;  %v5344_v1 = vmul.f32 %v5328_v21, %v12066_v8 }
 0x48b   :  { %v5536_v55 = vadd.f32 %v5535_v14, %v5534_v60  ;;  %v7169_v24 = vrot.slane %v11314_v7, 4  ;;  %v7181_v22 = vcombine.high %v7179_v20, %v7179_v20  ;;  %v7188_v39 = vrot.slane %v7179_v20, %v9550_v59 }
 0x48c   :  { %v5347_v42 = vadd.f32 %v5346_v3, %v5340_v43 }
 0x48d   :  { %7441 = vrcp.f32 %v5536_v55  ;;  %v7170_v9 = vadd.f32 %v7169_v24, %v11314_v7  ;;  %v7196_v56 = vcombine.high %v7188_v39, %v7188_v39  ;;  %v7195_v29 = vrot.slane %v7181_v22, %v9550_v59 }
 0x48e   :  { %v5348_v41 = vadd.f32 %v5347_v42, %v5341_v2  ;;  %v7204_v50 = vrot.slane %v7188_v39, %v9550_v59 }
 0x48f   :  { %v7171_v49 = vrot.slane %v7170_v9, 2  ;;  %v7218_v48 = vrot.slane %v7196_v56, %v9550_v59  ;;  %v7197_v45 = vcombine.high %v7195_v29, %v7195_v29  ;;  %v7211_v27 = vrot.slane %v7195_v29, %v9550_v59 }
 0x490   :  { %v5349_v5 = vadd.f32 %v5348_v41, %v5342_v62  ;;  %v7226_v18 = vcombine.high %v7204_v50, %v7204_v50  ;;  %v7233_v37 = vrot.slane %v7204_v50, %v11817_v53 }
 0x491   :  { %v7172_v11 = vadd.f32 %v7171_v49, %v7170_v9  ;;  %v7228_v40 = vcombine.high %v7218_v48, %v7218_v48  ;;  %v7237_v54 = vrot.slane %v7218_v48, %v11817_v53  ;;  %v7225_v52 = vrot.slane %v7197_v45, %v9550_v59 }
 0x492   :  { %v5350_v57 = vadd.f32 %v5349_v5, %v5343_v0  ;;  %v7241_v8 = vrot.slane %v7226_v18, %v11817_v53  ;;  %v7270_v17 = vmul.f32 %v7233_v37, %v12071_v4  ;;  %v7227_v58 = vcombine.high %v7211_v27, %v7211_v27 }
 0x493   :  { %v7173_v33 = vrot.slane %v7172_v11, 1  ;;  %v7271_v15 = vmul.f32 %v7237_v54, %v12072_v51  ;;  %v7245_v60 = vrot.slane %v7228_v40, %v11817_v53  ;;  %v7249_v14 = vrot.slane %v7211_v27, %v11817_v53 }
 0x494   :  { %v5351_v44 = vadd.f32 %v5350_v57, %v5344_v1  ;;  %v7272_v25 = vmul.f32 %v7241_v8, %v11925_v31  ;;  %v7229_v32 = vcombine.high %v7225_v52, %v7225_v52  ;;  %v7253_v43 = vrot.slane %v7225_v52, %v11817_v53 }
 0x495   :  { %v7174_v63 = vadd.f32 %v7173_v33, %v7172_v11  ;;  %v7278_v36 = vadd.f32 %v7271_v15, %v7270_v17  ;;  %v7273_v59 = vmul.f32 %v7245_v60, %v12073_v13  ;;  %v7257_v4 = vrot.slane %v7227_v58, %v11817_v53 }
 0x496   :  { %v5354_v16 = vmul.f32 %v12094_v12, %v5351_v44  ;;  %v7261_v2 = vrot.slane %v7229_v32, %v11817_v53  ;;  %v7275_v31 = vmul.f32 %v7253_v43, %v12052_v10 }
 0x497   :  { %7443 = vrcp.f32 %v7174_v63  ;;  %v7279_v3 = vadd.f32 %v7278_v36, %v7272_v25  ;;  %v7276_v34 = vmul.f32 %v7257_v4, %v12053_v35 }
 0x498   :  { %v5355_v6 = vrot.slane %v5354_v16, 4  ;;  %v7277_v13 = vmul.f32 %v7261_v2, %v12014_v61 }
 0x499   :  { %v7280_v28 = vadd.f32 %v7279_v3, %v7273_v59 }
 0x49a   :  { %v7442_v23 = vpop.eup %7441  ;;  %v5356_v30 = vadd.f32 %v5355_v6, %v5354_v16 }
 0x49b   :  { %v5538_v38 = vmul.f32 %v7442_v23, %v11293_v47  ;;  %v7274_v47 = vmul.f32 %v7249_v14, %v12074_v26 }
 0x49c   :  { %v5357_v51 = vrot.slane %v5356_v30, 2 }
 0x49d   :  { %5539 = vst [vmem:[#allocation3 + $0x70] sm:$0xff] %v5538_v38  ;;  %v7281_v46 = vadd.f32 %v7280_v28, %v7274_v47 }
 0x49e   :  { %v5358_v55 = vadd.f32 %v5357_v51, %v5356_v30 }
 0x49f   :  { %v7282_v20 = vadd.f32 %v7281_v46, %v7275_v31 }
 0x4a0   :  { %v5359_v19 = vrot.slane %v5358_v55, 1 }
 0x4a1   :  { %v7283_v21 = vadd.f32 %v7282_v20, %v7276_v34 }
 0x4a2   :  { %v5360_v42 = vadd.f32 %v5359_v19, %v5358_v55 }
 0x4a3   :  { %v7284_v41 = vadd.f32 %v7283_v21, %v7277_v13 }
 0x4a4   :  { %7445 = vrcp.f32 %v5360_v42  ;;  %v7444_v62 = vpop.eup %7443 }
 0x4a5   :  { %v7176_v24 = vmul.f32 %v7444_v62, %v11314_v7  ;;  %v7285_v26 = vrot.slane %v7284_v41, 4  ;;  %v7293_v7 = vld [vmem:[#allocation3] sm:$0xff] }
 0x4a7   :  { %7177 = vst [vmem:[#allocation3 + $0x8] sm:$0xff] %v7176_v24  ;;  %v7286_v22 = vadd.f32 %v7285_v26, %v7284_v41 }
 0x4a9   :  { %v7287_v39 = vrot.slane %v7286_v22, 2 }
 0x4ab   :  { %v7288_v53 = vadd.f32 %v7287_v39, %v7286_v22 }
 0x4ad   :  { %v7289_v10 = vrot.slane %v7288_v53, 1 }
 0x4af   :  { %v7290_v9 = vadd.f32 %v7289_v10, %v7288_v53 }
 0x4b1   :  { %v7446_v0 = vpop.eup %7445  ;;  %7447 = vrcp.f32 %v7290_v9 }
 0x4b2   :  { %v5362_v5 = vmul.f32 %v7446_v0, %v5354_v16 }
 0x4b4   :  { %v5366_v56 = vrot.slane %v5362_v5, 4 }
 0x4b6   :  { %v5367_v35 = vadd.f32 %v5366_v56, %v5362_v5 }
 0x4b8   :  { %v5368_v29 = vrot.slane %v5367_v35, 2 }
 0x4ba   :  { %v5369_v50 = vadd.f32 %v5368_v29, %v5367_v35 }
 0x4bc   :  { %v5370_v61 = vrot.slane %v5369_v50, 1 }
 0x4be   :  { %v5371_v1 = vadd.f32 %v5370_v61, %v5369_v50  ;;  %v7448_v57 = vpop.eup %7447 }
 0x4bf   :  { %v7292_v49 = vmul.f32 %v7448_v57, %v7284_v41 }
 0x4c0   :  { %7449 = vrcp.f32 %v5371_v1 }
 0x4c1   :  { %v7294_v48 = vmul.f32 %v7293_v7, %v7292_v49 }
 0x4c3   :  { %v7295_v18 = vrot.slane %v7294_v48, 4 }
 0x4c5   :  { %v7296_v44 = vadd.f32 %v7295_v18, %v7294_v48 }
 0x4c7   :  { %v7297_v11 = vrot.slane %v7296_v44, 2 }
 0x4c9   :  { %v7298_v40 = vadd.f32 %v7297_v11, %v7296_v44 }
 0x4cb   :  { %v7299_v54 = vrot.slane %v7298_v40, 1 }
 0x4cd   :  { %v7450_v45 = vpop.eup %7449  ;;  %v7300_v12 = vadd.f32 %v7299_v54, %v7298_v40 }
 0x4ce   :  { %v5373_v37 = vmul.f32 %v7450_v45, %v5362_v5 }
 0x4cf   :  { %7451 = vrcp.f32 %v7300_v12 }
 0x4d0   :  { %5374 = vst [vmem:[#allocation3 + $0x78] sm:$0xff] %v5373_v37 }
 0x4dc   :  { %v7452_v16 = vpop.eup %7451 }
 0x4dd   :  { %v7302_v33 = vmul.f32 %v7452_v16, %v7294_v48 }
 0x4df   :  { %7303 = vst [vmem:[#allocation3] sm:$0xff] %v7302_v33 }
 0x4e0   :  { %7486 = shalt.err (!%p7483_p4)
}
 0x4e1   :  { %s7500_s19 = smov 128   ;;  %s7501_s20 = smov 8  }
 0x4e2   :  { %7315 = dma.vmem_to_hbm [thread:$0]  %s7310_s17, 2048, %s11358_s7, [#allocation4], %s7500_s19, %s7500_s19, %s7501_s20  }
 0x4e3   :  { %7495 = dma.done.wait [#allocation4], 2048  }
 0x4e4   :  { %7496 = vsyncadd [#allocation4], 4294965248 }
 0x4e5   :  { %7319 = vsyncpa [#allocation4], 1 }

</bundles_post_ra>
